<compile_context>
chip_gen: v6e
topology: v6e:2x2x1
jax: 0.10.0
libtpu: 0.0.40
codegen_flags: <defaults>
</compile_context>

<pallas_src>
import functools

import numpy as np

import jax
import jax.numpy as jnp
from jax.experimental import pallas as pl
from jax.experimental.pallas import tpu as pltpu


# ------------------------------ fused kernel --------------------------------

def _lenet_fused_kernel(x_ref, rs_ref, m1_ref, b1_ref, s1_ref, c1_ref,
                        m2_ref, b2_ref, s2_ref, c2_ref,
                        w3_ref, b3_ref, w4_ref, b4_ref, w5_ref, b5_ref,
                        o_ref, *, block_b):
    f32 = jnp.float32
    bf16 = jnp.bfloat16
    B = block_b
    NR = B * 34            # rows of the padded input slab (34 rows per sample)
    NZ1 = NR - 6           # rows of conv1 output slab (28 valid per sample)
    NZ2 = B * 14 - 4       # rows of conv2 output slab (10 valid per sample)

    def mm(a, w):
        return jnp.dot(a, w, preferred_element_type=f32)

    # --- resize: Conv2d(1,1,k=3,pad=3) on the VPU. 9 shifted ref-sliced FMAs,
    #     scalars from SMEM.  Valid rows per sample: 0..31 of each 34-row block.
    r = x_ref[0:NR - 2, 0:32] * rs_ref[0]
    for k in range(1, 9):
        dh, dw = divmod(k, 3)
        r = r + x_ref[dh:dh + NR - 2, dw:dw + 32] * rs_ref[k]
    r = (r + rs_ref[9]).astype(bf16)                           # (NR-2, 32)

    # --- conv1 (1->6, k=5) as 5 banded matmuls (dw taps folded into m1[dh]).
    #     Output lanes packed as j*6 + c.  Valid rows: 0..27 per 34-row block.
    z1 = mm(r[0:NZ1, :], m1_ref[0])
    for dh in range(1, 5):
        z1 = z1 + mm(r[dh:dh + NZ1, :], m1_ref[dh])
    z1 = jnp.maximum(z1 + b1_ref[...], 0.0).astype(bf16)       # (NZ1, 168)

    # --- max_pool2d(2,2) #1: exact 0/1 selection matmuls.  The row selectors
    #     also compact per-sample blocks to exactly 14 rows.
    t1 = jnp.maximum(mm(s1_ref[0], z1), mm(s1_ref[1], z1)).astype(bf16)  # (B*14,168)
    p1 = jnp.maximum(mm(t1, c1_ref[0]), mm(t1, c1_ref[1])).astype(bf16)  # (B*14, 84)

    # --- conv2 (6->16, k=5) as 5 banded matmuls.  Output lanes j*16 + c.
    z2 = mm(p1[0:NZ2, :], m2_ref[0])
    for dh in range(1, 5):
        z2 = z2 + mm(p1[dh:dh + NZ2, :], m2_ref[dh])
    z2 = jnp.maximum(z2 + b2_ref[...], 0.0).astype(bf16)       # (NZ2, 160)

    # --- max_pool2d(2,2) #2: rows come out spatial-major (row = i*B + b) so
    #     the fc1 row blocks below are aligned 8-row slices.
    t2 = jnp.maximum(mm(s2_ref[0], z2), mm(s2_ref[1], z2)).astype(bf16)  # (5B,160)
    p2 = jnp.maximum(mm(t2, c2_ref[0]), mm(t2, c2_ref[1])).astype(bf16)  # (5B, 80)

    # --- fc1 + ReLU: torch .view(N,-1) flatten folded into w3's layout,
    #     contracted as 5 aligned row-block dots (one per spatial row i).
    a3 = b3_ref[...] + mm(p2[0:B, :], w3_ref[0])
    for i in range(1, 5):
        a3 = a3 + mm(p2[i * B:(i + 1) * B, :], w3_ref[i])
    a3 = jnp.maximum(a3, 0.0).astype(bf16)                     # (B, 120)

    # --- fc2 + ReLU, fc3, log_softmax (exp/log on the EUP).
    a4 = jnp.maximum(mm(a3, w4_ref[...]) + b4_ref[...], 0.0).astype(bf16)  # (B, 84)
    z5 = mm(a4, w5_ref[...]) + b5_ref[...]                     # (B, 10)
    m = jnp.max(z5, axis=-1, keepdims=True)
    s = z5 - m
    lse = jnp.log(jnp.sum(jnp.exp(s), axis=-1, keepdims=True))
    o_ref[...] = s - lse


# --------------------------- one-time weight packing -------------------------

def pack_params(params, block_b=8):
    """Precompute the kernel-side weight layout once (host-side, not per fwd)."""
    f32 = np.float32
    B = block_b

    # resize conv: 9 taps + bias as SMEM scalars (kept f32 for the VPU path).
    w_rs = np.asarray(params["resize_w"], f32).reshape(9)
    b_rs = np.asarray(params["resize_b"], f32).reshape(1)
    resize = jnp.asarray(np.concatenate([w_rs, b_rs]), jnp.float32)    # (10,)

    # conv1: banded per-dh weights (5, 32, 28*6); output lanes j*6 + c.
    w1 = np.asarray(params["conv1_w"], f32)                    # (6, 1, 5, 5)
    m1 = np.zeros((5, 32, 168), f32)
    for dh in range(5):
        for j in range(28):
            for dw in range(5):
                m1[dh, j + dw, j * 6:j * 6 + 6] = w1[:, 0, dh, dw]
    b1 = np.tile(np.asarray(params["conv1_b"], f32), 28)[None, :]      # (1, 168)

    # conv2: banded per-dh weights (5, 14*6, 10*16); in lanes j*6+ci, out j*16+co.
    w2 = np.asarray(params["conv2_w"], f32)                    # (16, 6, 5, 5)
    m2 = np.zeros((5, 84, 160), f32)
    for dh in range(5):
        for j in range(10):
            for dw in range(5):
                m2[dh, (j + dw) * 6:(j + dw) * 6 + 6,
                   j * 16:j * 16 + 16] = w2[:, :, dh, dw].T
    b2 = np.tile(np.asarray(params["conv2_b"], f32), 10)[None, :]      # (1, 160)

    # pool1 row selectors: pick even/odd rows of each 34-row block and compact
    # per-sample blocks to 14 rows (sample-major row order b*14 + i).
    nz1 = B * 34 - 6
    s1 = np.zeros((2, B * 14, nz1), f32)
    for b in range(B):
        for i in range(14):
            s1[0, b * 14 + i, b * 34 + 2 * i] = 1.0
            s1[1, b * 14 + i, b * 34 + 2 * i + 1] = 1.0

    # pool1 lane selectors (168 -> 84), lanes j*6 + c.
    c1 = np.zeros((2, 168, 84), f32)
    for j in range(14):
        for c in range(6):
            c1[0, (2 * j) * 6 + c, j * 6 + c] = 1.0
            c1[1, (2 * j + 1) * 6 + c, j * 6 + c] = 1.0

    # pool2 row selectors: output rows spatial-major (i*B + b) so fc1 slices
    # aligned B-row blocks.
    nz2 = B * 14 - 4
    s2 = np.zeros((2, 5 * B, nz2), f32)
    for b in range(B):
        for i in range(5):
            s2[0, i * B + b, b * 14 + 2 * i] = 1.0
            s2[1, i * B + b, b * 14 + 2 * i + 1] = 1.0

    # pool2 lane selectors (160 -> 80), lanes j*16 + c.
    c2 = np.zeros((2, 160, 80), f32)
    for j in range(5):
        for c in range(16):
            c2[0, (2 * j) * 16 + c, j * 16 + c] = 1.0
            c2[1, (2 * j + 1) * 16 + c, j * 16 + c] = 1.0

    # fc1: fold the NCHW flatten (c*25 + i*5 + j) so W3[i, j*16+c, o].
    fw1 = np.asarray(params["fc1_w"], f32).reshape(120, 16, 5, 5)   # (o,c,i,j)
    w3 = np.transpose(fw1, (2, 3, 1, 0)).reshape(5, 80, 120)
    b3 = np.asarray(params["fc1_b"], f32)[None, :]
    w4 = np.asarray(params["fc2_w"], f32).T                    # (120, 84)
    b4 = np.asarray(params["fc2_b"], f32)[None, :]
    w5 = np.asarray(params["fc3_w"], f32).T                    # (84, 10)
    b5 = np.asarray(params["fc3_b"], f32)[None, :]

    bf = lambda a: jnp.asarray(a, jnp.bfloat16)
    fj = lambda a: jnp.asarray(a, jnp.float32)
    return dict(resize=resize,
                m1=bf(m1), b1=fj(b1), s1=bf(s1), c1=bf(c1),
                m2=bf(m2), b2=fj(b2), s2=bf(s2), c2=bf(c2),
                w3=bf(w3), b3=fj(b3), w4=bf(w4), b4=fj(b4),
                w5=bf(w5), b5=fj(b5))


# ------------------------------- forward pass --------------------------------

def lenet_forward(packed, x):
    """x: (N, 1, 28, 28) float32 -> (N, 10) log-probs."""
    n = x.shape[0]
    B = packed["s2"].shape[1] // 5              # samples per grid step (static)
    g = -(-n // B)
    npad = g * B

    # Zero-pad (conv pad=3) and pad the batch up to a multiple of B, then stack
    # the batch along rows so each grid step sees a (B*34, 34) slab.
    xp = jnp.pad(x[:, 0].astype(jnp.float32), ((0, npad - n), (3, 3), (3, 3)))
    xs = xp.reshape(npad * 34, 34)

    const2 = lambda i: (0, 0)
    const3 = lambda i: (0, 0, 0)
    kernel = functools.partial(_lenet_fused_kernel, block_b=B)

    out = pl.pallas_call(
        kernel,
        out_shape=jax.ShapeDtypeStruct((npad, 10), jnp.float32),
        grid=(g,),
        in_specs=[
            pl.BlockSpec((B * 34, 34), lambda i: (i, 0)),                  # x slab
            pl.BlockSpec(memory_space=pltpu.MemorySpace.SMEM),             # resize
            pl.BlockSpec((5, 32, 168), const3),                            # m1
            pl.BlockSpec((1, 168), const2),                                # b1
            pl.BlockSpec((2, B * 14, B * 34 - 6), const3),                 # s1
            pl.BlockSpec((2, 168, 84), const3),                            # c1
            pl.BlockSpec((5, 84, 160), const3),                            # m2
            pl.BlockSpec((1, 160), const2),                                # b2
            pl.BlockSpec((2, 5 * B, B * 14 - 4), const3),                  # s2
            pl.BlockSpec((2, 160, 80), const3),                            # c2
            pl.BlockSpec((5, 80, 120), const3),                            # w3
            pl.BlockSpec((1, 120), const2),                                # b3
            pl.BlockSpec((120, 84), const2),                               # w4
            pl.BlockSpec((1, 84), const2),                                 # b4
            pl.BlockSpec((84, 10), const2),                                # w5
            pl.BlockSpec((1, 10), const2),                                 # b5
        ],
        out_specs=pl.BlockSpec((B, 10), lambda i: (i, 0)),
        compiler_params=pltpu.CompilerParams(
            dimension_semantics=("parallel",)),
    )(xs, packed["resize"], packed["m1"], packed["b1"], packed["s1"],
      packed["c1"], packed["m2"], packed["b2"], packed["s2"], packed["c2"],
      packed["w3"], packed["b3"], packed["w4"], packed["b4"],
      packed["w5"], packed["b5"])
    return out[:n]


# ------------------------- params / pure-JAX reference -----------------------

def init_params(key, in_channels=1, num_classes=10):
    # Deterministic synthetic init (kaiming-normal-ish convs, N(0, 0.01)
    # linears, zero biases) — shapes match the PyTorch module.
    ks = jax.random.split(key, 6)

    def conv_w(k, shape):
        cout, _, kh, kw = shape
        std = (2.0 / (cout * kh * kw)) ** 0.5              # fan_out, relu gain
        return std * jax.random.normal(k, shape, jnp.float32)

    def lin_w(k, shape):
        return 0.01 * jax.random.normal(k, shape, jnp.float32)

    return {
        "resize_w": conv_w(ks[0], (1, 1, 3, 3)),
        "resize_b": jnp.zeros((1,), jnp.float32),
        "conv1_w": conv_w(ks[1], (6, in_channels, 5, 5)),
        "conv1_b": jnp.zeros((6,), jnp.float32),
        "conv2_w": conv_w(ks[2], (16, 6, 5, 5)),
        "conv2_b": jnp.zeros((16,), jnp.float32),
        "fc1_w": lin_w(ks[3], (120, 16 * 5 * 5)),
        "fc1_b": jnp.zeros((120,), jnp.float32),
        "fc2_w": lin_w(ks[4], (84, 120)),
        "fc2_b": jnp.zeros((84,), jnp.float32),
        "fc3_w": lin_w(ks[5], (num_classes, 84)),
        "fc3_b": jnp.zeros((num_classes,), jnp.float32),
    }


def _reference_forward(params, x):
    """Plain XLA reference of the PyTorch module, for the numeric self-check."""
    hp = jax.lax.Precision.HIGHEST

    def conv(x, w, b, pad):
        y = jax.lax.conv_general_dilated(
            x, w, window_strides=(1, 1), padding=[(pad, pad), (pad, pad)],
            dimension_numbers=("NCHW", "OIHW", "NCHW"), precision=hp)
        return y + b[None, :, None, None]

    def pool(x):
        n, c, h, w = x.shape
        return jnp.max(x.reshape(n, c, h // 2, 2, w // 2, 2), axis=(3, 5))

    x = conv(x, params["resize_w"], params["resize_b"], 3)
    a1 = pool(jax.nn.relu(conv(x, params["conv1_w"], params["conv1_b"], 0)))
    a2 = pool(jax.nn.relu(conv(a1, params["conv2_w"], params["conv2_b"], 0)))
    flat = a2.reshape(a2.shape[0], -1)
    a3 = jax.nn.relu(jnp.dot(flat, params["fc1_w"].T, precision=hp) + params["fc1_b"])
    a4 = jax.nn.relu(jnp.dot(a3, params["fc2_w"].T, precision=hp) + params["fc2_b"])
    z5 = jnp.dot(a4, params["fc3_w"].T, precision=hp) + params["fc3_b"]
    return jax.nn.log_softmax(z5, axis=-1)


if __name__ == "__main__":
    key = jax.random.PRNGKey(0)
    pkey, xkey = jax.random.split(key)
    params = init_params(pkey, in_channels=1, num_classes=10)
    packed = pack_params(params, block_b=8)      # one-time weight re-layout

    # fc1 expects 16*5*5 features => spatial input is 1x28x28 (MNIST-style).
    # 16 samples -> 2 grid steps of 8 (keeps both v7x TensorCores busy).
    x = jax.random.normal(xkey, (16, 1, 28, 28), jnp.float32)

    fwd = jax.jit(lenet_forward)
    out = fwd(packed, x)
    jax.block_until_ready(out)

    assert out.shape == (16, 10)
    assert bool(jnp.all(jnp.isfinite(out)))

    ref = _reference_forward(params, x)
    err = float(jnp.max(jnp.abs(out - ref)))
    assert err < 2e-2, f"mismatch vs reference: max abs err = {err}"
    print("KERNEL_OK")
</pallas_src>

<mosaic_0001>
module attributes {stable_mosaic.version = 11 : i64} {
  func.func @_lenet_fused_kernel(%arg0: i32, %arg1: memref<272x34xf32, #tpu.memory_space<vmem>>, %arg2: memref<10xf32, #tpu.memory_space<smem>>, %arg3: memref<5x32x168xbf16, #tpu.memory_space<vmem>>, %arg4: memref<1x168xf32, #tpu.memory_space<vmem>>, %arg5: memref<2x112x266xbf16, #tpu.memory_space<vmem>>, %arg6: memref<2x168x84xbf16, #tpu.memory_space<vmem>>, %arg7: memref<5x84x160xbf16, #tpu.memory_space<vmem>>, %arg8: memref<1x160xf32, #tpu.memory_space<vmem>>, %arg9: memref<2x40x108xbf16, #tpu.memory_space<vmem>>, %arg10: memref<2x160x80xbf16, #tpu.memory_space<vmem>>, %arg11: memref<5x80x120xbf16, #tpu.memory_space<vmem>>, %arg12: memref<1x120xf32, #tpu.memory_space<vmem>>, %arg13: memref<120x84xbf16, #tpu.memory_space<vmem>>, %arg14: memref<1x84xf32, #tpu.memory_space<vmem>>, %arg15: memref<84x10xbf16, #tpu.memory_space<vmem>>, %arg16: memref<1x10xf32, #tpu.memory_space<vmem>>, %arg17: memref<8x10xf32, #tpu.memory_space<vmem>>) attributes {dimension_semantics = [#tpu.dimension_semantics<parallel>], iteration_bounds = array<i64: 2>, scalar_prefetch = 0 : i64, scratch_operands = 0 : i64, tpu.core_type = #tpu.core_type<tc>, window_params = [{transform_indices = @transform_0, window_bounds = array<i64: 272, 34>}, {transform_indices = @transform_1, window_bounds = array<i64: 10>}, {pipeline_mode = #tpu.pipeline_mode<synchronous>, transform_indices = @transform_2, window_bounds = array<i64: 5, 32, 168>}, {pipeline_mode = #tpu.pipeline_mode<synchronous>, transform_indices = @transform_3, window_bounds = array<i64: 1, 168>}, {pipeline_mode = #tpu.pipeline_mode<synchronous>, transform_indices = @transform_4, window_bounds = array<i64: 2, 112, 266>}, {pipeline_mode = #tpu.pipeline_mode<synchronous>, transform_indices = @transform_5, window_bounds = array<i64: 2, 168, 84>}, {pipeline_mode = #tpu.pipeline_mode<synchronous>, transform_indices = @transform_6, window_bounds = array<i64: 5, 84, 160>}, {pipeline_mode = #tpu.pipeline_mode<synchronous>, transform_indices = @transform_7, window_bounds = array<i64: 1, 160>}, {pipeline_mode = #tpu.pipeline_mode<synchronous>, transform_indices = @transform_8, window_bounds = array<i64: 2, 40, 108>}, {pipeline_mode = #tpu.pipeline_mode<synchronous>, transform_indices = @transform_9, window_bounds = array<i64: 2, 160, 80>}, {pipeline_mode = #tpu.pipeline_mode<synchronous>, transform_indices = @transform_10, window_bounds = array<i64: 5, 80, 120>}, {pipeline_mode = #tpu.pipeline_mode<synchronous>, transform_indices = @transform_11, window_bounds = array<i64: 1, 120>}, {pipeline_mode = #tpu.pipeline_mode<synchronous>, transform_indices = @transform_12, window_bounds = array<i64: 120, 84>}, {pipeline_mode = #tpu.pipeline_mode<synchronous>, transform_indices = @transform_13, window_bounds = array<i64: 1, 84>}, {pipeline_mode = #tpu.pipeline_mode<synchronous>, transform_indices = @transform_14, window_bounds = array<i64: 84, 10>}, {pipeline_mode = #tpu.pipeline_mode<synchronous>, transform_indices = @transform_15, window_bounds = array<i64: 1, 10>}, {transform_indices = @transform_16, window_bounds = array<i64: 8, 10>}]} {
    %c0 = arith.constant 0 : index
    %c0_0 = arith.constant 0 : index
    %0 = vector.load %arg1[%c0, %c0_0] : memref<272x34xf32, #tpu.memory_space<vmem>>, vector<270x32xf32>
    %c0_1 = arith.constant 0 : index
    %1 = memref.load %arg2[%c0_1] : memref<10xf32, #tpu.memory_space<smem>>
    %2 = vector.broadcast %1 : f32 to vector<270x32xf32>
    %3 = arith.mulf %0, %2 : vector<270x32xf32>
    %c0_2 = arith.constant 0 : index
    %c1 = arith.constant 1 : index
    %4 = vector.load %arg1[%c0_2, %c1] : memref<272x34xf32, #tpu.memory_space<vmem>>, vector<270x32xf32>
    %c1_3 = arith.constant 1 : index
    %5 = memref.load %arg2[%c1_3] : memref<10xf32, #tpu.memory_space<smem>>
    %6 = vector.broadcast %5 : f32 to vector<270x32xf32>
    %7 = arith.mulf %4, %6 : vector<270x32xf32>
    %8 = arith.addf %3, %7 : vector<270x32xf32>
    %c0_4 = arith.constant 0 : index
    %c2 = arith.constant 2 : index
    %9 = vector.load %arg1[%c0_4, %c2] : memref<272x34xf32, #tpu.memory_space<vmem>>, vector<270x32xf32>
    %c2_5 = arith.constant 2 : index
    %10 = memref.load %arg2[%c2_5] : memref<10xf32, #tpu.memory_space<smem>>
    %11 = vector.broadcast %10 : f32 to vector<270x32xf32>
    %12 = arith.mulf %9, %11 : vector<270x32xf32>
    %13 = arith.addf %8, %12 : vector<270x32xf32>
    %c1_6 = arith.constant 1 : index
    %c0_7 = arith.constant 0 : index
    %14 = vector.load %arg1[%c1_6, %c0_7] : memref<272x34xf32, #tpu.memory_space<vmem>>, vector<270x32xf32>
    %c3 = arith.constant 3 : index
    %15 = memref.load %arg2[%c3] : memref<10xf32, #tpu.memory_space<smem>>
    %16 = vector.broadcast %15 : f32 to vector<270x32xf32>
    %17 = arith.mulf %14, %16 : vector<270x32xf32>
    %18 = arith.addf %13, %17 : vector<270x32xf32>
    %c1_8 = arith.constant 1 : index
    %c1_9 = arith.constant 1 : index
    %19 = vector.load %arg1[%c1_8, %c1_9] : memref<272x34xf32, #tpu.memory_space<vmem>>, vector<270x32xf32>
    %c4 = arith.constant 4 : index
    %20 = memref.load %arg2[%c4] : memref<10xf32, #tpu.memory_space<smem>>
    %21 = vector.broadcast %20 : f32 to vector<270x32xf32>
    %22 = arith.mulf %19, %21 : vector<270x32xf32>
    %23 = arith.addf %18, %22 : vector<270x32xf32>
    %c1_10 = arith.constant 1 : index
    %c2_11 = arith.constant 2 : index
    %24 = vector.load %arg1[%c1_10, %c2_11] : memref<272x34xf32, #tpu.memory_space<vmem>>, vector<270x32xf32>
    %c5 = arith.constant 5 : index
    %25 = memref.load %arg2[%c5] : memref<10xf32, #tpu.memory_space<smem>>
    %26 = vector.broadcast %25 : f32 to vector<270x32xf32>
    %27 = arith.mulf %24, %26 : vector<270x32xf32>
    %28 = arith.addf %23, %27 : vector<270x32xf32>
    %c2_12 = arith.constant 2 : index
    %c0_13 = arith.constant 0 : index
    %29 = vector.load %arg1[%c2_12, %c0_13] : memref<272x34xf32, #tpu.memory_space<vmem>>, vector<270x32xf32>
    %c6 = arith.constant 6 : index
    %30 = memref.load %arg2[%c6] : memref<10xf32, #tpu.memory_space<smem>>
    %31 = vector.broadcast %30 : f32 to vector<270x32xf32>
    %32 = arith.mulf %29, %31 : vector<270x32xf32>
    %33 = arith.addf %28, %32 : vector<270x32xf32>
    %c2_14 = arith.constant 2 : index
    %c1_15 = arith.constant 1 : index
    %34 = vector.load %arg1[%c2_14, %c1_15] : memref<272x34xf32, #tpu.memory_space<vmem>>, vector<270x32xf32>
    %c7 = arith.constant 7 : index
    %35 = memref.load %arg2[%c7] : memref<10xf32, #tpu.memory_space<smem>>
    %36 = vector.broadcast %35 : f32 to vector<270x32xf32>
    %37 = arith.mulf %34, %36 : vector<270x32xf32>
    %38 = arith.addf %33, %37 : vector<270x32xf32>
    %c2_16 = arith.constant 2 : index
    %c2_17 = arith.constant 2 : index
    %39 = vector.load %arg1[%c2_16, %c2_17] : memref<272x34xf32, #tpu.memory_space<vmem>>, vector<270x32xf32>
    %c8 = arith.constant 8 : index
    %40 = memref.load %arg2[%c8] : memref<10xf32, #tpu.memory_space<smem>>
    %41 = vector.broadcast %40 : f32 to vector<270x32xf32>
    %42 = arith.mulf %39, %41 : vector<270x32xf32>
    %43 = arith.addf %38, %42 : vector<270x32xf32>
    %c9 = arith.constant 9 : index
    %44 = memref.load %arg2[%c9] : memref<10xf32, #tpu.memory_space<smem>>
    %45 = vector.broadcast %44 : f32 to vector<270x32xf32>
    %46 = arith.addf %43, %45 : vector<270x32xf32>
    %47 = arith.truncf %46 : vector<270x32xf32> to vector<270x32xbf16>
    %48 = vector.extract_strided_slice %47 {offsets = [0, 0], sizes = [266, 32], strides = [1, 1]} : vector<270x32xbf16> to vector<266x32xbf16>
    %c0_18 = arith.constant 0 : index
    %c0_19 = arith.constant 0 : index
    %c0_20 = arith.constant 0 : index
    %49 = vector.load %arg3[%c0_18, %c0_19, %c0_20] : memref<5x32x168xbf16, #tpu.memory_space<vmem>>, vector<1x32x168xbf16>
    %50 = vector.shape_cast %49 : vector<1x32x168xbf16> to vector<32x168xbf16>
    %cst = arith.constant dense<0.000000e+00> : vector<266x168xf32>
    %51 = tpu.matmul %48, %50, %cst {dimension_numbers = #tpu.dot_dimension_numbers<[1], [0], [0], [1], [0, 0, 1, 1], [], []>} : vector<266x32xbf16>, vector<32x168xbf16>, vector<266x168xf32> -> vector<266x168xf32>
    %52 = vector.extract_strided_slice %47 {offsets = [1, 0], sizes = [266, 32], strides = [1, 1]} : vector<270x32xbf16> to vector<266x32xbf16>
    %c1_21 = arith.constant 1 : index
    %c0_22 = arith.constant 0 : index
    %c0_23 = arith.constant 0 : index
    %53 = vector.load %arg3[%c1_21, %c0_22, %c0_23] : memref<5x32x168xbf16, #tpu.memory_space<vmem>>, vector<1x32x168xbf16>
    %54 = vector.shape_cast %53 : vector<1x32x168xbf16> to vector<32x168xbf16>
    %cst_24 = arith.constant dense<0.000000e+00> : vector<266x168xf32>
    %55 = tpu.matmul %52, %54, %cst_24 {dimension_numbers = #tpu.dot_dimension_numbers<[1], [0], [0], [1], [0, 0, 1, 1], [], []>} : vector<266x32xbf16>, vector<32x168xbf16>, vector<266x168xf32> -> vector<266x168xf32>
    %56 = arith.addf %51, %55 : vector<266x168xf32>
    %57 = vector.extract_strided_slice %47 {offsets = [2, 0], sizes = [266, 32], strides = [1, 1]} : vector<270x32xbf16> to vector<266x32xbf16>
    %c2_25 = arith.constant 2 : index
    %c0_26 = arith.constant 0 : index
    %c0_27 = arith.constant 0 : index
    %58 = vector.load %arg3[%c2_25, %c0_26, %c0_27] : memref<5x32x168xbf16, #tpu.memory_space<vmem>>, vector<1x32x168xbf16>
    %59 = vector.shape_cast %58 : vector<1x32x168xbf16> to vector<32x168xbf16>
    %cst_28 = arith.constant dense<0.000000e+00> : vector<266x168xf32>
    %60 = tpu.matmul %57, %59, %cst_28 {dimension_numbers = #tpu.dot_dimension_numbers<[1], [0], [0], [1], [0, 0, 1, 1], [], []>} : vector<266x32xbf16>, vector<32x168xbf16>, vector<266x168xf32> -> vector<266x168xf32>
    %61 = arith.addf %56, %60 : vector<266x168xf32>
    %62 = vector.extract_strided_slice %47 {offsets = [3, 0], sizes = [266, 32], strides = [1, 1]} : vector<270x32xbf16> to vector<266x32xbf16>
    %c3_29 = arith.constant 3 : index
    %c0_30 = arith.constant 0 : index
    %c0_31 = arith.constant 0 : index
    %63 = vector.load %arg3[%c3_29, %c0_30, %c0_31] : memref<5x32x168xbf16, #tpu.memory_space<vmem>>, vector<1x32x168xbf16>
    %64 = vector.shape_cast %63 : vector<1x32x168xbf16> to vector<32x168xbf16>
    %cst_32 = arith.constant dense<0.000000e+00> : vector<266x168xf32>
    %65 = tpu.matmul %62, %64, %cst_32 {dimension_numbers = #tpu.dot_dimension_numbers<[1], [0], [0], [1], [0, 0, 1, 1], [], []>} : vector<266x32xbf16>, vector<32x168xbf16>, vector<266x168xf32> -> vector<266x168xf32>
    %66 = arith.addf %61, %65 : vector<266x168xf32>
    %67 = vector.extract_strided_slice %47 {offsets = [4, 0], sizes = [266, 32], strides = [1, 1]} : vector<270x32xbf16> to vector<266x32xbf16>
    %c4_33 = arith.constant 4 : index
    %c0_34 = arith.constant 0 : index
    %c0_35 = arith.constant 0 : index
    %68 = vector.load %arg3[%c4_33, %c0_34, %c0_35] : memref<5x32x168xbf16, #tpu.memory_space<vmem>>, vector<1x32x168xbf16>
    %69 = vector.shape_cast %68 : vector<1x32x168xbf16> to vector<32x168xbf16>
    %cst_36 = arith.constant dense<0.000000e+00> : vector<266x168xf32>
    %70 = tpu.matmul %67, %69, %cst_36 {dimension_numbers = #tpu.dot_dimension_numbers<[1], [0], [0], [1], [0, 0, 1, 1], [], []>} : vector<266x32xbf16>, vector<32x168xbf16>, vector<266x168xf32> -> vector<266x168xf32>
    %71 = arith.addf %66, %70 : vector<266x168xf32>
    %c0_37 = arith.constant 0 : index
    %c0_38 = arith.constant 0 : index
    %72 = vector.load %arg4[%c0_37, %c0_38] : memref<1x168xf32, #tpu.memory_space<vmem>>, vector<1x168xf32>
    %73 = vector.broadcast %72 : vector<1x168xf32> to vector<266x168xf32>
    %74 = arith.addf %71, %73 : vector<266x168xf32>
    %cst_39 = arith.constant 0.000000e+00 : f32
    %75 = vector.broadcast %cst_39 : f32 to vector<266x168xf32>
    %76 = arith.maximumf %74, %75 : vector<266x168xf32>
    %77 = arith.truncf %76 : vector<266x168xf32> to vector<266x168xbf16>
    %c0_40 = arith.constant 0 : index
    %c0_41 = arith.constant 0 : index
    %c0_42 = arith.constant 0 : index
    %78 = vector.load %arg5[%c0_40, %c0_41, %c0_42] : memref<2x112x266xbf16, #tpu.memory_space<vmem>>, vector<1x112x266xbf16>
    %79 = vector.shape_cast %78 : vector<1x112x266xbf16> to vector<112x266xbf16>
    %cst_43 = arith.constant dense<0.000000e+00> : vector<112x168xf32>
    %80 = tpu.matmul %79, %77, %cst_43 {dimension_numbers = #tpu.dot_dimension_numbers<[1], [0], [0], [1], [0, 0, 1, 1], [], []>} : vector<112x266xbf16>, vector<266x168xbf16>, vector<112x168xf32> -> vector<112x168xf32>
    %c1_44 = arith.constant 1 : index
    %c0_45 = arith.constant 0 : index
    %c0_46 = arith.constant 0 : index
    %81 = vector.load %arg5[%c1_44, %c0_45, %c0_46] : memref<2x112x266xbf16, #tpu.memory_space<vmem>>, vector<1x112x266xbf16>
    %82 = vector.shape_cast %81 : vector<1x112x266xbf16> to vector<112x266xbf16>
    %cst_47 = arith.constant dense<0.000000e+00> : vector<112x168xf32>
    %83 = tpu.matmul %82, %77, %cst_47 {dimension_numbers = #tpu.dot_dimension_numbers<[1], [0], [0], [1], [0, 0, 1, 1], [], []>} : vector<112x266xbf16>, vector<266x168xbf16>, vector<112x168xf32> -> vector<112x168xf32>
    %84 = arith.maximumf %80, %83 : vector<112x168xf32>
    %85 = arith.truncf %84 : vector<112x168xf32> to vector<112x168xbf16>
    %c0_48 = arith.constant 0 : index
    %c0_49 = arith.constant 0 : index
    %c0_50 = arith.constant 0 : index
    %86 = vector.load %arg6[%c0_48, %c0_49, %c0_50] : memref<2x168x84xbf16, #tpu.memory_space<vmem>>, vector<1x168x84xbf16>
    %87 = vector.shape_cast %86 : vector<1x168x84xbf16> to vector<168x84xbf16>
    %cst_51 = arith.constant dense<0.000000e+00> : vector<112x84xf32>
    %88 = tpu.matmul %85, %87, %cst_51 {dimension_numbers = #tpu.dot_dimension_numbers<[1], [0], [0], [1], [0, 0, 1, 1], [], []>} : vector<112x168xbf16>, vector<168x84xbf16>, vector<112x84xf32> -> vector<112x84xf32>
    %c1_52 = arith.constant 1 : index
    %c0_53 = arith.constant 0 : index
    %c0_54 = arith.constant 0 : index
    %89 = vector.load %arg6[%c1_52, %c0_53, %c0_54] : memref<2x168x84xbf16, #tpu.memory_space<vmem>>, vector<1x168x84xbf16>
    %90 = vector.shape_cast %89 : vector<1x168x84xbf16> to vector<168x84xbf16>
    %cst_55 = arith.constant dense<0.000000e+00> : vector<112x84xf32>
    %91 = tpu.matmul %85, %90, %cst_55 {dimension_numbers = #tpu.dot_dimension_numbers<[1], [0], [0], [1], [0, 0, 1, 1], [], []>} : vector<112x168xbf16>, vector<168x84xbf16>, vector<112x84xf32> -> vector<112x84xf32>
    %92 = arith.maximumf %88, %91 : vector<112x84xf32>
    %93 = arith.truncf %92 : vector<112x84xf32> to vector<112x84xbf16>
    %94 = vector.extract_strided_slice %93 {offsets = [0, 0], sizes = [108, 84], strides = [1, 1]} : vector<112x84xbf16> to vector<108x84xbf16>
    %c0_56 = arith.constant 0 : index
    %c0_57 = arith.constant 0 : index
    %c0_58 = arith.constant 0 : index
    %95 = vector.load %arg7[%c0_56, %c0_57, %c0_58] : memref<5x84x160xbf16, #tpu.memory_space<vmem>>, vector<1x84x160xbf16>
    %96 = vector.shape_cast %95 : vector<1x84x160xbf16> to vector<84x160xbf16>
    %cst_59 = arith.constant dense<0.000000e+00> : vector<108x160xf32>
    %97 = tpu.matmul %94, %96, %cst_59 {dimension_numbers = #tpu.dot_dimension_numbers<[1], [0], [0], [1], [0, 0, 1, 1], [], []>} : vector<108x84xbf16>, vector<84x160xbf16>, vector<108x160xf32> -> vector<108x160xf32>
    %98 = vector.extract_strided_slice %93 {offsets = [1, 0], sizes = [108, 84], strides = [1, 1]} : vector<112x84xbf16> to vector<108x84xbf16>
    %c1_60 = arith.constant 1 : index
    %c0_61 = arith.constant 0 : index
    %c0_62 = arith.constant 0 : index
    %99 = vector.load %arg7[%c1_60, %c0_61, %c0_62] : memref<5x84x160xbf16, #tpu.memory_space<vmem>>, vector<1x84x160xbf16>
    %100 = vector.shape_cast %99 : vector<1x84x160xbf16> to vector<84x160xbf16>
    %cst_63 = arith.constant dense<0.000000e+00> : vector<108x160xf32>
    %101 = tpu.matmul %98, %100, %cst_63 {dimension_numbers = #tpu.dot_dimension_numbers<[1], [0], [0], [1], [0, 0, 1, 1], [], []>} : vector<108x84xbf16>, vector<84x160xbf16>, vector<108x160xf32> -> vector<108x160xf32>
    %102 = arith.addf %97, %101 : vector<108x160xf32>
    %103 = vector.extract_strided_slice %93 {offsets = [2, 0], sizes = [108, 84], strides = [1, 1]} : vector<112x84xbf16> to vector<108x84xbf16>
    %c2_64 = arith.constant 2 : index
    %c0_65 = arith.constant 0 : index
    %c0_66 = arith.constant 0 : index
    %104 = vector.load %arg7[%c2_64, %c0_65, %c0_66] : memref<5x84x160xbf16, #tpu.memory_space<vmem>>, vector<1x84x160xbf16>
    %105 = vector.shape_cast %104 : vector<1x84x160xbf16> to vector<84x160xbf16>
    %cst_67 = arith.constant dense<0.000000e+00> : vector<108x160xf32>
    %106 = tpu.matmul %103, %105, %cst_67 {dimension_numbers = #tpu.dot_dimension_numbers<[1], [0], [0], [1], [0, 0, 1, 1], [], []>} : vector<108x84xbf16>, vector<84x160xbf16>, vector<108x160xf32> -> vector<108x160xf32>
    %107 = arith.addf %102, %106 : vector<108x160xf32>
    %108 = vector.extract_strided_slice %93 {offsets = [3, 0], sizes = [108, 84], strides = [1, 1]} : vector<112x84xbf16> to vector<108x84xbf16>
    %c3_68 = arith.constant 3 : index
    %c0_69 = arith.constant 0 : index
    %c0_70 = arith.constant 0 : index
    %109 = vector.load %arg7[%c3_68, %c0_69, %c0_70] : memref<5x84x160xbf16, #tpu.memory_space<vmem>>, vector<1x84x160xbf16>
    %110 = vector.shape_cast %109 : vector<1x84x160xbf16> to vector<84x160xbf16>
    %cst_71 = arith.constant dense<0.000000e+00> : vector<108x160xf32>
    %111 = tpu.matmul %108, %110, %cst_71 {dimension_numbers = #tpu.dot_dimension_numbers<[1], [0], [0], [1], [0, 0, 1, 1], [], []>} : vector<108x84xbf16>, vector<84x160xbf16>, vector<108x160xf32> -> vector<108x160xf32>
    %112 = arith.addf %107, %111 : vector<108x160xf32>
    %113 = vector.extract_strided_slice %93 {offsets = [4, 0], sizes = [108, 84], strides = [1, 1]} : vector<112x84xbf16> to vector<108x84xbf16>
    %c4_72 = arith.constant 4 : index
    %c0_73 = arith.constant 0 : index
    %c0_74 = arith.constant 0 : index
    %114 = vector.load %arg7[%c4_72, %c0_73, %c0_74] : memref<5x84x160xbf16, #tpu.memory_space<vmem>>, vector<1x84x160xbf16>
    %115 = vector.shape_cast %114 : vector<1x84x160xbf16> to vector<84x160xbf16>
    %cst_75 = arith.constant dense<0.000000e+00> : vector<108x160xf32>
    %116 = tpu.matmul %113, %115, %cst_75 {dimension_numbers = #tpu.dot_dimension_numbers<[1], [0], [0], [1], [0, 0, 1, 1], [], []>} : vector<108x84xbf16>, vector<84x160xbf16>, vector<108x160xf32> -> vector<108x160xf32>
    %117 = arith.addf %112, %116 : vector<108x160xf32>
    %c0_76 = arith.constant 0 : index
    %c0_77 = arith.constant 0 : index
    %118 = vector.load %arg8[%c0_76, %c0_77] : memref<1x160xf32, #tpu.memory_space<vmem>>, vector<1x160xf32>
    %119 = vector.broadcast %118 : vector<1x160xf32> to vector<108x160xf32>
    %120 = arith.addf %117, %119 : vector<108x160xf32>
    %cst_78 = arith.constant 0.000000e+00 : f32
    %121 = vector.broadcast %cst_78 : f32 to vector<108x160xf32>
    %122 = arith.maximumf %120, %121 : vector<108x160xf32>
    %123 = arith.truncf %122 : vector<108x160xf32> to vector<108x160xbf16>
    %c0_79 = arith.constant 0 : index
    %c0_80 = arith.constant 0 : index
    %c0_81 = arith.constant 0 : index
    %124 = vector.load %arg9[%c0_79, %c0_80, %c0_81] : memref<2x40x108xbf16, #tpu.memory_space<vmem>>, vector<1x40x108xbf16>
    %125 = vector.shape_cast %124 : vector<1x40x108xbf16> to vector<40x108xbf16>
    %cst_82 = arith.constant dense<0.000000e+00> : vector<40x160xf32>
    %126 = tpu.matmul %125, %123, %cst_82 {dimension_numbers = #tpu.dot_dimension_numbers<[1], [0], [0], [1], [0, 0, 1, 1], [], []>} : vector<40x108xbf16>, vector<108x160xbf16>, vector<40x160xf32> -> vector<40x160xf32>
    %c1_83 = arith.constant 1 : index
    %c0_84 = arith.constant 0 : index
    %c0_85 = arith.constant 0 : index
    %127 = vector.load %arg9[%c1_83, %c0_84, %c0_85] : memref<2x40x108xbf16, #tpu.memory_space<vmem>>, vector<1x40x108xbf16>
    %128 = vector.shape_cast %127 : vector<1x40x108xbf16> to vector<40x108xbf16>
    %cst_86 = arith.constant dense<0.000000e+00> : vector<40x160xf32>
    %129 = tpu.matmul %128, %123, %cst_86 {dimension_numbers = #tpu.dot_dimension_numbers<[1], [0], [0], [1], [0, 0, 1, 1], [], []>} : vector<40x108xbf16>, vector<108x160xbf16>, vector<40x160xf32> -> vector<40x160xf32>
    %130 = arith.maximumf %126, %129 : vector<40x160xf32>
    %131 = arith.truncf %130 : vector<40x160xf32> to vector<40x160xbf16>
    %c0_87 = arith.constant 0 : index
    %c0_88 = arith.constant 0 : index
    %c0_89 = arith.constant 0 : index
    %132 = vector.load %arg10[%c0_87, %c0_88, %c0_89] : memref<2x160x80xbf16, #tpu.memory_space<vmem>>, vector<1x160x80xbf16>
    %133 = vector.shape_cast %132 : vector<1x160x80xbf16> to vector<160x80xbf16>
    %cst_90 = arith.constant dense<0.000000e+00> : vector<40x80xf32>
    %134 = tpu.matmul %131, %133, %cst_90 {dimension_numbers = #tpu.dot_dimension_numbers<[1], [0], [0], [1], [0, 0, 1, 1], [], []>} : vector<40x160xbf16>, vector<160x80xbf16>, vector<40x80xf32> -> vector<40x80xf32>
    %c1_91 = arith.constant 1 : index
    %c0_92 = arith.constant 0 : index
    %c0_93 = arith.constant 0 : index
    %135 = vector.load %arg10[%c1_91, %c0_92, %c0_93] : memref<2x160x80xbf16, #tpu.memory_space<vmem>>, vector<1x160x80xbf16>
    %136 = vector.shape_cast %135 : vector<1x160x80xbf16> to vector<160x80xbf16>
    %cst_94 = arith.constant dense<0.000000e+00> : vector<40x80xf32>
    %137 = tpu.matmul %131, %136, %cst_94 {dimension_numbers = #tpu.dot_dimension_numbers<[1], [0], [0], [1], [0, 0, 1, 1], [], []>} : vector<40x160xbf16>, vector<160x80xbf16>, vector<40x80xf32> -> vector<40x80xf32>
    %138 = arith.maximumf %134, %137 : vector<40x80xf32>
    %139 = arith.truncf %138 : vector<40x80xf32> to vector<40x80xbf16>
    %c0_95 = arith.constant 0 : index
    %c0_96 = arith.constant 0 : index
    %140 = vector.load %arg12[%c0_95, %c0_96] : memref<1x120xf32, #tpu.memory_space<vmem>>, vector<1x120xf32>
    %141 = vector.extract_strided_slice %139 {offsets = [0, 0], sizes = [8, 80], strides = [1, 1]} : vector<40x80xbf16> to vector<8x80xbf16>
    %c0_97 = arith.constant 0 : index
    %c0_98 = arith.constant 0 : index
    %c0_99 = arith.constant 0 : index
    %142 = vector.load %arg11[%c0_97, %c0_98, %c0_99] : memref<5x80x120xbf16, #tpu.memory_space<vmem>>, vector<1x80x120xbf16>
    %143 = vector.shape_cast %142 : vector<1x80x120xbf16> to vector<80x120xbf16>
    %cst_100 = arith.constant dense<0.000000e+00> : vector<8x120xf32>
    %144 = tpu.matmul %141, %143, %cst_100 {dimension_numbers = #tpu.dot_dimension_numbers<[1], [0], [0], [1], [0, 0, 1, 1], [], []>} : vector<8x80xbf16>, vector<80x120xbf16>, vector<8x120xf32> -> vector<8x120xf32>
    %145 = vector.broadcast %140 : vector<1x120xf32> to vector<8x120xf32>
    %146 = arith.addf %145, %144 : vector<8x120xf32>
    %147 = vector.extract_strided_slice %139 {offsets = [8, 0], sizes = [8, 80], strides = [1, 1]} : vector<40x80xbf16> to vector<8x80xbf16>
    %c1_101 = arith.constant 1 : index
    %c0_102 = arith.constant 0 : index
    %c0_103 = arith.constant 0 : index
    %148 = vector.load %arg11[%c1_101, %c0_102, %c0_103] : memref<5x80x120xbf16, #tpu.memory_space<vmem>>, vector<1x80x120xbf16>
    %149 = vector.shape_cast %148 : vector<1x80x120xbf16> to vector<80x120xbf16>
    %cst_104 = arith.constant dense<0.000000e+00> : vector<8x120xf32>
    %150 = tpu.matmul %147, %149, %cst_104 {dimension_numbers = #tpu.dot_dimension_numbers<[1], [0], [0], [1], [0, 0, 1, 1], [], []>} : vector<8x80xbf16>, vector<80x120xbf16>, vector<8x120xf32> -> vector<8x120xf32>
    %151 = arith.addf %146, %150 : vector<8x120xf32>
    %152 = vector.extract_strided_slice %139 {offsets = [16, 0], sizes = [8, 80], strides = [1, 1]} : vector<40x80xbf16> to vector<8x80xbf16>
    %c2_105 = arith.constant 2 : index
    %c0_106 = arith.constant 0 : index
    %c0_107 = arith.constant 0 : index
    %153 = vector.load %arg11[%c2_105, %c0_106, %c0_107] : memref<5x80x120xbf16, #tpu.memory_space<vmem>>, vector<1x80x120xbf16>
    %154 = vector.shape_cast %153 : vector<1x80x120xbf16> to vector<80x120xbf16>
    %cst_108 = arith.constant dense<0.000000e+00> : vector<8x120xf32>
    %155 = tpu.matmul %152, %154, %cst_108 {dimension_numbers = #tpu.dot_dimension_numbers<[1], [0], [0], [1], [0, 0, 1, 1], [], []>} : vector<8x80xbf16>, vector<80x120xbf16>, vector<8x120xf32> -> vector<8x120xf32>
    %156 = arith.addf %151, %155 : vector<8x120xf32>
    %157 = vector.extract_strided_slice %139 {offsets = [24, 0], sizes = [8, 80], strides = [1, 1]} : vector<40x80xbf16> to vector<8x80xbf16>
    %c3_109 = arith.constant 3 : index
    %c0_110 = arith.constant 0 : index
    %c0_111 = arith.constant 0 : index
    %158 = vector.load %arg11[%c3_109, %c0_110, %c0_111] : memref<5x80x120xbf16, #tpu.memory_space<vmem>>, vector<1x80x120xbf16>
    %159 = vector.shape_cast %158 : vector<1x80x120xbf16> to vector<80x120xbf16>
    %cst_112 = arith.constant dense<0.000000e+00> : vector<8x120xf32>
    %160 = tpu.matmul %157, %159, %cst_112 {dimension_numbers = #tpu.dot_dimension_numbers<[1], [0], [0], [1], [0, 0, 1, 1], [], []>} : vector<8x80xbf16>, vector<80x120xbf16>, vector<8x120xf32> -> vector<8x120xf32>
    %161 = arith.addf %156, %160 : vector<8x120xf32>
    %162 = vector.extract_strided_slice %139 {offsets = [32, 0], sizes = [8, 80], strides = [1, 1]} : vector<40x80xbf16> to vector<8x80xbf16>
    %c4_113 = arith.constant 4 : index
    %c0_114 = arith.constant 0 : index
    %c0_115 = arith.constant 0 : index
    %163 = vector.load %arg11[%c4_113, %c0_114, %c0_115] : memref<5x80x120xbf16, #tpu.memory_space<vmem>>, vector<1x80x120xbf16>
    %164 = vector.shape_cast %163 : vector<1x80x120xbf16> to vector<80x120xbf16>
    %cst_116 = arith.constant dense<0.000000e+00> : vector<8x120xf32>
    %165 = tpu.matmul %162, %164, %cst_116 {dimension_numbers = #tpu.dot_dimension_numbers<[1], [0], [0], [1], [0, 0, 1, 1], [], []>} : vector<8x80xbf16>, vector<80x120xbf16>, vector<8x120xf32> -> vector<8x120xf32>
    %166 = arith.addf %161, %165 : vector<8x120xf32>
    %cst_117 = arith.constant 0.000000e+00 : f32
    %167 = vector.broadcast %cst_117 : f32 to vector<8x120xf32>
    %168 = arith.maximumf %166, %167 : vector<8x120xf32>
    %169 = arith.truncf %168 : vector<8x120xf32> to vector<8x120xbf16>
    %c0_118 = arith.constant 0 : index
    %c0_119 = arith.constant 0 : index
    %170 = vector.load %arg13[%c0_118, %c0_119] : memref<120x84xbf16, #tpu.memory_space<vmem>>, vector<120x84xbf16>
    %cst_120 = arith.constant dense<0.000000e+00> : vector<8x84xf32>
    %171 = tpu.matmul %169, %170, %cst_120 {dimension_numbers = #tpu.dot_dimension_numbers<[1], [0], [0], [1], [0, 0, 1, 1], [], []>} : vector<8x120xbf16>, vector<120x84xbf16>, vector<8x84xf32> -> vector<8x84xf32>
    %c0_121 = arith.constant 0 : index
    %c0_122 = arith.constant 0 : index
    %172 = vector.load %arg14[%c0_121, %c0_122] : memref<1x84xf32, #tpu.memory_space<vmem>>, vector<1x84xf32>
    %173 = vector.broadcast %172 : vector<1x84xf32> to vector<8x84xf32>
    %174 = arith.addf %171, %173 : vector<8x84xf32>
    %cst_123 = arith.constant 0.000000e+00 : f32
    %175 = vector.broadcast %cst_123 : f32 to vector<8x84xf32>
    %176 = arith.maximumf %174, %175 : vector<8x84xf32>
    %177 = arith.truncf %176 : vector<8x84xf32> to vector<8x84xbf16>
    %c0_124 = arith.constant 0 : index
    %c0_125 = arith.constant 0 : index
    %178 = vector.load %arg15[%c0_124, %c0_125] : memref<84x10xbf16, #tpu.memory_space<vmem>>, vector<84x10xbf16>
    %cst_126 = arith.constant dense<0.000000e+00> : vector<8x10xf32>
    %179 = tpu.matmul %177, %178, %cst_126 {dimension_numbers = #tpu.dot_dimension_numbers<[1], [0], [0], [1], [0, 0, 1, 1], [], []>} : vector<8x84xbf16>, vector<84x10xbf16>, vector<8x10xf32> -> vector<8x10xf32>
    %c0_127 = arith.constant 0 : index
    %c0_128 = arith.constant 0 : index
    %180 = vector.load %arg16[%c0_127, %c0_128] : memref<1x10xf32, #tpu.memory_space<vmem>>, vector<1x10xf32>
    %181 = vector.broadcast %180 : vector<1x10xf32> to vector<8x10xf32>
    %182 = arith.addf %179, %181 : vector<8x10xf32>
    %cst_129 = arith.constant dense<0xFF800000> : vector<8xf32>
    %183 = vector.multi_reduction <maximumf>, %182, %cst_129 [1] : vector<8x10xf32> to vector<8xf32>
    %184 = vector.shape_cast %183 : vector<8xf32> to vector<8x1xf32>
    %185 = vector.broadcast %184 : vector<8x1xf32> to vector<8x10xf32>
    %186 = arith.subf %182, %185 : vector<8x10xf32>
    %187 = math.exp %186 : vector<8x10xf32>
    %cst_130 = arith.constant dense<0.000000e+00> : vector<8xf32>
    %188 = vector.multi_reduction <add>, %187, %cst_130 [1] : vector<8x10xf32> to vector<8xf32>
    %189 = vector.shape_cast %188 : vector<8xf32> to vector<8x1xf32>
    %190 = math.log %189 : vector<8x1xf32>
    %191 = vector.broadcast %190 : vector<8x1xf32> to vector<8x10xf32>
    %192 = arith.subf %186, %191 : vector<8x10xf32>
    %c0_131 = arith.constant 0 : index
    %c0_132 = arith.constant 0 : index
    %193 = vector.load %arg17[%c0_131, %c0_132] : memref<8x10xf32, #tpu.memory_space<vmem>>, vector<8x10xf32>
    tpu.vector_store %arg17[%c0_131, %c0_132], %192 {strides = array<i32>} : memref<8x10xf32, #tpu.memory_space<vmem>>, vector<8x10xf32>,
    return
  }
  func.func @transform_0(%arg0: i32) -> (i32, i32) {
    %c0_i32 = arith.constant 0 : i32
    %c0_i32_0 = arith.constant 0 : i32
    return %arg0, %c0_i32 : i32, i32
  }
  func.func @transform_1(%arg0: i32) -> i32 {
    %c0_i32 = arith.constant 0 : i32
    %c0_i32_0 = arith.constant 0 : i32
    return %c0_i32 : i32
  }
  func.func @transform_2(%arg0: i32) -> (i32, i32, i32) {
    %c0_i32 = arith.constant 0 : i32
    %c0_i32_0 = arith.constant 0 : i32
    %c0_i32_1 = arith.constant 0 : i32
    %c0_i32_2 = arith.constant 0 : i32
    return %c0_i32, %c0_i32_0, %c0_i32_1 : i32, i32, i32
  }
  func.func @transform_3(%arg0: i32) -> (i32, i32) {
    %c0_i32 = arith.constant 0 : i32
    %c0_i32_0 = arith.constant 0 : i32
    %c0_i32_1 = arith.constant 0 : i32
    return %c0_i32, %c0_i32_0 : i32, i32
  }
  func.func @transform_4(%arg0: i32) -> (i32, i32, i32) {
    %c0_i32 = arith.constant 0 : i32
    %c0_i32_0 = arith.constant 0 : i32
    %c0_i32_1 = arith.constant 0 : i32
    %c0_i32_2 = arith.constant 0 : i32
    return %c0_i32, %c0_i32_0, %c0_i32_1 : i32, i32, i32
  }
  func.func @transform_5(%arg0: i32) -> (i32, i32, i32) {
    %c0_i32 = arith.constant 0 : i32
    %c0_i32_0 = arith.constant 0 : i32
    %c0_i32_1 = arith.constant 0 : i32
    %c0_i32_2 = arith.constant 0 : i32
    return %c0_i32, %c0_i32_0, %c0_i32_1 : i32, i32, i32
  }
  func.func @transform_6(%arg0: i32) -> (i32, i32, i32) {
    %c0_i32 = arith.constant 0 : i32
    %c0_i32_0 = arith.constant 0 : i32
    %c0_i32_1 = arith.constant 0 : i32
    %c0_i32_2 = arith.constant 0 : i32
    return %c0_i32, %c0_i32_0, %c0_i32_1 : i32, i32, i32
  }
  func.func @transform_7(%arg0: i32) -> (i32, i32) {
    %c0_i32 = arith.constant 0 : i32
    %c0_i32_0 = arith.constant 0 : i32
    %c0_i32_1 = arith.constant 0 : i32
    return %c0_i32, %c0_i32_0 : i32, i32
  }
  func.func @transform_8(%arg0: i32) -> (i32, i32, i32) {
    %c0_i32 = arith.constant 0 : i32
    %c0_i32_0 = arith.constant 0 : i32
    %c0_i32_1 = arith.constant 0 : i32
    %c0_i32_2 = arith.constant 0 : i32
    return %c0_i32, %c0_i32_0, %c0_i32_1 : i32, i32, i32
  }
  func.func @transform_9(%arg0: i32) -> (i32, i32, i32) {
    %c0_i32 = arith.constant 0 : i32
    %c0_i32_0 = arith.constant 0 : i32
    %c0_i32_1 = arith.constant 0 : i32
    %c0_i32_2 = arith.constant 0 : i32
    return %c0_i32, %c0_i32_0, %c0_i32_1 : i32, i32, i32
  }
  func.func @transform_10(%arg0: i32) -> (i32, i32, i32) {
    %c0_i32 = arith.constant 0 : i32
    %c0_i32_0 = arith.constant 0 : i32
    %c0_i32_1 = arith.constant 0 : i32
    %c0_i32_2 = arith.constant 0 : i32
    return %c0_i32, %c0_i32_0, %c0_i32_1 : i32, i32, i32
  }
  func.func @transform_11(%arg0: i32) -> (i32, i32) {
    %c0_i32 = arith.constant 0 : i32
    %c0_i32_0 = arith.constant 0 : i32
    %c0_i32_1 = arith.constant 0 : i32
    return %c0_i32, %c0_i32_0 : i32, i32
  }
  func.func @transform_12(%arg0: i32) -> (i32, i32) {
    %c0_i32 = arith.constant 0 : i32
    %c0_i32_0 = arith.constant 0 : i32
    %c0_i32_1 = arith.constant 0 : i32
    return %c0_i32, %c0_i32_0 : i32, i32
  }
  func.func @transform_13(%arg0: i32) -> (i32, i32) {
    %c0_i32 = arith.constant 0 : i32
    %c0_i32_0 = arith.constant 0 : i32
    %c0_i32_1 = arith.constant 0 : i32
    return %c0_i32, %c0_i32_0 : i32, i32
  }
  func.func @transform_14(%arg0: i32) -> (i32, i32) {
    %c0_i32 = arith.constant 0 : i32
    %c0_i32_0 = arith.constant 0 : i32
    %c0_i32_1 = arith.constant 0 : i32
    return %c0_i32, %c0_i32_0 : i32, i32
  }
  func.func @transform_15(%arg0: i32) -> (i32, i32) {
    %c0_i32 = arith.constant 0 : i32
    %c0_i32_0 = arith.constant 0 : i32
    %c0_i32_1 = arith.constant 0 : i32
    return %c0_i32, %c0_i32_0 : i32, i32
  }
  func.func @transform_16(%arg0: i32) -> (i32, i32) {
    %c0_i32 = arith.constant 0 : i32
    %c0_i32_0 = arith.constant 0 : i32
    return %arg0, %c0_i32 : i32, i32
  }
}

</mosaic_0001>

<bundles_post_ra>
// kernel: lenet_forward.1
= control target key start
LH: loop header
LB: loop body
LE: loop exit
PB: predicated region body
PF: predicated region fallthrough
CT: control target
= control target key end

     0   :  { %s13618_s0 = inlined_call_operand.vmem [shape: f32[544,34], index: 0, kind: input, shape index: {}]   ;;  %s13619_s1 = inlined_call_operand.vmem [shape: f32[10], index: 1, kind: input, shape index: {}]   ;;  %s13620_s2 = inlined_call_operand.vmem [shape: bf16[5,32,168], index: 2, kind: input, shape index: {}]   ;;  %s13621_s3 = inlined_call_operand.vmem [shape: f32[1,168], index: 3, kind: input, shape index: {}]   ;;  %s13622_s4 = inlined_call_operand.vmem [shape: bf16[2,112,266], index: 4, kind: input, shape index: {}]   ;;  %s13623_s5 = inlined_call_operand.vmem [shape: bf16[2,168,84], index: 5, kind: input, shape index: {}]   ;;  %s13624_s6 = inlined_call_operand.vmem [shape: bf16[5,84,160], index: 6, kind: input, shape index: {}]   ;;  %s13625_s7 = inlined_call_operand.vmem [shape: f32[1,160], index: 7, kind: input, shape index: {}]   ;;  %s13626_s8 = inlined_call_operand.vmem [shape: bf16[2,40,108], index: 8, kind: input, shape index: {}]   ;;  %s13627_s9 = inlined_call_operand.vmem [shape: bf16[2,160,80], index: 9, kind: input, shape index: {}]   ;;  %s13628_s10 = inlined_call_operand.vmem [shape: bf16[5,80,120], index: 10, kind: input, shape index: {}]   ;;  %s13629_s11 = inlined_call_operand.vmem [shape: f32[1,120], index: 11, kind: input, shape index: {}]   ;;  %s13630_s12 = inlined_call_operand.vmem [shape: bf16[120,84], index: 12, kind: input, shape index: {}]   ;;  %s13631_s13 = inlined_call_operand.vmem [shape: f32[1,84], index: 13, kind: input, shape index: {}]   ;;  %s13632_s14 = inlined_call_operand.vmem [shape: bf16[84,10], index: 14, kind: input, shape index: {}]   ;;  %s13633_s15 = inlined_call_operand.vmem [shape: f32[1,10], index: 15, kind: input, shape index: {}]   ;;  %s13634_s16 = inlined_call_operand.hbm [shape: f32[16,10], index: 16, kind: output, shape index: {}]  }
   0x1   :  { %13680 = sst [smem:[#allocation96_spill]] %s13618_s0 }
   0x2   :  { %13681 = sst [smem:[#allocation97_spill]] %s13619_s1 }
   0x3   :  { %13682 = sst [smem:[#allocation98_spill]] %s13620_s2 }
   0x4   :  { %13683 = sst [smem:[#allocation99_spill]] %s13621_s3 }
   0x5   :  { %13684 = sst [smem:[#allocation100_spill]] %s13622_s4 }
   0x6   :  { %21 = vsyncpa [#allocation4], 0 }
   0x7   :  { %22 = vsyncpa [#allocation3], 0 }
   0x8   :  { %24 = vsyncpa [#allocation3 + $0x1], 0  ;;  %s9054_s21 = smov 0   ;;  %s9056_s22 = smov 0  }
   0x9   :  { %s9058_s23 = smov 0   ;;  %s9060_s24 = smov 0  }
   0xa LB: > { %13685 = sst [smem:[#allocation8_spill]] %s8956_s23  ;;  %s9075_s25 = sadd.s32 4294967295, %s8960_s24   ;;  %s8960_s24 = sphi %s9060_s24, %s14128_s24   ;;  %s8956_s23 = sphi %s9058_s23, %s14125_s23   ;;  %s8952_s22 = sphi %s9056_s22, %s14127_s22   ;;  %s8948_s21 = sphi %s9054_s21, %s14126_s21  }
   0xb   : > { %s7825_s26 = sadd.s32 4294967294, %s8960_s24   ;;  %s9079_s27 = sadd.s32 1, %s8960_s24  }
   0xc   : > { %s378_s28 = sadd.s32 1, %s8956_s23  ;;  %s375_s29 = ssub.s32 %s8960_s24, %s9079_s27 }
   0xd   : > { %p388_p0 = scmp.ne.s32.totalorder %s8956_s23, %s8952_s22  ;;  %p376_p1 = scmp.eq.s32.totalorder %s375_s29, 0 }
   0xe   : > { %p389_p2 = scmp.eq.s32.totalorder %s9075_s25, 1  ;;  %p394_p3 = scmp.ne.s32.totalorder %s8952_s22, %s8948_s21 }
   0xf   : > { %p395_p4 = scmp.eq.s32.totalorder %s7825_s26, 1  ;;  %p7826_p7 = scmp.ge.s32.totalorder %s8960_s24, 1 }
  0x10   : > { %s9090_s30 = scalar_select %p376_p1, %s8956_s23, %s378_s28  }
  0x11   : > { %p9092_p5 = por %p389_p2, %p388_p0  ;;  %p9096_p6 = por %p395_p4, %p394_p3 }
  0x12   : > { %13686 = sst [smem:[#allocation9_spill]] %s9090_s30  ;;  %p402_p8 = scmp.lt.s32.totalorder %s8960_s24, 3 }
  0x13   : > { %p8574_p9 = scmp.eq.s32.totalorder %s9075_s25, 0  ;;  %s13690_s1 = sld [smem:[#allocation97_spill]] }
  0x14   : > { %p9103_p10 = pnand %p7826_p7, %p402_p8 }
  0x16   : > { %p8566_p11 = pneg %p9103_p10 }
  0x18   : > { %p8567_p12 = pnand %p8574_p9, %p8566_p11 }
  0x19   : > { %s415_s26 = sshll.u32 %s13690_s1, 4  ;;  %s416_s26 = int_to_ptr.vmem [resolvable:$true] %s415_s26 }
  0x1a   : > { %s8881_s28 = scalar_lea.vmem %s416_s26, 16  ;;  %p8883_p0 = pneg %p8567_p12 }
  0x1b   : > { %p8882_p13 = scmp.ne.s32.totalorder %s416_s26, %s8881_s28  ;;  %p8889_p3 = scmp.lt.s32.totalorder %s416_s26, %s416_s26 }
  0x1c   : > { %p8890_p4 = scmp.lt.s32.totalorder %s8881_s28, %s8881_s28 }
  0x1d   : > { %p8884_p1 = pnand %p8883_p0, %p8882_p13 }
  0x1e   : > { %p8891_p7 = por %p8890_p4, %p8889_p3 }
  0x1f   : > { %p8885_p2 = pneg %p8884_p1 }
  0x21   : > { %p8892_p8 = pnand %p8891_p7, %p8885_p2 }
  0x23   : > { %8895 = shalt.err (!%p8892_p8)
}
  0x24   : > { %s8962_s29 = smov [#allocation2]   ;;  %479 = sbr.rel (%p9103_p10) target bundleno = 3427 (0xd63), region = 84 }
  0x25   : > { %8569 = dma.vmem_to_smem (!%p8567_p12), %s416_s26, 16, %s8962_s29, [#allocation4]  }
  0x29   : > { %8939 = dma.done.wait (%p8574_p9), [#allocation4], 16  }
  0x2a   : > { %8941 = vsyncadd (%p8574_p9), [#allocation4], 4294967280 }
  0x2b   : > { %485 = sfence }
  0x2c   : > { %s530_s19 = smul.u32 34, %s9075_s25  ;;  %s7833_s20 = sld [smem:[#allocation2 + $0x1]]  ;;  %v13638_v48 = vmov 0   ;;  %vm2269_vm0 = vcmask 261120   ;;  %vm2803_vm1 = vcmask 1046528   ;;  %vm3599_vm3 = vcmask 1045504  }
  0x2d   : > { %s7834_s28 = sld [smem:[#allocation2 + $0x2]]  ;;  %2610 = vmatprep.mubr.bf16.mxu1 %v13638_v48  ;;  %2353 = vmatprep.mubr.bf16.mxu0 %v13638_v48  ;;  %vm2113_vm2 = vsmask.f32 7424  ;;  %vm3184_vm4 = vsmask.f32 6400  ;;  %vm4312_vm5 = vcmask 1044480  }
  0x2e   : > { %p531_p11 = scmp.lt.s32.totalorder %s530_s19, 67  ;;  %s13691_s18 = sld [smem:[#allocation96_spill]]  ;;  %vm4290_vm6 = vcmask 80896   ;;  %vm5034_vm7 = vcmask 1043456   ;;  %vm5480_vm8 = vcmask 1041408   ;;  %vm5012_vm9 = vcmask 326656  }
  0x2f   : > { %s7839_s26 = sld [smem:[#allocation2 + $0x7]]  ;;  %vm5458_vm10 = vcmask 687104   ;;  %vm6603_vm11 = vcmask 883712   ;;  %vm8967_vm12 = vmmov 0   ;;  %vm7117_vm13 = vcmask 654336   ;;  %s8405_s29 = sshll.u32 %s9075_s25, 7 }
  0x30   : > { %s14130_s19 = smov (!%p531_p11, %s530_s19), 67  ;;  %s13692_s2 = sld [smem:[#allocation98_spill]]  ;;  %vm7581_vm14 = vcmask 982016  }
  0x31   : > { %s7832_s1 = sshll.u32 %s14130_s19, 3  ;;  %s7836_s19 = sld [smem:[#allocation2 + $0x4]] }
  0x32   : > { %v9121_v0 = vstv %s7833_s20  ;;  %s8964_s20 = smov 126   ;;  %s571_s23 = sld [smem:[#allocation2]] }
  0x33   : > { %v9150_v9 = vstv %s7834_s28  ;;  %s7837_s28 = sld [smem:[#allocation2 + $0x5]] }
  0x34   : > { %s9126_s30 = scalar_lea.vmem %s13691_s18, %s7832_s1  ;;  %s13635_s1 = smov 127  }
  0x35   : > { %v9129_v1 = vld [vmem:[%s9126_s30 + $0x10] sm:$0xff]  ;;  %v9132_v2 = vld [vmem:[%s9126_s30] sm:$0xff]  ;;  %v9135_v3 = vld [vmem:[%s9126_s30 + $0x18] sm:$0xff]  ;;  %v9234_v38 = vstv %s7839_s26  ;;  %s7835_s18 = sld [smem:[#allocation2 + $0x3]] }
  0x36   : > { %v611_v4 = vmul.f32 %v9121_v0, %v9129_v1  ;;  %v609_v5 = vmul.f32 %v9121_v0, %v9132_v2  ;;  %v9142_v6 = vld [vmem:[%s9126_s30 + $0x8] sm:$0xff]  ;;  %v612_v7 = vmul.f32 %v9121_v0, %v9135_v3  ;;  %v815_v11 = vmul.f32 %v9150_v9, %v9132_v2  ;;  %v9179_v19 = vld [vmem:[%s9126_s30 + $0x19] sm:$0xff]  ;;  %v9182_v20 = vld [vmem:[%s9126_s30 + $0x11] sm:$0xff]  ;;  %s7841_s26 = sld [smem:[#allocation2 + $0x9]] }
  0x37   : > { %v610_v8 = vmul.f32 %v9121_v0, %v9142_v6  ;;  %v816_v10 = vmul.f32 %v9150_v9, %v9142_v6  ;;  %v818_v12 = vmul.f32 %v9150_v9, %v9135_v3  ;;  %v817_v13 = vmul.f32 %v9150_v9, %v9129_v1  ;;  %v9165_v14 = vld [vmem:[%s9126_s30 + $0x9] sm:$0xff]  ;;  %v9170_v16 = vld [vmem:[%s9126_s30 + $0x1] sm:$0xff]  ;;  %v8615_v34 = vld [vmem:[%s13692_s2 + $0x14] ss:$8 sps:$4 sm:$0xff]   ;;  %s13964_s3 = sld [smem:[#allocation99_spill]] }
  0x38   : > { %681 = vrot.lane.b32.xlu1 %v611_v4, %s13635_s1  ;;  %677 = vrot.lane.b32.xlu0 %v609_v5, %s13635_s1  ;;  %v9167_v15 = vstv %s7836_s19  ;;  %v9193_v24 = vld [vmem:[%s9126_s30 + $0x28] sm:$0xff]  ;;  %s7840_s19 = sld [smem:[#allocation2 + $0x8]] }
  0x39   : > { %v1126_v17 = vmul.f32 %v9167_v15, %v9165_v14  ;;  %v1125_v18 = vmul.f32 %v9167_v15, %v9170_v16  ;;  %v1128_v21 = vmul.f32 %v9167_v15, %v9179_v19  ;;  %v1127_v22 = vmul.f32 %v9167_v15, %v9182_v20  ;;  %v9202_v27 = vld [vmem:[%s9126_s30 + $0x20] sm:$0xff]  ;;  %v9217_v32 = vld [vmem:[%s9126_s30 + $0xa] sm:$0xff]  ;;  %2590 = vmatprep.subr.bf16.mxu1 %v8615_v34  ;;  %v9252_v44 = vld [vmem:[%s9126_s30 + $0x12] sm:$0xff]  ;;  %s13991_s4 = sld [smem:[#allocation100_spill]] }
  0x3a   : > { %v9190_v23 = vstv %s7837_s28  ;;  %v614_v28 = vmul.f32 %v9121_v0, %v9193_v24  ;;  %v613_v29 = vmul.f32 %v9121_v0, %v9202_v27  ;;  %v9220_v33 = vld [vmem:[%s9126_s30 + $0x2] sm:$0xff]  ;;  %v820_v35 = vmul.f32 %v9150_v9, %v9193_v24  ;;  %v8617_v37 = vld [vmem:[%s13692_s2 + $0x10] ss:$8 sps:$4 sm:$0xff]   ;;  %s13693_s28 = smov 127   ;;  %v8621_v53 = vld [vmem:[%s13692_s2 + $0x34] ss:$8 sps:$4 sm:$0xff]  }
  0x3b   : > { %v1332_v25 = vmul.f32 %v9190_v23, %v9165_v14  ;;  %v1331_v26 = vmul.f32 %v9190_v23, %v9170_v16  ;;  %v1334_v30 = vmul.f32 %v9190_v23, %v9179_v19  ;;  %v1333_v31 = vmul.f32 %v9190_v23, %v9182_v20  ;;  %2591 = vmatpush1.bf16.msra.mxu1 %v8617_v37  ;;  %v8618_v39 = vld [vmem:[%s13692_s2 + $0x4] ss:$8 sps:$4 sm:$0xff]   ;;  %v8620_v42 = vld [vmem:[%s13692_s2] ss:$8 sps:$4 sm:$0xff]   ;;  %v8623_v54 = vld [vmem:[%s13692_s2 + $0x30] ss:$8 sps:$4 sm:$0xff]  }
  0x3c   : > { %683 = vrot.lane.b32.xlu1 %v612_v7, %s13635_s1  ;;  %679 = vrot.lane.b32.xlu0 %v610_v8, %s13635_s1  ;;  %v819_v36 = vmul.f32 %v9150_v9, %v9202_v27  ;;  %v1642_v40 = vmul.f32 %v9234_v38, %v9217_v32  ;;  %v1641_v41 = vmul.f32 %v9234_v38, %v9220_v33  ;;  %v9249_v43 = vld [vmem:[%s9126_s30 + $0x1a] sm:$0xff]  ;;  %v9265_v49 = vld [vmem:[%s9126_s30 + $0x29] sm:$0xff] }
  0x3d   : > { %2592 = vmatprep.subr.bf16.mxu1 %v8618_v39  ;;  %v1644_v45 = vmul.f32 %v9234_v38, %v9249_v43  ;;  %v1643_v46 = vmul.f32 %v9234_v38, %v9252_v44  ;;  %v9268_v50 = vld [vmem:[%s9126_s30 + $0x21] sm:$0xff]  ;;  %2333 = vmatprep.subr.bf16.mxu0 %v8621_v53  ;;  %v1130_v55 = vmul.f32 %v9167_v15, %v9265_v49  ;;  %v9295_v59 = vld [vmem:[%s9126_s30 + $0x38] sm:$0xff]  ;;  %v9298_v60 = vld [vmem:[%s9126_s30 + $0x30] sm:$0xff] }
  0x3e   : > { %v9260_v47 = vstv %s7840_s19  ;;  %2334 = vmatpush1.bf16.msra.mxu0 %v8623_v54  ;;  %v1129_v56 = vmul.f32 %v9167_v15, %v9268_v50  ;;  %v8624_v57 = vld [vmem:[%s13692_s2 + $0x24] ss:$8 sps:$4 sm:$0xff]   ;;  %v8626_v58 = vld [vmem:[%s13692_s2 + $0x20] ss:$8 sps:$4 sm:$0xff]   ;;  %v616_v63 = vmul.f32 %v9121_v0, %v9295_v59  ;;  %v615_v4 = vmul.f32 %v9121_v0, %v9298_v60  ;;  %v9370_v39 = vld [vmem:[%s9126_s30 + $0x32] sm:$0xff] }
  0x3f   : > { %2593 = vmatpush1.bf16.msra.mxu1 %v8620_v42  ;;  %v1848_v51 = vmul.f32 %v9260_v47, %v9217_v32  ;;  %v1847_v52 = vmul.f32 %v9260_v47, %v9220_v33  ;;  %2335 = vmatprep.subr.bf16.mxu0 %v8624_v57  ;;  %v1850_v61 = vmul.f32 %v9260_v47, %v9249_v43  ;;  %v9319_v8 = vld [vmem:[%s9126_s30 + $0x2a] sm:$0xff]  ;;  %v9367_v37 = vld [vmem:[%s9126_s30 + $0x3a] sm:$0xff] }
  0x40   : > { %885 = vrot.lane.b32.xlu1 %v816_v10, %s8964_s20  ;;  %883 = vrot.lane.b32.xlu0 %v815_v11, %s8964_s20  ;;  %v1849_v62 = vmul.f32 %v9260_v47, %v9252_v44  ;;  %v1336_v5 = vmul.f32 %v9190_v23, %v9265_v49  ;;  %v1335_v7 = vmul.f32 %v9190_v23, %v9268_v50  ;;  %v9322_v10 = vld [vmem:[%s9126_s30 + $0x22] sm:$0xff]  ;;  %v9395_v54 = vld [vmem:[%s9126_s30 + $0x58] sm:$0xff] }
  0x41   : > { %v822_v11 = vmul.f32 %v9150_v9, %v9295_v59  ;;  %v9377_v42 = vld [vmem:[%s9126_s30 + $0x49] sm:$0xff]  ;;  %v1853_v57 = vmul.f32 %v9260_v47, %v9370_v39 }
  0x42   : > { %2336 = vmatpush1.bf16.msra.mxu0 %v8626_v58  ;;  %v620_v58 = vmul.f32 %v9121_v0, %v9395_v54 }
  0x44   : > { %889 = vrot.lane.b32.xlu1 %v818_v12, %s8964_s20  ;;  %887 = vrot.lane.b32.xlu0 %v817_v13, %s8964_s20  ;;  %v821_v12 = vmul.f32 %v9150_v9, %v9298_v60  ;;  %v9331_v13 = vld [vmem:[%s9126_s30 + $0x39] sm:$0xff] }
  0x48   : > { %1195 = vrot.lane.b32.xlu1 %v1126_v17, %s13635_s1  ;;  %1193 = vrot.lane.b32.xlu0 %v1125_v18, %s13635_s1  ;;  %v9334_v17 = vld [vmem:[%s9126_s30 + $0x31] sm:$0xff]  ;;  %v1646_v18 = vmul.f32 %v9234_v38, %v9319_v8 }
  0x4c   : > { %1199 = vrot.lane.b32.xlu1 %v1128_v21, %s13635_s1  ;;  %1197 = vrot.lane.b32.xlu0 %v1127_v22, %s13635_s1  ;;  %v1645_v21 = vmul.f32 %v9234_v38, %v9322_v10  ;;  %v1132_v22 = vmul.f32 %v9167_v15, %v9331_v13 }
  0x50   : > { %1401 = vrot.lane.b32.xlu1 %v1332_v25, %s8964_s20  ;;  %1399 = vrot.lane.b32.xlu0 %v1331_v26, %s8964_s20  ;;  %v1131_v25 = vmul.f32 %v9167_v15, %v9334_v17  ;;  %v546_v26 = vld [vmem:[%s9126_s30 + $0x48] sm:$0xff] }
  0x54   : > { %687 = vrot.lane.b32.xlu1 %v614_v28, %s13635_s1  ;;  %685 = vrot.lane.b32.xlu0 %v613_v29, %s13635_s1  ;;  %v545_v28 = vld [vmem:[%s9126_s30 + $0x40] sm:$0xff]  ;;  %v1852_v29 = vmul.f32 %v9260_v47, %v9319_v8  ;;  %s7838_s1 = sld [smem:[#allocation2 + $0x6]] }
  0x55   : > { %v617_v34 = vmul.f32 %v9121_v0, %v545_v28 }
  0x58   : > { %1405 = vrot.lane.b32.xlu1 %v1334_v30, %s8964_s20  ;;  %1403 = vrot.lane.b32.xlu0 %v1333_v31, %s8964_s20  ;;  %v1851_v30 = vmul.f32 %v9260_v47, %v9322_v10  ;;  %v618_v31 = vmul.f32 %v9121_v0, %v546_v26 }
  0x5c   : > { %893 = vrot.lane.b32.xlu1 %v820_v35, %s8964_s20  ;;  %891 = vrot.lane.b32.xlu0 %v819_v36, %s8964_s20  ;;  %v1338_v35 = vmul.f32 %v9190_v23, %v9331_v13  ;;  %v1337_v36 = vmul.f32 %v9190_v23, %v9334_v17 }
  0x60   : > { %1711 = vrot.lane.b32.xlu1 %v1642_v40, %s13693_s28  ;;  %1709 = vrot.lane.b32.xlu0 %v1641_v41, %s13693_s28  ;;  %v824_v40 = vmul.f32 %v9150_v9, %v546_v26  ;;  %v823_v41 = vmul.f32 %v9150_v9, %v545_v28 }
  0x64   : > { %1715 = vrot.lane.b32.xlu1 %v1644_v45, %s13693_s28  ;;  %1713 = vrot.lane.b32.xlu0 %v1643_v46, %s13693_s28  ;;  %v9380_v45 = vld [vmem:[%s9126_s30 + $0x41] sm:$0xff]  ;;  %v1648_v46 = vmul.f32 %v9234_v38, %v9367_v37 }
  0x65   : > { %v1133_v53 = vmul.f32 %v9167_v15, %v9380_v45 }
  0x68   : > { %1917 = vrot.lane.b32.xlu1 %v1848_v51, %s8964_s20  ;;  %1915 = vrot.lane.b32.xlu0 %v1847_v52, %s8964_s20  ;;  %v1647_v51 = vmul.f32 %v9234_v38, %v9370_v39  ;;  %v1134_v52 = vmul.f32 %v9167_v15, %v9377_v42 }
  0x6c   : > { %1203 = vrot.lane.b32.xlu1 %v1130_v55, %s13693_s28  ;;  %1201 = vrot.lane.b32.xlu0 %v1129_v56, %s13693_s28  ;;  %v9398_v55 = vld [vmem:[%s9126_s30 + $0x50] sm:$0xff]  ;;  %v1854_v56 = vmul.f32 %v9260_v47, %v9367_v37 }
  0x70   : > { %1921 = vrot.lane.b32.xlu1 %v1850_v61, %s8964_s20  ;;  %1919 = vrot.lane.b32.xlu0 %v1849_v62, %s8964_s20  ;;  %v619_v61 = vmul.f32 %v9121_v0, %v9398_v55  ;;  %v1340_v62 = vmul.f32 %v9190_v23, %v9377_v42 }
  0x74   : > { %691 = vrot.lane.b32.xlu1 %v616_v63, %s13693_s28  ;;  %689 = vrot.lane.b32.xlu0 %v615_v4, %s13693_s28  ;;  %v1339_v63 = vmul.f32 %v9190_v23, %v9380_v45  ;;  %v9419_v4 = vld [vmem:[%s9126_s30 + $0x4a] sm:$0xff] }
  0x75   : > { %v1650_v26 = vmul.f32 %v9234_v38, %v9419_v4 }
  0x78   : > { %1409 = vrot.lane.b32.xlu1 %v1336_v5, %s8964_s20  ;;  %1407 = vrot.lane.b32.xlu0 %v1335_v7, %s8964_s20  ;;  %v9422_v5 = vld [vmem:[%s9126_s30 + $0x42] sm:$0xff]  ;;  %v826_v7 = vmul.f32 %v9150_v9, %v9395_v54 }
  0x79   : > { %v1649_v28 = vmul.f32 %v9234_v38, %v9422_v5 }
  0x7c   : > { %897 = vrot.lane.b32.xlu1 %v822_v11, %s8964_s20  ;;  %895 = vrot.lane.b32.xlu0 %v821_v12, %s8964_s20  ;;  %v825_v11 = vmul.f32 %v9150_v9, %v9398_v55  ;;  %v9430_v12 = vstv %s571_s23 }
  0x80   : > { %1719 = vrot.lane.b32.xlu1 %v1646_v18, %s13693_s28  ;;  %1717 = vrot.lane.b32.xlu0 %v1645_v21, %s13693_s28 }
  0x84   : > { %1207 = vrot.lane.b32.xlu1 %v1132_v22, %s13693_s28  ;;  %1205 = vrot.lane.b32.xlu0 %v1131_v25, %s13693_s28  ;;  %v9433_v22 = vld [vmem:[%s9126_s30 + $0x59] sm:$0xff]  ;;  %v9436_v25 = vld [vmem:[%s9126_s30 + $0x51] sm:$0xff] }
  0x88   : > { %1925 = vrot.lane.b32.xlu1 %v1852_v29, %s8964_s20  ;;  %1923 = vrot.lane.b32.xlu0 %v1851_v30, %s8964_s20  ;;  %v573_v29 = vmul.f32 %v9430_v12, %v9132_v2  ;;  %v574_v30 = vmul.f32 %v9430_v12, %v9142_v6  ;;  %v1136_v2 = vmul.f32 %v9167_v15, %v9433_v22 }
  0x89   : > { %v1135_v6 = vmul.f32 %v9167_v15, %v9436_v25 }
  0x8c   : > { %695 = vrot.lane.b32.xlu1 %v618_v31, %s13693_s28  ;;  %693 = vrot.lane.b32.xlu0 %v617_v34, %s13693_s28 }
  0x90   : > { %1413 = vrot.lane.b32.xlu1 %v1338_v35, %s8964_s20  ;;  %1411 = vrot.lane.b32.xlu0 %v1337_v36, %s8964_s20  ;;  %v9448_v35 = vstv %s7835_s18  ;;  %v575_v36 = vmul.f32 %v9430_v12, %v9129_v1 }
  0x91   : > { %v1055_v1 = vmul.f32 %v9448_v35, %v9170_v16  ;;  %v1057_v16 = vmul.f32 %v9448_v35, %v9182_v20 }
  0x94   : > { %901 = vrot.lane.b32.xlu1 %v824_v40, %s8964_s20  ;;  %899 = vrot.lane.b32.xlu0 %v823_v41, %s8964_s20  ;;  %v576_v40 = vmul.f32 %v9430_v12, %v9135_v3 }
  0x98   : > { %1723 = vrot.lane.b32.xlu1 %v1648_v46, %s13693_s28  ;;  %1721 = vrot.lane.b32.xlu0 %v1647_v51, %s13693_s28  ;;  %v1056_v51 = vmul.f32 %v9448_v35, %v9165_v14  ;;  %v1058_v14 = vmul.f32 %v9448_v35, %v9179_v19 }
  0x9c   : > { %1211 = vrot.lane.b32.xlu1 %v1134_v52, %s13693_s28  ;;  %1209 = vrot.lane.b32.xlu0 %v1133_v53, %s13693_s28 }
  0xa0   : > { %1929 = vrot.lane.b32.xlu1 %v1854_v56, %s8964_s20  ;;  %1927 = vrot.lane.b32.xlu0 %v1853_v57, %s8964_s20  ;;  %v1856_v57 = vmul.f32 %v9260_v47, %v9419_v4 }
  0xa4   : > { %699 = vrot.lane.b32.xlu1 %v620_v58, %s13693_s28  ;;  %697 = vrot.lane.b32.xlu0 %v619_v61, %s13693_s28  ;;  %v1855_v58 = vmul.f32 %v9260_v47, %v9422_v5 }
  0xa8   : > { %1417 = vrot.lane.b32.xlu1 %v1340_v62, %s8964_s20  ;;  %1415 = vrot.lane.b32.xlu0 %v1339_v63, %s8964_s20 }
  0xaa   : > { %v682_v18 = vpop.permute.xlu1 %681  ;;  %v678_v21 = vpop.permute.xlu0 %677 }
  0xab   : > { %v779_v41 = vadd.f32 %v678_v21, %v573_v29  ;;  %v781_v61 = vadd.f32 %v682_v18, %v575_v36  ;;  %v9478_v21 = vld [vmem:[%s9126_s30 + $0x60] sm:$0xff] }
  0xac   : > { %905 = vrot.lane.b32.xlu1 %v826_v7, %s8964_s20  ;;  %903 = vrot.lane.b32.xlu0 %v825_v11, %s8964_s20  ;;  %v9475_v11 = vld [vmem:[%s9126_s30 + $0x68] sm:$0xff]  ;;  %v621_v20 = vmul.f32 %v9121_v0, %v9478_v21 }
  0xad   : > { %v622_v19 = vmul.f32 %v9121_v0, %v9475_v11 }
  0xae   : > { %v684_v31 = vpop.permute.xlu1 %683  ;;  %v680_v34 = vpop.permute.xlu0 %679 }
  0xaf   : > { %v780_v46 = vadd.f32 %v680_v34, %v574_v30  ;;  %v782_v62 = vadd.f32 %v684_v31, %v576_v40  ;;  %v1342_v40 = vmul.f32 %v9190_v23, %v9433_v22 }
  0xb0   : > { %1727 = vrot.lane.b32.xlu1 %v1650_v26, %s13693_s28  ;;  %1725 = vrot.lane.b32.xlu0 %v1649_v28, %s13693_s28 }
  0xb2   : > { %v886_v3 = vpop.permute.xlu1 %885  ;;  %v884_v52 = vpop.permute.xlu0 %883 }
  0xb3   : > { %v986_v53 = vadd.f32 %v886_v3, %v780_v46  ;;  %v985_v56 = vadd.f32 %v884_v52, %v779_v41  ;;  %v9492_v46 = vstv %s7838_s1 }
  0xb4   : > { %1215 = vrot.lane.b32.xlu1 %v1136_v2, %s13693_s28  ;;  %1213 = vrot.lane.b32.xlu0 %v1135_v6, %s13693_s28  ;;  %v1341_v2 = vmul.f32 %v9190_v23, %v9436_v25 }
  0xb5   : > { %v1090_v63 = vadd.f32 %v1056_v51, %v986_v53  ;;  %v1089_v7 = vadd.f32 %v1055_v1, %v985_v56  ;;  %v828_v51 = vmul.f32 %v9150_v9, %v9475_v11  ;;  %v827_v1 = vmul.f32 %v9150_v9, %v9478_v21  ;;  %v9501_v53 = vld [vmem:[%s9126_s30 + $0x5a] sm:$0xff]  ;;  %v9504_v56 = vld [vmem:[%s9126_s30 + $0x52] sm:$0xff] }
  0xb6   : > { %v890_v26 = vpop.permute.xlu1 %889  ;;  %v888_v28 = vpop.permute.xlu0 %887 }
  0xb7   : > { %v988_v29 = vadd.f32 %v890_v26, %v782_v62  ;;  %v987_v30 = vadd.f32 %v888_v28, %v781_v61  ;;  %v9517_v26 = vld [vmem:[%s9126_s30 + $0x69] sm:$0xff] }
  0xb8   : > { %1933 = vrot.lane.b32.xlu1 %v1856_v57, %s8964_s20  ;;  %1931 = vrot.lane.b32.xlu0 %v1855_v58, %s8964_s20  ;;  %v1572_v57 = vmul.f32 %v9492_v46, %v9217_v32  ;;  %v1571_v58 = vmul.f32 %v9492_v46, %v9220_v33  ;;  %v9520_v32 = vld [vmem:[%s9126_s30 + $0x61] sm:$0xff] }
  0xb9   : > { %v1092_v18 = vadd.f32 %v1058_v14, %v988_v29  ;;  %v1091_v31 = vadd.f32 %v1057_v16, %v987_v30 }
  0xba   : > { %v1196_v34 = vpop.permute.xlu1 %1195  ;;  %v1194_v36 = vpop.permute.xlu0 %1193 }
  0xbb   : > { %v1296_v3 = vadd.f32 %v1196_v34, %v1090_v63  ;;  %v1295_v52 = vadd.f32 %v1194_v36, %v1089_v7  ;;  %v1652_v63 = vmul.f32 %v9234_v38, %v9501_v53  ;;  %v1651_v7 = vmul.f32 %v9234_v38, %v9504_v56 }
  0xbc   : > { %703 = vrot.lane.b32.xlu1 %v622_v19, %s13693_s28  ;;  %701 = vrot.lane.b32.xlu0 %v621_v20, %s13693_s28  ;;  %v578_v19 = vmul.f32 %v9430_v12, %v9193_v24  ;;  %v577_v20 = vmul.f32 %v9430_v12, %v9202_v27  ;;  %v1138_v34 = vmul.f32 %v9167_v15, %v9517_v26 }
  0xbd   : > { %v1137_v36 = vmul.f32 %v9167_v15, %v9520_v32  ;;  %v1574_v24 = vmul.f32 %v9492_v46, %v9249_v43  ;;  %v1573_v27 = vmul.f32 %v9492_v46, %v9252_v44  ;;  %v1060_v43 = vmul.f32 %v9448_v35, %v9265_v49 }
  0xbe   : > { %v1200_v6 = vpop.permute.xlu1 %1199  ;;  %v1198_v41 = vpop.permute.xlu0 %1197  ;;  %v1059_v44 = vmul.f32 %v9448_v35, %v9268_v50 }
  0xc0   : > { %1421 = vrot.lane.b32.xlu1 %v1342_v40, %s8964_s20  ;;  %1419 = vrot.lane.b32.xlu0 %v1341_v2, %s8964_s20  ;;  %v1298_v40 = vadd.f32 %v1200_v6, %v1092_v18  ;;  %v1297_v2 = vadd.f32 %v1198_v41, %v1091_v31  ;;  %v1857_v18 = vmul.f32 %v9260_v47, %v9504_v56  ;;  %v9547_v41 = vld [vmem:[%s9126_s30 + $0x78] sm:$0xff] }
  0xc1   : > { %v624_v49 = vmul.f32 %v9121_v0, %v9547_v41 }
  0xc2   : > { %v1402_v14 = vpop.permute.xlu1 %1401  ;;  %v1400_v16 = vpop.permute.xlu0 %1399 }
  0xc3   : > { %v1502_v61 = vadd.f32 %v1402_v14, %v1296_v3  ;;  %v1501_v62 = vadd.f32 %v1400_v16, %v1295_v52 }
  0xc4   : > { %909 = vrot.lane.b32.xlu1 %v828_v51, %s8964_s20  ;;  %907 = vrot.lane.b32.xlu0 %v827_v1, %s8964_s20 }
  0xc5   : > { %v1606_v28 = vadd.f32 %v1572_v57, %v1502_v61  ;;  %v1605_v33 = vadd.f32 %v1571_v58, %v1501_v62  ;;  %v1858_v57 = vmul.f32 %v9260_v47, %v9501_v53  ;;  %v9550_v58 = vld [vmem:[%s9126_s30 + $0x70] sm:$0xff] }
  0xc6   : > { %v688_v29 = vpop.permute.xlu1 %687  ;;  %v686_v30 = vpop.permute.xlu0 %685  ;;  %13694 = vst [vmem:[#allocation10_spill] sm:$0xff] %v9550_v58  ;;  %v623_v50 = vmul.f32 %v9121_v0, %v9550_v58 }
  0xc7   : > { %v784_v31 = vadd.f32 %v688_v29, %v578_v19  ;;  %v783_v6 = vadd.f32 %v686_v30, %v577_v20 }
  0xc8   : > { %1731 = vrot.lane.b32.xlu1 %v1652_v63, %s13693_s28  ;;  %1729 = vrot.lane.b32.xlu0 %v1651_v7, %s13693_s28 }
  0xca   : > { %v1406_v51 = vpop.permute.xlu1 %1405  ;;  %v1404_v1 = vpop.permute.xlu0 %1403 }
  0xcb   : > { %v1504_v3 = vadd.f32 %v1406_v51, %v1298_v40  ;;  %v1503_v52 = vadd.f32 %v1404_v1, %v1297_v2 }
  0xcc   : > { %1219 = vrot.lane.b32.xlu1 %v1138_v34, %s13693_s28  ;;  %1217 = vrot.lane.b32.xlu0 %v1137_v36, %s13693_s28  ;;  %v1344_v34 = vmul.f32 %v9190_v23, %v9517_v26  ;;  %v1343_v36 = vmul.f32 %v9190_v23, %v9520_v32 }
  0xcd   : > { %v1608_v14 = vadd.f32 %v1574_v24, %v1504_v3  ;;  %v1607_v16 = vadd.f32 %v1573_v27, %v1503_v52  ;;  %v830_v24 = vmul.f32 %v9150_v9, %v9547_v41  ;;  %v829_v27 = vmul.f32 %v9150_v9, %v9550_v58  ;;  %v9575_v3 = vld [vmem:[%s9126_s30 + $0x6a] sm:$0xff]  ;;  %v9578_v52 = vld [vmem:[%s9126_s30 + $0x62] sm:$0xff] }
  0xce   : > { %v894_v61 = vpop.permute.xlu1 %893  ;;  %v892_v62 = vpop.permute.xlu0 %891 }
  0xcf   : > { %v990_v63 = vadd.f32 %v894_v61, %v784_v31  ;;  %v989_v7 = vadd.f32 %v892_v62, %v783_v6  ;;  %v1654_v6 = vmul.f32 %v9234_v38, %v9575_v3  ;;  %v9591_v62 = vld [vmem:[%s9126_s30 + $0x79] sm:$0xff] }
  0xd0   : > { %1937 = vrot.lane.b32.xlu1 %v1858_v57, %s8964_s20  ;;  %1935 = vrot.lane.b32.xlu0 %v1857_v18, %s8964_s20  ;;  %v9580_v57 = vstv %s7841_s26  ;;  %13695 = vst [vmem:[#allocation11_spill] sm:$0xff] %v9591_v62  ;;  %s527_s26 = sand.u32 1, %s8952_s22  }
  0xd1   : > { %v9558_v29 = vadd.f32 %v1060_v43, %v990_v63  ;;  %v9560_v30 = vadd.f32 %v1059_v44, %v989_v7  ;;  %v9594_v63 = vld [vmem:[%s9126_s30 + $0x71] sm:$0xff]  ;;  %s7831_s19 = sshll.u32 %s527_s26, 3 }
  0xd2   : > { %v1712_v19 = vpop.permute.xlu1 %1711  ;;  %v1710_v20 = vpop.permute.xlu0 %1709  ;;  %13696 = vst [vmem:[#allocation12_spill] sm:$0xff] %v9594_v63  ;;  %s529_s23 = scalar_lea.vmem [#allocation5], %s7831_s19 }
  0xd3   : > { %v1812_v51 = vadd.f32 %v1712_v19, %v1606_v28  ;;  %v1811_v1 = vadd.f32 %v1710_v20, %v1605_v33  ;;  %v1653_v28 = vmul.f32 %v9234_v38, %v9578_v52  ;;  %v1140_v19 = vmul.f32 %v9167_v15, %v9591_v62 }
  0xd4   : > { %707 = vrot.lane.b32.xlu1 %v624_v49, %s13693_s28  ;;  %705 = vrot.lane.b32.xlu0 %v623_v50, %s13693_s28  ;;  %v1139_v20 = vmul.f32 %v9167_v15, %v9594_v63 }
  0xd6   : > { %v1716_v40 = vpop.permute.xlu1 %1715  ;;  %v1714_v2 = vpop.permute.xlu0 %1713 }
  0xd8   : > { %1425 = vrot.lane.b32.xlu1 %v1344_v34, %s8964_s20  ;;  %1423 = vrot.lane.b32.xlu0 %v1343_v36, %s8964_s20  ;;  %v1814_v34 = vadd.f32 %v1716_v40, %v1608_v14  ;;  %v1813_v36 = vadd.f32 %v1714_v2, %v1607_v16  ;;  %v579_v40 = vmul.f32 %v9430_v12, %v9298_v60 }
  0xda   : > { %v1918_v18 = vpop.permute.xlu1 %1917  ;;  %v1916_v43 = vpop.permute.xlu0 %1915 }
  0xdb   : > { %v2018_v44 = vadd.f32 %v1918_v18, %v1812_v51  ;;  %v2017_v31 = vadd.f32 %v1916_v43, %v1811_v1  ;;  %v580_v43 = vmul.f32 %v9430_v12, %v9295_v59  ;;  %v1859_v59 = vmul.f32 %v9260_v47, %v9578_v52 }
  0xdc   : > { %913 = vrot.lane.b32.xlu1 %v830_v24, %s8964_s20  ;;  %911 = vrot.lane.b32.xlu0 %v829_v27, %s8964_s20  ;;  %v9607_v24 = vld [vmem:[%s9126_s30 + $0x88] sm:$0xff] }
  0xdd   : > { %v2054_v33 = vadd.f32 %v9580_v57, %v2018_v44  ;;  %v2053_v61 = vadd.f32 %v9580_v57, %v2017_v31  ;;  %v9615_v44 = vld [vmem:[%s9126_s30 + $0x80] sm:$0xff]  ;;  %v1860_v31 = vmul.f32 %v9260_v47, %v9575_v3 }
  0xde   : > { %v1204_v7 = vpop.permute.xlu1 %1203  ;;  %v1202_v49 = vpop.permute.xlu0 %1201 }
  0xdf   : > { %v9596_v50 = vpack.c.bf16 %v2054_v33, %v2053_v61  ;;  %v625_v61 = vmul.f32 %v9121_v0, %v9615_v44 }
  0xe0   : > { %1735 = vrot.lane.b32.xlu1 %v1654_v6, %s13693_s28  ;;  %1733 = vrot.lane.b32.xlu0 %v1653_v28, %s13693_s28  ;;  %v626_v6 = vmul.f32 %v9121_v0, %v9607_v24 }
  0xe1   : > { %7871 = vmatmul.mubr.msk.bf16.vlgmr.msra.gmra.mxu1 %vm2269_vm0, %v9596_v50  ;;  %v2115_v27 = vshrl.u32 %v9596_v50, 16  ;;  %v2117_v51 = vshll.u32 %v9596_v50, 16 }
  0xe2   : > { %v1922_v1 = vpop.permute.xlu1 %1921  ;;  %v1920_v18 = vpop.permute.xlu0 %1919  ;;  %2620 = vmatprep.mubr.bf16.mxu1 %v13638_v48  ;;  %v1300_v48 = vadd.f32 %v1204_v7, %v9558_v29 }
  0xe3   : > { %v2020_v14 = vadd.f32 %v1922_v1, %v1814_v34  ;;  %v2019_v16 = vadd.f32 %v1920_v18, %v1813_v36  ;;  %v9619_v2 = vrot.slane %v2115_v27, 1  ;;  %v3186_v28 = vrot.slane %v2117_v51, 2 }
  0xe4   : > { %1223 = vrot.lane.b32.xlu1 %v1140_v19, %s13693_s28  ;;  %1221 = vrot.lane.b32.xlu0 %v1139_v20, %s13693_s28  ;;  %v2119_v34 = vrot.slane %v2117_v51, 1  ;;  %v1346_v18 = vmul.f32 %v9190_v23, %v9591_v62  ;;  %v1345_v51 = vmul.f32 %v9190_v23, %v9594_v63 }
  0xe5   : > { %v2056_v33 = vadd.f32 %v9580_v57, %v2020_v14  ;;  %v2055_v60 = vadd.f32 %v9580_v57, %v2019_v16  ;;  %v3187_v36 = vor.u32 %v3186_v28, %v9619_v2  ;;  %v1576_v14 = vmul.f32 %v9492_v46, %v9319_v8 }
  0xe6   : > { %v692_v19 = vpop.permute.xlu1 %691  ;;  %v690_v20 = vpop.permute.xlu0 %689  ;;  %v1575_v16 = vmul.f32 %v9492_v46, %v9322_v10  ;;  %v1062_v2 = vmul.f32 %v9448_v35, %v9331_v13  ;;  %v1299_v28 = vadd.f32 %v1202_v49, %v9560_v30  ;;  %v2804_v13 = vrot.slane %v9596_v50, 1 }
  0xe7   : > { %v9634_v1 = vpack.c.bf16 %v2056_v33, %v2055_v60  ;;  %v1061_v33 = vmul.f32 %v9448_v35, %v9334_v17  ;;  %v13697_v60 = vmov 0   ;;  %v786_v10 = vadd.f32 %v692_v19, %v580_v43 }
  0xe8   : > { %1941 = vrot.lane.b32.xlu1 %v1860_v31, %s8964_s20  ;;  %1939 = vrot.lane.b32.xlu0 %v1859_v59, %s8964_s20  ;;  %v2120_v59 = vor.u32 %v2119_v34, %v2115_v27  ;;  %v3600_v30 = vrot.slane %v9596_v50, 2 }
  0xe9   : > { %7872 = vmatmul.mubr.msk.bf16.gmra.mxu1 %vm2269_vm0, %v9634_v1  ;;  %v2122_v8 = vshll.u32 %v9634_v1, 16  ;;  %v13643_v29 = vrot.slane %v9634_v1, 1  ;;  %v13698_v27 = vshrl.u32 %v9634_v1, 16 }
  0xea   : > { %v1410_v7 = vpop.permute.xlu1 %1409  ;;  %v1408_v31 = vpop.permute.xlu0 %1407  ;;  %2630 = vmatprep.mubr.bf16.mxu1 %v13697_v60 }
  0xeb   : > { %v1506_v49 = vadd.f32 %v1410_v7, %v1300_v48  ;;  %v1505_v63 = vadd.f32 %v1408_v31, %v1299_v28  ;;  %v9660_v62 = vrot.slane %v2122_v8, 1  ;;  %v3189_v58 = vrot.slane %v2122_v8, 2 }
  0xec   : > { %711 = vrot.lane.b32.xlu1 %v626_v6, %s13693_s28  ;;  %709 = vrot.lane.b32.xlu0 %v625_v61, %s13693_s28  ;;  %v3188_v34 = vrot.slane %v13698_v27, 1  ;;  %v9669_v17 = vsel %vm2803_vm1, %v2804_v13, %v13643_v29  ;;  %v785_v48 = vadd.f32 %v690_v20, %v579_v40  ;;  %v13700_v7 = vrot.slane %v9634_v1, 2 }
  0xed   : > { %13699 = vst [vmem:[#allocation13_spill] sm:$0xff] %v9669_v17  ;;  %v2125_v28 = vsel %vm2113_vm2, %v2120_v59, %v9660_v62  ;;  %v1610_v8 = vadd.f32 %v1576_v14, %v1506_v49  ;;  %v1609_v43 = vadd.f32 %v1575_v16, %v1505_v63  ;;  %v832_v63 = vmul.f32 %v9150_v9, %v9607_v24 }
  0xee   : > { %v898_v6 = vpop.permute.xlu1 %897  ;;  %v896_v61 = vpop.permute.xlu0 %895  ;;  %7850 = vmatmul.mubr.msk.bf16.vlgmr.msra.gmra.mxu0 %vm2269_vm0, %v2125_v28  ;;  %v9675_v19 = vor.u32 %v3189_v58, %v3188_v34  ;;  %v9680_v31 = vsel %vm3599_vm3, %v3600_v30, %v13700_v7  ;;  %v831_v58 = vmul.f32 %v9150_v9, %v9615_v44 }
  0xef   : > { %13701 = vst [vmem:[#allocation14_spill] sm:$0xff] %v9680_v31  ;;  %v992_v50 = vadd.f32 %v898_v6, %v786_v10  ;;  %v991_v40 = vadd.f32 %v896_v61, %v785_v48  ;;  %2363 = vmatprep.mubr.bf16.mxu0 %v13697_v60  ;;  %v9698_v10 = vld [vmem:[%s9126_s30 + $0x7a] sm:$0xff] }
  0xf0   : > { %1429 = vrot.lane.b32.xlu1 %v1346_v18, %s8964_s20  ;;  %1427 = vrot.lane.b32.xlu0 %v1345_v51, %s8964_s20  ;;  %v9691_v20 = vsel %vm3184_vm4, %v3187_v36, %v9675_v19  ;;  %v9701_v18 = vld [vmem:[%s9126_s30 + $0x72] sm:$0xff]  ;;  %v1656_v13 = vmul.f32 %v9234_v38, %v9698_v10 }
  0xf1   : > { %13702 = vst [vmem:[#allocation15_spill] sm:$0xff] %v9691_v20  ;;  %v9693_v14 = vadd.f32 %v1062_v2, %v992_v50  ;;  %v9695_v16 = vadd.f32 %v1061_v33, %v991_v40  ;;  %v1655_v36 = vmul.f32 %v9234_v38, %v9701_v18  ;;  %v9710_v2 = vld [vmem:[%s9126_s30 + $0x89] sm:$0xff]  ;;  %v9713_v33 = vld [vmem:[%s9126_s30 + $0x81] sm:$0xff]  ;;  %v1862_v40 = vmul.f32 %v9260_v47, %v9698_v10 }
  0xf2   : > { %v1720_v59 = vpop.permute.xlu1 %1719  ;;  %v1718_v51 = vpop.permute.xlu0 %1717  ;;  %13703 = vst [vmem:[#allocation16_spill] sm:$0xff] %v9713_v33  ;;  %v1142_v27 = vmul.f32 %v9167_v15, %v9710_v2  ;;  %v1141_v34 = vmul.f32 %v9167_v15, %v9713_v33  ;;  %v1347_v29 = vmul.f32 %v9190_v23, %v9713_v33  ;;  %v13711_v20 = vrot.slane %v9634_v1, 2 }
  0xf3   : > { %v1816_v48 = vadd.f32 %v1720_v59, %v1610_v8  ;;  %v1815_v28 = vadd.f32 %v1718_v51, %v1609_v43  ;;  %v9730_v8 = vld [vmem:[%s9126_s30 + $0x98] sm:$0xff]  ;;  %v9733_v43 = vld [vmem:[%s9126_s30 + $0x90] sm:$0xff] }
  0xf4   : > { %917 = vrot.lane.b32.xlu1 %v832_v63, %s8964_s20  ;;  %915 = vrot.lane.b32.xlu0 %v831_v58, %s8964_s20  ;;  %v1861_v63 = vmul.f32 %v9260_v47, %v9701_v18  ;;  %13704 = vst [vmem:[#allocation17_spill] sm:$0xff] %v9730_v8  ;;  %13705 = vst [vmem:[#allocation18_spill] sm:$0xff] %v9733_v43 }
  0xf6   : > { %v1208_v30 = vpop.permute.xlu1 %1207  ;;  %v1206_v49 = vpop.permute.xlu0 %1205 }
  0xf8   : > { %1739 = vrot.lane.b32.xlu1 %v1656_v13, %s13693_s28  ;;  %1737 = vrot.lane.b32.xlu0 %v1655_v36, %s13693_s28 }
  0xfa   : > { %v1926_v6 = vpop.permute.xlu1 %1925  ;;  %v1924_v61 = vpop.permute.xlu0 %1923 }
  0xfb   : > { %v2022_v7 = vadd.f32 %v1926_v6, %v1816_v48  ;;  %v2021_v50 = vadd.f32 %v1924_v61, %v1815_v28 }
  0xfc   : > { %1227 = vrot.lane.b32.xlu1 %v1142_v27, %s13693_s28  ;;  %1225 = vrot.lane.b32.xlu0 %v1141_v34, %s13693_s28  ;;  %v628_v27 = vmul.f32 %v9121_v0, %v9730_v8  ;;  %v627_v34 = vmul.f32 %v9121_v0, %v9733_v43 }
  0xfd   : > { %v2058_v58 = vadd.f32 %v9580_v57, %v2022_v7  ;;  %v2057_v13 = vadd.f32 %v9580_v57, %v2021_v50 }
  0xfe   : > { %v9735_v59 = vpop.permute.xlu1 %695  ;;  %v9737_v51 = vpop.permute.xlu0 %693 }
  0xff   : > { %v9739_v36 = vpack.c.bf16 %v2058_v58, %v2057_v13  ;;  %v1348_v13 = vmul.f32 %v9190_v23, %v9710_v2 }
 0x100   : > { %1945 = vrot.lane.b32.xlu1 %v1862_v40, %s8964_s20  ;;  %1943 = vrot.lane.b32.xlu0 %v1861_v63, %s8964_s20  ;;  %v13706_v40 = vshrl.u32 %v9634_v1, 16 }
 0x101   : > { %7873 = vmatmul.mubr.msk.bf16.gmra.mxu1 %vm2269_vm0, %v9739_v36  ;;  %v2130_v48 = vshll.u32 %v9739_v36, 16  ;;  %v13644_v28 = vshrl.u32 %v9739_v36, 16  ;;  %v13707_v31 = vrot.slane %v9739_v36, 1 }
 0x102   : > { %v1414_v61 = vpop.permute.xlu1 %1413  ;;  %v1412_v7 = vpop.permute.xlu0 %1411  ;;  %2640 = vmatprep.mubr.bf16.mxu1 %v13697_v60  ;;  %v2128_v63 = vor.u32 %v13706_v40, %v9660_v62  ;;  %v13708_v62 = vrot.slane %v9634_v1, 1 }
 0x103   : > { %v9757_v58 = vrot.slane %v2130_v48, 1  ;;  %v3192_v6 = vrot.slane %v13644_v28, 1  ;;  %v3193_v50 = vrot.slane %v2130_v48, 2  ;;  %v13710_v48 = vrot.slane %v9739_v36, 2 }
 0x104   : > { %715 = vrot.lane.b32.xlu1 %v628_v27, %s13693_s28  ;;  %713 = vrot.lane.b32.xlu0 %v627_v34, %s13693_s28  ;;  %v9772_v40 = vsel %vm2803_vm1, %v13708_v62, %v13707_v31  ;;  %v834_v31 = vmul.f32 %v9150_v9, %v9730_v8 }
 0x105   : > { %13709 = vst [vmem:[#allocation19_spill] sm:$0xff] %v9772_v40  ;;  %v2133_v27 = vsel %vm2113_vm2, %v2128_v63, %v9757_v58  ;;  %v9781_v28 = vor.u32 %v3193_v50, %v3192_v6  ;;  %v9788_v33 = vsel %vm3599_vm3, %v13711_v20, %v13710_v48  ;;  %v833_v6 = vmul.f32 %v9150_v9, %v9733_v43  ;;  %v9805_v63 = vld [vmem:[%s9126_s30 + $0x8a] sm:$0xff] }
 0x106   : > { %v9776_v34 = vpop.permute.xlu1 %901  ;;  %v9778_v17 = vpop.permute.xlu0 %899  ;;  %7851 = vmatmul.mubr.msk.bf16.gmra.mxu0 %vm2269_vm0, %v2133_v27  ;;  %13712 = vst [vmem:[#allocation20_spill] sm:$0xff] %v9788_v33  ;;  %v1302_v20 = vadd.f32 %v1208_v30, %v9693_v14  ;;  %v1301_v50 = vadd.f32 %v1206_v49, %v9695_v16  ;;  %v1578_v33 = vmul.f32 %v9492_v46, %v9367_v37  ;;  %v9821_v30 = vld [vmem:[%s9126_s30 + $0x99] sm:$0xff]  ;;  %v9824_v49 = vld [vmem:[%s9126_s30 + $0x91] sm:$0xff] }
 0x107   : > { %2373 = vmatprep.mubr.bf16.mxu0 %v13697_v60  ;;  %v9800_v1 = vsel %vm3184_vm4, %v9675_v19, %v9781_v28  ;;  %v1577_v19 = vmul.f32 %v9492_v46, %v9370_v39  ;;  %v1658_v14 = vmul.f32 %v9234_v38, %v9805_v63  ;;  %13715 = vst [vmem:[#allocation23_spill] sm:$0xff] %v9821_v30 }
 0x108   : > { %1433 = vrot.lane.b32.xlu1 %v1348_v13, %s8964_s20  ;;  %1431 = vrot.lane.b32.xlu0 %v1347_v29, %s8964_s20  ;;  %13713 = vst [vmem:[#allocation21_spill] sm:$0xff] %v9800_v1  ;;  %v9808_v29 = vld [vmem:[%s9126_s30 + $0x82] sm:$0xff]  ;;  %v1508_v27 = vadd.f32 %v1414_v61, %v1302_v20  ;;  %v1507_v48 = vadd.f32 %v1412_v7, %v1301_v50 }
 0x109   : > { %13714 = vst [vmem:[#allocation22_spill] sm:$0xff] %v9808_v29  ;;  %v1657_v16 = vmul.f32 %v9234_v38, %v9808_v29 }
 0x10a   : > { %v1724_v13 = vpop.permute.xlu1 %1723  ;;  %v1722_v62 = vpop.permute.xlu0 %1721  ;;  %v1612_v39 = vadd.f32 %v1578_v33, %v1508_v27  ;;  %v1611_v7 = vadd.f32 %v1577_v19, %v1507_v48  ;;  %v8877_v27 = vld [vmem:[%s9126_s30 + $0x48] sm:$0xff]  ;;  %v1864_v19 = vmul.f32 %v9260_v47, %v9805_v63 }
 0x10b   : > { %v582_v48 = vmul.f32 %v8877_v27, %v9430_v12 }
 0x10c   : > { %921 = vrot.lane.b32.xlu1 %v834_v31, %s8964_s20  ;;  %919 = vrot.lane.b32.xlu0 %v833_v6, %s8964_s20  ;;  %v1144_v31 = vmul.f32 %v9167_v15, %v9821_v30  ;;  %v1143_v6 = vmul.f32 %v9167_v15, %v9824_v49  ;;  %v1818_v20 = vadd.f32 %v1724_v13, %v1612_v39  ;;  %v9852_v39 = vld [vmem:[%s9126_s30 + $0xa0] sm:$0xff] }
 0x10d   : > { %v1817_v50 = vadd.f32 %v1722_v62, %v1611_v7  ;;  %v1863_v13 = vmul.f32 %v9260_v47, %v9808_v29 }
 0x10e   : > { %v9826_v61 = vpop.permute.xlu1 %1211  ;;  %v9828_v37 = vpop.permute.xlu0 %1209 }
 0x110   : > { %1743 = vrot.lane.b32.xlu1 %v1658_v14, %s13693_s28  ;;  %1741 = vrot.lane.b32.xlu0 %v1657_v16, %s13693_s28  ;;  %v8878_v14 = vld [vmem:[%s9126_s30 + $0x40] sm:$0xff] }
 0x111   : > { %v581_v62 = vmul.f32 %v8878_v14, %v9430_v12 }
 0x112   : > { %v1930_v40 = vpop.permute.xlu1 %1929  ;;  %v1928_v1 = vpop.permute.xlu0 %1927 }
 0x113   : > { %v2024_v43 = vadd.f32 %v1930_v40, %v1818_v20  ;;  %v2023_v33 = vadd.f32 %v1928_v1, %v1817_v50  ;;  %v9849_v1 = vld [vmem:[%s9126_s30 + $0xa8] sm:$0xff]  ;;  %v788_v20 = vadd.f32 %v9735_v59, %v582_v48  ;;  %v629_v50 = vmul.f32 %v9121_v0, %v9852_v39 }
 0x114   : > { %1231 = vrot.lane.b32.xlu1 %v1144_v31, %s13693_s28  ;;  %1229 = vrot.lane.b32.xlu0 %v1143_v6, %s13693_s28  ;;  %v1064_v48 = vmul.f32 %v9448_v35, %v9377_v42  ;;  %v13716_v59 = vshrl.u32 %v9739_v36, 16 }
 0x115   : > { %v2060_v16 = vadd.f32 %v9580_v57, %v2024_v43  ;;  %v2059_v40 = vadd.f32 %v9580_v57, %v2023_v33  ;;  %v630_v43 = vmul.f32 %v9121_v0, %v9849_v1  ;;  %v787_v33 = vadd.f32 %v9737_v51, %v581_v62 }
 0x116   : > { %v9854_v7 = vpop.permute.xlu1 %699  ;;  %v9856_v31 = vpop.permute.xlu0 %697  ;;  %v1350_v51 = vmul.f32 %v9190_v23, %v9821_v30  ;;  %v2136_v42 = vor.u32 %v13716_v59, %v9757_v58 }
 0x117   : > { %v9858_v6 = vpack.c.bf16 %v2060_v16, %v2059_v40  ;;  %v994_v40 = vadd.f32 %v9776_v34, %v788_v20  ;;  %v993_v14 = vadd.f32 %v9778_v17, %v787_v33  ;;  %v13719_v17 = vrot.slane %v9739_v36, 1 }
 0x118   : > { %1949 = vrot.lane.b32.xlu1 %v1864_v19, %s8964_s20  ;;  %1947 = vrot.lane.b32.xlu0 %v1863_v13, %s8964_s20  ;;  %v1063_v19 = vmul.f32 %v9448_v35, %v9380_v45  ;;  %v1349_v45 = vmul.f32 %v9190_v23, %v9824_v49 }
 0x119   : > { %7874 = vmatmul.mubr.msk.bf16.gmra.mxu1 %vm2269_vm0, %v9858_v6  ;;  %v2138_v27 = vshll.u32 %v9858_v6, 16  ;;  %v13717_v30 = vshrl.u32 %v9858_v6, 16  ;;  %v13718_v34 = vrot.slane %v9858_v6, 1  ;;  %v13721_v33 = vrot.slane %v9858_v6, 2 }
 0x11a   : > { %v1418_v13 = vpop.permute.xlu1 %1417  ;;  %v1416_v16 = vpop.permute.xlu0 %1415  ;;  %2650 = vmatprep.mubr.bf16.mxu1 %v13697_v60 }
 0x11b   : > { %v9886_v8 = vrot.slane %v2138_v27, 1  ;;  %v3196_v62 = vrot.slane %v13717_v30, 1  ;;  %v3197_v29 = vrot.slane %v2138_v27, 2  ;;  %v9899_v20 = vsel %vm2803_vm1, %v13719_v17, %v13718_v34 }
 0x11c   : > { %719 = vrot.lane.b32.xlu1 %v630_v43, %s13693_s28  ;;  %717 = vrot.lane.b32.xlu0 %v629_v50, %s13693_s28  ;;  %13720 = vst [vmem:[#allocation24_spill] sm:$0xff] %v9899_v20  ;;  %v13722_v27 = vrot.slane %v9739_v36, 2  ;;  %v1098_v34 = vadd.f32 %v1064_v48, %v994_v40  ;;  %v1097_v17 = vadd.f32 %v1063_v19, %v993_v14  ;;  %v9932_v19 = vld [vmem:[%s9126_s30 + $0x9a] sm:$0xff] }
 0x11d   : > { %v2141_v58 = vsel %vm2113_vm2, %v2136_v42, %v9886_v8  ;;  %v9908_v30 = vor.u32 %v3197_v29, %v3196_v62  ;;  %v836_v42 = vmul.f32 %v9150_v9, %v9849_v1  ;;  %v835_v29 = vmul.f32 %v9150_v9, %v9852_v39 }
 0x11e   : > { %v9903_v43 = vpop.permute.xlu1 %905  ;;  %v9905_v50 = vpop.permute.xlu0 %903  ;;  %7852 = vmatmul.mubr.msk.bf16.gmra.mxu0 %vm2269_vm0, %v2141_v58  ;;  %v9915_v59 = vsel %vm3599_vm3, %v13722_v27, %v13721_v33  ;;  %v1304_v14 = vadd.f32 %v9826_v61, %v1098_v34  ;;  %v1303_v48 = vadd.f32 %v9828_v37, %v1097_v17  ;;  %v1580_v33 = vmul.f32 %v9492_v46, %v9419_v4  ;;  %v9948_v27 = vld [vmem:[%s9126_s30 + $0xa9] sm:$0xff] }
 0x11f   : > { %13723 = vst [vmem:[#allocation25_spill] sm:$0xff] %v9915_v59  ;;  %2383 = vmatprep.mubr.bf16.mxu0 %v13697_v60  ;;  %v9927_v36 = vsel %vm3184_vm4, %v9781_v28, %v9908_v30  ;;  %v1579_v28 = vmul.f32 %v9492_v46, %v9422_v5  ;;  %v1660_v61 = vmul.f32 %v9234_v38, %v9932_v19 }
 0x120   : > { %1437 = vrot.lane.b32.xlu1 %v1350_v51, %s8964_s20  ;;  %1435 = vrot.lane.b32.xlu0 %v1349_v45, %s8964_s20  ;;  %13724 = vst [vmem:[#allocation26_spill] sm:$0xff] %v9927_v36  ;;  %v9935_v51 = vld [vmem:[%s9126_s30 + $0x92] sm:$0xff]  ;;  %v1510_v45 = vadd.f32 %v1418_v13, %v1304_v14  ;;  %v1509_v58 = vadd.f32 %v1416_v16, %v1303_v48  ;;  %v9951_v13 = vld [vmem:[%s9126_s30 + $0xa1] sm:$0xff] }
 0x121   : > { %v1659_v37 = vmul.f32 %v9234_v38, %v9935_v51  ;;  %v1146_v17 = vmul.f32 %v9167_v15, %v9948_v27 }
 0x122   : > { %v1728_v62 = vpop.permute.xlu1 %1727  ;;  %v1726_v40 = vpop.permute.xlu0 %1725  ;;  %v1614_v34 = vadd.f32 %v1580_v33, %v1510_v45  ;;  %v1613_v5 = vadd.f32 %v1579_v28, %v1509_v58  ;;  %v584_v45 = vmul.f32 %v9430_v12, %v9395_v54  ;;  %v1866_v58 = vmul.f32 %v9260_v47, %v9932_v19  ;;  %v9976_v28 = vld [vmem:[%s9126_s30 + $0xb8] sm:$0xff]  ;;  %v9979_v54 = vld [vmem:[%s9126_s30 + $0xb0] sm:$0xff] }
 0x123   : > { %v1865_v33 = vmul.f32 %v9260_v47, %v9935_v51 }
 0x124   : > { %925 = vrot.lane.b32.xlu1 %v836_v42, %s8964_s20  ;;  %923 = vrot.lane.b32.xlu0 %v835_v29, %s8964_s20  ;;  %v1145_v42 = vmul.f32 %v9167_v15, %v9951_v13  ;;  %v1820_v29 = vadd.f32 %v1728_v62, %v1614_v34  ;;  %v1819_v14 = vadd.f32 %v1726_v40, %v1613_v5 }
 0x125   : > { %v583_v62 = vmul.f32 %v9430_v12, %v9398_v55  ;;  %v790_v5 = vadd.f32 %v9854_v7, %v584_v45  ;;  %v632_v55 = vmul.f32 %v9121_v0, %v9976_v28 }
 0x126   : > { %v9953_v16 = vpop.permute.xlu1 %1215  ;;  %v9955_v4 = vpop.permute.xlu0 %1213 }
 0x128   : > { %1747 = vrot.lane.b32.xlu1 %v1660_v61, %s13693_s28  ;;  %1745 = vrot.lane.b32.xlu0 %v1659_v37, %s13693_s28 }
 0x12a   : > { %v1934_v48 = vpop.permute.xlu1 %1933  ;;  %v1932_v59 = vpop.permute.xlu0 %1931 }
 0x12b   : > { %v2026_v20 = vadd.f32 %v1934_v48, %v1820_v29  ;;  %v2025_v36 = vadd.f32 %v1932_v59, %v1819_v14  ;;  %v1066_v29 = vmul.f32 %v9448_v35, %v9433_v22  ;;  %v1065_v14 = vmul.f32 %v9448_v35, %v9436_v25 }
 0x12c   : > { %1235 = vrot.lane.b32.xlu1 %v1146_v17, %s13693_s28  ;;  %1233 = vrot.lane.b32.xlu0 %v1145_v42, %s13693_s28  ;;  %v1351_v25 = vmul.f32 %v9190_v23, %v9951_v13 }
 0x12d   : > { %v2062_v40 = vadd.f32 %v9580_v57, %v2026_v20  ;;  %v2061_v59 = vadd.f32 %v9580_v57, %v2025_v36  ;;  %v631_v20 = vmul.f32 %v9121_v0, %v9979_v54  ;;  %v789_v36 = vadd.f32 %v9856_v31, %v583_v62 }
 0x12e   : > { %v9981_v61 = vpop.permute.xlu1 %703  ;;  %v9983_v37 = vpop.permute.xlu0 %701  ;;  %v1352_v31 = vmul.f32 %v9190_v23, %v9948_v27 }
 0x12f   : > { %v9985_v34 = vpack.c.bf16 %v2062_v40, %v2061_v59  ;;  %v995_v62 = vadd.f32 %v9905_v50, %v789_v36  ;;  %v13725_v40 = vshrl.u32 %v9858_v6, 16  ;;  %v13727_v50 = vrot.slane %v9858_v6, 1 }
 0x130   : > { %1953 = vrot.lane.b32.xlu1 %v1866_v58, %s8964_s20  ;;  %1951 = vrot.lane.b32.xlu0 %v1865_v33, %s8964_s20  ;;  %v996_v33 = vadd.f32 %v9903_v43, %v790_v5 }
 0x131   : > { %7875 = vmatmul.mubr.msk.bf16.gmra.mxu1 %vm2269_vm0, %v9985_v34  ;;  %v2146_v17 = vshll.u32 %v9985_v34, 16  ;;  %v13650_v42 = vshrl.u32 %v9985_v34, 16  ;;  %v2144_v22 = vor.u32 %v13725_v40, %v9886_v8  ;;  %v13726_v43 = vrot.slane %v9985_v34, 1 }
 0x132   : > { %v1422_v48 = vpop.permute.xlu1 %1421  ;;  %v1420_v45 = vpop.permute.xlu0 %1419  ;;  %2660 = vmatprep.mubr.bf16.mxu1 %v13697_v60  ;;  %v13730_v40 = vrot.slane %v9858_v6, 2 }
 0x133   : > { %v10013_v59 = vrot.slane %v2146_v17, 1  ;;  %v3200_v58 = vrot.slane %v13650_v42, 1  ;;  %v3201_v7 = vrot.slane %v2146_v17, 2  ;;  %v10026_v5 = vsel %vm2803_vm1, %v13727_v50, %v13726_v43 }
 0x134   : > { %723 = vrot.lane.b32.xlu1 %v632_v55, %s13693_s28  ;;  %721 = vrot.lane.b32.xlu0 %v631_v20, %s13693_s28  ;;  %13728 = vst [vmem:[#allocation27_spill] sm:$0xff] %v10026_v5  ;;  %v13729_v17 = vrot.slane %v9985_v34, 2  ;;  %v1100_v50 = vadd.f32 %v1066_v29, %v996_v33  ;;  %v1099_v42 = vadd.f32 %v1065_v14, %v995_v62 }
 0x135   : > { %v2149_v8 = vsel %vm2113_vm2, %v2144_v22, %v10013_v59  ;;  %v10035_v36 = vor.u32 %v3201_v7, %v3200_v58  ;;  %v838_v22 = vmul.f32 %v9150_v9, %v9976_v28  ;;  %v837_v7 = vmul.f32 %v9150_v9, %v9979_v54  ;;  %v10062_v58 = vld [vmem:[%s9126_s30 + $0xa2] sm:$0xff] }
 0x136   : > { %v10030_v55 = vpop.permute.xlu1 %909  ;;  %v10032_v20 = vpop.permute.xlu0 %907  ;;  %7853 = vmatmul.mubr.msk.bf16.gmra.mxu0 %vm2269_vm0, %v2149_v8  ;;  %v10042_v43 = vsel %vm3599_vm3, %v13730_v40, %v13729_v17  ;;  %v1306_v29 = vadd.f32 %v9953_v16, %v1100_v50  ;;  %v1305_v14 = vadd.f32 %v9955_v4, %v1099_v42  ;;  %v1582_v17 = vmul.f32 %v9492_v46, %v9501_v53  ;;  %v10075_v42 = vld [vmem:[%s9126_s30 + $0xb9] sm:$0xff] }
 0x137   : > { %13731 = vst [vmem:[#allocation28_spill] sm:$0xff] %v10042_v43  ;;  %2393 = vmatprep.mubr.bf16.mxu0 %v13697_v60  ;;  %v10054_v6 = vsel %vm3184_vm4, %v9908_v30, %v10035_v36  ;;  %v1581_v30 = vmul.f32 %v9492_v46, %v9504_v56  ;;  %v1661_v4 = vmul.f32 %v9234_v38, %v10062_v58 }
 0x138   : > { %1441 = vrot.lane.b32.xlu1 %v1352_v31, %s8964_s20  ;;  %1439 = vrot.lane.b32.xlu0 %v1351_v25, %s8964_s20  ;;  %13732 = vst [vmem:[#allocation29_spill] sm:$0xff] %v10054_v6  ;;  %v10059_v31 = vld [vmem:[%s9126_s30 + $0xaa] sm:$0xff]  ;;  %v1512_v25 = vadd.f32 %v1422_v48, %v1306_v29  ;;  %v1511_v8 = vadd.f32 %v1420_v45, %v1305_v14 }
 0x139   : > { %v1662_v16 = vmul.f32 %v9234_v38, %v10059_v31  ;;  %v10078_v48 = vld [vmem:[%s9126_s30 + $0xb1] sm:$0xff]  ;;  %v1148_v50 = vmul.f32 %v9167_v15, %v10075_v42 }
 0x13a   : > { %v1732_v33 = vpop.permute.xlu1 %1731  ;;  %v1730_v62 = vpop.permute.xlu0 %1729  ;;  %v1616_v40 = vadd.f32 %v1582_v17, %v1512_v25  ;;  %v1615_v56 = vadd.f32 %v1581_v30, %v1511_v8  ;;  %v586_v25 = vmul.f32 %v9430_v12, %v9475_v11  ;;  %v1868_v8 = vmul.f32 %v9260_v47, %v10059_v31  ;;  %v562_v30 = vld [vmem:[%s9126_s30 + $0xc8] sm:$0xff] }
 0x13b   : > { %v1867_v17 = vmul.f32 %v9260_v47, %v10062_v58 }
 0x13c   : > { %929 = vrot.lane.b32.xlu1 %v838_v22, %s8964_s20  ;;  %927 = vrot.lane.b32.xlu0 %v837_v7, %s8964_s20  ;;  %v1147_v22 = vmul.f32 %v9167_v15, %v10078_v48  ;;  %v1822_v7 = vadd.f32 %v1732_v33, %v1616_v40  ;;  %v1821_v29 = vadd.f32 %v1730_v62, %v1615_v56 }
 0x13d   : > { %v585_v33 = vmul.f32 %v9430_v12, %v9478_v21  ;;  %v792_v56 = vadd.f32 %v9981_v61, %v586_v25  ;;  %v634_v21 = vmul.f32 %v9121_v0, %v562_v30  ;;  %v1068_v61 = vmul.f32 %v9448_v35, %v9517_v26 }
 0x13e   : > { %v10080_v45 = vpop.permute.xlu1 %1219  ;;  %v10082_v53 = vpop.permute.xlu0 %1217 }
 0x140   : > { %1751 = vrot.lane.b32.xlu1 %v1662_v16, %s13693_s28  ;;  %1749 = vrot.lane.b32.xlu0 %v1661_v4, %s13693_s28  ;;  %v561_v16 = vld [vmem:[%s9126_s30 + $0xc0] sm:$0xff] }
 0x142   : > { %v1938_v14 = vpop.permute.xlu1 %1937  ;;  %v1936_v43 = vpop.permute.xlu0 %1935 }
 0x143   : > { %v2028_v5 = vadd.f32 %v1938_v14, %v1822_v7  ;;  %v2027_v6 = vadd.f32 %v1936_v43, %v1821_v29  ;;  %v1067_v29 = vmul.f32 %v9448_v35, %v9520_v32  ;;  %v1353_v32 = vmul.f32 %v9190_v23, %v10078_v48 }
 0x144   : > { %1239 = vrot.lane.b32.xlu1 %v1148_v50, %s13693_s28  ;;  %1237 = vrot.lane.b32.xlu0 %v1147_v22, %s13693_s28 }
 0x145   : > { %v2064_v62 = vadd.f32 %v9580_v57, %v2028_v5  ;;  %v2063_v43 = vadd.f32 %v9580_v57, %v2027_v6  ;;  %v633_v5 = vmul.f32 %v9121_v0, %v561_v16  ;;  %v791_v6 = vadd.f32 %v9983_v37, %v585_v33 }
 0x146   : > { %v10104_v11 = vpop.permute.xlu1 %707  ;;  %v10106_v4 = vpop.permute.xlu0 %705  ;;  %v1354_v37 = vmul.f32 %v9190_v23, %v10075_v42 }
 0x147   : > { %v10108_v40 = vpack.c.bf16 %v2064_v62, %v2063_v43  ;;  %v997_v33 = vadd.f32 %v10032_v20, %v791_v6  ;;  %v13733_v62 = vshrl.u32 %v9985_v34, 16  ;;  %v13735_v20 = vrot.slane %v9985_v34, 1 }
 0x148   : > { %1957 = vrot.lane.b32.xlu1 %v1868_v8, %s8964_s20  ;;  %1955 = vrot.lane.b32.xlu0 %v1867_v17, %s8964_s20  ;;  %v998_v17 = vadd.f32 %v10030_v55, %v792_v56 }
 0x149   : > { %7876 = vmatmul.mubr.msk.bf16.gmra.mxu1 %vm2269_vm0, %v10108_v40  ;;  %v2154_v50 = vshll.u32 %v10108_v40, 16  ;;  %v13651_v22 = vshrl.u32 %v10108_v40, 16  ;;  %v2152_v26 = vor.u32 %v13733_v62, %v10013_v59  ;;  %v13734_v55 = vrot.slane %v10108_v40, 1 }
 0x14a   : > { %v1426_v14 = vpop.permute.xlu1 %1425  ;;  %v1424_v25 = vpop.permute.xlu0 %1423  ;;  %2670 = vmatprep.mubr.bf16.mxu1 %v13697_v60  ;;  %v13738_v62 = vrot.slane %v9985_v34, 2 }
 0x14b   : > { %v10134_v43 = vrot.slane %v2154_v50, 1  ;;  %v3204_v8 = vrot.slane %v13651_v22, 1  ;;  %v3205_v7 = vrot.slane %v2154_v50, 2  ;;  %v10147_v56 = vsel %vm2803_vm1, %v13735_v20, %v13734_v55 }
 0x14c   : > { %727 = vrot.lane.b32.xlu1 %v634_v21, %s13693_s28  ;;  %725 = vrot.lane.b32.xlu0 %v633_v5, %s13693_s28  ;;  %13736 = vst [vmem:[#allocation30_spill] sm:$0xff] %v10147_v56  ;;  %v13737_v50 = vrot.slane %v10108_v40, 2  ;;  %v1102_v20 = vadd.f32 %v1068_v61, %v998_v17  ;;  %v1101_v22 = vadd.f32 %v1067_v29, %v997_v33 }
 0x14d   : > { %v2157_v59 = vsel %vm2113_vm2, %v2152_v26, %v10134_v43  ;;  %v10156_v6 = vor.u32 %v3205_v7, %v3204_v8  ;;  %v840_v26 = vmul.f32 %v9150_v9, %v562_v30  ;;  %v839_v7 = vmul.f32 %v9150_v9, %v561_v16  ;;  %v10178_v8 = vld [vmem:[%s9126_s30 + $0xba] sm:$0xff] }
 0x14e   : > { %v10151_v21 = vpop.permute.xlu1 %913  ;;  %v10153_v5 = vpop.permute.xlu0 %911  ;;  %7854 = vmatmul.mubr.msk.bf16.gmra.mxu0 %vm2269_vm0, %v2157_v59  ;;  %v10163_v55 = vsel %vm3599_vm3, %v13738_v62, %v13737_v50  ;;  %v1308_v61 = vadd.f32 %v10080_v45, %v1102_v20  ;;  %v1307_v29 = vadd.f32 %v10082_v53, %v1101_v22  ;;  %v1584_v16 = vmul.f32 %v9492_v46, %v9575_v3  ;;  %v10194_v22 = vld [vmem:[%s9126_s30 + $0xc9] sm:$0xff] }
 0x14f   : > { %13739 = vst [vmem:[#allocation31_spill] sm:$0xff] %v10163_v55  ;;  %2403 = vmatprep.mubr.bf16.mxu0 %v13697_v60  ;;  %v10173_v34 = vsel %vm3184_vm4, %v10035_v36, %v10156_v6  ;;  %v1583_v36 = vmul.f32 %v9492_v46, %v9578_v52  ;;  %v1664_v45 = vmul.f32 %v9234_v38, %v10178_v8  ;;  %13741 = vst [vmem:[#allocation33_spill] sm:$0xff] %v10194_v22 }
 0x150   : > { %1445 = vrot.lane.b32.xlu1 %v1354_v37, %s8964_s20  ;;  %1443 = vrot.lane.b32.xlu0 %v1353_v32, %s8964_s20  ;;  %13740 = vst [vmem:[#allocation32_spill] sm:$0xff] %v10173_v34  ;;  %v10181_v37 = vld [vmem:[%s9126_s30 + $0xb2] sm:$0xff]  ;;  %v1514_v30 = vadd.f32 %v1426_v14, %v1308_v61  ;;  %v1513_v32 = vadd.f32 %v1424_v25, %v1307_v29  ;;  %v10197_v14 = vld [vmem:[%s9126_s30 + $0xc1] sm:$0xff] }
 0x151   : > { %v1663_v53 = vmul.f32 %v9234_v38, %v10181_v37  ;;  %v1150_v50 = vmul.f32 %v9167_v15, %v10194_v22  ;;  %v1149_v62 = vmul.f32 %v9167_v15, %v10197_v14  ;;  %v588_v29 = vmul.f32 %v9430_v12, %v9547_v41 }
 0x152   : > { %v1736_v17 = vpop.permute.xlu1 %1735  ;;  %v1734_v33 = vpop.permute.xlu0 %1733  ;;  %v1618_v59 = vadd.f32 %v1584_v16, %v1514_v30  ;;  %v1617_v52 = vadd.f32 %v1583_v36, %v1513_v32  ;;  %v13742_v16 = vld [vmem:[#allocation10_spill] sm:$0xff]  ;;  %v1356_v56 = vmul.f32 %v9190_v23, %v10194_v22  ;;  %v13749_v22 = vrot.slane %v10108_v40, 1 }
 0x153   : > { %v587_v36 = vmul.f32 %v9430_v12, %v13742_v16 }
 0x154   : > { %933 = vrot.lane.b32.xlu1 %v840_v26, %s8964_s20  ;;  %931 = vrot.lane.b32.xlu0 %v839_v7, %s8964_s20  ;;  %v1824_v20 = vadd.f32 %v1736_v17, %v1618_v59  ;;  %v1823_v26 = vadd.f32 %v1734_v33, %v1617_v52  ;;  %v1869_v17 = vmul.f32 %v9260_v47, %v10181_v37  ;;  %v10220_v33 = vld [vmem:[%s9126_s30 + $0xd8] sm:$0xff]  ;;  %v10225_v59 = vld [vmem:[%s9126_s30 + $0xd0] sm:$0xff] }
 0x155   : > { %13743 = vst [vmem:[#allocation10_spill] sm:$0xff] %v10225_v59 }
 0x156   : > { %v10199_v25 = vpop.permute.xlu1 %1223  ;;  %v10201_v3 = vpop.permute.xlu0 %1221 }
 0x158   : > { %1755 = vrot.lane.b32.xlu1 %v1664_v45, %s13693_s28  ;;  %1753 = vrot.lane.b32.xlu0 %v1663_v53, %s13693_s28  ;;  %v1870_v45 = vmul.f32 %v9260_v47, %v10178_v8 }
 0x15a   : > { %v1942_v7 = vpop.permute.xlu1 %1941  ;;  %v1940_v61 = vpop.permute.xlu0 %1939 }
 0x15b   : > { %v2030_v30 = vadd.f32 %v1942_v7, %v1824_v20  ;;  %v2029_v32 = vadd.f32 %v1940_v61, %v1823_v26  ;;  %v794_v26 = vadd.f32 %v10104_v11, %v588_v29  ;;  %v793_v7 = vadd.f32 %v10106_v4, %v587_v36  ;;  %v13744_v29 = vld [vmem:[#allocation11_spill] sm:$0xff]  ;;  %v13745_v36 = vld [vmem:[#allocation12_spill] sm:$0xff] }
 0x15c   : > { %1243 = vrot.lane.b32.xlu1 %v1150_v50, %s13693_s28  ;;  %1241 = vrot.lane.b32.xlu0 %v1149_v62, %s13693_s28  ;;  %v636_v62 = vmul.f32 %v9121_v0, %v10220_v33  ;;  %v635_v61 = vmul.f32 %v9121_v0, %v10225_v59  ;;  %v1070_v4 = vmul.f32 %v9448_v35, %v13744_v29 }
 0x15d   : > { %v2066_v53 = vadd.f32 %v9580_v57, %v2030_v30  ;;  %v2065_v41 = vadd.f32 %v9580_v57, %v2029_v32  ;;  %v1000_v16 = vadd.f32 %v10151_v21, %v794_v26  ;;  %v999_v11 = vadd.f32 %v10153_v5, %v793_v7 }
 0x15e   : > { %v10227_v52 = vpop.permute.xlu1 %711  ;;  %v10229_v20 = vpop.permute.xlu0 %709  ;;  %v13752_v26 = vrot.slane %v10108_v40, 2 }
 0x15f   : > { %v10231_v50 = vpack.c.bf16 %v2066_v53, %v2065_v41  ;;  %v13746_v41 = vshrl.u32 %v10108_v40, 16  ;;  %v842_v40 = vmul.f32 %v9150_v9, %v10220_v33 }
 0x160   : > { %1961 = vrot.lane.b32.xlu1 %v1870_v45, %s8964_s20  ;;  %1959 = vrot.lane.b32.xlu0 %v1869_v17, %s8964_s20  ;;  %v1069_v45 = vmul.f32 %v9448_v35, %v13745_v36 }
 0x161   : > { %7877 = vmatmul.mubr.msk.bf16.gmra.mxu1 %vm2269_vm0, %v10231_v50  ;;  %v2162_v30 = vshll.u32 %v10231_v50, 16  ;;  %v2160_v55 = vor.u32 %v13746_v41, %v10134_v43  ;;  %v13747_v29 = vshrl.u32 %v10231_v50, 16  ;;  %v1355_v43 = vmul.f32 %v9190_v23, %v10197_v14 }
 0x162   : > { %v1430_v17 = vpop.permute.xlu1 %1429  ;;  %v1428_v53 = vpop.permute.xlu0 %1427  ;;  %2680 = vmatprep.mubr.bf16.mxu1 %v13697_v60  ;;  %v13748_v34 = vrot.slane %v10231_v50, 1  ;;  %v13751_v5 = vrot.slane %v10231_v50, 2 }
 0x163   : > { %v10259_v32 = vrot.slane %v2162_v30, 1  ;;  %v3208_v36 = vrot.slane %v13747_v29, 1  ;;  %v3209_v41 = vrot.slane %v2162_v30, 2  ;;  %v1103_v29 = vadd.f32 %v1069_v45, %v999_v11 }
 0x164   : > { %731 = vrot.lane.b32.xlu1 %v636_v62, %s13693_s28  ;;  %729 = vrot.lane.b32.xlu0 %v635_v61, %s13693_s28  ;;  %v10272_v21 = vsel %vm2803_vm1, %v13749_v22, %v13748_v34  ;;  %v10279_v7 = vsel %vm3599_vm3, %v13752_v26, %v13751_v5  ;;  %v1104_v22 = vadd.f32 %v1070_v4, %v1000_v16  ;;  %v10308_v4 = vld [vmem:[%s9126_s30 + $0xc2] sm:$0xff] }
 0x165   : > { %13750 = vst [vmem:[#allocation11_spill] sm:$0xff] %v10272_v21  ;;  %13753 = vst [vmem:[#allocation12_spill] sm:$0xff] %v10279_v7  ;;  %v2165_v62 = vsel %vm2113_vm2, %v2160_v55, %v10259_v32  ;;  %v10288_v34 = vor.u32 %v3209_v41, %v3208_v36  ;;  %v841_v55 = vmul.f32 %v9150_v9, %v10225_v59  ;;  %v13765_v59 = vrot.slane %v10231_v50, 2 }
 0x166   : > { %v10283_v61 = vpop.permute.xlu1 %917  ;;  %v10285_v30 = vpop.permute.xlu0 %915  ;;  %7855 = vmatmul.mubr.msk.bf16.gmra.mxu0 %vm2269_vm0, %v2165_v62  ;;  %v1310_v16 = vadd.f32 %v10199_v25, %v1104_v22  ;;  %v1309_v11 = vadd.f32 %v10201_v3, %v1103_v29  ;;  %v1586_v26 = vmul.f32 %v9492_v46, %v9698_v10  ;;  %v1665_v3 = vmul.f32 %v9234_v38, %v10308_v4  ;;  %v10321_v62 = vld [vmem:[%s9126_s30 + $0xd9] sm:$0xff] }
 0x167   : > { %2413 = vmatprep.mubr.bf16.mxu0 %v13697_v60  ;;  %v10300_v36 = vsel %vm3184_vm4, %v10156_v6, %v10288_v34  ;;  %v1585_v6 = vmul.f32 %v9492_v46, %v9701_v18  ;;  %13755 = vst [vmem:[#allocation35_spill] sm:$0xff] %v10321_v62  ;;  %v1152_v29 = vmul.f32 %v9167_v15, %v10321_v62 }
 0x168   : > { %1449 = vrot.lane.b32.xlu1 %v1356_v56, %s8964_s20  ;;  %1447 = vrot.lane.b32.xlu0 %v1355_v43, %s8964_s20  ;;  %13754 = vst [vmem:[#allocation34_spill] sm:$0xff] %v10300_v36  ;;  %v10305_v56 = vld [vmem:[%s9126_s30 + $0xca] sm:$0xff]  ;;  %v1516_v41 = vadd.f32 %v1430_v17, %v1310_v16  ;;  %v1515_v5 = vadd.f32 %v1428_v53, %v1309_v11 }
 0x169   : > { %v1666_v25 = vmul.f32 %v9234_v38, %v10305_v56  ;;  %v10324_v17 = vld [vmem:[%s9126_s30 + $0xd1] sm:$0xff]  ;;  %v1358_v21 = vmul.f32 %v9190_v23, %v10321_v62 }
 0x16a   : > { %v1740_v45 = vpop.permute.xlu1 %1739  ;;  %v1738_v43 = vpop.permute.xlu0 %1737  ;;  %v1620_v22 = vadd.f32 %v1586_v26, %v1516_v41  ;;  %v1619_v18 = vadd.f32 %v1585_v6, %v1515_v5  ;;  %v590_v41 = vmul.f32 %v9430_v12, %v9607_v24  ;;  %v589_v6 = vmul.f32 %v9430_v12, %v9615_v44 }
 0x16b   : > { %v1357_v36 = vmul.f32 %v9190_v23, %v10324_v17 }
 0x16c   : > { %937 = vrot.lane.b32.xlu1 %v842_v40, %s8964_s20  ;;  %935 = vrot.lane.b32.xlu0 %v841_v55, %s8964_s20  ;;  %v1151_v40 = vmul.f32 %v9167_v15, %v10324_v17  ;;  %v1826_v55 = vadd.f32 %v1740_v45, %v1620_v22  ;;  %v1825_v16 = vadd.f32 %v1738_v43, %v1619_v18  ;;  %v10347_v43 = vld [vmem:[%s9126_s30 + $0xe8] sm:$0xff] }
 0x16d   : > { %v1871_v45 = vmul.f32 %v9260_v47, %v10308_v4  ;;  %13756 = vst [vmem:[#allocation36_spill] sm:$0xff] %v10347_v43 }
 0x16e   : > { %v10326_v53 = vpop.permute.xlu1 %1227  ;;  %v10328_v10 = vpop.permute.xlu0 %1225 }
 0x170   : > { %1759 = vrot.lane.b32.xlu1 %v1666_v25, %s13693_s28  ;;  %1757 = vrot.lane.b32.xlu0 %v1665_v3, %s13693_s28  ;;  %v1872_v25 = vmul.f32 %v9260_v47, %v10305_v56 }
 0x172   : > { %v1946_v11 = vpop.permute.xlu1 %1945  ;;  %v1944_v7 = vpop.permute.xlu0 %1943 }
 0x173   : > { %v2032_v5 = vadd.f32 %v1946_v11, %v1826_v55  ;;  %v2031_v26 = vadd.f32 %v1944_v7, %v1825_v16  ;;  %v10352_v7 = vld [vmem:[%s9126_s30 + $0xe0] sm:$0xff]  ;;  %v795_v55 = vadd.f32 %v10229_v20, %v589_v6  ;;  %v1072_v20 = vmul.f32 %v9448_v35, %v9710_v2 }
 0x174   : > { %1247 = vrot.lane.b32.xlu1 %v1152_v29, %s13693_s28  ;;  %1245 = vrot.lane.b32.xlu0 %v1151_v40, %s13693_s28  ;;  %13757 = vst [vmem:[#allocation37_spill] sm:$0xff] %v10352_v7  ;;  %v638_v29 = vmul.f32 %v9121_v0, %v10347_v43  ;;  %v796_v40 = vadd.f32 %v10227_v52, %v590_v41  ;;  %v13758_v41 = vld [vmem:[#allocation16_spill] sm:$0xff]  ;;  %v8629_v52 = vld [vmem:[%s13692_s2 + $0x54] ss:$8 sps:$4 sm:$0xff]  }
 0x175   : > { %v2068_v3 = vadd.f32 %v9580_v57, %v2032_v5  ;;  %v2067_v24 = vadd.f32 %v9580_v57, %v2031_v26  ;;  %v637_v16 = vmul.f32 %v9121_v0, %v10352_v7  ;;  %v1071_v6 = vmul.f32 %v9448_v35, %v13758_v41  ;;  %v8627_v5 = vld [vmem:[%s13692_s2 + $0x50] ss:$8 sps:$4 sm:$0xff]   ;;  %2920 = vmatprep.subr.bf16.mxu0 %v8629_v52 }
 0x176   : > { %v10354_v22 = vpop.permute.xlu1 %715  ;;  %v10356_v44 = vpop.permute.xlu0 %713  ;;  %v1002_v2 = vadd.f32 %v10283_v61, %v796_v40  ;;  %v1001_v26 = vadd.f32 %v10285_v30, %v795_v55  ;;  %v13762_v30 = vrot.slane %v10231_v50, 1  ;;  %2921 = vmatpush1.bf16.msra.mxu0 %v8627_v5 }
 0x177   : > { %v10358_v18 = vpack.c.bf16 %v2068_v3, %v2067_v24  ;;  %v13759_v3 = vshrl.u32 %v10231_v50, 16  ;;  %v843_v50 = vmul.f32 %v9150_v9, %v10352_v7 }
 0x178   : > { %1965 = vrot.lane.b32.xlu1 %v1872_v25, %s8964_s20  ;;  %1963 = vrot.lane.b32.xlu0 %v1871_v45, %s8964_s20 }
 0x179   : > { %7878 = vmatmul.mubr.msk.bf16.gmra.mxu1 %vm2269_vm0, %v10358_v18  ;;  %v2170_v11 = vshll.u32 %v10358_v18, 16  ;;  %v2168_v24 = vor.u32 %v13759_v3, %v10259_v32  ;;  %v13760_v32 = vshrl.u32 %v10358_v18, 16  ;;  %v13761_v61 = vrot.slane %v10358_v18, 1 }
 0x17a   : > { %v1434_v25 = vpop.permute.xlu1 %1433  ;;  %v1432_v45 = vpop.permute.xlu0 %1431  ;;  %2690 = vmatprep.mubr.bf16.mxu1 %v13697_v60  ;;  %v13764_v55 = vrot.slane %v10358_v18, 2 }
 0x17b   : > { %v10389_v41 = vrot.slane %v2170_v11, 1  ;;  %v3212_v3 = vrot.slane %v13760_v32, 1  ;;  %v3213_v62 = vrot.slane %v2170_v11, 2  ;;  %v10405_v40 = vsel %vm2803_vm1, %v13762_v30, %v13761_v61 }
 0x17c   : > { %735 = vrot.lane.b32.xlu1 %v638_v29, %s13693_s28  ;;  %733 = vrot.lane.b32.xlu0 %v637_v16, %s13693_s28  ;;  %13763 = vst [vmem:[#allocation16_spill] sm:$0xff] %v10405_v40  ;;  %v10412_v32 = vsel %vm3599_vm3, %v13765_v59, %v13764_v55  ;;  %v1106_v30 = vadd.f32 %v1072_v20, %v1002_v2 }
 0x17d   : > { %13766 = vst [vmem:[#allocation38_spill] sm:$0xff] %v10412_v32  ;;  %v2173_v29 = vsel %vm2113_vm2, %v2168_v24, %v10389_v41  ;;  %v10421_v61 = vor.u32 %v3213_v62, %v3212_v3  ;;  %v1105_v40 = vadd.f32 %v1071_v6, %v1001_v26  ;;  %v844_v59 = vmul.f32 %v9150_v9, %v10347_v43  ;;  %v13768_v3 = vld [vmem:[#allocation22_spill] sm:$0xff]  ;;  %v13770_v32 = vld [vmem:[#allocation17_spill] sm:$0xff] }
 0x17e   : > { %v10416_v16 = vpop.permute.xlu1 %921  ;;  %v10418_v11 = vpop.permute.xlu0 %919  ;;  %7856 = vmatmul.mubr.msk.bf16.gmra.mxu0 %vm2269_vm0, %v2173_v29  ;;  %v1312_v26 = vadd.f32 %v10326_v53, %v1106_v30  ;;  %v1588_v2 = vmul.f32 %v9492_v46, %v9805_v63  ;;  %v13776_v43 = vrot.slane %v10358_v18, 1 }
 0x17f   : > { %2423 = vmatprep.mubr.bf16.mxu0 %v13697_v60  ;;  %v10433_v62 = vsel %vm3184_vm4, %v10288_v34, %v10421_v61  ;;  %v1311_v5 = vadd.f32 %v10328_v10, %v1105_v40  ;;  %v1587_v34 = vmul.f32 %v9492_v46, %v13768_v3  ;;  %v10454_v40 = vld [vmem:[%s9126_s30 + $0xe9] sm:$0xff] }
 0x180   : > { %1453 = vrot.lane.b32.xlu1 %v1358_v21, %s8964_s20  ;;  %1451 = vrot.lane.b32.xlu0 %v1357_v36, %s8964_s20  ;;  %13767 = vst [vmem:[#allocation39_spill] sm:$0xff] %v10433_v62  ;;  %v10438_v21 = vld [vmem:[%s9126_s30 + $0xda] sm:$0xff]  ;;  %v10441_v36 = vld [vmem:[%s9126_s30 + $0xd2] sm:$0xff]  ;;  %v1518_v6 = vadd.f32 %v1434_v25, %v1312_v26  ;;  %13769 = vst [vmem:[#allocation22_spill] sm:$0xff] %v10454_v40  ;;  %v1154_v30 = vmul.f32 %v9167_v15, %v10454_v40 }
 0x181   : > { %v1517_v24 = vadd.f32 %v1432_v45, %v1311_v5  ;;  %v1668_v53 = vmul.f32 %v9234_v38, %v10438_v21  ;;  %v1667_v10 = vmul.f32 %v9234_v38, %v10441_v36  ;;  %v10457_v25 = vld [vmem:[%s9126_s30 + $0xe1] sm:$0xff]  ;;  %v1360_v7 = vmul.f32 %v9190_v23, %v10454_v40 }
 0x182   : > { %v1744_v52 = vpop.permute.xlu1 %1743  ;;  %v1742_v20 = vpop.permute.xlu0 %1741  ;;  %v1622_v55 = vadd.f32 %v1588_v2, %v1518_v6  ;;  %v592_v6 = vmul.f32 %v9430_v12, %v13770_v32 }
 0x183   : > { %v1621_v29 = vadd.f32 %v1587_v34, %v1517_v24  ;;  %v13771_v34 = vld [vmem:[#allocation18_spill] sm:$0xff] }
 0x184   : > { %941 = vrot.lane.b32.xlu1 %v844_v59, %s8964_s20  ;;  %939 = vrot.lane.b32.xlu0 %v843_v50, %s8964_s20  ;;  %v1153_v59 = vmul.f32 %v9167_v15, %v10457_v25  ;;  %v1828_v50 = vadd.f32 %v1744_v52, %v1622_v55  ;;  %v1873_v52 = vmul.f32 %v9260_v47, %v10441_v36 }
 0x185   : > { %v1827_v26 = vadd.f32 %v1742_v20, %v1621_v29  ;;  %v10480_v20 = vld [vmem:[%s9126_s30 + $0xf8] sm:$0xff]  ;;  %v10485_v29 = vld [vmem:[%s9126_s30 + $0xf0] sm:$0xff] }
 0x186   : > { %v10459_v45 = vpop.permute.xlu1 %1231  ;;  %v10461_v63 = vpop.permute.xlu0 %1229 }
 0x188   : > { %1763 = vrot.lane.b32.xlu1 %v1668_v53, %s13693_s28  ;;  %1761 = vrot.lane.b32.xlu0 %v1667_v10, %s13693_s28  ;;  %v591_v53 = vmul.f32 %v9430_v12, %v13771_v34  ;;  %v1874_v10 = vmul.f32 %v9260_v47, %v10438_v21 }
 0x18a   : > { %v1950_v5 = vpop.permute.xlu1 %1949  ;;  %v1948_v3 = vpop.permute.xlu0 %1947 }
 0x18b   : > { %v2034_v24 = vadd.f32 %v1950_v5, %v1828_v50  ;;  %v2033_v2 = vadd.f32 %v1948_v3, %v1827_v26  ;;  %v798_v5 = vadd.f32 %v10354_v22, %v592_v6  ;;  %v797_v3 = vadd.f32 %v10356_v44, %v591_v53  ;;  %v13772_v6 = vld [vmem:[#allocation23_spill] sm:$0xff] }
 0x18c   : > { %1251 = vrot.lane.b32.xlu1 %v1154_v30, %s13693_s28  ;;  %1249 = vrot.lane.b32.xlu0 %v1153_v59, %s13693_s28  ;;  %v640_v59 = vmul.f32 %v9121_v0, %v10480_v20  ;;  %v1074_v44 = vmul.f32 %v9448_v35, %v13772_v6  ;;  %v1073_v53 = vmul.f32 %v9448_v35, %v9824_v49 }
 0x18d   : > { %v2070_v55 = vadd.f32 %v9580_v57, %v2034_v24  ;;  %v2069_v32 = vadd.f32 %v9580_v57, %v2033_v2  ;;  %v639_v24 = vmul.f32 %v9121_v0, %v10485_v29  ;;  %v1003_v22 = vadd.f32 %v10418_v11, %v797_v3 }
 0x18e   : > { %v10487_v50 = vpop.permute.xlu1 %719  ;;  %v10489_v26 = vpop.permute.xlu0 %717 }
 0x18f   : > { %v10491_v30 = vpack.c.bf16 %v2070_v55, %v2069_v32  ;;  %v13773_v32 = vshrl.u32 %v10358_v18, 16  ;;  %v1004_v55 = vadd.f32 %v10416_v16, %v798_v5  ;;  %v13779_v5 = vrot.slane %v10358_v18, 2 }
 0x190   : > { %1969 = vrot.lane.b32.xlu1 %v1874_v10, %s8964_s20  ;;  %1967 = vrot.lane.b32.xlu0 %v1873_v52, %s8964_s20  ;;  %v846_v18 = vmul.f32 %v9150_v9, %v10480_v20 }
 0x191   : > { %7879 = vmatmul.mubr.msk.bf16.gmra.mxu1 %vm2269_vm0, %v10491_v30  ;;  %v2178_v2 = vshll.u32 %v10491_v30, 16  ;;  %v2176_v62 = vor.u32 %v13773_v32, %v10389_v41  ;;  %v13774_v6 = vshrl.u32 %v10491_v30, 16  ;;  %v1359_v41 = vmul.f32 %v9190_v23, %v10457_v25 }
 0x192   : > { %v1438_v10 = vpop.permute.xlu1 %1437  ;;  %v1436_v52 = vpop.permute.xlu0 %1435  ;;  %2700 = vmatprep.mubr.bf16.mxu1 %v13697_v60  ;;  %v13775_v40 = vrot.slane %v10491_v30, 1  ;;  %v13778_v11 = vrot.slane %v10491_v30, 2 }
 0x193   : > { %v10519_v34 = vrot.slane %v2178_v2, 1  ;;  %v3216_v49 = vrot.slane %v13774_v6, 1  ;;  %v3217_v32 = vrot.slane %v2178_v2, 2  ;;  %v1107_v6 = vadd.f32 %v1073_v53, %v1003_v22 }
 0x194   : > { %739 = vrot.lane.b32.xlu1 %v640_v59, %s13693_s28  ;;  %737 = vrot.lane.b32.xlu0 %v639_v24, %s13693_s28  ;;  %v10532_v16 = vsel %vm2803_vm1, %v13776_v43, %v13775_v40  ;;  %v10539_v3 = vsel %vm3599_vm3, %v13779_v5, %v13778_v11  ;;  %v1108_v40 = vadd.f32 %v1074_v44, %v1004_v55  ;;  %v10568_v44 = vld [vmem:[%s9126_s30 + $0xe2] sm:$0xff] }
 0x195   : > { %13777 = vst [vmem:[#allocation17_spill] sm:$0xff] %v10532_v16  ;;  %13780 = vst [vmem:[#allocation18_spill] sm:$0xff] %v10539_v3  ;;  %v2181_v59 = vsel %vm2113_vm2, %v2176_v62, %v10519_v34  ;;  %v10548_v43 = vor.u32 %v3217_v32, %v3216_v49  ;;  %v845_v62 = vmul.f32 %v9150_v9, %v10485_v29 }
 0x196   : > { %v10543_v24 = vpop.permute.xlu1 %925  ;;  %v10545_v2 = vpop.permute.xlu0 %923  ;;  %7857 = vmatmul.mubr.msk.bf16.gmra.mxu0 %vm2269_vm0, %v2181_v59  ;;  %v1314_v55 = vadd.f32 %v10459_v45, %v1108_v40  ;;  %v1313_v22 = vadd.f32 %v10461_v63, %v1107_v6  ;;  %v1590_v5 = vmul.f32 %v9492_v46, %v9932_v19  ;;  %v1669_v63 = vmul.f32 %v9234_v38, %v10568_v44  ;;  %v10581_v59 = vld [vmem:[%s9126_s30 + $0xf9] sm:$0xff] }
 0x197   : > { %2433 = vmatprep.mubr.bf16.mxu0 %v13697_v60  ;;  %v10560_v49 = vsel %vm3184_vm4, %v10421_v61, %v10548_v43  ;;  %v1589_v61 = vmul.f32 %v9492_v46, %v9935_v51  ;;  %v1156_v6 = vmul.f32 %v9167_v15, %v10581_v59 }
 0x198   : > { %1457 = vrot.lane.b32.xlu1 %v1360_v7, %s8964_s20  ;;  %1455 = vrot.lane.b32.xlu0 %v1359_v41, %s8964_s20  ;;  %13781 = vst [vmem:[#allocation23_spill] sm:$0xff] %v10560_v49  ;;  %v10565_v7 = vld [vmem:[%s9126_s30 + $0xea] sm:$0xff]  ;;  %v1520_v32 = vadd.f32 %v1438_v10, %v1314_v55  ;;  %v1519_v11 = vadd.f32 %v1436_v52, %v1313_v22 }
 0x199   : > { %v1670_v45 = vmul.f32 %v9234_v38, %v10565_v7  ;;  %v10584_v10 = vld [vmem:[%s9126_s30 + $0xf1] sm:$0xff] }
 0x19a   : > { %v1748_v53 = vpop.permute.xlu1 %1747  ;;  %v1746_v41 = vpop.permute.xlu0 %1745  ;;  %v1624_v40 = vadd.f32 %v1590_v5, %v1520_v32  ;;  %v1623_v51 = vadd.f32 %v1589_v61, %v1519_v11  ;;  %v594_v32 = vmul.f32 %v9430_v12, %v9849_v1  ;;  %v593_v61 = vmul.f32 %v9430_v12, %v9852_v39 }
 0x19c   : > { %945 = vrot.lane.b32.xlu1 %v846_v18, %s8964_s20  ;;  %943 = vrot.lane.b32.xlu0 %v845_v62, %s8964_s20  ;;  %v1155_v18 = vmul.f32 %v9167_v15, %v10584_v10  ;;  %v1830_v62 = vadd.f32 %v1748_v53, %v1624_v40  ;;  %v1829_v55 = vadd.f32 %v1746_v41, %v1623_v51  ;;  %v10607_v41 = vld [vmem:[%s9126_s30 + $0x108] sm:$0x3f] }
 0x19d   : > { %v1875_v53 = vmul.f32 %v9260_v47, %v10568_v44 }
 0x19e   : > { %v10586_v52 = vpop.permute.xlu1 %1235  ;;  %v10588_v19 = vpop.permute.xlu0 %1233 }
 0x1a0   : > { %1767 = vrot.lane.b32.xlu1 %v1670_v45, %s13693_s28  ;;  %1765 = vrot.lane.b32.xlu0 %v1669_v63, %s13693_s28  ;;  %v1876_v45 = vmul.f32 %v9260_v47, %v10565_v7 }
 0x1a2   : > { %v1954_v22 = vpop.permute.xlu1 %1953  ;;  %v1952_v3 = vpop.permute.xlu0 %1951 }
 0x1a3   : > { %v2036_v11 = vadd.f32 %v1954_v22, %v1830_v62  ;;  %v2035_v5 = vadd.f32 %v1952_v3, %v1829_v55  ;;  %v10612_v3 = vld [vmem:[%s9126_s30 + $0x100] sm:$0xff]  ;;  %v799_v62 = vadd.f32 %v10489_v26, %v593_v61  ;;  %v1076_v26 = vmul.f32 %v9448_v35, %v9948_v27 }
 0x1a4   : > { %1255 = vrot.lane.b32.xlu1 %v1156_v6, %s13693_s28  ;;  %1253 = vrot.lane.b32.xlu0 %v1155_v18, %s13693_s28  ;;  %v642_v6 = vmul.f32 %v9121_v0, %v10607_v41  ;;  %v800_v18 = vadd.f32 %v10487_v50, %v594_v32  ;;  %v641_v55 = vmul.f32 %v9121_v0, %v10612_v3  ;;  %v13782_v0 = vshrl.u32 %v10491_v30, 16 }
 0x1a5   : > { %v2072_v63 = vadd.f32 %v9580_v57, %v2036_v11  ;;  %v2071_v1 = vadd.f32 %v9580_v57, %v2035_v5  ;;  %v1075_v32 = vmul.f32 %v9448_v35, %v9951_v13  ;;  %v1005_v50 = vadd.f32 %v10545_v2, %v799_v62  ;;  %v2612_v5 = vpop.f32.mrf.mxu1 }
 0x1a6   : > { %v10614_v40 = vpop.permute.xlu1 %723  ;;  %v10616_v39 = vpop.permute.xlu0 %721  ;;  %v13787_v62 = vrot.slane %v10491_v30, 2 }
 0x1a7   : > { %v10618_v51 = vpack.c.bf16 %v2072_v63, %v2071_v1  ;;  %v1362_v63 = vmul.f32 %v9190_v23, %v10581_v59  ;;  %v1006_v1 = vadd.f32 %v10543_v24, %v800_v18  ;;  %v13784_v24 = vrot.slane %v10491_v30, 1 }
 0x1a8   : > { %1973 = vrot.lane.b32.xlu1 %v1876_v45, %s8964_s20  ;;  %1971 = vrot.lane.b32.xlu0 %v1875_v53, %s8964_s20  ;;  %v2184_v53 = vor.u32 %v13782_v0, %v10519_v34  ;;  %v1361_v34 = vmul.f32 %v9190_v23, %v10584_v10 }
 0x1a9   : > { %7880 = vmatmul.mubr.msk.bf16.gmra.mxu1 %vm2269_vm0, %v10618_v51  ;;  %v2186_v22 = vshll.u32 %v10618_v51, 16  ;;  %v13658_v11 = vshrl.u32 %v10618_v51, 16  ;;  %v13783_v16 = vrot.slane %v10618_v51, 1  ;;  %v13786_v18 = vrot.slane %v10618_v51, 2 }
 0x1aa   : > { %v1442_v61 = vpop.permute.xlu1 %1441  ;;  %v1440_v45 = vpop.permute.xlu0 %1439  ;;  %2710 = vmatprep.mubr.bf16.mxu1 %v13697_v60 }
 0x1ab   : > { %v10646_v27 = vrot.slane %v2186_v22, 1  ;;  %v3220_v13 = vrot.slane %v13658_v11, 1  ;;  %v3221_v0 = vrot.slane %v2186_v22, 2  ;;  %v10659_v2 = vsel %vm2803_vm1, %v13784_v24, %v13783_v16 }
 0x1ac   : > { %743 = vrot.lane.b32.xlu1 %v642_v6, %s13693_s28  ;;  %741 = vrot.lane.b32.xlu0 %v641_v55, %s13693_s28  ;;  %13785 = vst [vmem:[#allocation40_spill] sm:$0xff] %v10659_v2  ;;  %v10666_v11 = vsel %vm3599_vm3, %v13787_v62, %v13786_v18  ;;  %v1110_v16 = vadd.f32 %v1076_v26, %v1006_v1  ;;  %v2614_v2 = vpop.f32.mrf.mxu1 }
 0x1ad   : > { %13788 = vst [vmem:[#allocation41_spill] sm:$0xff] %v10666_v11  ;;  %v2189_v6 = vsel %vm2113_vm2, %v2184_v53, %v10646_v27  ;;  %v10675_v49 = vor.u32 %v3221_v0, %v3220_v13  ;;  %v1109_v24 = vadd.f32 %v1075_v32, %v1005_v50  ;;  %v848_v18 = vmul.f32 %v9150_v9, %v10607_v41  ;;  %v10694_v0 = vld [vmem:[%s9126_s30 + $0xfa] sm:$0xff] }
 0x1ae   : > { %v10670_v55 = vpop.permute.xlu1 %929  ;;  %v10672_v22 = vpop.permute.xlu0 %927  ;;  %7858 = vmatmul.mubr.msk.bf16.gmra.mxu0 %vm2269_vm0, %v2189_v6  ;;  %v847_v13 = vmul.f32 %v9150_v9, %v10612_v3  ;;  %v1316_v26 = vadd.f32 %v10586_v52, %v1110_v16  ;;  %v1591_v52 = vmul.f32 %v9492_v46, %v10062_v58 }
 0x1af   : > { %v2355_v30 = vpop.f32.mrf.mxu0  ;;  %2443 = vmatprep.mubr.bf16.mxu0 %v13697_v60  ;;  %v10689_v50 = vsel %vm3184_vm4, %v10548_v43, %v10675_v49  ;;  %v1315_v32 = vadd.f32 %v10588_v19, %v1109_v24  ;;  %v2616_v62 = vpop.f32.mrf.mxu1  ;;  %v1592_v43 = vmul.f32 %v9492_v46, %v10059_v31  ;;  %v10717_v24 = vld [vmem:[%s9126_s30 + $0x101] sm:$0xff] }
 0x1b0   : > { %v10680_v53 = vadd.f32 %v2612_v5, %v2355_v30  ;;  %1461 = vrot.lane.b32.xlu1 %v1362_v63, %s8964_s20  ;;  %1459 = vrot.lane.b32.xlu0 %v1361_v34, %s8964_s20  ;;  %v10697_v5 = vld [vmem:[%s9126_s30 + $0xf2] sm:$0xff]  ;;  %v1522_v6 = vadd.f32 %v1442_v61, %v1316_v26 }
 0x1b1   : > { %v2357_v1 = vpop.f32.mrf.mxu0  ;;  %v1521_v30 = vadd.f32 %v1440_v45, %v1315_v32  ;;  %v1671_v61 = vmul.f32 %v9234_v38, %v10697_v5  ;;  %v10714_v45 = vld [vmem:[%s9126_s30 + $0x109] sm:$0x3f] }
 0x1b2   : > { %13789 = vst [vmem:[#allocation42_spill] sm:$0xff] %v10680_v53  ;;  %v10699_v63 = vadd.f32 %v2614_v2, %v2357_v1  ;;  %v1752_v34 = vpop.permute.xlu1 %1751  ;;  %v1750_v9 = vpop.permute.xlu0 %1749  ;;  %v1672_v2 = vmul.f32 %v9234_v38, %v10694_v0  ;;  %v1626_v26 = vadd.f32 %v1592_v43, %v1522_v6  ;;  %v595_v43 = vmul.f32 %v9430_v12, %v9979_v54 }
 0x1b3   : > { %v2359_v19 = vpop.f32.mrf.mxu0  ;;  %v1625_v32 = vadd.f32 %v1591_v52, %v1521_v30  ;;  %v10745_v54 = vpop.f32.mrf.mxu1 }
 0x1b4   : > { %13790 = vst [vmem:[#allocation43_spill] sm:$0xff] %v10699_v63  ;;  %v10705_v16 = vadd.f32 %v2616_v62, %v2359_v19  ;;  %949 = vrot.lane.b32.xlu1 %v848_v18, %s8964_s20  ;;  %947 = vrot.lane.b32.xlu0 %v847_v13, %s8964_s20  ;;  %v1158_v18 = vmul.f32 %v9167_v15, %v10714_v45  ;;  %13792 = vst [vmem:[#allocation45_spill] sm:$0xff] %v10745_v54 }
 0x1b5   : > { %v1157_v13 = vmul.f32 %v9167_v15, %v10717_v24  ;;  %v1832_v1 = vadd.f32 %v1752_v34, %v1626_v26  ;;  %v1831_v62 = vadd.f32 %v1750_v9, %v1625_v32  ;;  %v1878_v15 = vmul.f32 %v9260_v47, %v10694_v0  ;;  %v10752_v26 = vld [vmem:[%s9126_s30 + $0x10a] sm:$0x3f] }
 0x1b6   : > { %13791 = vst [vmem:[#allocation44_spill] sm:$0xff] %v10705_v16  ;;  %v10719_v31 = vpop.permute.xlu1 %1239  ;;  %v10721_v58 = vpop.permute.xlu0 %1237  ;;  %v596_v16 = vmul.f32 %v9430_v12, %v9976_v28  ;;  %v1877_v34 = vmul.f32 %v9260_v47, %v10697_v5 }
 0x1b8   : > { %1771 = vrot.lane.b32.xlu1 %v1672_v2, %s13693_s28  ;;  %1769 = vrot.lane.b32.xlu0 %v1671_v61, %s13693_s28  ;;  %v1364_v61 = vmul.f32 %v9190_v23, %v10714_v45  ;;  %v802_v32 = vadd.f32 %v10614_v40, %v596_v16  ;;  %v1078_v16 = vmul.f32 %v9448_v35, %v10075_v42 }
 0x1ba   : > { %v1958_v19 = vpop.permute.xlu1 %1957  ;;  %v1956_v11 = vpop.permute.xlu0 %1955 }
 0x1bb   : > { %v2038_v6 = vadd.f32 %v1958_v19, %v1832_v1  ;;  %v2037_v30 = vadd.f32 %v1956_v11, %v1831_v62  ;;  %v10764_v62 = vld [vmem:[%s9126_s30 + $0x102] sm:$0xff] }
 0x1bc   : > { %1259 = vrot.lane.b32.xlu1 %v1158_v18, %s13693_s28  ;;  %1257 = vrot.lane.b32.xlu0 %v1157_v13, %s13693_s28  ;;  %v801_v18 = vadd.f32 %v10616_v39, %v595_v43  ;;  %v1363_v13 = vmul.f32 %v9190_v23, %v10717_v24  ;;  %v13793_v43 = vshrl.u32 %v10618_v51, 16 }
 0x1bd   : > { %v2074_v9 = vadd.f32 %v9580_v57, %v2038_v6  ;;  %v2073_v28 = vadd.f32 %v9580_v57, %v2037_v30  ;;  %v1077_v6 = vmul.f32 %v9448_v35, %v10078_v48  ;;  %v8630_v48 = vld [vmem:[%s13692_s2 + $0x40] ss:$8 sps:$4 sm:$0xff]  }
 0x1be   : > { %v10741_v52 = vpop.permute.xlu1 %727  ;;  %v10743_v11 = vpop.permute.xlu0 %725  ;;  %v1007_v39 = vadd.f32 %v10672_v22, %v801_v18  ;;  %v8635_v22 = vld [vmem:[%s13692_s2 + $0x74] ss:$8 sps:$4 sm:$0xff]   ;;  %v13794_v18 = vrot.slane %v10618_v51, 1 }
 0x1bf   : > { %v10747_v2 = vpack.c.bf16 %v2074_v9, %v2073_v28  ;;  %v2622_v9 = vpop.f32.mrf.mxu1  ;;  %v1008_v28 = vadd.f32 %v10670_v55, %v802_v32  ;;  %v1673_v55 = vmul.f32 %v9234_v38, %v10764_v62  ;;  %3335 = vmatprep.subr.bf16.mxu1 %v8635_v22 }
 0x1c0   : > { %1977 = vrot.lane.b32.xlu1 %v1878_v15, %s8964_s20  ;;  %1975 = vrot.lane.b32.xlu0 %v1877_v34, %s8964_s20  ;;  %v2192_v15 = vor.u32 %v13793_v43, %v10646_v27  ;;  %v1674_v34 = vmul.f32 %v9234_v38, %v10752_v26  ;;  %v8632_v27 = vld [vmem:[%s13692_s2 + $0x44] ss:$8 sps:$4 sm:$0xff]   ;;  %v10812_v38 = vpop.f32.mrf.mxu0 }
 0x1c1   : > { %7881 = vmatmul.mubr.msk.bf16.gmra.mxu1 %vm2269_vm0, %v10747_v2  ;;  %v2194_v1 = vshll.u32 %v10747_v2, 16  ;;  %v13659_v19 = vshrl.u32 %v10747_v2, 16  ;;  %v13660_v40 = vrot.slane %v10747_v2, 1  ;;  %13798 = vst [vmem:[#allocation47_spill] sm:$0xff] %v10812_v38  ;;  %2922 = vmatprep.subr.bf16.mxu0 %v8632_v27  ;;  %v1111_v27 = vadd.f32 %v1077_v6, %v1007_v39 }
 0x1c2   : > { %v1446_v23 = vpop.permute.xlu1 %1445  ;;  %v1444_v30 = vpop.permute.xlu0 %1443  ;;  %2720 = vmatprep.mubr.bf16.mxu1 %v13697_v60  ;;  %v1880_v38 = vmul.f32 %v9260_v47, %v10752_v26  ;;  %2923 = vmatpush1.bf16.msra.mxu0 %v8630_v48 }
 0x1c3   : > { %v10781_v42 = vrot.slane %v2194_v1, 1  ;;  %v3224_v43 = vrot.slane %v13659_v19, 1  ;;  %v3225_v32 = vrot.slane %v2194_v1, 2  ;;  %v10803_v54 = vsel %vm2803_vm1, %v13794_v18, %v13660_v40  ;;  %v8633_v1 = vld [vmem:[%s13692_s2 + $0x70] ss:$8 sps:$4 sm:$0xff]  }
 0x1c4   : > { %1465 = vrot.lane.b32.xlu1 %v1364_v61, %s8964_s20  ;;  %1463 = vrot.lane.b32.xlu0 %v1363_v13, %s8964_s20  ;;  %v13795_v19 = vrot.slane %v10747_v2, 2  ;;  %v13796_v61 = vrot.slane %v10618_v51, 2  ;;  %v8638_v51 = vld [vmem:[%s13692_s2 + $0x64] ss:$8 sps:$4 sm:$0xff]   ;;  %v1317_v6 = vadd.f32 %v10721_v58, %v1111_v27 }
 0x1c5   : > { %v2197_v63 = vsel %vm2113_vm2, %v2192_v15, %v10781_v42  ;;  %v1112_v15 = vadd.f32 %v1078_v16, %v1008_v28  ;;  %3336 = vmatpush1.bf16.msra.mxu1 %v8633_v1 }
 0x1c6   : > { %v10810_v13 = vsel %vm3599_vm3, %v13796_v61, %v13795_v19  ;;  %v10819_v53 = vpop.permute.xlu1 %933  ;;  %v10821_v18 = vpop.permute.xlu0 %931  ;;  %7859 = vmatmul.mubr.msk.bf16.gmra.mxu0 %vm2269_vm0, %v2197_v63  ;;  %v10827_v19 = vor.u32 %v3225_v32, %v3224_v43  ;;  %v1879_v63 = vmul.f32 %v9260_v47, %v10764_v62  ;;  %3337 = vmatprep.subr.bf16.mxu1 %v8638_v51 }
 0x1c7   : > { %13797 = vst [vmem:[#allocation46_spill] sm:$0xff] %v10810_v13  ;;  %v2624_v61 = vpop.f32.mrf.mxu1  ;;  %v2365_v40 = vpop.f32.mrf.mxu0  ;;  %2453 = vmatprep.mubr.bf16.mxu0 %v13697_v60  ;;  %v1318_v16 = vadd.f32 %v10719_v31, %v1112_v15  ;;  %v1593_v31 = vmul.f32 %v9492_v46, %v10181_v37 }
 0x1c8   : > { %v10832_v13 = vadd.f32 %v2622_v9, %v2365_v40  ;;  %1775 = vrot.lane.b32.xlu1 %v1674_v34, %s13693_s28  ;;  %1773 = vrot.lane.b32.xlu0 %v1673_v55, %s13693_s28  ;;  %v10841_v39 = vsel %vm3184_vm4, %v10675_v49, %v10827_v19  ;;  %v8636_v40 = vld [vmem:[%s13692_s2 + $0x60] ss:$8 sps:$4 sm:$0xff]   ;;  %v1523_v55 = vadd.f32 %v1444_v30, %v1317_v6  ;;  %s7741_s28 = scalar_lea.sflag [#allocation3], %s527_s26 }
 0x1c9   : > { %v2367_v28 = vpop.f32.mrf.mxu0  ;;  %v2626_v47 = vpop.f32.mrf.mxu1  ;;  %v1524_v43 = vadd.f32 %v1446_v23, %v1318_v16  ;;  %v1594_v49 = vmul.f32 %v9492_v46, %v10178_v8  ;;  %3338 = vmatpush1.bf16.msra.mxu1 %v8636_v40  ;;  %v8879_v16 = vld [vmem:[%s9126_s30 + $0xc8] sm:$0xff] }
 0x1ca   : > { %v10848_v34 = vadd.f32 %v2624_v61, %v2367_v28  ;;  %v1756_v9 = vpop.permute.xlu1 %1755  ;;  %v1754_v48 = vpop.permute.xlu0 %1753  ;;  %v1627_v30 = vadd.f32 %v1593_v31, %v1523_v55  ;;  %v598_v6 = vmul.f32 %v8879_v16, %v9430_v12  ;;  %v8880_v28 = vld [vmem:[%s9126_s30 + $0xc0] sm:$0xff] }
 0x1cb   : > { %v2369_v58 = vpop.f32.mrf.mxu0  ;;  %v1628_v23 = vadd.f32 %v1594_v49, %v1524_v43  ;;  %v10872_v49 = vpop.f32.mrf.mxu1 }
 0x1cc   : > { %v10854_v22 = vadd.f32 %v2626_v47, %v2369_v58  ;;  %1981 = vrot.lane.b32.xlu1 %v1880_v38, %s8964_s20  ;;  %1979 = vrot.lane.b32.xlu0 %v1879_v63, %s8964_s20  ;;  %v1833_v61 = vadd.f32 %v1754_v48, %v1627_v30  ;;  %v597_v47 = vmul.f32 %v8880_v28, %v9430_v12  ;;  %s7752_s20 = scalar_lea.hbm %s13634_s16, %s8405_s29 }
 0x1cd   : > { %v1834_v51 = vadd.f32 %v1756_v9, %v1628_v23  ;;  %v804_v48 = vadd.f32 %v10741_v52, %v598_v6  ;;  %13799 = vst [vmem:[#allocation48_spill] sm:$0xff] %v10872_v49  ;;  %v1079_v52 = vmul.f32 %v9448_v35, %v10197_v14  ;;  %v13802_v14 = vrot.slane %v10747_v2, 1 }
 0x1ce   : > { %v1244_v32 = vpop.permute.xlu1 %1243  ;;  %v1242_v1 = vpop.permute.xlu0 %1241  ;;  %v803_v55 = vadd.f32 %v10743_v11, %v597_v47 }
 0x1cf   : > { %v1010_v16 = vadd.f32 %v10819_v53, %v804_v48 }
 0x1d0   : > { %v1009_v6 = vadd.f32 %v10821_v18, %v803_v55  ;;  %v10906_v18 = vpop.f32.mrf.mxu0 }
 0x1d1   : > { %13805 = vst [vmem:[#allocation49_spill] sm:$0xff] %v10906_v18 }
 0x1d2   : > { %v1962_v8 = vpop.permute.xlu1 %1961  ;;  %v1960_v15 = vpop.permute.xlu0 %1959 }
 0x1d3   : > { %v2040_v27 = vadd.f32 %v1962_v8, %v1834_v51  ;;  %v2039_v37 = vadd.f32 %v1960_v15, %v1833_v61  ;;  %v13800_v51 = vld [vmem:[#allocation33_spill] sm:$0xff]  ;;  %v13801_v15 = vshrl.u32 %v10747_v2, 16 }
 0x1d4   : > { %v1080_v61 = vmul.f32 %v9448_v35, %v13800_v51 }
 0x1d5   : > { %v2076_v38 = vadd.f32 %v9580_v57, %v2040_v27  ;;  %v2075_v63 = vadd.f32 %v9580_v57, %v2039_v37  ;;  %v2200_v27 = vor.u32 %v13801_v15, %v10781_v42  ;;  %v2632_v37 = vpop.f32.mrf.mxu1  ;;  %v13803_v42 = vrot.slane %v10747_v2, 2 }
 0x1d6   : > { %v10864_v40 = vpop.permute.xlu1 %731  ;;  %v10866_v43 = vpop.permute.xlu0 %729 }
 0x1d7   : > { %v10868_v9 = vpack.c.bf16 %v2076_v38, %v2075_v63  ;;  %v2634_v15 = vpop.f32.mrf.mxu1 }
 0x1d9   : > { %7882 = vmatmul.mubr.msk.bf16.gmra.mxu1 %vm2269_vm0, %v10868_v9  ;;  %v2202_v31 = vshll.u32 %v10868_v9, 16  ;;  %v13662_v58 = vshrl.u32 %v10868_v9, 16  ;;  %v13661_v23 = vrot.slane %v10868_v9, 1  ;;  %v13663_v30 = vrot.slane %v10868_v9, 2 }
 0x1da   : > { %v1450_v11 = vpop.permute.xlu1 %1449  ;;  %v1448_v8 = vpop.permute.xlu0 %1447  ;;  %2730 = vmatprep.mubr.bf16.mxu1 %v13697_v60 }
 0x1db   : > { %v2204_v28 = vrot.slane %v2202_v31, 1  ;;  %v3228_v47 = vrot.slane %v13662_v58, 1  ;;  %v3229_v38 = vrot.slane %v2202_v31, 2  ;;  %v10897_v63 = vsel %vm2803_vm1, %v13802_v14, %v13661_v23 }
 0x1dc   : > { %v10904_v53 = vsel %vm3599_vm3, %v13803_v42, %v13663_v30  ;;  %v1114_v14 = vadd.f32 %v1080_v61, %v1010_v16  ;;  %v1113_v23 = vadd.f32 %v1079_v52, %v1009_v6  ;;  %v1596_v16 = vmul.f32 %v9492_v46, %v10305_v56  ;;  %v13807_v56 = vld [vmem:[#allocation10_spill] sm:$0xff] }
 0x1dd   : > { %13804 = vst [vmem:[#allocation33_spill] sm:$0xff] %v10904_v53  ;;  %v2205_v48 = vsel %vm2113_vm2, %v2200_v27, %v2204_v28  ;;  %v10910_v51 = vor.u32 %v3229_v38, %v3228_v47 }
 0x1de   : > { %v938_v55 = vpop.permute.xlu1 %937  ;;  %v936_v31 = vpop.permute.xlu0 %935  ;;  %7860 = vmatmul.mubr.msk.bf16.gmra.mxu0 %vm2269_vm0, %v2205_v48  ;;  %v1320_v27 = vadd.f32 %v1244_v32, %v1114_v14  ;;  %v1319_v30 = vadd.f32 %v1242_v1, %v1113_v23 }
 0x1df   : > { %v2375_v58 = vpop.f32.mrf.mxu0  ;;  %2463 = vmatprep.mubr.bf16.mxu0 %v13697_v60  ;;  %v10918_v42 = vsel %vm3184_vm4, %v10827_v19, %v10910_v51  ;;  %v2636_v48 = vpop.f32.mrf.mxu1 }
 0x1e0   : > { %v10913_v2 = vadd.f32 %v2632_v37, %v2375_v58  ;;  %v1526_v61 = vadd.f32 %v1450_v11, %v1320_v27  ;;  %v1525_v52 = vadd.f32 %v1448_v8, %v1319_v30  ;;  %v1595_v58 = vmul.f32 %v9492_v46, %v10308_v4 }
 0x1e1   : > { %v2377_v49 = vpop.f32.mrf.mxu0  ;;  %v600_v30 = vmul.f32 %v9430_v12, %v10220_v33  ;;  %v599_v8 = vmul.f32 %v9430_v12, %v13807_v56 }
 0x1e2   : > { %v10920_v18 = vadd.f32 %v2634_v15, %v2377_v49  ;;  %v1760_v47 = vpop.permute.xlu1 %1759  ;;  %v1758_v38 = vpop.permute.xlu0 %1757  ;;  %v1630_v1 = vadd.f32 %v1596_v16, %v1526_v61  ;;  %v1629_v23 = vadd.f32 %v1595_v58, %v1525_v52 }
 0x1e3   : > { %v2379_v37 = vpop.f32.mrf.mxu0  ;;  %v10942_v52 = vpop.f32.mrf.mxu1 }
 0x1e4   : > { %13806 = vst [vmem:[#allocation50_spill] sm:$0xff] %v10920_v18  ;;  %v10926_v6 = vadd.f32 %v2636_v48, %v2379_v37  ;;  %v1836_v49 = vadd.f32 %v1760_v47, %v1630_v1  ;;  %v1835_v15 = vadd.f32 %v1758_v38, %v1629_v23  ;;  %v806_v38 = vadd.f32 %v10864_v40, %v600_v30  ;;  %v13809_v37 = vld [vmem:[#allocation35_spill] sm:$0xff] }
 0x1e5   : > { %13808 = vst [vmem:[#allocation10_spill] sm:$0xff] %v10942_v52  ;;  %v1082_v1 = vmul.f32 %v9448_v35, %v13809_v37  ;;  %v1081_v40 = vmul.f32 %v9448_v35, %v10324_v17 }
 0x1e6   : > { %v1248_v19 = vpop.permute.xlu1 %1247  ;;  %v1246_v32 = vpop.permute.xlu0 %1245 }
 0x1ea   : > { %v1966_v14 = vpop.permute.xlu1 %1965  ;;  %v1964_v53 = vpop.permute.xlu0 %1963 }
 0x1eb   : > { %v2042_v18 = vadd.f32 %v1966_v14, %v1836_v49  ;;  %v2041_v11 = vadd.f32 %v1964_v53, %v1835_v15  ;;  %v805_v53 = vadd.f32 %v10866_v43, %v599_v8  ;;  %v13810_v49 = vshrl.u32 %v10868_v9, 16  ;;  %v2642_v14 = vpop.f32.mrf.mxu1 }
 0x1ed   : > { %v2078_v4 = vadd.f32 %v9580_v57, %v2042_v18  ;;  %v2077_v27 = vadd.f32 %v9580_v57, %v2041_v11  ;;  %v2208_v15 = vor.u32 %v13810_v49, %v2204_v28  ;;  %v1012_v11 = vadd.f32 %v938_v55, %v806_v38  ;;  %v10973_v55 = vpop.f32.mrf.mxu0  ;;  %v2644_v49 = vpop.f32.mrf.mxu1 }
 0x1ee   : > { %v10934_v48 = vpop.permute.xlu1 %735  ;;  %v10936_v61 = vpop.permute.xlu0 %733  ;;  %v1011_v30 = vadd.f32 %v936_v31, %v805_v53  ;;  %v13812_v28 = vrot.slane %v10868_v9, 2  ;;  %13814 = vst [vmem:[#allocation51_spill] sm:$0xff] %v10973_v55 }
 0x1ef   : > { %v10938_v47 = vpack.c.bf16 %v2078_v4, %v2077_v27  ;;  %v13811_v27 = vrot.slane %v10868_v9, 1 }
 0x1f1   : > { %7883 = vmatmul.mubr.msk.bf16.gmra.mxu1 %vm2269_vm0, %v10938_v47  ;;  %v2210_v33 = vshll.u32 %v10938_v47, 16  ;;  %v13665_v18 = vshrl.u32 %v10938_v47, 16  ;;  %v13664_v16 = vrot.slane %v10938_v47, 1  ;;  %v13666_v58 = vrot.slane %v10938_v47, 2 }
 0x1f2   : > { %v1454_v43 = vpop.permute.xlu1 %1453  ;;  %v1452_v23 = vpop.permute.xlu0 %1451  ;;  %2740 = vmatprep.mubr.bf16.mxu1 %v13697_v60 }
 0x1f3   : > { %v2212_v56 = vrot.slane %v2210_v33, 1  ;;  %v3233_v8 = vrot.slane %v2210_v33, 2  ;;  %v3232_v4 = vrot.slane %v13665_v18, 1  ;;  %v10964_v17 = vsel %vm2803_vm1, %v13811_v27, %v13664_v16 }
 0x1f4   : > { %v10971_v37 = vsel %vm3599_vm3, %v13812_v28, %v13666_v58  ;;  %v1116_v27 = vadd.f32 %v1082_v1, %v1012_v11  ;;  %v1115_v16 = vadd.f32 %v1081_v40, %v1011_v30  ;;  %v1598_v11 = vmul.f32 %v9492_v46, %v10438_v21 }
 0x1f5   : > { %13813 = vst [vmem:[#allocation35_spill] sm:$0xff] %v10971_v37  ;;  %v2213_v31 = vsel %vm2113_vm2, %v2208_v15, %v2212_v56  ;;  %v10977_v33 = vor.u32 %v3233_v8, %v3232_v4 }
 0x1f6   : > { %v942_v38 = vpop.permute.xlu1 %941  ;;  %v940_v53 = vpop.permute.xlu0 %939  ;;  %7861 = vmatmul.mubr.msk.bf16.gmra.mxu0 %vm2269_vm0, %v2213_v31  ;;  %v1322_v15 = vadd.f32 %v1248_v19, %v1116_v27  ;;  %v1321_v58 = vadd.f32 %v1246_v32, %v1115_v16 }
 0x1f7   : > { %v2385_v18 = vpop.f32.mrf.mxu0  ;;  %2473 = vmatprep.mubr.bf16.mxu0 %v13697_v60  ;;  %v10985_v28 = vsel %vm3184_vm4, %v10910_v51, %v10977_v33  ;;  %v2646_v31 = vpop.f32.mrf.mxu1 }
 0x1f8   : > { %v10980_v9 = vadd.f32 %v2642_v14, %v2385_v18  ;;  %v1528_v1 = vadd.f32 %v1454_v43, %v1322_v15  ;;  %v1527_v40 = vadd.f32 %v1452_v23, %v1321_v58  ;;  %v1597_v18 = vmul.f32 %v9492_v46, %v10441_v36  ;;  %v8641_v58 = vld [vmem:[%s13692_s2 + $0x94] ss:$8 sps:$4 sm:$0xff]   ;;  %v13816_v23 = vld [vmem:[#allocation36_spill] sm:$0xff]  ;;  %v13817_v15 = vld [vmem:[#allocation37_spill] sm:$0xff] }
 0x1f9   : > { %v2387_v52 = vpop.f32.mrf.mxu0  ;;  %v602_v36 = vmul.f32 %v9430_v12, %v13816_v23  ;;  %3716 = vmatprep.subr.bf16.mxu0 %v8641_v58 }
 0x1fa   : > { %v10987_v55 = vadd.f32 %v2644_v49, %v2387_v52  ;;  %v1764_v8 = vpop.permute.xlu1 %1763  ;;  %v1762_v4 = vpop.permute.xlu0 %1761  ;;  %v1632_v32 = vadd.f32 %v1598_v11, %v1528_v1  ;;  %v1631_v16 = vadd.f32 %v1597_v18, %v1527_v40 }
 0x1fb   : > { %v2389_v14 = vpop.f32.mrf.mxu0  ;;  %v808_v18 = vadd.f32 %v10934_v48, %v602_v36  ;;  %v1083_v48 = vmul.f32 %v9448_v35, %v10457_v25 }
 0x1fc   : > { %v10993_v30 = vadd.f32 %v2646_v31, %v2389_v14  ;;  %v1838_v52 = vadd.f32 %v1764_v8, %v1632_v32  ;;  %v1837_v49 = vadd.f32 %v1762_v4, %v1631_v16  ;;  %v601_v31 = vmul.f32 %v9430_v12, %v13817_v15  ;;  %v11012_v14 = vpop.f32.mrf.mxu1 }
 0x1fd   : > { %13818 = vst [vmem:[#allocation36_spill] sm:$0xff] %v11012_v14  ;;  %v1014_v15 = vadd.f32 %v942_v38, %v808_v18  ;;  %v11043_v38 = vpop.f32.mrf.mxu0 }
 0x1fe   : > { %13815 = vst [vmem:[#allocation52_spill] sm:$0xff] %v10993_v30  ;;  %v1252_v51 = vpop.permute.xlu1 %1251  ;;  %v1250_v19 = vpop.permute.xlu0 %1249 }
 0x1ff   : > { %v2652_v36 = vpop.f32.mrf.mxu1 }
 0x202   : > { %v1970_v27 = vpop.permute.xlu1 %1969  ;;  %v1968_v37 = vpop.permute.xlu0 %1967 }
 0x203   : > { %v2044_v43 = vadd.f32 %v1970_v27, %v1838_v52  ;;  %v2043_v21 = vadd.f32 %v1968_v37, %v1837_v49  ;;  %v807_v37 = vadd.f32 %v10936_v61, %v601_v31  ;;  %v13819_v27 = vld [vmem:[#allocation22_spill] sm:$0xff] }
 0x204   : > { %v1084_v58 = vmul.f32 %v9448_v35, %v13819_v27  ;;  %v13821_v27 = vrot.slane %v10938_v47, 1  ;;  %13825 = vst [vmem:[#allocation22_spill] sm:$0xff] %v11043_v38 }
 0x205   : > { %v2080_v1 = vadd.f32 %v9580_v57, %v2044_v43  ;;  %v2079_v8 = vadd.f32 %v9580_v57, %v2043_v21  ;;  %v13820_v21 = vshrl.u32 %v10938_v47, 16  ;;  %v1013_v31 = vadd.f32 %v940_v53, %v807_v37 }
 0x206   : > { %v11004_v4 = vpop.permute.xlu1 %739  ;;  %v11006_v40 = vpop.permute.xlu0 %737 }
 0x207   : > { %v11008_v11 = vpack.c.bf16 %v2080_v1, %v2079_v8  ;;  %v2216_v23 = vor.u32 %v13820_v21, %v2212_v56  ;;  %v13823_v56 = vrot.slane %v10938_v47, 2 }
 0x209   : > { %7884 = vmatmul.mubr.msk.bf16.gmra.mxu1 %vm2269_vm0, %v11008_v11  ;;  %v2218_v32 = vshll.u32 %v11008_v11, 16  ;;  %v13667_v16 = vshrl.u32 %v11008_v11, 16  ;;  %v13668_v52 = vrot.slane %v11008_v11, 1  ;;  %v13822_v14 = vrot.slane %v11008_v11, 2 }
 0x20a   : > { %v1458_v61 = vpop.permute.xlu1 %1457  ;;  %v1456_v43 = vpop.permute.xlu0 %1455  ;;  %2750 = vmatprep.mubr.bf16.mxu1 %v13697_v60 }
 0x20b   : > { %v2220_v1 = vrot.slane %v2218_v32, 1  ;;  %v3237_v8 = vrot.slane %v2218_v32, 2  ;;  %v3236_v49 = vrot.slane %v13667_v16, 1  ;;  %v11034_v25 = vsel %vm2803_vm1, %v13821_v27, %v13668_v52  ;;  %v2654_v16 = vpop.f32.mrf.mxu1 }
 0x20c   : > { %v11041_v21 = vsel %vm3599_vm3, %v13823_v56, %v13822_v14  ;;  %v1118_v27 = vadd.f32 %v1084_v58, %v1014_v15  ;;  %v1117_v52 = vadd.f32 %v1083_v48, %v1013_v31  ;;  %v1600_v15 = vmul.f32 %v9492_v46, %v10565_v7 }
 0x20d   : > { %13824 = vst [vmem:[#allocation37_spill] sm:$0xff] %v11041_v21  ;;  %v2221_v53 = vsel %vm2113_vm2, %v2216_v23, %v2220_v1  ;;  %v11047_v32 = vor.u32 %v3237_v8, %v3236_v49  ;;  %v603_v7 = vmul.f32 %v9430_v12, %v10485_v29 }
 0x20e   : > { %v946_v18 = vpop.permute.xlu1 %945  ;;  %v944_v37 = vpop.permute.xlu0 %943  ;;  %7862 = vmatmul.mubr.msk.bf16.gmra.mxu0 %vm2269_vm0, %v2221_v53  ;;  %v1324_v23 = vadd.f32 %v1252_v51, %v1118_v27  ;;  %v1323_v56 = vadd.f32 %v1250_v19, %v1117_v52 }
 0x20f   : > { %v2395_v30 = vpop.f32.mrf.mxu0  ;;  %2483 = vmatprep.mubr.bf16.mxu0 %v13697_v60  ;;  %v11055_v14 = vsel %vm3184_vm4, %v10977_v33, %v11047_v32  ;;  %v2656_v53 = vpop.f32.mrf.mxu1 }
 0x210   : > { %v11050_v47 = vadd.f32 %v2652_v36, %v2395_v30  ;;  %v1530_v58 = vadd.f32 %v1458_v61, %v1324_v23  ;;  %v1529_v48 = vadd.f32 %v1456_v43, %v1323_v56  ;;  %v1599_v30 = vmul.f32 %v9492_v46, %v10568_v44 }
 0x211   : > { %v2397_v38 = vpop.f32.mrf.mxu0  ;;  %v604_v43 = vmul.f32 %v9430_v12, %v10480_v20 }
 0x212   : > { %13826 = vst [vmem:[#allocation53_spill] sm:$0xff] %v11050_v47  ;;  %v11057_v21 = vadd.f32 %v2654_v16, %v2397_v38  ;;  %v1768_v49 = vpop.permute.xlu1 %1767  ;;  %v1766_v8 = vpop.permute.xlu0 %1765  ;;  %v1634_v19 = vadd.f32 %v1600_v15, %v1530_v58  ;;  %v1633_v52 = vadd.f32 %v1599_v30, %v1529_v48  ;;  %v1086_v15 = vmul.f32 %v9448_v35, %v10581_v59 }
 0x213   : > { %v2399_v36 = vpop.f32.mrf.mxu0  ;;  %v11075_v48 = vpop.f32.mrf.mxu1  ;;  %v13830_v59 = vrot.slane %v11008_v11, 1 }
 0x214   : > { %13827 = vst [vmem:[#allocation54_spill] sm:$0xff] %v11057_v21  ;;  %v11063_v31 = vadd.f32 %v2656_v53, %v2399_v36  ;;  %v1840_v16 = vadd.f32 %v1768_v49, %v1634_v19  ;;  %v1839_v38 = vadd.f32 %v1766_v8, %v1633_v52  ;;  %v810_v49 = vadd.f32 %v11004_v4, %v604_v43 }
 0x215   : > { %v809_v8 = vadd.f32 %v11006_v40, %v603_v7  ;;  %13828 = vst [vmem:[#allocation55_spill] sm:$0xff] %v11075_v48  ;;  %v1085_v4 = vmul.f32 %v9448_v35, %v10584_v10  ;;  %v13829_v36 = vshrl.u32 %v11008_v11, 16  ;;  %v2662_v52 = vpop.f32.mrf.mxu1  ;;  %v13886_v48 = vld [vmem:[#allocation38_spill] sm:$0xff] }
 0x216   : > { %v1256_v33 = vpop.permute.xlu1 %1255  ;;  %v1254_v51 = vpop.permute.xlu0 %1253 }
 0x217   : > { %v2224_v19 = vor.u32 %v13829_v36, %v2220_v1  ;;  %v13831_v1 = vrot.slane %v11008_v11, 2 }
 0x21a   : > { %v1974_v27 = vpop.permute.xlu1 %1973  ;;  %v1972_v21 = vpop.permute.xlu0 %1971 }
 0x21b   : > { %v2046_v47 = vadd.f32 %v1974_v27, %v1840_v16  ;;  %v2045_v61 = vadd.f32 %v1972_v21, %v1839_v38  ;;  %v1016_v16 = vadd.f32 %v946_v18, %v810_v49  ;;  %v1015_v38 = vadd.f32 %v944_v37, %v809_v8  ;;  %v11108_v37 = vpop.f32.mrf.mxu0  ;;  %v2664_v8 = vpop.f32.mrf.mxu1 }
 0x21c   : > { %13832 = vst [vmem:[#allocation56_spill] sm:$0xff] %v11108_v37 }
 0x21d   : > { %v2082_v44 = vadd.f32 %v9580_v57, %v2046_v47  ;;  %v2081_v23 = vadd.f32 %v9580_v57, %v2045_v61  ;;  %v1119_v36 = vadd.f32 %v1085_v4, %v1015_v38 }
 0x21e   : > { %v744_v56 = vpop.permute.xlu1 %743  ;;  %v742_v53 = vpop.permute.xlu0 %741 }
 0x21f   : > { %v11071_v58 = vpack.c.bf16 %v2082_v44, %v2081_v23 }
 0x221   : > { %7885 = vmatmul.mubr.msk.bf16.gmra.mxu1 %vm2269_vm0, %v11071_v58  ;;  %v2226_v20 = vshll.u32 %v11071_v58, 16  ;;  %v13671_v29 = vshrl.u32 %v11071_v58, 16  ;;  %v13670_v21 = vrot.slane %v11071_v58, 1  ;;  %v13669_v47 = vrot.slane %v11071_v58, 2 }
 0x222   : > { %v1462_v40 = vpop.permute.xlu1 %1461  ;;  %v1460_v30 = vpop.permute.xlu0 %1459  ;;  %2760 = vmatprep.mubr.bf16.mxu1 %v13697_v60 }
 0x223   : > { %v11090_v27 = vrot.slane %v2226_v20, 1  ;;  %v3241_v61 = vrot.slane %v2226_v20, 2  ;;  %v3240_v43 = vrot.slane %v13671_v29, 1  ;;  %v11099_v10 = vsel %vm2803_vm1, %v13830_v59, %v13670_v21 }
 0x224   : > { %v11106_v18 = vsel %vm3599_vm3, %v13831_v1, %v13669_v47  ;;  %v1120_v20 = vadd.f32 %v1086_v15, %v1016_v16  ;;  %v1325_v47 = vadd.f32 %v1254_v51, %v1119_v36 }
 0x225   : > { %v2229_v7 = vsel %vm2113_vm2, %v2224_v19, %v11090_v27  ;;  %v11113_v49 = vor.u32 %v3241_v61, %v3240_v43  ;;  %v605_v61 = vmul.f32 %v9430_v12, %v10612_v3 }
 0x226   : > { %v950_v44 = vpop.permute.xlu1 %949  ;;  %v948_v23 = vpop.permute.xlu0 %947  ;;  %7863 = vmatmul.mubr.msk.bf16.gmra.mxu0 %vm2269_vm0, %v2229_v7  ;;  %v1326_v19 = vadd.f32 %v1256_v33, %v1120_v20  ;;  %v606_v7 = vmul.f32 %v9430_v12, %v10607_v41  ;;  %v1601_v33 = vmul.f32 %v9492_v46, %v10697_v5  ;;  %v1088_v12 = vmul.f32 %v9448_v35, %v10714_v45 }
 0x227   : > { %v2405_v59 = vpop.f32.mrf.mxu0  ;;  %2493 = vmatprep.mubr.bf16.mxu0 %v13697_v60  ;;  %v11121_v1 = vsel %vm3184_vm4, %v11047_v32, %v11113_v49  ;;  %v1602_v32 = vmul.f32 %v9492_v46, %v10694_v0  ;;  %v811_v36 = vadd.f32 %v742_v53, %v605_v61  ;;  %v1604_v45 = vmul.f32 %v9492_v46, %v10752_v26 }
 0x228   : > { %v11116_v11 = vadd.f32 %v2662_v52, %v2405_v59  ;;  %v2666_v52 = vpop.f32.mrf.mxu1  ;;  %v1532_v43 = vadd.f32 %v1462_v40, %v1326_v19  ;;  %v1531_v59 = vadd.f32 %v1460_v30, %v1325_v47  ;;  %v812_v41 = vadd.f32 %v744_v56, %v606_v7 }
 0x229   : > { %v2407_v15 = vpop.f32.mrf.mxu0  ;;  %v1017_v30 = vadd.f32 %v948_v23, %v811_v36  ;;  %v1603_v7 = vmul.f32 %v9492_v46, %v10764_v62 }
 0x22a   : > { %v11127_v4 = vadd.f32 %v2664_v8, %v2407_v15  ;;  %v1772_v16 = vpop.permute.xlu1 %1771  ;;  %v1770_v38 = vpop.permute.xlu0 %1769  ;;  %v1087_v8 = vmul.f32 %v9448_v35, %v10717_v24  ;;  %v1018_v47 = vadd.f32 %v950_v44, %v812_v41  ;;  %v1636_v19 = vadd.f32 %v1602_v32, %v1532_v43 }
 0x22b   : > { %v2409_v51 = vpop.f32.mrf.mxu0  ;;  %v1635_v0 = vadd.f32 %v1601_v33, %v1531_v59  ;;  %v11145_v32 = vpop.f32.mrf.mxu1 }
 0x22c   : > { %v11133_v20 = vadd.f32 %v2666_v52, %v2409_v51  ;;  %v1842_v15 = vadd.f32 %v1772_v16, %v1636_v19  ;;  %v1122_v52 = vadd.f32 %v1088_v12, %v1018_v47  ;;  %v1121_v51 = vadd.f32 %v1087_v8, %v1017_v30  ;;  %13833 = vst [vmem:[#allocation57_spill] sm:$0xff] %v11145_v32 }
 0x22d   : > { %v1841_v21 = vadd.f32 %v1770_v38, %v1635_v0  ;;  %v2672_v12 = vpop.f32.mrf.mxu1  ;;  %v13835_v19 = vrot.slane %v11071_v58, 1 }
 0x22e   : > { %v1260_v3 = vpop.permute.xlu1 %1259  ;;  %v1258_v40 = vpop.permute.xlu0 %1257 }
 0x22f   : > { %v1328_v35 = vadd.f32 %v1260_v3, %v1122_v52  ;;  %v1327_v24 = vadd.f32 %v1258_v40, %v1121_v51  ;;  %v13834_v3 = vshrl.u32 %v11071_v58, 16  ;;  %v11162_v52 = vpop.f32.mrf.mxu0 }
 0x230   : > { %13837 = vst [vmem:[#allocation58_spill] sm:$0xff] %v11162_v52 }
 0x231   : > { %v2232_v8 = vor.u32 %v13834_v3, %v11090_v27 }
 0x232   : > { %v1978_v5 = vpop.permute.xlu1 %1977  ;;  %v1976_v29 = vpop.permute.xlu0 %1975 }
 0x233   : > { %v2048_v56 = vadd.f32 %v1978_v5, %v1842_v15  ;;  %v2047_v53 = vadd.f32 %v1976_v29, %v1841_v21  ;;  %v13836_v15 = vrot.slane %v11071_v58, 2 }
 0x235   : > { %v2084_v44 = vadd.f32 %v9580_v57, %v2048_v56  ;;  %v2083_v23 = vadd.f32 %v9580_v57, %v2047_v53 }
 0x236   : > { %v1466_v61 = vpop.permute.xlu1 %1465  ;;  %v1464_v16 = vpop.permute.xlu0 %1463 }
 0x237   : > { %v2102_v38 = vpack.c.bf16 %v2084_v44, %v2083_v23  ;;  %v1534_v43 = vadd.f32 %v1466_v61, %v1328_v35  ;;  %v1533_v59 = vadd.f32 %v1464_v16, %v1327_v24  ;;  %v2674_v35 = vpop.f32.mrf.mxu1 }
 0x239   : > { %7886 = vmatmul.mubr.msk.bf16.gmra.mxu1 %vm2269_vm0, %v2102_v38  ;;  %v1638_v29 = vadd.f32 %v1604_v45, %v1534_v43  ;;  %v1637_v26 = vadd.f32 %v1603_v7, %v1533_v59  ;;  %v2234_v21 = vshll.u32 %v2102_v38, 16  ;;  %v2238_v33 = vshrl.u32 %v2102_v38, 16 }
 0x23a   : > { %v1776_v46 = vpop.permute.xlu1 %1775  ;;  %v1774_v62 = vpop.permute.xlu0 %1773  ;;  %2770 = vmatprep.mubr.bf16.mxu1 %v13697_v60  ;;  %v2833_v41 = vrot.slane %v2102_v38, 1  ;;  %v3629_v36 = vrot.slane %v2102_v38, 2 }
 0x23b   : > { %v2236_v40 = vrot.slane %v2234_v21, 1  ;;  %v3245_v47 = vrot.slane %v2234_v21, 2  ;;  %v3244_v30 = vrot.slane %v2238_v33, 1  ;;  %v1844_v51 = vadd.f32 %v1776_v46, %v1638_v29  ;;  %v2676_v29 = vpop.f32.mrf.mxu1 }
 0x23c   : > { %v11155_v0 = vsel %vm2803_vm1, %v13835_v19, %v2833_v41  ;;  %v11160_v5 = vsel %vm3599_vm3, %v13836_v15, %v3629_v36  ;;  %v1843_v56 = vadd.f32 %v1774_v62, %v1637_v26 }
 0x23d   : > { %v2237_v53 = vsel %vm2113_vm2, %v2232_v8, %v2236_v40  ;;  %v3246_v7 = vor.u32 %v3245_v47, %v3244_v30  ;;  %v2240_v3 = vor.u32 %v2238_v33, %v2236_v40  ;;  %v13838_v40 = vld [vmem:[#allocation15_spill] sm:$0xff] }
 0x23e   : > { %v1982_v27 = vpop.permute.xlu1 %1981  ;;  %v1980_v45 = vpop.permute.xlu0 %1979  ;;  %7864 = vmatmul.mubr.msk.bf16.gmra.mxu0 %vm2269_vm0, %v2237_v53 }
 0x23f   : > { %v2050_v24 = vadd.f32 %v1982_v27, %v1844_v51  ;;  %v2049_v44 = vadd.f32 %v1980_v45, %v1843_v56  ;;  %v2415_v23 = vpop.f32.mrf.mxu0  ;;  %2503 = vmatprep.mubr.bf16.mxu0 %v13697_v60  ;;  %v11171_v61 = vsel %vm3184_vm4, %v11113_v49, %v3246_v7  ;;  %v13841_v45 = vld [vmem:[#allocation21_spill] sm:$0xff] }
 0x240   : > { %v11167_v58 = vadd.f32 %v2672_v12, %v2415_v23 }
 0x241   : > { %v2086_v16 = vadd.f32 %v9580_v57, %v2050_v24  ;;  %v2085_v38 = vadd.f32 %v9580_v57, %v2049_v44  ;;  %v2417_v43 = vpop.f32.mrf.mxu0  ;;  %v8639_v44 = vld [vmem:[%s13692_s2 + $0x90] ss:$8 sps:$4 sm:$0xff]  }
 0x242   : > { %v11175_v59 = vadd.f32 %v2674_v35, %v2417_v43 }
 0x243   : > { %v11177_v26 = vpack.c.bf16 %v2086_v16, %v2085_v38  ;;  %v2419_v21 = vpop.f32.mrf.mxu0  ;;  %v8644_v16 = vld [vmem:[%s13692_s2 + $0x84] ss:$8 sps:$4 sm:$0xff]  }
 0x244   : > { %v11179_v46 = vadd.f32 %v2676_v29, %v2419_v21  ;;  %v13842_v21 = vld [vmem:[#allocation13_spill] sm:$0xff] }
 0x245   : > { %7887 = vmatmul.mubr.msk.bf16.gmra.mxu1 %vm2269_vm0, %v11177_v26  ;;  %v2242_v62 = vshll.u32 %v11177_v26, 16  ;;  %v2246_v49 = vshrl.u32 %v11177_v26, 16  ;;  %v2835_v57 = vrot.slane %v11177_v26, 1  ;;  %v13672_v12 = vrot.slane %v11177_v26, 2  ;;  %v11214_v27 = vpop.f32.mrf.mxu0 }
 0x246   : > { %3355 = vmatprep.mubr.bf16.mxu1 %v13697_v60  ;;  %13840 = vst [vmem:[#allocation59_spill] sm:$0xff] %v11214_v27 }
 0x247   : > { %v2244_v8 = vrot.slane %v2242_v62, 1  ;;  %v3249_v47 = vrot.slane %v2242_v62, 2  ;;  %v3248_v30 = vrot.slane %v2246_v49, 1  ;;  %v11191_v19 = vsel %vm2803_vm1, %v2833_v41, %v2835_v57  ;;  %v11210_v41 = vpop.f32.mrf.mxu1 }
 0x248   : > { %v11196_v15 = vsel %vm3599_vm3, %v3629_v36, %v13672_v12  ;;  %13839 = vst [vmem:[#allocation15_spill] sm:$0xff] %v11210_v41 }
 0x249   : > { %v2245_v51 = vsel %vm2113_vm2, %v2240_v3, %v2244_v8  ;;  %v11199_v56 = vor.u32 %v3249_v47, %v3248_v30  ;;  %v2248_v36 = vor.u32 %v2246_v49, %v2244_v8  ;;  %v2682_v53 = vpop.f32.mrf.mxu1  ;;  %v8642_v49 = vld [vmem:[%s13692_s2 + $0x80] ss:$8 sps:$4 sm:$0xff]   ;;  %v13843_v3 = vld [vmem:[#allocation26_spill] sm:$0xff]  ;;  %v13844_v8 = vld [vmem:[#allocation19_spill] sm:$0xff]  ;;  %s7754_s2 = sshll.u32 %s529_s23, 4  ;;  %s7755_s2 = int_to_ptr.vmem [resolvable:$true] %s7754_s2 }
 0x24a   : > { %7865 = vmatmul.mubr.msk.bf16.gmra.mxu0 %vm2269_vm0, %v2245_v51  ;;  %v13845_v47 = vld [vmem:[#allocation29_spill] sm:$0xff]  ;;  %s8896_s1 = scalar_lea.vmem %s7755_s2, 128 }
 0x24b   : > { %2513 = vmatprep.mubr.bf16.mxu0 %v13697_v60  ;;  %v11205_v33 = vsel %vm3184_vm4, %v3246_v7, %v11199_v56  ;;  %v2684_v7 = vpop.f32.mrf.mxu1  ;;  %p8897_p9 = scmp.ne.s32.totalorder %s7755_s2, %s8896_s1 }
 0x24d   : > { %7921 = vmatmul.mubr.msk.bf16.vlgmr.msra.gmra.mxu1 %vm2269_vm0, %v13838_v40  ;;  %v2686_v43 = vpop.f32.mrf.mxu1  ;;  %v13847_v40 = vld [vmem:[#allocation24_spill] sm:$0xff]  ;;  %p8898_p10 = pnand %p8897_p9, %p9092_p5 }
 0x24e   : > { %3365 = vmatprep.mubr.bf16.mxu1 %v13697_v60 }
 0x24f   : > { %v11246_v30 = vpop.f32.mrf.mxu1  ;;  %p8899_p12 = pneg %p8898_p10 }
 0x250   : > { %13846 = vst [vmem:[#allocation21_spill] sm:$0xff] %v11246_v30 }
 0x251   : > { %v2692_v51 = vpop.f32.mrf.mxu1 }
 0x252   : > { %7866 = vmatmul.mubr.msk.bf16.gmra.mxu0 %vm2269_vm0, %v2248_v36 }
 0x253   : > { %2940 = vmatprep.mubr.bf16.mxu0 %v13697_v60 }
 0x255   : > { %7922 = vmatmul.mubr.msk.bf16.gmra.mxu1 %vm2269_vm0, %v13841_v45  ;;  %v2694_v45 = vpop.f32.mrf.mxu1 }
 0x256   : > { %v2425_v35 = vpop.f32.mrf.mxu0  ;;  %3375 = vmatprep.mubr.bf16.mxu1 %v13697_v60 }
 0x257   : > { %v11219_v24 = vadd.f32 %v2682_v53, %v2425_v35  ;;  %v13849_v53 = vld [vmem:[#allocation32_spill] sm:$0xff] }
 0x258   : > { %v2427_v23 = vpop.f32.mrf.mxu0 }
 0x259   : > { %v11227_v38 = vadd.f32 %v2684_v7, %v2427_v23 }
 0x25a   : > { %v2429_v29 = vpop.f32.mrf.mxu0  ;;  %7896 = vmatmul.mubr.msk.bf16.vlgmr.msra.gmra.mxu0 %vm2269_vm0, %v13842_v21 }
 0x25b   : > { %v11231_v62 = vadd.f32 %v2686_v43, %v2429_v29  ;;  %2950 = vmatprep.mubr.bf16.mxu0 %v13697_v60  ;;  %3717 = vmatpush1.bf16.msra.mxu0 %v8639_v44  ;;  %v13850_v29 = vld [vmem:[#allocation27_spill] sm:$0xff] }
 0x25c   : > { %3718 = vmatprep.subr.bf16.mxu0 %v8644_v16  ;;  %v11251_v36 = vpop.f32.mrf.mxu0  ;;  %v2696_v16 = vpop.f32.mrf.mxu1 }
 0x25d   : > { %7923 = vmatmul.mubr.msk.bf16.gmra.mxu1 %vm2269_vm0, %v13843_v3  ;;  %13848 = vst [vmem:[#allocation13_spill] sm:$0xff] %v11251_v36  ;;  %v13852_v3 = vld [vmem:[#allocation30_spill] sm:$0xff] }
 0x25e   : > { %3385 = vmatprep.mubr.bf16.mxu1 %v13697_v60 }
 0x25f   : > { %3719 = vmatpush1.bf16.msra.mxu0 %v8642_v49  ;;  %v13851_v49 = vld [vmem:[#allocation34_spill] sm:$0xff] }
 0x262   : > { %7897 = vmatmul.mubr.msk.bf16.gmra.mxu0 %vm2269_vm0, %v13844_v8  ;;  %v13853_v8 = vld [vmem:[#allocation39_spill] sm:$0xff] }
 0x263   : > { %2960 = vmatprep.mubr.bf16.mxu0 %v13697_v60 }
 0x265   : > { %7924 = vmatmul.mubr.msk.bf16.gmra.mxu1 %vm2269_vm0, %v13845_v47  ;;  %v11274_v47 = vpop.f32.mrf.mxu1 }
 0x266   : > { %3395 = vmatprep.mubr.bf16.mxu1 %v13697_v60  ;;  %13854 = vst [vmem:[#allocation26_spill] sm:$0xff] %v11274_v47 }
 0x26a   : > { %7898 = vmatmul.mubr.msk.bf16.gmra.mxu0 %vm2269_vm0, %v13847_v40  ;;  %v13855_v40 = vld [vmem:[#allocation11_spill] sm:$0xff] }
 0x26b   : > { %2970 = vmatprep.mubr.bf16.mxu0 %v13697_v60 }
 0x26d   : > { %7925 = vmatmul.mubr.msk.bf16.gmra.mxu1 %vm2269_vm0, %v13849_v53 }
 0x26e   : > { %v2435_v7 = vpop.f32.mrf.mxu0  ;;  %3405 = vmatprep.mubr.bf16.mxu1 %v13697_v60 }
 0x26f   : > { %v11256_v35 = vadd.f32 %v2692_v51, %v2435_v7  ;;  %v2702_v51 = vpop.f32.mrf.mxu1 }
 0x270   : > { %v2437_v44 = vpop.f32.mrf.mxu0 }
 0x271   : > { %v11258_v23 = vadd.f32 %v2694_v45, %v2437_v44  ;;  %v13857_v45 = vld [vmem:[#allocation23_spill] sm:$0xff]  ;;  %v2704_v7 = vpop.f32.mrf.mxu1 }
 0x272   : > { %v2439_v43 = vpop.f32.mrf.mxu0  ;;  %7899 = vmatmul.mubr.msk.bf16.gmra.mxu0 %vm2269_vm0, %v13850_v29 }
 0x273   : > { %v11262_v21 = vadd.f32 %v2696_v16, %v2439_v43  ;;  %2980 = vmatprep.mubr.bf16.mxu0 %v13697_v60 }
 0x274   : > { %v11279_v53 = vpop.f32.mrf.mxu0 }
 0x275   : > { %7926 = vmatmul.mubr.msk.bf16.gmra.mxu1 %vm2269_vm0, %v13851_v49  ;;  %13856 = vst [vmem:[#allocation19_spill] sm:$0xff] %v11279_v53  ;;  %v2706_v49 = vpop.f32.mrf.mxu1  ;;  %v13871_v53 = vld [vmem:[#allocation20_spill] sm:$0xff] }
 0x276   : > { %3415 = vmatprep.mubr.bf16.mxu1 %v13697_v60 }
 0x27a   : > { %7900 = vmatmul.mubr.msk.bf16.gmra.mxu0 %vm2269_vm0, %v13852_v3 }
 0x27b   : > { %2990 = vmatprep.mubr.bf16.mxu0 %v13697_v60 }
 0x27d   : > { %7927 = vmatmul.mubr.msk.bf16.gmra.mxu1 %vm2269_vm0, %v13853_v8  ;;  %v13858_v8 = vld [vmem:[#allocation16_spill] sm:$0xff] }
 0x27e   : > { %3425 = vmatprep.mubr.bf16.mxu1 %v13697_v60 }
 0x282   : > { %7901 = vmatmul.mubr.msk.bf16.gmra.mxu0 %vm2269_vm0, %v13855_v40 }
 0x283   : > { %3000 = vmatprep.mubr.bf16.mxu0 %v13697_v60 }
 0x285   : > { %7928 = vmatmul.mubr.msk.bf16.gmra.mxu1 %vm2269_vm0, %v13857_v45  ;;  %v13859_v45 = vld [vmem:[#allocation17_spill] sm:$0xff] }
 0x286   : > { %v2445_v44 = vpop.f32.mrf.mxu0  ;;  %3435 = vmatprep.mubr.bf16.mxu1 %v13697_v60 }
 0x287   : > { %v11284_v16 = vadd.f32 %v2702_v51, %v2445_v44  ;;  %v11302_v51 = vpop.f32.mrf.mxu1  ;;  %v13861_v44 = vld [vmem:[#allocation40_spill] sm:$0xff] }
 0x288   : > { %v2447_v43 = vpop.f32.mrf.mxu0  ;;  %13860 = vst [vmem:[#allocation29_spill] sm:$0xff] %v11302_v51 }
 0x289   : > { %v11286_v29 = vadd.f32 %v2704_v7, %v2447_v43  ;;  %v2712_v7 = vpop.f32.mrf.mxu1 }
 0x28a   : > { %v2449_v3 = vpop.f32.mrf.mxu0  ;;  %7902 = vmatmul.mubr.msk.bf16.gmra.mxu0 %vm2269_vm0, %v13858_v8 }
 0x28b   : > { %v11290_v40 = vadd.f32 %v2706_v49, %v2449_v3  ;;  %3010 = vmatprep.mubr.bf16.mxu0 %v13697_v60  ;;  %v2714_v43 = vpop.f32.mrf.mxu1 }
 0x28d   : > { %7929 = vmatmul.mubr.msk.bf16.gmra.mxu1 %vm2269_vm0, %v10689_v50  ;;  %v11307_v50 = vpop.f32.mrf.mxu0 }
 0x28e   : > { %3445 = vmatprep.mubr.bf16.mxu1 %v13697_v60  ;;  %13862 = vst [vmem:[#allocation24_spill] sm:$0xff] %v11307_v50 }
 0x292   : > { %7903 = vmatmul.mubr.msk.bf16.gmra.mxu0 %vm2269_vm0, %v13859_v45  ;;  %v2716_v45 = vpop.f32.mrf.mxu1 }
 0x293   : > { %3020 = vmatprep.mubr.bf16.mxu0 %v13697_v60 }
 0x295   : > { %7930 = vmatmul.mubr.msk.bf16.gmra.mxu1 %vm2269_vm0, %v10841_v39 }
 0x296   : > { %3455 = vmatprep.mubr.bf16.mxu1 %v13697_v60 }
 0x29a   : > { %7904 = vmatmul.mubr.msk.bf16.gmra.mxu0 %vm2269_vm0, %v13861_v44 }
 0x29b   : > { %3030 = vmatprep.mubr.bf16.mxu0 %v13697_v60 }
 0x29d   : > { %7931 = vmatmul.mubr.msk.bf16.gmra.mxu1 %vm2269_vm0, %v10918_v42 }
 0x29e   : > { %v2455_v49 = vpop.f32.mrf.mxu0  ;;  %3465 = vmatprep.mubr.bf16.mxu1 %v13697_v60 }
 0x29f   : > { %v11312_v39 = vadd.f32 %v2712_v7, %v2455_v49 }
 0x2a0   : > { %v2457_v3 = vpop.f32.mrf.mxu0 }
 0x2a1   : > { %v11314_v8 = vadd.f32 %v2714_v43, %v2457_v3 }
 0x2a2   : > { %v2459_v12 = vpop.f32.mrf.mxu0  ;;  %7905 = vmatmul.mubr.msk.bf16.gmra.mxu0 %vm2269_vm0, %v10803_v54  ;;  %v11330_v54 = vpop.f32.mrf.mxu1 }
 0x2a3   : > { %v11318_v44 = vadd.f32 %v2716_v45, %v2459_v12  ;;  %3040 = vmatprep.mubr.bf16.mxu0 %v13697_v60  ;;  %13863 = vst [vmem:[#allocation32_spill] sm:$0xff] %v11330_v54  ;;  %v13872_v54 = vld [vmem:[#allocation25_spill] sm:$0xff] }
 0x2a4   : > { %v2722_v42 = vpop.f32.mrf.mxu1 }
 0x2a5   : > { %7932 = vmatmul.mubr.msk.bf16.gmra.mxu1 %vm2269_vm0, %v10985_v28  ;;  %v11335_v28 = vpop.f32.mrf.mxu0 }
 0x2a6   : > { %3475 = vmatprep.mubr.bf16.mxu1 %v13697_v60  ;;  %13864 = vst [vmem:[#allocation27_spill] sm:$0xff] %v11335_v28 }
 0x2aa   : > { %7906 = vmatmul.mubr.msk.bf16.gmra.mxu0 %vm2269_vm0, %v10897_v63  ;;  %v2724_v63 = vpop.f32.mrf.mxu1 }
 0x2ab   : > { %3050 = vmatprep.mubr.bf16.mxu0 %v13697_v60 }
 0x2ac   : > { %v2726_v49 = vpop.f32.mrf.mxu1 }
 0x2ad   : > { %7933 = vmatmul.mubr.msk.bf16.gmra.mxu1 %vm2269_vm0, %v11055_v14 }
 0x2ae   : > { %3485 = vmatprep.mubr.bf16.mxu1 %v13697_v60 }
 0x2b2   : > { %7907 = vmatmul.mubr.msk.bf16.gmra.mxu0 %vm2269_vm0, %v10964_v17 }
 0x2b3   : > { %3060 = vmatprep.mubr.bf16.mxu0 %v13697_v60 }
 0x2b5   : > { %7934 = vmatmul.mubr.msk.bf16.gmra.mxu1 %vm2269_vm0, %v11121_v1 }
 0x2b6   : > { %v2465_v12 = vpop.f32.mrf.mxu0  ;;  %3495 = vmatprep.mubr.bf16.mxu1 %v13697_v60 }
 0x2b7   : > { %v11340_v14 = vadd.f32 %v2722_v42, %v2465_v12 }
 0x2b8   : > { %v2467_v7 = vpop.f32.mrf.mxu0 }
 0x2b9   : > { %v11342_v43 = vadd.f32 %v2724_v63, %v2467_v7 }
 0x2ba   : > { %v2469_v3 = vpop.f32.mrf.mxu0  ;;  %7908 = vmatmul.mubr.msk.bf16.gmra.mxu0 %vm2269_vm0, %v11034_v25  ;;  %v11358_v25 = vpop.f32.mrf.mxu1 }
 0x2bb   : > { %v11346_v17 = vadd.f32 %v2726_v49, %v2469_v3  ;;  %3070 = vmatprep.mubr.bf16.mxu0 %v13697_v60  ;;  %13865 = vst [vmem:[#allocation34_spill] sm:$0xff] %v11358_v25 }
 0x2bc   : > { %v2732_v1 = vpop.f32.mrf.mxu1 }
 0x2bd   : > { %7935 = vmatmul.mubr.msk.bf16.gmra.mxu1 %vm2269_vm0, %v11171_v61  ;;  %v11363_v61 = vpop.f32.mrf.mxu0 }
 0x2be   : > { %3505 = vmatprep.mubr.bf16.mxu1 %v13697_v60  ;;  %13866 = vst [vmem:[#allocation30_spill] sm:$0xff] %v11363_v61 }
 0x2c2   : > { %7909 = vmatmul.mubr.msk.bf16.gmra.mxu0 %vm2269_vm0, %v11099_v10  ;;  %v2734_v10 = vpop.f32.mrf.mxu1 }
 0x2c3   : > { %3080 = vmatprep.mubr.bf16.mxu0 %v13697_v60 }
 0x2c4   : > { %v2736_v12 = vpop.f32.mrf.mxu1 }
 0x2c5   : > { %7936 = vmatmul.mubr.msk.bf16.gmra.mxu1 %vm2269_vm0, %v11205_v33 }
 0x2c6   : > { %3515 = vmatprep.mubr.bf16.mxu1 %v13697_v60 }
 0x2ca   : > { %7910 = vmatmul.mubr.msk.bf16.gmra.mxu0 %vm2269_vm0, %v11155_v0 }
 0x2cb   : > { %3090 = vmatprep.mubr.bf16.mxu0 %v13697_v60 }
 0x2cd   : > { %7937 = vmatmul.mubr.msk.bf16.gmra.mxu1 %vm2269_vm0, %v11199_v56  ;;  %v11379_v56 = vpop.f32.mrf.mxu1 }
 0x2ce   : > { %v2475_v45 = vpop.f32.mrf.mxu0  ;;  %13867 = vst [vmem:[#allocation39_spill] sm:$0xff] %v11379_v56  ;;  %v13876_v56 = vld [vmem:[#allocation31_spill] sm:$0xff] }
 0x2cf   : > { %v11367_v42 = vadd.f32 %v2732_v1, %v2475_v45  ;;  %v2742_v49 = vpop.f32.mrf.mxu1  ;;  %v13868_v1 = vld [vmem:[#allocation14_spill] sm:$0xff] }
 0x2d0   : > { %v2477_v33 = vpop.f32.mrf.mxu0 }
 0x2d1   : > { %v11369_v63 = vadd.f32 %v2734_v10, %v2477_v33  ;;  %v2744_v3 = vpop.f32.mrf.mxu1 }
 0x2d2   : > { %v2479_v7 = vpop.f32.mrf.mxu0  ;;  %7911 = vmatmul.mubr.msk.bf16.gmra.mxu0 %vm2269_vm0, %v11191_v19 }
 0x2d3   : > { %v11373_v0 = vadd.f32 %v2736_v12, %v2479_v7  ;;  %3100 = vmatprep.mubr.bf16.mxu0 %v13697_v60  ;;  %v2746_v10 = vpop.f32.mrf.mxu1 }
 0x2d4   : > { %v11385_v19 = vpop.f32.mrf.mxu0 }
 0x2d5   : > { %13869 = vst [vmem:[#allocation11_spill] sm:$0xff] %v11385_v19  ;;  %v11389_v7 = vpop.f32.mrf.mxu1 }
 0x2d6   : > { %13870 = vst [vmem:[#allocation23_spill] sm:$0xff] %v11389_v7 }
 0x2da   : > { %7912 = vmatmul.mubr.msk.bf16.gmra.mxu0 %vm2269_vm0, %v2835_v57 }
 0x2db   : > { %3736 = vmatprep.mubr.bf16.mxu0 %v13697_v60 }
 0x2e1   : > { %v2752_v51 = vpop.f32.mrf.mxu1 }
 0x2e2   : > { %7946 = vmatmul.mubr.msk.bf16.vlgmr.msra.gmra.mxu0 %vm2269_vm0, %v13868_v1 }
 0x2e3   : > { %3746 = vmatprep.mubr.bf16.mxu0 %v13697_v60  ;;  %v2754_v1 = vpop.f32.mrf.mxu1 }
 0x2e6   : > { %v2485_v45 = vpop.f32.mrf.mxu0 }
 0x2e7   : > { %v11387_v33 = vadd.f32 %v2742_v49, %v2485_v45  ;;  %v2756_v49 = vpop.f32.mrf.mxu1 }
 0x2e8   : > { %v2487_v12 = vpop.f32.mrf.mxu0 }
 0x2e9   : > { %v11391_v57 = vadd.f32 %v2744_v3, %v2487_v12  ;;  %v11401_v45 = vpop.f32.mrf.mxu1  ;;  %v13874_v12 = vld [vmem:[#allocation28_spill] sm:$0xff] }
 0x2ea   : > { %v2489_v47 = vpop.f32.mrf.mxu0  ;;  %7947 = vmatmul.mubr.msk.bf16.gmra.mxu0 %vm2269_vm0, %v13871_v53  ;;  %13873 = vst [vmem:[#allocation16_spill] sm:$0xff] %v11401_v45 }
 0x2eb   : > { %v11395_v50 = vadd.f32 %v2746_v10, %v2489_v47  ;;  %3756 = vmatprep.mubr.bf16.mxu0 %v13697_v60 }
 0x2ec   : > { %v11406_v47 = vpop.f32.mrf.mxu0 }
 0x2ed   : > { %13875 = vst [vmem:[#allocation17_spill] sm:$0xff] %v11406_v47 }
 0x2f2   : > { %7948 = vmatmul.mubr.msk.bf16.gmra.mxu0 %vm2269_vm0, %v13872_v54 }
 0x2f3   : > { %3766 = vmatprep.mubr.bf16.mxu0 %v13697_v60 }
 0x2f9   : > { %v2762_v3 = vpop.f32.mrf.mxu1 }
 0x2fa   : > { %7949 = vmatmul.mubr.msk.bf16.gmra.mxu0 %vm2269_vm0, %v13874_v12 }
 0x2fb   : > { %v2764_v28 = vpop.f32.mrf.mxu1  ;;  %3776 = vmatprep.mubr.bf16.mxu0 %v13697_v60 }
 0x2fd   : > { %v2766_v10 = vpop.f32.mrf.mxu1 }
 0x2fe   : > { %v2495_v53 = vpop.f32.mrf.mxu0 }
 0x2ff   : > { %v11408_v25 = vadd.f32 %v2752_v51, %v2495_v53  ;;  %v11414_v45 = vpop.f32.mrf.mxu1  ;;  %v13880_v53 = vld [vmem:[#allocation12_spill] sm:$0xff] }
 0x300   : > { %v2497_v61 = vpop.f32.mrf.mxu0  ;;  %13877 = vst [vmem:[#allocation40_spill] sm:$0xff] %v11414_v45 }
 0x301   : > { %v11410_v54 = vadd.f32 %v2754_v1, %v2497_v61 }
 0x302   : > { %v2499_v7 = vpop.f32.mrf.mxu0  ;;  %7950 = vmatmul.mubr.msk.bf16.gmra.mxu0 %vm2269_vm0, %v13876_v56 }
 0x303   : > { %v11416_v19 = vadd.f32 %v2756_v49, %v2499_v7  ;;  %3786 = vmatprep.mubr.bf16.mxu0 %v13697_v60 }
 0x304   : > { %v11419_v47 = vpop.f32.mrf.mxu0 }
 0x305   : > { %13878 = vst [vmem:[#allocation14_spill] sm:$0xff] %v11416_v19  ;;  %v2772_v12 = vpop.f32.mrf.mxu1  ;;  %13879 = vst [vmem:[#allocation20_spill] sm:$0xff] %v11419_v47  ;;  %v13898_v19 = vld [vmem:[#allocation41_spill] sm:$0xff] }
 0x307   : > { %v2774_v30 = vpop.f32.mrf.mxu1 }
 0x309   : > { %v2776_v36 = vpop.f32.mrf.mxu1 }
 0x30a   : > { %v2505_v51 = vpop.f32.mrf.mxu0  ;;  %7951 = vmatmul.mubr.msk.bf16.gmra.mxu0 %vm2269_vm0, %v13880_v53 }
 0x30b   : > { %v11423_v61 = vadd.f32 %v2762_v3, %v2505_v51  ;;  %v11425_v1 = vpop.f32.mrf.mxu1  ;;  %3796 = vmatprep.mubr.bf16.mxu0 %v13697_v60 }
 0x30c   : > { %13882 = vst [vmem:[#allocation28_spill] sm:$0xff] %v11425_v1  ;;  %v2507_v56 = vpop.f32.mrf.mxu0 }
 0x30d   : > { %13881 = vst [vmem:[#allocation25_spill] sm:$0xff] %v11423_v61  ;;  %v11428_v7 = vadd.f32 %v2764_v28, %v2507_v56  ;;  %v3357_v49 = vpop.f32.mrf.mxu1 }
 0x30e   : > { %v2509_v45 = vpop.f32.mrf.mxu0 }
 0x30f   : > { %13883 = vst [vmem:[#allocation31_spill] sm:$0xff] %v11428_v7  ;;  %v11430_v41 = vadd.f32 %v2766_v10, %v2509_v45  ;;  %v3359_v27 = vpop.f32.mrf.mxu1  ;;  %v13892_v7 = vld [vmem:[#allocation18_spill] sm:$0xff] }
 0x310   : > { %v11432_v47 = vpop.f32.mrf.mxu0 }
 0x311   : > { %13884 = vst [vmem:[#allocation12_spill] sm:$0xff] %v11430_v41  ;;  %13885 = vst [vmem:[#allocation60_spill] sm:$0xff] %v11432_v47  ;;  %v3361_v32 = vpop.f32.mrf.mxu1 }
 0x312   : > { %v2515_v52 = vpop.f32.mrf.mxu0  ;;  %7952 = vmatmul.mubr.msk.bf16.gmra.mxu0 %vm2269_vm0, %v13886_v48  ;;  %v13893_v48 = vld [vmem:[#allocation42_spill] sm:$0xff] }
 0x313   : > { %v11436_v3 = vadd.f32 %v2772_v12, %v2515_v52  ;;  %v11438_v51 = vpop.f32.mrf.mxu1  ;;  %3806 = vmatprep.mubr.bf16.mxu0 %v13697_v60 }
 0x314   : > { %13888 = vst [vmem:[#allocation61_spill] sm:$0xff] %v11438_v51  ;;  %v2517_v28 = vpop.f32.mrf.mxu0 }
 0x315   : > { %13887 = vst [vmem:[#allocation38_spill] sm:$0xff] %v11436_v3  ;;  %v11441_v53 = vadd.f32 %v2774_v30, %v2517_v28  ;;  %v3367_v56 = vpop.f32.mrf.mxu1  ;;  %v13895_v28 = vld [vmem:[#allocation43_spill] sm:$0xff] }
 0x316   : > { %v2519_v45 = vpop.f32.mrf.mxu0 }
 0x317   : > { %13889 = vst [vmem:[#allocation62_spill] sm:$0xff] %v11441_v53  ;;  %v11443_v10 = vadd.f32 %v2776_v36, %v2519_v45  ;;  %v3369_v1 = vpop.f32.mrf.mxu1 }
 0x318   : > { %v11445_v47 = vpop.f32.mrf.mxu0 }
 0x319   : > { %13890 = vst [vmem:[#allocation63_spill] sm:$0xff] %v11443_v10  ;;  %13891 = vst [vmem:[#allocation64_spill] sm:$0xff] %v11445_v47  ;;  %v3371_v37 = vpop.f32.mrf.mxu1  ;;  %v13896_v10 = vld [vmem:[#allocation44_spill] sm:$0xff] }
 0x31a   : > { %v2942_v41 = vpop.f32.mrf.mxu0  ;;  %7953 = vmatmul.mubr.msk.bf16.gmra.mxu0 %vm2269_vm0, %v13892_v7 }
 0x31b   : > { %v3111_v52 = vadd.f32 %v2942_v41, %v13893_v48  ;;  %v11450_v12 = vpop.f32.mrf.mxu1  ;;  %3816 = vmatprep.mubr.bf16.mxu0 %v13697_v60 }
 0x31c   : > { %13894 = vst [vmem:[#allocation18_spill] sm:$0xff] %v11450_v12  ;;  %v2944_v30 = vpop.f32.mrf.mxu0 }
 0x31d   : > { %v3112_v51 = vadd.f32 %v2944_v30, %v13895_v28  ;;  %v3377_v53 = vpop.f32.mrf.mxu1  ;;  %v11454_v36 = vadd.f32 %v3357_v49, %v3111_v52 }
 0x31e   : > { %v2946_v45 = vpop.f32.mrf.mxu0 }
 0x31f   : > { %v3113_v47 = vadd.f32 %v2946_v45, %v13896_v10  ;;  %v11457_v3 = vpop.f32.mrf.mxu1  ;;  %v11459_v61 = vadd.f32 %v3359_v27, %v3112_v51 }
 0x320   : > { %v11461_v7 = vpop.f32.mrf.mxu0 }
 0x321   : > { %v11463_v41 = vpop.f32.mrf.mxu1  ;;  %v11465_v48 = vadd.f32 %v3361_v32, %v3113_v47 }
 0x322   : > { %13897 = vst [vmem:[#allocation42_spill] sm:$0xff] %v11463_v41  ;;  %v2952_v12 = vpop.f32.mrf.mxu0  ;;  %7954 = vmatmul.mubr.msk.bf16.gmra.mxu0 %vm2269_vm0, %v13898_v19  ;;  %v13902_v41 = vld [vmem:[#allocation46_spill] sm:$0xff] }
 0x323   : > { %v3115_v49 = vadd.f32 %v2952_v12, %v10832_v13  ;;  %v11470_v52 = vpop.f32.mrf.mxu1  ;;  %3826 = vmatprep.mubr.bf16.mxu0 %v13697_v60 }
 0x324   : > { %13899 = vst [vmem:[#allocation43_spill] sm:$0xff] %v11470_v52  ;;  %v2954_v10 = vpop.f32.mrf.mxu0 }
 0x325   : > { %v3116_v27 = vadd.f32 %v2954_v10, %v10848_v34  ;;  %v11474_v51 = vpop.f32.mrf.mxu1  ;;  %v11476_v30 = vadd.f32 %v3367_v56, %v3115_v49  ;;  %v13904_v49 = vld [vmem:[#allocation50_spill] sm:$0xff] }
 0x326   : > { %v2956_v28 = vpop.f32.mrf.mxu0 }
 0x327   : > { %v3117_v32 = vadd.f32 %v2956_v28, %v10854_v22  ;;  %v11479_v47 = vpop.f32.mrf.mxu1  ;;  %v11481_v45 = vadd.f32 %v3369_v1, %v3116_v27 }
 0x328   : > { %13900 = vst [vmem:[#allocation44_spill] sm:$0xff] %v11479_v47  ;;  %v11483_v19 = vpop.f32.mrf.mxu0 }
 0x329   : > { %v11485_v13 = vpop.f32.mrf.mxu1  ;;  %v11487_v12 = vadd.f32 %v3371_v37, %v3117_v32 }
 0x32a   : > { %13901 = vst [vmem:[#allocation41_spill] sm:$0xff] %v11485_v13  ;;  %v2962_v52 = vpop.f32.mrf.mxu0  ;;  %7955 = vmatmul.mubr.msk.bf16.gmra.mxu0 %vm2269_vm0, %v13902_v41  ;;  %v13916_v13 = vld [vmem:[#allocation53_spill] sm:$0xff] }
 0x32b   : > { %v3119_v34 = vadd.f32 %v2962_v52, %v10913_v2  ;;  %v11492_v56 = vpop.f32.mrf.mxu1  ;;  %3836 = vmatprep.mubr.bf16.mxu0 %v13697_v60 }
 0x32c   : > { %13903 = vst [vmem:[#allocation46_spill] sm:$0xff] %v11492_v56  ;;  %v2964_v22 = vpop.f32.mrf.mxu0  ;;  %v13908_v56 = vld [vmem:[#allocation33_spill] sm:$0xff] }
 0x32d   : > { %v11496_v1 = vadd.f32 %v2964_v22, %v13904_v49  ;;  %v11498_v10 = vpop.f32.mrf.mxu1  ;;  %v11500_v27 = vadd.f32 %v3377_v53, %v3119_v34 }
 0x32e   : > { %13905 = vst [vmem:[#allocation50_spill] sm:$0xff] %v11498_v10  ;;  %v2966_v37 = vpop.f32.mrf.mxu0 }
 0x32f   : > { %v11503_v28 = vadd.f32 %v2966_v37, %v10926_v6  ;;  %v11505_v32 = vpop.f32.mrf.mxu1 }
 0x330   : > { %13906 = vst [vmem:[#allocation65_spill] sm:$0xff] %v11505_v32  ;;  %v11507_v41 = vpop.f32.mrf.mxu0  ;;  %v13911_v32 = vld [vmem:[#allocation52_spill] sm:$0xff] }
 0x331   : > { %v11509_v2 = vpop.f32.mrf.mxu1 }
 0x332   : > { %13907 = vst [vmem:[#allocation66_spill] sm:$0xff] %v11509_v2  ;;  %v2972_v52 = vpop.f32.mrf.mxu0  ;;  %7956 = vmatmul.mubr.msk.bf16.gmra.mxu0 %vm2269_vm0, %v13908_v56 }
 0x333   : > { %v11514_v22 = vadd.f32 %v2972_v52, %v10980_v9  ;;  %v11516_v49 = vpop.f32.mrf.mxu1  ;;  %3846 = vmatprep.mubr.bf16.mxu0 %v13697_v60 }
 0x334   : > { %13909 = vst [vmem:[#allocation33_spill] sm:$0xff] %v11516_v49  ;;  %v2974_v53 = vpop.f32.mrf.mxu0  ;;  %v13915_v49 = vld [vmem:[#allocation35_spill] sm:$0xff] }
 0x335   : > { %v11520_v6 = vadd.f32 %v2974_v53, %v10987_v55  ;;  %v11522_v34 = vpop.f32.mrf.mxu1 }
 0x336   : > { %13910 = vst [vmem:[#allocation67_spill] sm:$0xff] %v11522_v34  ;;  %v2976_v37 = vpop.f32.mrf.mxu0 }
 0x337   : > { %v11525_v2 = vadd.f32 %v2976_v37, %v13911_v32  ;;  %v11527_v10 = vpop.f32.mrf.mxu1  ;;  %v13919_v32 = vld [vmem:[#allocation54_spill] sm:$0xff] }
 0x338   : > { %13913 = vst [vmem:[#allocation68_spill] sm:$0xff] %v11527_v10  ;;  %v11529_v56 = vpop.f32.mrf.mxu0 }
 0x339   : > { %13912 = vst [vmem:[#allocation52_spill] sm:$0xff] %v11525_v2  ;;  %v11531_v9 = vpop.f32.mrf.mxu1 }
 0x33a   : > { %13914 = vst [vmem:[#allocation69_spill] sm:$0xff] %v11531_v9  ;;  %v2982_v52 = vpop.f32.mrf.mxu0  ;;  %7957 = vmatmul.mubr.msk.bf16.gmra.mxu0 %vm2269_vm0, %v13915_v49 }
 0x33b   : > { %v11536_v47 = vadd.f32 %v2982_v52, %v13916_v13  ;;  %v11538_v55 = vpop.f32.mrf.mxu1  ;;  %3856 = vmatprep.mubr.bf16.mxu0 %v13697_v60 }
 0x33c   : > { %13918 = vst [vmem:[#allocation53_spill] sm:$0xff] %v11538_v55  ;;  %v2984_v53 = vpop.f32.mrf.mxu0  ;;  %v13923_v55 = vld [vmem:[#allocation37_spill] sm:$0xff] }
 0x33d   : > { %13917 = vst [vmem:[#allocation35_spill] sm:$0xff] %v11536_v47  ;;  %v11542_v37 = vadd.f32 %v2984_v53, %v13919_v32  ;;  %v11544_v10 = vpop.f32.mrf.mxu1 }
 0x33e   : > { %13920 = vst [vmem:[#allocation54_spill] sm:$0xff] %v11544_v10  ;;  %v2986_v34 = vpop.f32.mrf.mxu0 }
 0x33f   : > { %v11547_v9 = vadd.f32 %v2986_v34, %v11063_v31  ;;  %v11549_v2 = vpop.f32.mrf.mxu1 }
 0x340   : > { %13921 = vst [vmem:[#allocation70_spill] sm:$0xff] %v11549_v2  ;;  %v11551_v49 = vpop.f32.mrf.mxu0 }
 0x341   : > { %v11553_v13 = vpop.f32.mrf.mxu1 }
 0x342   : > { %13922 = vst [vmem:[#allocation71_spill] sm:$0xff] %v11553_v13  ;;  %v2992_v52 = vpop.f32.mrf.mxu0  ;;  %7958 = vmatmul.mubr.msk.bf16.gmra.mxu0 %vm2269_vm0, %v13923_v55 }
 0x343   : > { %v11558_v47 = vadd.f32 %v2992_v52, %v11116_v11  ;;  %v11560_v53 = vpop.f32.mrf.mxu1  ;;  %3866 = vmatprep.mubr.bf16.mxu0 %v13697_v60 }
 0x344   : > { %13924 = vst [vmem:[#allocation37_spill] sm:$0xff] %v11560_v53  ;;  %v2994_v32 = vpop.f32.mrf.mxu0 }
 0x345   : > { %v11564_v31 = vadd.f32 %v2994_v32, %v11127_v4  ;;  %v11566_v34 = vpop.f32.mrf.mxu1 }
 0x346   : > { %13925 = vst [vmem:[#allocation72_spill] sm:$0xff] %v11566_v34  ;;  %v2996_v2 = vpop.f32.mrf.mxu0 }
 0x347   : > { %v11569_v13 = vadd.f32 %v2996_v2, %v11133_v20  ;;  %v11571_v10 = vpop.f32.mrf.mxu1 }
 0x348   : > { %13927 = vst [vmem:[#allocation74_spill] sm:$0xff] %v11571_v10  ;;  %v11573_v55 = vpop.f32.mrf.mxu0 }
 0x349   : > { %13926 = vst [vmem:[#allocation73_spill] sm:$0xff] %v11569_v13  ;;  %v11575_v11 = vpop.f32.mrf.mxu1 }
 0x34a   : > { %13928 = vst [vmem:[#allocation75_spill] sm:$0xff] %v11575_v11  ;;  %v3002_v52 = vpop.f32.mrf.mxu0  ;;  %7959 = vmatmul.mubr.msk.bf16.gmra.mxu0 %vm2269_vm0, %v11106_v18 }
 0x34b   : > { %v11580_v53 = vadd.f32 %v3002_v52, %v11167_v58  ;;  %v11582_v4 = vpop.f32.mrf.mxu1  ;;  %3876 = vmatprep.mubr.bf16.mxu0 %v13697_v60 }
 0x34c   : > { %13929 = vst [vmem:[#allocation76_spill] sm:$0xff] %v11582_v4  ;;  %v3004_v32 = vpop.f32.mrf.mxu0 }
 0x34d   : > { %v11586_v20 = vadd.f32 %v3004_v32, %v11175_v59  ;;  %v3437_v2 = vpop.f32.mrf.mxu1 }
 0x34e   : > { %v3006_v10 = vpop.f32.mrf.mxu0 }
 0x34f   : > { %13930 = vst [vmem:[#allocation77_spill] sm:$0xff] %v11586_v20  ;;  %v11589_v34 = vadd.f32 %v3006_v10, %v11179_v46  ;;  %v3439_v11 = vpop.f32.mrf.mxu1 }
 0x350   : > { %v11591_v13 = vpop.f32.mrf.mxu0 }
 0x351   : > { %13931 = vst [vmem:[#allocation78_spill] sm:$0xff] %v11591_v13  ;;  %v3441_v52 = vpop.f32.mrf.mxu1 }
 0x352   : > { %v3012_v18 = vpop.f32.mrf.mxu0  ;;  %7960 = vmatmul.mubr.msk.bf16.gmra.mxu0 %vm2269_vm0, %v11160_v5 }
 0x353   : > { %v11596_v58 = vadd.f32 %v3012_v18, %v11219_v24  ;;  %3886 = vmatprep.mubr.bf16.mxu0 %v13697_v60  ;;  %v11605_v10 = vpop.f32.mrf.mxu1 }
 0x354   : > { %v3014_v59 = vpop.f32.mrf.mxu0  ;;  %13934 = vst [vmem:[#allocation81_spill] sm:$0xff] %v11605_v10 }
 0x355   : > { %v11600_v32 = vadd.f32 %v3014_v59, %v11227_v38  ;;  %v3447_v24 = vpop.f32.mrf.mxu1 }
 0x356   : > { %v3016_v4 = vpop.f32.mrf.mxu0 }
 0x357   : > { %13932 = vst [vmem:[#allocation79_spill] sm:$0xff] %v11600_v32  ;;  %v11603_v46 = vadd.f32 %v3016_v4, %v11231_v62 }
 0x358   : > { %v11607_v20 = vpop.f32.mrf.mxu0 }
 0x359   : > { %13933 = vst [vmem:[#allocation80_spill] sm:$0xff] %v11603_v46  ;;  %13935 = vst [vmem:[#allocation82_spill] sm:$0xff] %v11607_v20  ;;  %v3449_v46 = vpop.f32.mrf.mxu1 }
 0x35a   : > { %v3022_v13 = vpop.f32.mrf.mxu0  ;;  %7961 = vmatmul.mubr.msk.bf16.gmra.mxu0 %vm2269_vm0, %v11196_v15 }
 0x35b   : > { %v3143_v5 = vadd.f32 %v3022_v13, %v11256_v35  ;;  %3896 = vmatprep.mubr.bf16.mxu0 %v13697_v60  ;;  %v13937_v35 = vrot.slane %v11177_v26, 2 }
 0x35c   : > { %v3024_v18 = vpop.f32.mrf.mxu0 }
 0x35d   : > { %v3144_v38 = vadd.f32 %v3024_v18, %v11258_v23  ;;  %v11614_v59 = vadd.f32 %v3437_v2, %v3143_v5  ;;  %v3451_v23 = vpop.f32.mrf.mxu1 }
 0x35e   : > { %v3026_v62 = vpop.f32.mrf.mxu0 }
 0x35f   : > { %v3145_v4 = vadd.f32 %v3026_v62, %v11262_v21  ;;  %v11617_v10 = vadd.f32 %v3439_v11, %v3144_v38  ;;  %v11634_v38 = vpop.f32.mrf.mxu1 }
 0x360   : > { %v11619_v20 = vpop.f32.mrf.mxu0  ;;  %13938 = vst [vmem:[#allocation84_spill] sm:$0xff] %v11634_v38  ;;  %v13949_v38 = vld [vmem:[#allocation25_spill] sm:$0xff] }
 0x361   : > { %13936 = vst [vmem:[#allocation83_spill] sm:$0xff] %v11619_v20  ;;  %v11621_v32 = vadd.f32 %v3441_v52, %v3145_v4  ;;  %v13951_v20 = vld [vmem:[#allocation31_spill] sm:$0xff] }
 0x362   : > { %v3032_v15 = vpop.f32.mrf.mxu0  ;;  %7962 = vmatmul.mubr.msk.bf16.gmra.mxu0 %vm2269_vm0, %v13937_v35 }
 0x363   : > { %v3147_v13 = vadd.f32 %v3032_v15, %v11284_v16  ;;  %4815 = vmatprep.mubr.bf16.mxu0 %v13697_v60  ;;  %v3457_v15 = vpop.f32.mrf.mxu1 }
 0x364   : > { %v3034_v2 = vpop.f32.mrf.mxu0 }
 0x365   : > { %v3148_v21 = vadd.f32 %v3034_v2, %v11286_v29  ;;  %v11629_v11 = vadd.f32 %v3447_v24, %v3147_v13 }
 0x366   : > { %v3036_v5 = vpop.f32.mrf.mxu0 }
 0x367   : > { %v3149_v18 = vadd.f32 %v3036_v5, %v11290_v40  ;;  %v11632_v52 = vadd.f32 %v3449_v46, %v3148_v21 }
 0x368   : > { %v11636_v26 = vpop.f32.mrf.mxu0 }
 0x369   : > { %13939 = vst [vmem:[#allocation85_spill] sm:$0xff] %v11636_v26  ;;  %v11638_v62 = vadd.f32 %v3451_v23, %v3149_v18 }
 0x36a   : > { %v3042_v16 = vpop.f32.mrf.mxu0 }
 0x36b   : > { %v3151_v4 = vadd.f32 %v3042_v16, %v11312_v39 }
 0x36c   : > { %v3044_v35 = vpop.f32.mrf.mxu0 }
 0x36d   : > { %v11642_v29 = vadd.f32 %v3044_v35, %v11314_v8  ;;  %v11644_v24 = vadd.f32 %v3457_v15, %v3151_v4 }
 0x36e   : > { %v3046_v13 = vpop.f32.mrf.mxu0 }
 0x36f   : > { %13940 = vst [vmem:[#allocation86_spill] sm:$0xff] %v11642_v29  ;;  %v11647_v40 = vadd.f32 %v3046_v13, %v11318_v44 }
 0x370   : > { %v11649_v46 = vpop.f32.mrf.mxu0 }
 0x371   : > { %13941 = vst [vmem:[#allocation87_spill] sm:$0xff] %v11649_v46 }
 0x372   : > { %v3052_v2 = vpop.f32.mrf.mxu0 }
 0x373   : > { %v11652_v23 = vadd.f32 %v3052_v2, %v11340_v14 }
 0x374   : > { %v3054_v21 = vpop.f32.mrf.mxu0 }
 0x375   : > { %v11655_v39 = vadd.f32 %v3054_v21, %v11342_v43 }
 0x376   : > { %v3056_v5 = vpop.f32.mrf.mxu0 }
 0x377   : > { %13942 = vst [vmem:[#allocation88_spill] sm:$0xff] %v11655_v39  ;;  %v11658_v8 = vadd.f32 %v3056_v5, %v11346_v17 }
 0x378   : > { %v11660_v18 = vpop.f32.mrf.mxu0 }
 0x379   : > { %13943 = vst [vmem:[#allocation89_spill] sm:$0xff] %v11660_v18 }
 0x37a   : > { %v3062_v16 = vpop.f32.mrf.mxu0 }
 0x37b   : > { %v11663_v44 = vadd.f32 %v3062_v16, %v11367_v42 }
 0x37c   : > { %v3064_v4 = vpop.f32.mrf.mxu0 }
 0x37d   : > { %v11666_v15 = vadd.f32 %v3064_v4, %v11369_v63 }
 0x37e   : > { %v3066_v14 = vpop.f32.mrf.mxu0 }
 0x37f   : > { %v11669_v35 = vadd.f32 %v3066_v14, %v11373_v0 }
 0x380   : > { %v11671_v43 = vpop.f32.mrf.mxu0 }
 0x382   : > { %v3072_v13 = vpop.f32.mrf.mxu0 }
 0x383   : > { %v11674_v17 = vadd.f32 %v3072_v13, %v11387_v33  ;;  %v13946_v13 = vld [vmem:[#allocation14_spill] sm:$0xff] }
 0x384   : > { %v3074_v2 = vpop.f32.mrf.mxu0 }
 0x385   : > { %v11677_v21 = vadd.f32 %v3074_v2, %v11391_v57 }
 0x386   : > { %v3076_v42 = vpop.f32.mrf.mxu0 }
 0x387   : > { %v11680_v5 = vadd.f32 %v3076_v42, %v11395_v50 }
 0x388   : > { %v11682_v63 = vpop.f32.mrf.mxu0 }
 0x38a   : > { %v3082_v16 = vpop.f32.mrf.mxu0 }
 0x38b   : > { %v11685_v0 = vadd.f32 %v3082_v16, %v11408_v25  ;;  %v13953_v16 = vld [vmem:[#allocation12_spill] sm:$0xff] }
 0x38c   : > { %v3084_v4 = vpop.f32.mrf.mxu0 }
 0x38d   : > { %13944 = vst [vmem:[#allocation90_spill] sm:$0xff] %v11685_v0  ;;  %v11688_v14 = vadd.f32 %v3084_v4, %v11410_v54  ;;  %v3977_v54 = vlaneseq }
 0x38e   : > { %v3086_v33 = vpop.f32.mrf.mxu0 }
 0x38f   : > { %13945 = vst [vmem:[#allocation91_spill] sm:$0xff] %v11688_v14  ;;  %v11691_v60 = vadd.f32 %v3086_v33, %v13946_v13  ;;  %v13956_v33 = vld [vmem:[#allocation38_spill] sm:$0xff]  ;;  %v11709_v46 = vshrl.u32 %v3977_v54, 7 }
 0x390   : > { %v11693_v57 = vpop.f32.mrf.mxu0 }
 0x391   : > { %13947 = vst [vmem:[#allocation14_spill] sm:$0xff] %v11691_v60  ;;  %13948 = vst [vmem:[#allocation92_spill] sm:$0xff] %v11693_v57  ;;  %v14016_v57 = vld [vmem:[#allocation75_spill] sm:$0xff] }
 0x392   : > { %v3092_v2 = vpop.f32.mrf.mxu0  ;;  %13958 = vst [vmem:[#allocation94_spill] sm:$0xff] %v11709_v46 }
 0x393   : > { %v11696_v50 = vadd.f32 %v3092_v2, %v13949_v38  ;;  %v13959_v38 = vld [vmem:[#allocation62_spill] sm:$0xff] }
 0x394   : > { %v3094_v42 = vpop.f32.mrf.mxu0 }
 0x395   : > { %13950 = vst [vmem:[#allocation25_spill] sm:$0xff] %v11696_v50  ;;  %v11699_v29 = vadd.f32 %v3094_v42, %v13951_v20  ;;  %v13961_v20 = vld [vmem:[#allocation63_spill] sm:$0xff] }
 0x396   : > { %v3096_v25 = vpop.f32.mrf.mxu0 }
 0x397   : > { %13952 = vst [vmem:[#allocation31_spill] sm:$0xff] %v11699_v29  ;;  %v11702_v26 = vadd.f32 %v3096_v25, %v13953_v16  ;;  %v13674_v25 = vsub.s32 0, %v11709_v46 }
 0x398   : > { %v11704_v4 = vpop.f32.mrf.mxu0 }
 0x399   : > { %13954 = vst [vmem:[#allocation12_spill] sm:$0xff] %v11702_v26  ;;  %13955 = vst [vmem:[#allocation93_spill] sm:$0xff] %v11704_v4  ;;  %v3975_v26 = vld [vmem:[%s13964_s3] sm:$0x3]  ;;  %v13967_v4 = vld [vmem:[#allocation61_spill] sm:$0xff]  ;;  %s8968_s3 = smov [#allocation5]  }
 0x39a   : > { %v3102_v39 = vpop.f32.mrf.mxu0 }
 0x39b   : > { %v11707_v13 = vadd.f32 %v3102_v39, %v13956_v33  ;;  %v13965_v39 = vld [vmem:[#allocation47_spill] sm:$0xff]  ;;  %v13966_v33 = vld [vmem:[#allocation45_spill] sm:$0xff] }
 0x39c   : > { %v3104_v18 = vpop.f32.mrf.mxu0  ;;  %v2619_v54 = vadd.f32 %v13966_v33, %v13965_v39 }
 0x39d   : > { %13957 = vst [vmem:[#allocation38_spill] sm:$0xff] %v11707_v13  ;;  %v11712_v2 = vadd.f32 %v3104_v18, %v13959_v38  ;;  %v13675_v13 = vsub.s32 1, %v11709_v46 }
 0x39e   : > { %v3106_v50 = vpop.f32.mrf.mxu0  ;;  %v3114_v18 = vadd.f32 %v11461_v7, %v2619_v54  ;;  %v13968_v54 = vld [vmem:[#allocation49_spill] sm:$0xff] }
 0x39f   : > { %13960 = vst [vmem:[#allocation62_spill] sm:$0xff] %v11712_v2  ;;  %v11715_v42 = vadd.f32 %v3106_v50, %v13961_v20  ;;  %v11730_v50 = vrot.slane %v3975_v26, %v13674_v25  ;;  %v11735_v2 = vrot.slane %v3975_v26, %v13675_v13 }
 0x3a0   : > { %v11718_v16 = vpop.f32.mrf.mxu0  ;;  %v3529_v7 = vadd.f32 %v13967_v4, %v3114_v18 }
 0x3a1   : > { %13962 = vst [vmem:[#allocation63_spill] sm:$0xff] %v11715_v42  ;;  %13963 = vst [vmem:[#allocation95_spill] sm:$0xff] %v11718_v16 }
 0x3a2   : > { %v3738_v29 = vpop.f32.mrf.mxu0 }
 0x3a3   : > { %v3907_v38 = vadd.f32 %v3738_v29, %v11454_v36  ;;  %v13969_v36 = vld [vmem:[#allocation48_spill] sm:$0xff] }
 0x3a4   : > { %v3740_v20 = vpop.f32.mrf.mxu0  ;;  %v2629_v29 = vadd.f32 %v13969_v36, %v13968_v54 }
 0x3a5   : > { %v3908_v42 = vadd.f32 %v3740_v20, %v11459_v61  ;;  %v3987_v39 = vadd.f32 %v11730_v50, %v3907_v38 }
 0x3a6   : > { %v3742_v16 = vpop.f32.mrf.mxu0  ;;  %v3118_v20 = vadd.f32 %v11483_v19, %v2629_v29  ;;  %v13971_v19 = vld [vmem:[#allocation18_spill] sm:$0xff] }
 0x3a7   : > { %v3909_v33 = vadd.f32 %v3742_v16, %v11465_v48  ;;  %v3988_v25 = vadd.f32 %v11735_v2, %v3908_v42  ;;  %v4055_v13 = vmax.f32 %v3987_v39, 0.0  ;;  %v13973_v29 = vld [vmem:[#allocation10_spill] sm:$0xff] }
 0x3a8   : > { %v3744_v60 = vpop.f32.mrf.mxu0 }
 0x3a9   : > { %v3989_v14 = vadd.f32 %v11730_v50, %v3909_v33  ;;  %v3910_v61 = vadd.f32 %v3744_v60, %v3529_v7  ;;  %v4056_v4 = vmax.f32 %v3988_v25, 0.0  ;;  %v3533_v7 = vadd.f32 %v13971_v19, %v3118_v20 }
 0x3aa   : > { %v3748_v26 = vpop.f32.mrf.mxu0 }
 0x3ab   : > { %v4057_v46 = vmax.f32 %v3989_v14, 0.0  ;;  %v3990_v38 = vadd.f32 %v11735_v2, %v3910_v61  ;;  %v3911_v48 = vadd.f32 %v3748_v26, %v11476_v30  ;;  %v13972_v14 = vld [vmem:[#allocation51_spill] sm:$0xff] }
 0x3ac   : > { %v3750_v16 = vpop.f32.mrf.mxu0  ;;  %v2639_v61 = vadd.f32 %v13973_v29, %v13972_v14 }
 0x3ad   : > { %v11747_v18 = vpack.c.bf16 %v4057_v46, %v4055_v13  ;;  %v4058_v54 = vmax.f32 %v3990_v38, 0.0  ;;  %v3912_v36 = vadd.f32 %v3750_v16, %v11481_v45  ;;  %v3991_v33 = vadd.f32 %v11730_v50, %v3911_v48 }
 0x3ae   : > { %v3752_v42 = vpop.f32.mrf.mxu0  ;;  %v3122_v45 = vadd.f32 %v11507_v41, %v2639_v61  ;;  %v3535_v38 = vadd.f32 %v11457_v3, %v11496_v1  ;;  %v13975_v3 = vld [vmem:[#allocation43_spill] sm:$0xff]  ;;  %v13976_v61 = vld [vmem:[#allocation22_spill] sm:$0xff] }
 0x3af   : > { %13970 = vst [vmem:[#allocation47_spill] sm:$0xff] %v11747_v18  ;;  %v3913_v60 = vadd.f32 %v3752_v42, %v11487_v12  ;;  %v11753_v39 = vpack.c.bf16 %v4058_v54, %v4056_v4  ;;  %v3992_v25 = vadd.f32 %v11735_v2, %v3912_v36  ;;  %v4059_v12 = vmax.f32 %v3991_v33, 0.0  ;;  %v13974_v54 = vld [vmem:[#allocation42_spill] sm:$0xff] }
 0x3b0   : > { %v3754_v30 = vpop.f32.mrf.mxu0  ;;  %v3536_v42 = vadd.f32 %v13974_v54, %v11503_v28  ;;  %v3537_v1 = vadd.f32 %v13975_v3, %v3122_v45 }
 0x3b1   : > { %v3993_v46 = vadd.f32 %v11730_v50, %v3913_v60  ;;  %v3914_v13 = vadd.f32 %v3754_v30, %v3533_v7  ;;  %v4060_v36 = vmax.f32 %v3992_v25, 0.0  ;;  %v13977_v30 = vld [vmem:[#allocation36_spill] sm:$0xff] }
 0x3b2   : > { %v3758_v26 = vpop.f32.mrf.mxu0 }
 0x3b3   : > { %v4061_v48 = vmax.f32 %v3993_v46, 0.0  ;;  %v3994_v20 = vadd.f32 %v11735_v2, %v3914_v13  ;;  %v3915_v16 = vadd.f32 %v3758_v26, %v11500_v27  ;;  %v2649_v27 = vadd.f32 %v13977_v30, %v13976_v61 }
 0x3b4   : > { %v3760_v4 = vpop.f32.mrf.mxu0  ;;  %v3538_v26 = vadd.f32 %v11474_v51, %v11514_v22  ;;  %v11786_v22 = vpop.f32.mrf.mxu1 }
 0x3b5   : > { %v11766_v19 = vpack.c.bf16 %v4061_v48, %v4059_v12  ;;  %v4062_v60 = vmax.f32 %v3994_v20, 0.0  ;;  %v3916_v7 = vadd.f32 %v3760_v4, %v3535_v38  ;;  %v3995_v14 = vadd.f32 %v11730_v50, %v3915_v16  ;;  %v13978_v48 = vld [vmem:[#allocation44_spill] sm:$0xff]  ;;  %13981 = vst [vmem:[#allocation45_spill] sm:$0xff] %v11786_v22 }
 0x3b6   : > { %v3762_v41 = vpop.f32.mrf.mxu0  ;;  %v3126_v38 = vadd.f32 %v11529_v56, %v2649_v27  ;;  %v3539_v45 = vadd.f32 %v13978_v48, %v11520_v6  ;;  %v13983_v27 = vld [vmem:[#allocation56_spill] sm:$0xff]  ;;  %v13985_v48 = vld [vmem:[#allocation35_spill] sm:$0xff] }
 0x3b7   : > { %v3917_v29 = vadd.f32 %v3762_v41, %v3536_v42  ;;  %v11770_v33 = vpack.c.bf16 %v4062_v60, %v4060_v36  ;;  %v3996_v13 = vadd.f32 %v11735_v2, %v3916_v7  ;;  %v4063_v20 = vmax.f32 %v3995_v14, 0.0  ;;  %v13979_v36 = vld [vmem:[#allocation52_spill] sm:$0xff]  ;;  %v13980_v60 = vld [vmem:[#allocation41_spill] sm:$0xff]  ;;  %v13982_v14 = vld [vmem:[#allocation46_spill] sm:$0xff] }
 0x3b8   : > { %v3764_v46 = vpop.f32.mrf.mxu0  ;;  %v3540_v7 = vadd.f32 %v13980_v60, %v13979_v36  ;;  %v3541_v61 = vadd.f32 %v13982_v14, %v3126_v38  ;;  %v13987_v38 = vld [vmem:[#allocation65_spill] sm:$0xff] }
 0x3b9   : > { %v3997_v28 = vadd.f32 %v11730_v50, %v3917_v29  ;;  %v3918_v25 = vadd.f32 %v3764_v46, %v3537_v1  ;;  %v4064_v41 = vmax.f32 %v3996_v13, 0.0  ;;  %v13984_v46 = vld [vmem:[#allocation55_spill] sm:$0xff] }
 0x3ba   : > { %v3768_v12 = vpop.f32.mrf.mxu0 }
 0x3bb   : > { %v4065_v16 = vmax.f32 %v3997_v28, 0.0  ;;  %v3998_v4 = vadd.f32 %v11735_v2, %v3918_v25  ;;  %v3919_v54 = vadd.f32 %v3768_v12, %v3538_v26  ;;  %v2659_v28 = vadd.f32 %v13984_v46, %v13983_v27 }
 0x3bc   : > { %v3770_v42 = vpop.f32.mrf.mxu0 }
 0x3bd   : > { %v11784_v29 = vpack.c.bf16 %v4065_v16, %v4063_v20  ;;  %v4066_v3 = vmax.f32 %v3998_v4, 0.0  ;;  %v3920_v51 = vadd.f32 %v3770_v42, %v3539_v45  ;;  %v3999_v1 = vadd.f32 %v11730_v50, %v3919_v54  ;;  %v13986_v45 = vld [vmem:[#allocation50_spill] sm:$0xff]  ;;  %v11799_v4 = vpop.f32.mrf.mxu1 }
 0x3be   : > { %v3772_v56 = vpop.f32.mrf.mxu0  ;;  %v3542_v20 = vadd.f32 %v13986_v45, %v13985_v48  ;;  %v3130_v16 = vadd.f32 %v11551_v49, %v2659_v28  ;;  %v3543_v42 = vadd.f32 %v13987_v38, %v11542_v37 }
 0x3bf   : > { %v3921_v6 = vadd.f32 %v3772_v56, %v3540_v7  ;;  %v11790_v30 = vpack.c.bf16 %v4066_v3, %v4064_v41  ;;  %v4000_v13 = vadd.f32 %v11735_v2, %v3920_v51  ;;  %v4067_v36 = vmax.f32 %v3999_v1, 0.0  ;;  %v13988_v51 = vld [vmem:[#allocation66_spill] sm:$0xff]  ;;  %v11808_v27 = vpop.f32.mrf.mxu1  ;;  %v13990_v1 = vld [vmem:[#allocation33_spill] sm:$0xff] }
 0x3c0   : > { %v3774_v25 = vpop.f32.mrf.mxu0  ;;  %v3544_v56 = vadd.f32 %v13988_v51, %v11547_v9  ;;  %13989 = vst [vmem:[#allocation61_spill] sm:$0xff] %v11808_v27  ;;  %v13992_v9 = vld [vmem:[#allocation58_spill] sm:$0xff]  ;;  %v14013_v27 = vld [vmem:[#allocation77_spill] sm:$0xff] }
 0x3c1   : > { %v4001_v26 = vadd.f32 %v11730_v50, %v3921_v6  ;;  %v3922_v12 = vadd.f32 %v3774_v25, %v3541_v61  ;;  %v4068_v6 = vmax.f32 %v4000_v13, 0.0  ;;  %v3545_v25 = vadd.f32 %v13990_v1, %v3130_v16  ;;  %v13993_v13 = vld [vmem:[#allocation57_spill] sm:$0xff] }
 0x3c2   : > { %v3778_v54 = vpop.f32.mrf.mxu0  ;;  %v2669_v48 = vadd.f32 %v13993_v13, %v13992_v9 }
 0x3c3   : > { %v4069_v60 = vmax.f32 %v4001_v26, 0.0  ;;  %v4002_v7 = vadd.f32 %v11735_v2, %v3922_v12  ;;  %v3923_v41 = vadd.f32 %v3778_v54, %v3542_v20  ;;  %v8647_v12 = vld [vmem:[%s13991_s4 + $0x4] ss:$12 sps:$4 sm:$0xff]  }
 0x3c4   : > { %v3780_v3 = vpop.f32.mrf.mxu0  ;;  %4351 = vmatprep.mubr.bf16.mxu1 %v8647_v12  ;;  %v3134_v16 = vadd.f32 %v11573_v55, %v2669_v48 }
 0x3c5   : > { %v11806_v14 = vpack.c.bf16 %v4069_v60, %v4067_v36  ;;  %v4070_v61 = vmax.f32 %v4002_v7, 0.0  ;;  %v3924_v49 = vadd.f32 %v3780_v3, %v3543_v42  ;;  %v4003_v28 = vadd.f32 %v11730_v50, %v3923_v41  ;;  %v13994_v42 = vld [vmem:[#allocation67_spill] sm:$0xff]  ;;  %v11824_v60 = vpop.f32.mrf.mxu1  ;;  %v13995_v41 = vld [vmem:[#allocation68_spill] sm:$0xff] }
 0x3c6   : > { %v3782_v46 = vpop.f32.mrf.mxu0  ;;  %v3546_v36 = vadd.f32 %v13994_v42, %v11558_v47  ;;  %v3547_v3 = vadd.f32 %v13995_v41, %v11564_v31 }
 0x3c7   : > { %v3925_v37 = vadd.f32 %v3782_v46, %v3544_v56  ;;  %v11812_v26 = vpack.c.bf16 %v4070_v61, %v4068_v6  ;;  %v4004_v20 = vadd.f32 %v11735_v2, %v3924_v49  ;;  %v4071_v51 = vmax.f32 %v4003_v28, 0.0  ;;  %v13996_v46 = vld [vmem:[#allocation73_spill] sm:$0xff]  ;;  %v11833_v9 = vpop.f32.mrf.mxu1 }
 0x3c8   : > { %v3784_v45 = vpop.f32.mrf.mxu0  ;;  %13998 = vst [vmem:[#allocation49_spill] sm:$0xff] %v11833_v9  ;;  %v13999_v28 = vld [vmem:[#allocation53_spill] sm:$0xff] }
 0x3c9   : > { %v4005_v54 = vadd.f32 %v11730_v50, %v3925_v37  ;;  %v3926_v38 = vadd.f32 %v3784_v45, %v3545_v25  ;;  %v13997_v37 = vld [vmem:[#allocation69_spill] sm:$0xff]  ;;  %v4072_v25 = vmax.f32 %v4004_v20, 0.0  ;;  %v3549_v45 = vadd.f32 %v13999_v28, %v3134_v16  ;;  %v14001_v16 = vld [vmem:[#allocation59_spill] sm:$0xff] }
 0x3ca   : > { %v3788_v7 = vpop.f32.mrf.mxu0  ;;  %v3548_v1 = vadd.f32 %v13997_v37, %v13996_v46  ;;  %v14002_v46 = vld [vmem:[#allocation15_spill] sm:$0xff] }
 0x3cb   : > { %v4073_v56 = vmax.f32 %v4005_v54, 0.0  ;;  %v4006_v6 = vadd.f32 %v11735_v2, %v3926_v38  ;;  %v3927_v61 = vadd.f32 %v3788_v7, %v3546_v36  ;;  %v14000_v7 = vld [vmem:[#allocation54_spill] sm:$0xff]  ;;  %v2679_v37 = vadd.f32 %v14002_v46, %v14001_v16  ;;  %v14009_v16 = vld [vmem:[#allocation37_spill] sm:$0xff] }
 0x3cc   : > { %v3790_v49 = vpop.f32.mrf.mxu0  ;;  %v3550_v41 = vadd.f32 %v14000_v7, %v11580_v53  ;;  %v14004_v53 = vld [vmem:[#allocation78_spill] sm:$0xff] }
 0x3cd   : > { %v11831_v47 = vpack.c.bf16 %v4073_v56, %v4071_v51  ;;  %v4074_v12 = vmax.f32 %v4006_v6, 0.0  ;;  %v3928_v55 = vadd.f32 %v3790_v49, %v3547_v3  ;;  %v4007_v48 = vadd.f32 %v11730_v50, %v3927_v61  ;;  %v11843_v3 = vpop.f32.mrf.mxu1 }
 0x3ce   : > { %v3792_v13 = vpop.f32.mrf.mxu0  ;;  %v3138_v28 = vadd.f32 %v14004_v53, %v2679_v37  ;;  %v14011_v53 = vld [vmem:[#allocation74_spill] sm:$0xff] }
 0x3cf   : > { %v3929_v31 = vadd.f32 %v3792_v13, %v3548_v1  ;;  %v11837_v54 = vpack.c.bf16 %v4074_v12, %v4072_v25  ;;  %v4008_v42 = vadd.f32 %v11735_v2, %v3928_v55  ;;  %v4075_v56 = vmax.f32 %v4007_v48, 0.0  ;;  %v14003_v13 = vld [vmem:[#allocation71_spill] sm:$0xff] }
 0x3d0   : > { %v3794_v38 = vpop.f32.mrf.mxu0  ;;  %v3553_v46 = vadd.f32 %v14009_v16, %v3138_v28 }
 0x3d1   : > { %v4009_v36 = vadd.f32 %v11730_v50, %v3929_v31  ;;  %v3930_v20 = vadd.f32 %v3794_v38, %v3549_v45  ;;  %v4076_v25 = vmax.f32 %v4008_v42, 0.0  ;;  %v3552_v31 = vadd.f32 %v14003_v13, %v11589_v34  ;;  %v11853_v45 = vpop.f32.mrf.mxu1  ;;  %v14010_v13 = vld [vmem:[#allocation79_spill] sm:$0xff] }
 0x3d2   : > { %v3798_v51 = vpop.f32.mrf.mxu0  ;;  %14005 = vst [vmem:[#allocation48_spill] sm:$0xff] %v11853_v45 }
 0x3d3   : > { %v4077_v6 = vmax.f32 %v4009_v36, 0.0  ;;  %v4010_v61 = vadd.f32 %v11735_v2, %v3930_v20  ;;  %v3931_v49 = vadd.f32 %v3798_v51, %v3550_v41  ;;  %v14006_v41 = vld [vmem:[#allocation13_spill] sm:$0xff]  ;;  %v11863_v34 = vpop.f32.mrf.mxu1 }
 0x3d4   : > { %v3800_v1 = vpop.f32.mrf.mxu0  ;;  %v14007_v51 = vld [vmem:[#allocation21_spill] sm:$0xff] }
 0x3d5   : > { %v11848_v12 = vpack.c.bf16 %v4077_v6, %v4075_v56  ;;  %v4078_v55 = vmax.f32 %v4010_v61, 0.0  ;;  %v4011_v38 = vadd.f32 %v11730_v50, %v3931_v49  ;;  %v2689_v42 = vadd.f32 %v14007_v51, %v14006_v41  ;;  %v14008_v6 = vld [vmem:[#allocation72_spill] sm:$0xff]  ;;  %v14014_v41 = vld [vmem:[#allocation70_spill] sm:$0xff]  ;;  %v11875_v16 = vpop.f32.mrf.mxu1 }
 0x3d6   : > { %v3802_v48 = vpop.f32.mrf.mxu0  ;;  %v3554_v61 = vadd.f32 %v14008_v6, %v11596_v58  ;;  %v3555_v49 = vadd.f32 %v14011_v53, %v14010_v13  ;;  %v3551_v51 = vadd.f32 %v14014_v41, %v14013_v27  ;;  %v14015_v6 = vld [vmem:[#allocation80_spill] sm:$0xff] }
 0x3d7   : > { %v3933_v36 = vadd.f32 %v3802_v48, %v3552_v31  ;;  %v11856_v20 = vpack.c.bf16 %v4078_v55, %v4076_v25  ;;  %v14012_v31 = vld [vmem:[#allocation82_spill] sm:$0xff]  ;;  %v4079_v55 = vmax.f32 %v4011_v38, 0.0  ;;  %v3556_v28 = vadd.f32 %v14016_v57, %v14015_v6  ;;  %v11882_v53 = vpop.f32.mrf.mxu1 }
 0x3d8   : > { %v3804_v7 = vpop.f32.mrf.mxu0  ;;  %v3142_v25 = vadd.f32 %v14012_v31, %v2689_v42  ;;  %v3932_v0 = vadd.f32 %v3800_v1, %v3551_v51 }
 0x3d9   : > { %v4013_v56 = vadd.f32 %v11730_v50, %v3933_v36  ;;  %v3934_v36 = vadd.f32 %v3804_v7, %v3553_v46  ;;  %v11892_v6 = vpop.f32.mrf.mxu1 }
 0x3da   : > { %v3808_v37 = vpop.f32.mrf.mxu0  ;;  %v4012_v57 = vadd.f32 %v11735_v2, %v3932_v0 }
 0x3db   : > { %v4081_v48 = vmax.f32 %v4013_v56, 0.0  ;;  %v3935_v22 = vadd.f32 %v3808_v37, %v3554_v61  ;;  %v14017_v56 = vld [vmem:[#allocation76_spill] sm:$0xff]  ;;  %v4014_v37 = vadd.f32 %v11735_v2, %v3934_v36 }
 0x3dc   : > { %v3810_v9 = vpop.f32.mrf.mxu0  ;;  %v3557_v61 = vadd.f32 %v14017_v56, %v3142_v25  ;;  %v4080_v0 = vmax.f32 %v4012_v57, 0.0 }
 0x3dd   : > { %v11871_v45 = vpack.c.bf16 %v4081_v48, %v4079_v55  ;;  %v3936_v58 = vadd.f32 %v3810_v9, %v3555_v49  ;;  %v4015_v42 = vadd.f32 %v11730_v50, %v3935_v22  ;;  %v4082_v25 = vmax.f32 %v4014_v37, 0.0 }
 0x3de   : > { %v3812_v13 = vpop.f32.mrf.mxu0 }
 0x3df   : > { %v3937_v38 = vadd.f32 %v3812_v13, %v3556_v28  ;;  %v4016_v7 = vadd.f32 %v11735_v2, %v3936_v58  ;;  %v4083_v1 = vmax.f32 %v4015_v42, 0.0 }
 0x3e0   : > { %v3814_v27 = vpop.f32.mrf.mxu0 }
 0x3e1   : > { %v4017_v46 = vadd.f32 %v11730_v50, %v3937_v38  ;;  %v3938_v9 = vadd.f32 %v3814_v27, %v3557_v61  ;;  %v4084_v41 = vmax.f32 %v4016_v7, 0.0  ;;  %v11902_v61 = vpack.c.bf16 %v4082_v25, %v4080_v0 }
 0x3e2   : > { %v3818_v49 = vpop.f32.mrf.mxu0  ;;  %v3568_v0 = vadd.f32 %v11799_v4, %v11647_v40 }
 0x3e3   : > { %v4085_v31 = vmax.f32 %v4017_v46, 0.0  ;;  %v4018_v22 = vadd.f32 %v11735_v2, %v3938_v9  ;;  %v3939_v55 = vadd.f32 %v3818_v49, %v11614_v59 }
 0x3e4   : > { %v3820_v48 = vpop.f32.mrf.mxu0 }
 0x3e5   : > { %v11887_v51 = vpack.c.bf16 %v4085_v31, %v4083_v1  ;;  %v4086_v36 = vmax.f32 %v4018_v22, 0.0  ;;  %v11890_v58 = vadd.f32 %v3820_v48, %v11617_v10  ;;  %v4019_v13 = vadd.f32 %v11730_v50, %v3939_v55  ;;  %v11904_v10 = vpop.f32.mrf.mxu1 }
 0x3e6   : > { %v3822_v28 = vpop.f32.mrf.mxu0 }
 0x3e7   : > { %v3941_v42 = vadd.f32 %v3822_v28, %v11621_v32  ;;  %v11896_v38 = vpack.c.bf16 %v4086_v36, %v4084_v41  ;;  %v4087_v27 = vmax.f32 %v4019_v13, 0.0  ;;  %v11914_v49 = vpop.f32.mrf.mxu1 }
 0x3e8   : > { %v11898_v59 = vpop.f32.mrf.mxu0 }
 0x3e9   : > { %v4021_v56 = vadd.f32 %v11730_v50, %v3941_v42  ;;  %4319 = vmatprep.subr.bf16.mxu1 %v11896_v38  ;;  %v11923_v25 = vpop.f32.mrf.mxu1 }
 0x3ea   : > { %v3828_v37 = vpop.f32.mrf.mxu0  ;;  %4320 = vmatpush1.bf16.msra.mxu1 %v11887_v51 }
 0x3eb   : > { %v4089_v7 = vmax.f32 %v4021_v56, 0.0  ;;  %v3943_v46 = vadd.f32 %v3828_v37, %v11629_v11  ;;  %4321 = vmatprep.subr.bf16.mxu1 %v11902_v61  ;;  %v11934_v13 = vpop.f32.mrf.mxu1 }
 0x3ec   : > { %v3830_v32 = vpop.f32.mrf.mxu0 }
 0x3ed   : > { %v11909_v9 = vpack.c.bf16 %v4089_v7, %v4087_v27  ;;  %v11912_v57 = vadd.f32 %v3830_v32, %v11632_v52  ;;  %v4023_v31 = vadd.f32 %v11730_v50, %v3943_v46  ;;  %v3570_v7 = vadd.f32 %v11824_v60, %v11652_v23  ;;  %v11944_v46 = vpop.f32.mrf.mxu1 }
 0x3ee   : > { %v3832_v1 = vpop.f32.mrf.mxu0  ;;  %4322 = vmatpush1.bf16.msra.mxu1 %v11871_v45 }
 0x3ef   : > { %v3945_v22 = vadd.f32 %v3832_v1, %v11638_v62  ;;  %4323 = vmatprep.subr.bf16.mxu1 %v11856_v20  ;;  %v4091_v52 = vmax.f32 %v4023_v31, 0.0 }
 0x3f0   : > { %v11920_v11 = vpop.f32.mrf.mxu0 }
 0x3f1   : > { %v4025_v55 = vadd.f32 %v11730_v50, %v3945_v22 }
 0x3f2   : > { %v3838_v48 = vpop.f32.mrf.mxu0  ;;  %4324 = vmatpush1.bf16.msra.mxu1 %v11848_v12 }
 0x3f3   : > { %v4093_v41 = vmax.f32 %v4025_v55, 0.0  ;;  %v3947_v36 = vadd.f32 %v3838_v48, %v11644_v24  ;;  %4325 = vmatprep.subr.bf16.mxu1 %v11837_v54  ;;  %v3572_v55 = vadd.f32 %v11843_v3, %v11658_v8  ;;  %v11954_v48 = vpop.f32.mrf.mxu1  ;;  %v3574_v8 = vadd.f32 %v11863_v34, %v11663_v44 }
 0x3f4   : > { %v11928_v28 = vpop.f32.mrf.mxu0  ;;  %v3576_v44 = vadd.f32 %v11882_v53, %v11669_v35  ;;  %v3578_v35 = vadd.f32 %v11904_v10, %v11674_v17 }
 0x3f5   : > { %v11930_v62 = vpack.c.bf16 %v4093_v41, %v4091_v52  ;;  %v4027_v56 = vadd.f32 %v11730_v50, %v3947_v36  ;;  %v14018_v36 = vld [vmem:[#allocation11_spill] sm:$0xff]  ;;  %v3501_v3 = vpop.f32.mrf.mxu1 }
 0x3f6   : > { %v3842_v42 = vpop.f32.mrf.mxu0  ;;  %4326 = vmatpush1.bf16.msra.mxu1 %v11831_v47 }
 0x3f7   : > { %v3949_v37 = vadd.f32 %v3842_v42, %v3568_v0  ;;  %4327 = vmatprep.subr.bf16.mxu1 %v11812_v26  ;;  %v4095_v4 = vmax.f32 %v4027_v56, 0.0  ;;  %v14019_v0 = vld [vmem:[#allocation39_spill] sm:$0xff]  ;;  %v3503_v34 = vpop.f32.mrf.mxu1 }
 0x3f8   : > { %v11939_v24 = vpop.f32.mrf.mxu0  ;;  %v2739_v42 = vadd.f32 %v14019_v0, %v14018_v36  ;;  %v14021_v36 = vld [vmem:[#allocation23_spill] sm:$0xff] }
 0x3f9   : > { %v4029_v27 = vadd.f32 %v11730_v50, %v3949_v37  ;;  %v3507_v53 = vpop.f32.mrf.mxu1 }
 0x3fa   : > { %v3848_v40 = vpop.f32.mrf.mxu0  ;;  %4328 = vmatpush1.bf16.msra.mxu1 %v11806_v14 }
 0x3fb   : > { %v4097_v32 = vmax.f32 %v4029_v27, 0.0  ;;  %v3951_v1 = vadd.f32 %v3848_v40, %v3570_v7  ;;  %4329 = vmatprep.subr.bf16.mxu1 %v11790_v30  ;;  %v3575_v27 = vadd.f32 %v11875_v16, %v11666_v15  ;;  %v3162_v7 = vadd.f32 %v11671_v43, %v2739_v42 }
 0x3fc   : > { %v11948_v31 = vpop.f32.mrf.mxu0 }
 0x3fd   : > { %v11950_v22 = vpack.c.bf16 %v4097_v32, %v4095_v4  ;;  %v4031_v60 = vadd.f32 %v11730_v50, %v3951_v1  ;;  %v3577_v43 = vadd.f32 %v11892_v6, %v3162_v7 }
 0x3fe   : > { %v3852_v23 = vpop.f32.mrf.mxu0  ;;  %4330 = vmatpush1.bf16.msra.mxu1 %v11784_v29 }
 0x3ff   : > { %v3953_v52 = vadd.f32 %v3852_v23, %v3572_v55  ;;  %4331 = vmatprep.subr.bf16.mxu1 %v11770_v33  ;;  %v4099_v40 = vmax.f32 %v4031_v60, 0.0  ;;  %v14020_v60 = vld [vmem:[#allocation17_spill] sm:$0xff] }
 0x400   : > { %v11959_v41 = vpop.f32.mrf.mxu0  ;;  %v2749_v0 = vadd.f32 %v14021_v36, %v14020_v60 }
 0x401   : > { %v4033_v56 = vadd.f32 %v11730_v50, %v3953_v52 }
 0x402   : > { %v3858_v37 = vpop.f32.mrf.mxu0  ;;  %4332 = vmatpush1.bf16.msra.mxu1 %v11766_v19 }
 0x403   : > { %v4101_v4 = vmax.f32 %v4033_v56, 0.0  ;;  %v3955_v32 = vadd.f32 %v3858_v37, %v3574_v8  ;;  %4333 = vmatprep.subr.bf16.mxu1 %v11753_v39 }
 0x404   : > { %v3860_v1 = vpop.f32.mrf.mxu0 }
 0x405   : > { %v11971_v55 = vpack.c.bf16 %v4101_v4, %v4099_v40  ;;  %v3956_v23 = vadd.f32 %v3860_v1, %v3575_v27  ;;  %v4035_v15 = vadd.f32 %v11730_v50, %v3955_v32  ;;  %v3166_v27 = vadd.f32 %v11682_v63, %v2749_v0  ;;  %v14023_v0 = vld [vmem:[#allocation16_spill] sm:$0xff] }
 0x406   : > { %v3862_v52 = vpop.f32.mrf.mxu0  ;;  %4334 = vmatpush1.bf16.msra.mxu1 %v11747_v18  ;;  %v3579_v4 = vadd.f32 %v11914_v49, %v11677_v21 }
 0x407   : > { %v3957_v16 = vadd.f32 %v3862_v52, %v3576_v44  ;;  %v4036_v56 = vadd.f32 %v11735_v2, %v3956_v23  ;;  %v4103_v6 = vmax.f32 %v4035_v15, 0.0  ;;  %v3580_v23 = vadd.f32 %v11923_v25, %v11680_v5  ;;  %v14022_v15 = vld [vmem:[#allocation20_spill] sm:$0xff] }
 0x408   : > { %v3864_v42 = vpop.f32.mrf.mxu0  ;;  %v3581_v21 = vadd.f32 %v11934_v13, %v3166_v27 }
 0x409   : > { %v4037_v8 = vadd.f32 %v11730_v50, %v3957_v16  ;;  %v3958_v37 = vadd.f32 %v3864_v42, %v3577_v43  ;;  %v4104_v52 = vmax.f32 %v4036_v56, 0.0  ;;  %v3509_v43 = vpop.f32.mrf.mxu1  ;;  %v2759_v42 = vadd.f32 %v14023_v0, %v14022_v15 }
 0x40a   : > { %v3868_v40 = vpop.f32.mrf.mxu0 }
 0x40b   : > { %v4105_v7 = vmax.f32 %v4037_v8, 0.0  ;;  %v4038_v32 = vadd.f32 %v11735_v2, %v3958_v37  ;;  %v3959_v1 = vadd.f32 %v3868_v40, %v3578_v35  ;;  %v14024_v37 = vld [vmem:[#allocation90_spill] sm:$0xff]  ;;  %v3511_v40 = vpop.f32.mrf.mxu1 }
 0x40c   : > { %v3870_v44 = vpop.f32.mrf.mxu0  ;;  %v3582_v35 = vadd.f32 %v11944_v46, %v14024_v37 }
 0x40d   : > { %v11990_v16 = vpack.c.bf16 %v4105_v7, %v4103_v6  ;;  %v4106_v17 = vmax.f32 %v4038_v32, 0.0  ;;  %v3960_v10 = vadd.f32 %v3870_v44, %v3579_v4  ;;  %v4039_v60 = vadd.f32 %v11730_v50, %v3959_v1  ;;  %v14025_v4 = vld [vmem:[#allocation92_spill] sm:$0xff]  ;;  %v14026_v32 = vld [vmem:[#allocation91_spill] sm:$0xff]  ;;  %v3513_v15 = vpop.f32.mrf.mxu1 }
 0x40e   : > { %v3872_v63 = vpop.f32.mrf.mxu0  ;;  %v3170_v6 = vadd.f32 %v14025_v4, %v2759_v42  ;;  %v3583_v13 = vadd.f32 %v11954_v48, %v14026_v32 }
 0x40f   : > { %v3961_v36 = vadd.f32 %v3872_v63, %v3580_v23  ;;  %v11994_v49 = vpack.c.bf16 %v4106_v17, %v4104_v52  ;;  %v4040_v5 = vadd.f32 %v11735_v2, %v3960_v10  ;;  %v4107_v27 = vmax.f32 %v4039_v60, 0.0  ;;  %v14027_v17 = vld [vmem:[#allocation14_spill] sm:$0xff]  ;;  %v14028_v60 = vld [vmem:[#allocation60_spill] sm:$0xff] }
 0x410   : > { %v3874_v8 = vpop.f32.mrf.mxu0  ;;  %v3584_v10 = vadd.f32 %v3501_v3, %v14027_v17  ;;  %v3585_v37 = vadd.f32 %v3503_v34, %v3170_v6 }
 0x411   : > { %v4041_v25 = vadd.f32 %v11730_v50, %v3961_v36  ;;  %v3962_v56 = vadd.f32 %v3874_v8, %v3581_v21  ;;  %v4108_v63 = vmax.f32 %v4040_v5, 0.0 }
 0x412   : > { %v3878_v7 = vpop.f32.mrf.mxu0 }
 0x413   : > { %v4109_v1 = vmax.f32 %v4041_v25, 0.0  ;;  %v4042_v44 = vadd.f32 %v11735_v2, %v3962_v56  ;;  %v3963_v23 = vadd.f32 %v3878_v7, %v3582_v35  ;;  %v14029_v25 = vld [vmem:[#allocation40_spill] sm:$0xff]  ;;  %v14030_v7 = vld [vmem:[#allocation25_spill] sm:$0xff] }
 0x414   : > { %v3880_v52 = vpop.f32.mrf.mxu0  ;;  %v2769_v56 = vadd.f32 %v14029_v25, %v14028_v60  ;;  %v3586_v32 = vadd.f32 %v3507_v53, %v14030_v7 }
 0x415   : > { %v12007_v36 = vpack.c.bf16 %v4109_v1, %v4107_v27  ;;  %v4110_v21 = vmax.f32 %v4042_v44, 0.0  ;;  %v3964_v46 = vadd.f32 %v3880_v52, %v3583_v13  ;;  %v4043_v42 = vadd.f32 %v11730_v50, %v3963_v23  ;;  %v3517_v13 = vpop.f32.mrf.mxu1  ;;  %v14031_v27 = vld [vmem:[#allocation93_spill] sm:$0xff]  ;;  %v14032_v23 = vld [vmem:[#allocation31_spill] sm:$0xff] }
 0x416   : > { %v3882_v0 = vpop.f32.mrf.mxu0  ;;  %v3174_v1 = vadd.f32 %v14031_v27, %v2769_v56  ;;  %v3587_v52 = vadd.f32 %v3509_v43, %v14032_v23  ;;  %v14037_v27 = vld [vmem:[#allocation28_spill] sm:$0xff] }
 0x417   : > { %v3965_v8 = vadd.f32 %v3882_v0, %v3584_v10  ;;  %v12010_v48 = vpack.c.bf16 %v4110_v21, %v4108_v63  ;;  %v4044_v4 = vadd.f32 %v11735_v2, %v3964_v46  ;;  %v4111_v34 = vmax.f32 %v4043_v42, 0.0  ;;  %v14033_v21 = vld [vmem:[#allocation12_spill] sm:$0xff]  ;;  %v3519_v53 = vpop.f32.mrf.mxu1  ;;  %v14034_v42 = vld [vmem:[#allocation30_spill] sm:$0xff] }
 0x418   : > { %v3884_v35 = vpop.f32.mrf.mxu0  ;;  %v3588_v0 = vadd.f32 %v3511_v40, %v14033_v21  ;;  %v3589_v7 = vadd.f32 %v3513_v15, %v3174_v1  ;;  %v14040_v15 = vld [vmem:[#allocation95_spill] sm:$0xff] }
 0x419   : > { %v4045_v3 = vadd.f32 %v11730_v50, %v3965_v8  ;;  %v3966_v5 = vadd.f32 %v3884_v35, %v3585_v37  ;;  %v4112_v46 = vmax.f32 %v4044_v4, 0.0 }
 0x41a   : > { %v3888_v44 = vpop.f32.mrf.mxu0 }
 0x41b   : > { %v4113_v6 = vmax.f32 %v4045_v3, 0.0  ;;  %v4046_v17 = vadd.f32 %v11735_v2, %v3966_v5  ;;  %v3967_v10 = vadd.f32 %v3888_v44, %v3586_v32  ;;  %v14035_v3 = vld [vmem:[#allocation34_spill] sm:$0xff]  ;;  %v14036_v32 = vld [vmem:[#allocation64_spill] sm:$0xff] }
 0x41c   : > { %v3890_v63 = vpop.f32.mrf.mxu0  ;;  %v2729_v5 = vadd.f32 %v14035_v3, %v14034_v42  ;;  %v2779_v44 = vadd.f32 %v14037_v27, %v14036_v32  ;;  %v14042_v32 = vld [vmem:[#allocation27_spill] sm:$0xff] }
 0x41d   : > { %v12021_v60 = vpack.c.bf16 %v4113_v6, %v4111_v34  ;;  %v4114_v8 = vmax.f32 %v4046_v17, 0.0  ;;  %v3968_v37 = vadd.f32 %v3890_v63, %v3587_v52  ;;  %v4047_v56 = vadd.f32 %v11730_v50, %v3967_v10  ;;  %v14038_v34 = vld [vmem:[#allocation38_spill] sm:$0xff]  ;;  %v14039_v17 = vld [vmem:[#allocation89_spill] sm:$0xff]  ;;  %v3521_v63 = vpop.f32.mrf.mxu1 }
 0x41e   : > { %v3892_v25 = vpop.f32.mrf.mxu0  ;;  %v3590_v6 = vadd.f32 %v3517_v13, %v14038_v34  ;;  %v3158_v10 = vadd.f32 %v14039_v17, %v2729_v5  ;;  %v3178_v1 = vadd.f32 %v14040_v15, %v2779_v44  ;;  %v14045_v44 = vld [vmem:[#allocation87_spill] sm:$0xff] }
 0x41f   : > { %v3969_v35 = vadd.f32 %v3892_v25, %v3588_v0  ;;  %v12024_v43 = vpack.c.bf16 %v4114_v8, %v4112_v46  ;;  %v4048_v4 = vadd.f32 %v11735_v2, %v3968_v37  ;;  %v14041_v0 = vld [vmem:[#allocation62_spill] sm:$0xff]  ;;  %v4115_v8 = vmax.f32 %v4047_v56, 0.0  ;;  %v14043_v37 = vld [vmem:[#allocation32_spill] sm:$0xff]  ;;  %v3523_v18 = vpop.f32.mrf.mxu1 }
 0x420   : > { %v3894_v40 = vpop.f32.mrf.mxu0  ;;  %v3591_v46 = vadd.f32 %v3519_v53, %v14041_v0  ;;  %v2719_v27 = vadd.f32 %v14043_v37, %v14042_v32  ;;  %v14046_v53 = vld [vmem:[#allocation48_spill] sm:$0xff]  ;;  %v14048_v37 = vld [vmem:[#allocation29_spill] sm:$0xff] }
 0x421   : > { %v4049_v23 = vadd.f32 %v11730_v50, %v3969_v35  ;;  %v3970_v52 = vadd.f32 %v3894_v40, %v3589_v7  ;;  %v14044_v7 = vld [vmem:[#allocation63_spill] sm:$0xff]  ;;  %v4116_v13 = vmax.f32 %v4048_v4, 0.0  ;;  %v3573_v56 = vadd.f32 %v14046_v53, %v3158_v10  ;;  %v14047_v32 = vld [vmem:[#allocation24_spill] sm:$0xff]  ;;  %v14055_v53 = vld [vmem:[#allocation86_spill] sm:$0xff] }
 0x422   : > { %v3898_v21 = vpop.f32.mrf.mxu0  ;;  %v3592_v40 = vadd.f32 %v3521_v63, %v14044_v7  ;;  %v3154_v15 = vadd.f32 %v14045_v44, %v2719_v27  ;;  %v2709_v63 = vadd.f32 %v14048_v37, %v14047_v32  ;;  %v14049_v4 = vld [vmem:[#allocation88_spill] sm:$0xff] }
 0x423   : > { %v4117_v25 = vmax.f32 %v4049_v23, 0.0  ;;  %v4050_v42 = vadd.f32 %v11735_v2, %v3970_v52  ;;  %v3971_v3 = vadd.f32 %v3898_v21, %v3590_v6  ;;  %v3593_v21 = vadd.f32 %v3523_v18, %v3178_v1  ;;  %v14052_v1 = vld [vmem:[#allocation61_spill] sm:$0xff] }
 0x424   : > { %v3900_v35 = vpop.f32.mrf.mxu0  ;;  %v3569_v7 = vadd.f32 %v14052_v1, %v3154_v15  ;;  %v14060_v1 = vmov 0  }
 0x425   : > { %v12040_v34 = vpack.c.bf16 %v4117_v25, %v4115_v8  ;;  %v4118_v5 = vmax.f32 %v4050_v42, 0.0  ;;  %v3972_v17 = vadd.f32 %v3900_v35, %v3591_v46  ;;  %v4051_v52 = vadd.f32 %v11730_v50, %v3971_v3  ;;  %v14050_v8 = vld [vmem:[#allocation49_spill] sm:$0xff] }
 0x426   : > { %v3902_v23 = vpop.f32.mrf.mxu0  ;;  %v3571_v25 = vadd.f32 %v14050_v8, %v14049_v4  ;;  %v3954_v46 = vadd.f32 %v11959_v41, %v3573_v56  ;;  %v14051_v3 = vld [vmem:[#allocation85_spill] sm:$0xff]  ;;  %v14053_v41 = vld [vmem:[#allocation19_spill] sm:$0xff] }
 0x427   : > { %v3973_v6 = vadd.f32 %v3902_v23, %v3592_v40  ;;  %v12045_v0 = vpack.c.bf16 %v4118_v5, %v4116_v13  ;;  %v4052_v27 = vadd.f32 %v11735_v2, %v3972_v17  ;;  %v3150_v18 = vadd.f32 %v14051_v3, %v2709_v63  ;;  %v14054_v17 = vld [vmem:[#allocation26_spill] sm:$0xff]  ;;  %v14056_v56 = vld [vmem:[#allocation45_spill] sm:$0xff]  ;;  %v14058_v63 = vld [vmem:[#allocation84_spill] sm:$0xff] }
 0x428   : > { %v3904_v42 = vpop.f32.mrf.mxu0  ;;  %v3952_v40 = vadd.f32 %v11948_v31, %v3571_v25  ;;  %v4119_v13 = vmax.f32 %v4051_v52, 0.0  ;;  %v3567_v23 = vadd.f32 %v14056_v56, %v14055_v53  ;;  %v4034_v15 = vadd.f32 %v11735_v2, %v3954_v46  ;;  %v14057_v31 = vld [vmem:[#allocation83_spill] sm:$0xff] }
 0x429   : > { %v4053_v10 = vadd.f32 %v11730_v50, %v3973_v6  ;;  %v3974_v35 = vadd.f32 %v3904_v42, %v3593_v21  ;;  %4335 = vmatprep.subr.bf16.mxu1 %v12045_v0  ;;  %v2699_v50 = vadd.f32 %v14054_v17, %v14053_v41  ;;  %v3950_v6 = vadd.f32 %v11939_v24, %v3569_v7 }
 0x42a   : > { %4336 = vmatpush2.bf16.msra.mxu1 %v12040_v34  ;;  %v4120_v21 = vmax.f32 %v4052_v27, 0.0  ;;  %v3565_v4 = vadd.f32 %v14058_v63, %v3150_v18  ;;  %v3948_v8 = vadd.f32 %v11928_v28, %v3567_v23  ;;  %v4032_v25 = vadd.f32 %v11735_v2, %v3952_v40  ;;  %v8656_v63 = vld [vmem:[%s13991_s4 + $0x4c] ss:$12 sps:$4 sm:$0xff]  }
 0x42b   : > { %v4121_v5 = vmax.f32 %v4053_v10, 0.0  ;;  %v4054_v44 = vadd.f32 %v11735_v2, %v3974_v35  ;;  %4337 = vmatprep.subr.bf16.mxu1 %v12024_v43  ;;  %v3146_v52 = vadd.f32 %v14057_v31, %v2699_v50  ;;  %v4030_v46 = vadd.f32 %v11735_v2, %v3950_v6  ;;  %v14059_v35 = vld [vmem:[#allocation81_spill] sm:$0xff]  ;;  %v8653_v31 = vld [vmem:[%s13991_s4 + $0x34] ss:$12 sps:$4 sm:$0xff]  }
 0x42c   : > { %v3946_v24 = vadd.f32 %v11920_v11, %v3565_v4  ;;  %v4102_v27 = vmax.f32 %v4034_v15, 0.0  ;;  %v4028_v28 = vadd.f32 %v11735_v2, %v3948_v8  ;;  %v4100_v18 = vmax.f32 %v4032_v25, 0.0  ;;  %v8645_v15 = vld [vmem:[%s13991_s4] ss:$12 sps:$4 sm:$0xff]   ;;  %v8692_v4 = vld [vmem:[%s13991_s4 + $0x110] ss:$12 sps:$4 sm:$0xff]  }
 0x42d   : > { %v4155_v32 = vpack.c.bf16 %v4121_v5, %v4119_v13  ;;  %v4122_v37 = vmax.f32 %v4054_v44, 0.0  ;;  %v3561_v3 = vadd.f32 %v14059_v35, %v3146_v52  ;;  %v4098_v40 = vmax.f32 %v4030_v46, 0.0  ;;  %v8651_v52 = vld [vmem:[%s13991_s4 + $0x30] ss:$12 sps:$4 sm:$0xff]   ;;  %v8654_v8 = vld [vmem:[%s13991_s4 + $0x48] ss:$12 sps:$4 sm:$0xff]  }
 0x42e   : > { %4338 = vmatpush2.bf16.msra.mxu1 %v12021_v60  ;;  %v4026_v7 = vadd.f32 %v11735_v2, %v3946_v24  ;;  %v12084_v13 = vpack.c.bf16 %v4102_v27, %v4100_v18  ;;  %v4024_v5 = vadd.f32 %v11735_v2, %v11912_v57  ;;  %v4096_v44 = vmax.f32 %v4028_v28, 0.0  ;;  %v8676_v57 = vld [vmem:[%s13991_s4 + $0xb0] ss:$12 sps:$4 sm:$0xff]   ;;  %v8657_v24 = vld [vmem:[%s13991_s4 + $0x60] ss:$12 sps:$4 sm:$0xff]  }
 0x42f   : > { %v4156_v42 = vpack.c.bf16 %v4122_v37, %v4120_v21  ;;  %4339 = vmatprep.subr.bf16.mxu1 %v12010_v48  ;;  %v4314_v10 = vsel %vm4312_vm5, %v4155_v32, 0  ;;  %v3942_v11 = vadd.f32 %v11898_v59, %v3561_v3  ;;  %v4020_v59 = vadd.f32 %v11735_v2, %v11890_v58  ;;  %v8680_v58 = vld [vmem:[%s13991_s4 + $0xc8] ss:$12 sps:$4 sm:$0xff]   ;;  %v8684_v32 = vld [vmem:[%s13991_s4 + $0xe0] ss:$12 sps:$4 sm:$0xff]  }
 0x430   : > { %v4094_v17 = vmax.f32 %v4026_v7, 0.0  ;;  %v12091_v50 = vpack.c.bf16 %v4098_v40, %v4096_v44  ;;  %v4092_v53 = vmax.f32 %v4024_v5, 0.0  ;;  %v8650_v21 = vld [vmem:[%s13991_s4 + $0x1c] ss:$12 sps:$4 sm:$0xff]   ;;  %v8648_v37 = vld [vmem:[%s13991_s4 + $0x18] ss:$12 sps:$4 sm:$0xff]  }
 0x431   : > { %8041 = vmatprep.subr.msk.bf16.mxu0 %vm4312_vm5, %v4156_v42  ;;  %v4022_v41 = vadd.f32 %v11735_v2, %v3942_v11  ;;  %v4088_v6 = vmax.f32 %v4020_v59, 0.0  ;;  %v8659_v25 = vld [vmem:[%s13991_s4 + $0x64] ss:$12 sps:$4 sm:$0xff]   ;;  %v8662_v46 = vld [vmem:[%s13991_s4 + $0x7c] ss:$12 sps:$4 sm:$0xff]   ;;  %v8708_v7 = vld [vmem:[%s13623_s5 + $0x74] sm:$0xff]  }
 0x432   : > { %4340 = vmatpush2.bf16.msra.mxu1 %v12007_v36  ;;  %4798 = vmatpush1.bf16.msra.mxu0 %v4314_v10  ;;  %v12100_v23 = vpack.c.bf16 %v4094_v17, %v4092_v53  ;;  %v8700_v27 = vld [vmem:[%s13991_s4 + $0x140] ss:$12 sps:$4 sm:$0xff]   ;;  %v8663_v3 = vld [vmem:[%s13991_s4 + $0x90] ss:$12 sps:$4 sm:$0xff]   ;;  %v8666_v28 = vld [vmem:[%s13991_s4 + $0x8] ss:$12 sps:$4 sm:$0xff]  }
 0x433   : > { %4341 = vmatprep.subr.bf16.mxu1 %v11994_v49  ;;  %5215 = vmatprep.subr.bf16.mxu0 %v14060_v1  ;;  %v4090_v56 = vmax.f32 %v4022_v41, 0.0  ;;  %v8665_v35 = vld [vmem:[%s13991_s4 + $0x94] ss:$12 sps:$4 sm:$0xff]   ;;  %v8709_v40 = vld [vmem:[%s13623_s5 + $0x18] sm:$0xff]   ;;  %v8712_v44 = vld [vmem:[%s13623_s5 + $0x64] sm:$0xff]  }
 0x434   : > { %v8667_v18 = vld [vmem:[%s13991_s4 + $0x20] ss:$12 sps:$4 sm:$0xff]   ;;  %v8711_v5 = vld [vmem:[%s13623_s5 + $0x10] sm:$0xff]  }
 0x435   : > { %8042 = vmatmul.mubr.msk.bf16.vlgmr.msra.gmra.mxu0 %vm4290_vm6, %v8676_v57  ;;  %v12106_v2 = vpack.c.bf16 %v4090_v56, %v4088_v6  ;;  %v8707_v11 = vld [vmem:[%s13623_s5 + $0x20] sm:$0xff]   ;;  %v8713_v41 = vld [vmem:[%s13623_s5 + $0x8] sm:$0xff]   ;;  %v8716_v59 = vld [vmem:[%s13623_s5 + $0x54] sm:$0xff]  }
 0x436   : > { %4342 = vmatpush2.bf16.msra.mxu1 %v11990_v16  ;;  %4825 = vmatprep.mubr.bf16.mxu0 %v14060_v1  ;;  %v8714_v17 = vld [vmem:[%s13623_s5 + $0x5c] sm:$0xff]   ;;  %v8717_v53 = vld [vmem:[%s13623_s5 + $0x50] ss:$0 sps:$4 sm:$0xff]   ;;  %v8718_v57 = vld [vmem:[%s13623_s5 + $0xa4] ss:$0 sps:$4 sm:$0xff]  }
 0x437   : > { %4343 = vmatprep.subr.bf16.mxu1 %v12084_v13  ;;  %v5036_v56 = vsel %vm5034_vm7, %v8717_v53, 0  ;;  %v8719_v6 = vld [vmem:[%s13623_s5 + $0x48] sm:$0xff]  }
 0x43a   : > { %4344 = vmatpush2.bf16.msra.mxu1 %v11971_v55 }
 0x43b   : > { %4345 = vmatprep.subr.bf16.mxu1 %v12091_v50 }
 0x43d   : > { %8043 = vmatmul.mubr.msk.bf16.gmra.mxu0 %vm4290_vm6, %v8680_v58 }
 0x43e   : > { %4346 = vmatpush2.bf16.msra.mxu1 %v11950_v22  ;;  %4835 = vmatprep.mubr.bf16.mxu0 %v14060_v1 }
 0x43f   : > { %4347 = vmatprep.subr.bf16.mxu1 %v12100_v23 }
 0x442   : > { %4348 = vmatpush2.bf16.msra.mxu1 %v11930_v62 }
 0x443   : > { %4349 = vmatprep.subr.bf16.mxu1 %v12106_v2 }
 0x445   : > { %8044 = vmatmul.mubr.msk.bf16.gmra.mxu0 %vm4290_vm6, %v8684_v32  ;;  %v8722_v32 = vld [vmem:[%s13623_s5 + $0x94] sm:$0xff]  }
 0x446   : > { %4350 = vmatpush2.bf16.msra.mxu1 %v11909_v9  ;;  %4845 = vmatprep.mubr.bf16.mxu0 %v14060_v1 }
 0x447   : > { %7984 = vmatprep.subr.msk.bf16.mxu1 %vm4312_vm5, %v4156_v42  ;;  %v8696_v42 = vld [vmem:[%s13991_s4 + $0x128] ss:$12 sps:$4 sm:$0xff]  }
 0x449   : > { %4352 = vmatmul.mubr.bf16.vlgmr.msra.gmra.mxu1 %v8645_v15 }
 0x44a   : > { %4437 = vmatpush1.bf16.msra.mxu1 %v4314_v10  ;;  %4361 = vmatprep.mubr.bf16.mxu1 %v8650_v21  ;;  %v8660_v10 = vld [vmem:[%s13991_s4 + $0x78] ss:$12 sps:$4 sm:$0xff]  }
 0x44b   : > { %4680 = vmatprep.subr.bf16.mxu1 %v11896_v38  ;;  %v8688_v38 = vld [vmem:[%s13991_s4 + $0xf8] ss:$12 sps:$4 sm:$0xff]  }
 0x44c   : > { %v8721_v21 = vld [vmem:[%s13623_s5 + $0x40] sm:$0xff]  }
 0x44d   : > { %8045 = vmatmul.mubr.msk.bf16.gmra.mxu0 %vm4290_vm6, %v8688_v38 }
 0x44e   : > { %4855 = vmatprep.mubr.bf16.mxu0 %v14060_v1 }
 0x451   : > { %4362 = vmatmul.mubr.bf16.gmra.mxu1 %v8648_v37 }
 0x452   : > { %4371 = vmatprep.mubr.bf16.mxu1 %v8653_v31 }
 0x455   : > { %8046 = vmatmul.mubr.msk.bf16.gmra.mxu0 %vm4290_vm6, %v8692_v4 }
 0x456   : > { %4865 = vmatprep.mubr.bf16.mxu0 %v14060_v1 }
 0x459   : > { %4372 = vmatmul.mubr.bf16.gmra.mxu1 %v8651_v52 }
 0x45a   : > { %4381 = vmatprep.mubr.bf16.mxu1 %v8656_v63 }
 0x45d   : > { %8047 = vmatmul.mubr.msk.bf16.gmra.mxu0 %vm4290_vm6, %v8696_v42 }
 0x45e   : > { %4875 = vmatprep.mubr.bf16.mxu0 %v14060_v1 }
 0x461   : > { %4382 = vmatmul.mubr.bf16.gmra.mxu1 %v8654_v8 }
 0x462   : > { %4391 = vmatprep.mubr.bf16.mxu1 %v8659_v25 }
 0x465   : > { %8048 = vmatmul.mubr.msk.bf16.gmra.mxu0 %vm4290_vm6, %v8700_v27 }
 0x469   : > { %4392 = vmatmul.mubr.bf16.gmra.mxu1 %v8657_v24 }
 0x46a   : > { %4401 = vmatprep.mubr.bf16.mxu1 %v8662_v46 }
 0x471   : > { %4402 = vmatmul.mubr.bf16.gmra.mxu1 %v8660_v10 }
 0x472   : > { %4411 = vmatprep.mubr.bf16.mxu1 %v8665_v35 }
 0x479   : > { %4412 = vmatmul.mubr.bf16.gmra.mxu1 %v8663_v3 }
 0x47a   : > { %4454 = vmatprep.mubr.bf16.mxu1 %v14060_v1 }
 0x481   : > { %7985 = vmatmul.mubr.msk.bf16.vlgmr.msra.gmra.mxu1 %vm4290_vm6, %v8666_v28 }
 0x482   : > { %4681 = vmatpush1.bf16.msra.mxu1 %v11887_v51  ;;  %4464 = vmatprep.mubr.bf16.mxu1 %v14060_v1  ;;  %v8668_v51 = vld [vmem:[%s13991_s4 + $0x38] ss:$12 sps:$4 sm:$0xff]  }
 0x483   : > { %4682 = vmatprep.subr.bf16.mxu1 %v11902_v61  ;;  %v8685_v61 = vld [vmem:[%s13991_s4 + $0xf0] ss:$12 sps:$4 sm:$0xff]  }
 0x486   : > { %4683 = vmatpush1.bf16.msra.mxu1 %v11871_v45  ;;  %v8681_v45 = vld [vmem:[%s13991_s4 + $0xd8] ss:$12 sps:$4 sm:$0xff]  }
 0x487   : > { %4684 = vmatprep.subr.bf16.mxu1 %v11856_v20  ;;  %v8687_v20 = vld [vmem:[%s13991_s4 + $0xf4] ss:$12 sps:$4 sm:$0xff]  }
 0x489   : > { %7986 = vmatmul.mubr.msk.bf16.gmra.mxu1 %vm4290_vm6, %v8667_v18 }
 0x48a   : > { %4685 = vmatpush1.bf16.msra.mxu1 %v11848_v12  ;;  %4474 = vmatprep.mubr.bf16.mxu1 %v14060_v1  ;;  %v8683_v12 = vld [vmem:[%s13991_s4 + $0xdc] ss:$12 sps:$4 sm:$0xff]  }
 0x48b   : > { %4686 = vmatprep.subr.bf16.mxu1 %v11837_v54  ;;  %v8669_v54 = vld [vmem:[%s13991_s4 + $0x50] ss:$12 sps:$4 sm:$0xff]  }
 0x48e   : > { %4687 = vmatpush1.bf16.msra.mxu1 %v11831_v47  ;;  %v8677_v47 = vld [vmem:[%s13991_s4 + $0xc0] ss:$12 sps:$4 sm:$0xff]  }
 0x48f   : > { %4688 = vmatprep.subr.bf16.mxu1 %v11812_v26  ;;  %v8679_v26 = vld [vmem:[%s13991_s4 + $0xc4] ss:$12 sps:$4 sm:$0xff]  }
 0x491   : > { %7987 = vmatmul.mubr.msk.bf16.gmra.mxu1 %vm4290_vm6, %v8668_v51 }
 0x492   : > { %4689 = vmatpush1.bf16.msra.mxu1 %v11806_v14  ;;  %4484 = vmatprep.mubr.bf16.mxu1 %v14060_v1  ;;  %v14061_v14 = vld [vmem:[#allocation47_spill] sm:$0xff] }
 0x493   : > { %4690 = vmatprep.subr.bf16.mxu1 %v11790_v30  ;;  %v8670_v30 = vld [vmem:[%s13991_s4 + $0x68] ss:$12 sps:$4 sm:$0xff]  }
 0x496   : > { %4691 = vmatpush1.bf16.msra.mxu1 %v11784_v29  ;;  %v8673_v29 = vld [vmem:[%s13991_s4 + $0xa8] ss:$12 sps:$4 sm:$0xff]  }
 0x497   : > { %4692 = vmatprep.subr.bf16.mxu1 %v11770_v33  ;;  %v8675_v33 = vld [vmem:[%s13991_s4 + $0xac] ss:$12 sps:$4 sm:$0xff]  }
 0x499   : > { %7988 = vmatmul.mubr.msk.bf16.gmra.mxu1 %vm4290_vm6, %v8669_v54 }
 0x49a   : > { %4693 = vmatpush1.bf16.msra.mxu1 %v11766_v19  ;;  %4494 = vmatprep.mubr.bf16.mxu1 %v14060_v1  ;;  %v8672_v19 = vld [vmem:[%s13991_s4 + $0x98] ss:$12 sps:$4 sm:$0xff]  }
 0x49b   : > { %4694 = vmatprep.subr.bf16.mxu1 %v11753_v39  ;;  %v8671_v39 = vld [vmem:[%s13991_s4 + $0x80] ss:$12 sps:$4 sm:$0xff]  }
 0x49e   : > { %4695 = vmatpush1.bf16.msra.mxu1 %v14061_v14 }
 0x49f   : > { %4696 = vmatprep.subr.bf16.mxu1 %v12045_v0  ;;  %v8697_v0 = vld [vmem:[%s13991_s4 + $0x138] ss:$12 sps:$4 sm:$0xff]  }
 0x4a1   : > { %7989 = vmatmul.mubr.msk.bf16.gmra.mxu1 %vm4290_vm6, %v8670_v30 }
 0x4a2   : > { %4697 = vmatpush2.bf16.msra.mxu1 %v12040_v34  ;;  %4504 = vmatprep.mubr.bf16.mxu1 %v14060_v1  ;;  %v8706_v34 = vld [vmem:[%s13623_s5 + $0x7c] sm:$0xff]  }
 0x4a3   : > { %4698 = vmatprep.subr.bf16.mxu1 %v12024_v43  ;;  %v8705_v43 = vld [vmem:[%s13623_s5 + $0x28] sm:$0xff]  }
 0x4a6   : > { %4699 = vmatpush2.bf16.msra.mxu1 %v12021_v60  ;;  %v8704_v60 = vld [vmem:[%s13623_s5 + $0x84] sm:$0xff]  }
 0x4a7   : > { %4700 = vmatprep.subr.bf16.mxu1 %v12010_v48  ;;  %v8703_v48 = vld [vmem:[%s13623_s5 + $0x30] sm:$0xff]  }
 0x4a9   : > { %7990 = vmatmul.mubr.msk.bf16.gmra.mxu1 %vm4290_vm6, %v8671_v39 }
 0x4aa   : > { %4701 = vmatpush2.bf16.msra.mxu1 %v12007_v36  ;;  %4514 = vmatprep.mubr.bf16.mxu1 %v14060_v1  ;;  %v8699_v36 = vld [vmem:[%s13991_s4 + $0x13c] ss:$12 sps:$4 sm:$0xff]  }
 0x4ab   : > { %4702 = vmatprep.subr.bf16.mxu1 %v11994_v49  ;;  %v8693_v49 = vld [vmem:[%s13991_s4 + $0x120] ss:$12 sps:$4 sm:$0xff]  }
 0x4ae   : > { %4703 = vmatpush2.bf16.msra.mxu1 %v11990_v16  ;;  %v8702_v16 = vld [vmem:[%s13623_s5 + $0x8c] sm:$0xff]  }
 0x4af   : > { %4704 = vmatprep.subr.bf16.mxu1 %v12084_v13  ;;  %5216 = vmatpush1.bf16.msra.mxu0 %v8702_v16  ;;  %v8710_v13 = vld [vmem:[%s13623_s5 + $0x6c] sm:$0xff]  }
 0x4b0   : > { %5217 = vmatprep.subr.bf16.mxu0 %v14060_v1 }
 0x4b1   : > { %7991 = vmatmul.mubr.msk.bf16.gmra.mxu1 %vm4290_vm6, %v8672_v19 }
 0x4b2   : > { %4705 = vmatpush2.bf16.msra.mxu1 %v11971_v55  ;;  %4712 = vmatprep.mubr.bf16.mxu1 %v8675_v33  ;;  %v8701_v55 = vld [vmem:[%s13623_s5 + $0x38] sm:$0xff]  }
 0x4b3   : > { %4706 = vmatprep.subr.bf16.mxu1 %v12091_v50  ;;  %5218 = vmatpush1.bf16.msra.mxu0 %v8704_v60  ;;  %v8715_v50 = vld [vmem:[%s13623_s5] sm:$0xff]  }
 0x4b4   : > { %5219 = vmatprep.subr.bf16.mxu0 %v14060_v1 }
 0x4b6   : > { %4707 = vmatpush2.bf16.msra.mxu1 %v11950_v22  ;;  %v8695_v22 = vld [vmem:[%s13991_s4 + $0x124] ss:$12 sps:$4 sm:$0xff]  }
 0x4b7   : > { %4708 = vmatprep.subr.bf16.mxu1 %v12100_v23  ;;  %5220 = vmatpush1.bf16.msra.mxu0 %v8706_v34  ;;  %v5213_v23 = vsel %vm5034_vm7, %v8718_v57, 0 }
 0x4b8   : > { %5221 = vmatprep.subr.bf16.mxu0 %v14060_v1 }
 0x4ba   : > { %4709 = vmatpush2.bf16.msra.mxu1 %v11930_v62  ;;  %v8689_v62 = vld [vmem:[%s13991_s4 + $0x108] ss:$12 sps:$4 sm:$0xff]  }
 0x4bb   : > { %4710 = vmatprep.subr.bf16.mxu1 %v12106_v2  ;;  %5222 = vmatpush1.bf16.msra.mxu0 %v8708_v7  ;;  %v8720_v2 = vld [vmem:[%s13623_s5 + $0x9c] sm:$0xff]  }
 0x4bc   : > { %5223 = vmatprep.subr.bf16.mxu0 %v14060_v1 }
 0x4be   : > { %4711 = vmatpush2.bf16.msra.mxu1 %v11909_v9  ;;  %v8691_v9 = vld [vmem:[%s13991_s4 + $0x10c] ss:$12 sps:$4 sm:$0xff]   ;;  %s8900_s4 = sshll.u32 %s8968_s3, 4  ;;  %s8901_s4 = int_to_ptr.vmem [resolvable:$false] %s8900_s4 }
 0x4bf   : > { %5038 = vmatprep.subr.bf16.mxu1 %v14060_v1  ;;  %5224 = vmatpush1.bf16.msra.mxu0 %v8710_v13  ;;  %s8902_s25 = scalar_lea.vmem %s8901_s4, 256  ;;  %p8903_p13 = scmp.lt.s32.totalorder %s7755_s2, %s8901_s4 }
 0x4c0   : > { %5225 = vmatprep.subr.bf16.mxu0 %v14060_v1  ;;  %p8904_p0 = scmp.lt.s32.totalorder %s8902_s25, %s8896_s1 }
 0x4c1   : > { %4713 = vmatmul.mubr.bf16.vlgmr.msra.gmra.mxu1 %v8673_v29 }
 0x4c2   : > { %4722 = vmatprep.mubr.bf16.mxu1 %v8679_v26  ;;  %5039 = vmatpush1.bf16.msra.mxu1 %v8701_v55  ;;  %p8905_p1 = por %p8904_p0, %p8903_p13 }
 0x4c3   : > { %5040 = vmatprep.subr.bf16.mxu1 %v14060_v1  ;;  %5226 = vmatpush1.bf16.msra.mxu0 %v8712_v44 }
 0x4c4   : > { %5227 = vmatprep.subr.bf16.mxu0 %v14060_v1  ;;  %p8906_p2 = pnand %p8905_p1, %p8899_p12 }
 0x4c6   : > { %5041 = vmatpush1.bf16.msra.mxu1 %v8703_v48 }
 0x4c7   : > { %5042 = vmatprep.subr.bf16.mxu1 %v14060_v1  ;;  %5228 = vmatpush1.bf16.msra.mxu0 %v8714_v17 }
 0x4c8   : > { %5229 = vmatprep.subr.bf16.mxu0 %v14060_v1 }
 0x4c9   : > { %4723 = vmatmul.mubr.bf16.gmra.mxu1 %v8677_v47  ;;  %v12437_v47 = vld [vmem:[%s13624_s6 + $0x50] sm:$0x33] }
 0x4ca   : > { %4732 = vmatprep.mubr.bf16.mxu1 %v8683_v12  ;;  %5043 = vmatpush1.bf16.msra.mxu1 %v8705_v43  ;;  %v8148_v12 = vcombine.high %v12437_v47, %v12437_v47 }
 0x4cb   : > { %5044 = vmatprep.subr.bf16.mxu1 %v14060_v1  ;;  %5230 = vmatpush1.bf16.msra.mxu0 %v8716_v59 }
 0x4cc   : > { %5241 = vmatprep.subr.bf16.mxu0 %v14060_v1 }
 0x4ce   : > { %5045 = vmatpush1.bf16.msra.mxu1 %v8707_v11 }
 0x4cf   : > { %5046 = vmatprep.subr.bf16.mxu1 %v14060_v1  ;;  %5242 = vmatpush2.bf16.msra.mxu0 %v5213_v23 }
 0x4d0   : > { %5243 = vmatprep.subr.bf16.mxu0 %v14060_v1 }
 0x4d1   : > { %4733 = vmatmul.mubr.bf16.gmra.mxu1 %v8681_v45 }
 0x4d2   : > { %4742 = vmatprep.mubr.bf16.mxu1 %v8687_v20  ;;  %5047 = vmatpush1.bf16.msra.mxu1 %v8709_v40  ;;  %v12444_v20 = vld [vmem:[%s13624_s6 + $0xa8] sm:$0x33] }
 0x4d3   : > { %5048 = vmatprep.subr.bf16.mxu1 %v14060_v1  ;;  %5244 = vmatpush2.bf16.msra.mxu0 %v8720_v2 }
 0x4d4   : > { %5245 = vmatprep.subr.bf16.mxu0 %v14060_v1 }
 0x4d6   : > { %5049 = vmatpush1.bf16.msra.mxu1 %v8711_v5 }
 0x4d7   : > { %5050 = vmatprep.subr.bf16.mxu1 %v14060_v1  ;;  %5246 = vmatpush2.bf16.msra.mxu0 %v8722_v32 }
 0x4d8   : > { %8149 = vmatprep.subr.msk.bf16.mxu0 %vm5480_vm8, %v8148_v12 }
 0x4d9   : > { %4743 = vmatmul.mubr.bf16.gmra.mxu1 %v8685_v61  ;;  %v8128_v61 = vcombine.high %v12444_v20, %v12444_v20 }
 0x4da   : > { %4752 = vmatprep.mubr.bf16.mxu1 %v8691_v9  ;;  %5051 = vmatpush1.bf16.msra.mxu1 %v8713_v41 }
 0x4db   : > { %5052 = vmatprep.subr.bf16.mxu1 %v14060_v1 }
 0x4de   : > { %5053 = vmatpush1.bf16.msra.mxu1 %v8715_v50 }
 0x4df   : > { %5064 = vmatprep.subr.bf16.mxu1 %v14060_v1 }
 0x4e1   : > { %4753 = vmatmul.mubr.bf16.gmra.mxu1 %v8689_v62 }
 0x4e2   : > { %4762 = vmatprep.mubr.bf16.mxu1 %v8695_v22  ;;  %5065 = vmatpush2.bf16.msra.mxu1 %v5036_v56 }
 0x4e3   : > { %5066 = vmatprep.subr.bf16.mxu1 %v14060_v1 }
 0x4e6   : > { %5067 = vmatpush2.bf16.msra.mxu1 %v8719_v6 }
 0x4e7   : > { %5068 = vmatprep.subr.bf16.mxu1 %v14060_v1 }
 0x4e9   : > { %4763 = vmatmul.mubr.bf16.gmra.mxu1 %v8693_v49 }
 0x4ea   : > { %4772 = vmatprep.mubr.bf16.mxu1 %v8699_v36  ;;  %5069 = vmatpush2.bf16.msra.mxu1 %v8721_v21 }
 0x4eb   : > { %8129 = vmatprep.subr.msk.bf16.mxu1 %vm5480_vm8, %v8128_v61 }
 0x4f1   : > { %4773 = vmatmul.mubr.bf16.gmra.mxu1 %v8697_v0 }
 0x4f5   : > { %v4817_v49 = vpop.f32.mrf.mxu0 }
 0x4f7   : > { %v4819_v60 = vpop.f32.mrf.mxu0 }
 0x4f9   : > { %v4821_v0 = vpop.f32.mrf.mxu0 }
 0x4fb   : > { %v4823_v40 = vpop.f32.mrf.mxu0 }
 0x4fd   : > { %v4827_v44 = vpop.f32.mrf.mxu0 }
 0x4ff   : > { %v4829_v50 = vpop.f32.mrf.mxu0 }
 0x501   : > { %v4831_v57 = vpop.f32.mrf.mxu0 }
 0x503   : > { %v4833_v6 = vpop.f32.mrf.mxu0 }
 0x505   : > { %v12486_v32 = vpop.f32.mrf.mxu0 }
 0x507   : > { %v12492_v1 = vpop.f32.mrf.mxu0 }
 0x509   : > { %v12370_v58 = vpop.f32.mrf.mxu1 }
 0x50b   : > { %v12372_v15 = vpop.f32.mrf.mxu1 }
 0x50d   : > { %v12382_v37 = vpop.f32.mrf.mxu1 }
 0x50f   : > { %v12384_v31 = vpop.f32.mrf.mxu1 }
 0x511   : > { %v12386_v38 = vpop.f32.mrf.mxu1 }
 0x513   : > { %v12388_v52 = vpop.f32.mrf.mxu1 }
 0x515   : > { %v12390_v63 = vpop.f32.mrf.mxu1 }
 0x517   : > { %v12392_v4 = vpop.f32.mrf.mxu1 }
 0x519   : > { %v12394_v8 = vpop.f32.mrf.mxu1 }
 0x51b   : > { %v12396_v25 = vpop.f32.mrf.mxu1 }
 0x51d   : > { %v12398_v42 = vpop.f32.mrf.mxu1 }
 0x51f   : > { %v12400_v24 = vpop.f32.mrf.mxu1 }
 0x521   : > { %v12402_v46 = vpop.f32.mrf.mxu1 }
 0x523   : > { %v12404_v27 = vpop.f32.mrf.mxu1 }
 0x525   : > { %v12406_v10 = vpop.f32.mrf.mxu1 }
 0x527   : > { %v12408_v35 = vpop.f32.mrf.mxu1 }
 0x529   : > { %v12410_v3 = vpop.f32.mrf.mxu1 }
 0x52a   : > { %14062 = vst [vmem:[#allocation18_spill] sm:$0xff] %v12410_v3 }
 0x52b   : > { %v12412_v28 = vpop.f32.mrf.mxu1 }
 0x52c   : > { %14063 = vst [vmem:[#allocation51_spill] sm:$0xff] %v12412_v28 }
 0x52d   : > { %v12414_v18 = vpop.f32.mrf.mxu1 }
 0x52e   : > { %14064 = vst [vmem:[#allocation10_spill] sm:$0xff] %v12414_v18 }
 0x52f   : > { %v12416_v51 = vpop.f32.mrf.mxu1 }
 0x530   : > { %14065 = vst [vmem:[#allocation42_spill] sm:$0xff] %v12416_v51 }
 0x531   : > { %v12418_v54 = vpop.f32.mrf.mxu1 }
 0x532   : > { %14066 = vst [vmem:[#allocation43_spill] sm:$0xff] %v12418_v54 }
 0x533   : > { %v12420_v30 = vpop.f32.mrf.mxu1 }
 0x534   : > { %14067 = vst [vmem:[#allocation22_spill] sm:$0xff] %v12420_v30 }
 0x535   : > { %v12422_v14 = vpop.f32.mrf.mxu1 }
 0x536   : > { %14068 = vst [vmem:[#allocation36_spill] sm:$0xff] %v12422_v14 }
 0x537   : > { %v12424_v39 = vpop.f32.mrf.mxu1 }
 0x538   : > { %14069 = vst [vmem:[#allocation44_spill] sm:$0xff] %v12424_v39 }
 0x539   : > { %v12426_v19 = vpop.f32.mrf.mxu1 }
 0x53a   : > { %14070 = vst [vmem:[#allocation52_spill] sm:$0xff] %v12426_v19 }
 0x53b   : > { %v12428_v33 = vpop.f32.mrf.mxu1 }
 0x53c   : > { %14071 = vst [vmem:[#allocation41_spill] sm:$0xff] %v12428_v33  ;;  %v12496_v33 = vpop.f32.mrf.mxu0 }
 0x53d   : > { %v12430_v29 = vpop.f32.mrf.mxu1 }
 0x53e   : > { %14072 = vst [vmem:[#allocation46_spill] sm:$0xff] %v12430_v29  ;;  %v12500_v19 = vpop.f32.mrf.mxu0 }
 0x53f   : > { %v12432_v26 = vpop.f32.mrf.mxu1 }
 0x540   : > { %14073 = vst [vmem:[#allocation56_spill] sm:$0xff] %v12432_v26  ;;  %v12504_v30 = vpop.f32.mrf.mxu0 }
 0x541   : > { %v4456_v45 = vpop.f32.mrf.mxu1 }
 0x542   : > { %v12508_v14 = vpop.f32.mrf.mxu0 }
 0x543   : > { %v4458_v9 = vpop.f32.mrf.mxu1 }
 0x545   : > { %v4460_v62 = vpop.f32.mrf.mxu1 }
 0x547   : > { %v4462_v22 = vpop.f32.mrf.mxu1 }
 0x549   : > { %v12450_v55 = vpop.f32.mrf.mxu1 }
 0x54b   : > { %v12452_v16 = vpop.f32.mrf.mxu1 }
 0x54d   : > { %v12454_v36 = vpop.f32.mrf.mxu1 }
 0x54f   : > { %v12456_v48 = vpop.f32.mrf.mxu1 }
 0x551   : > { %v12458_v43 = vpop.f32.mrf.mxu1 }
 0x553   : > { %v12460_v34 = vpop.f32.mrf.mxu1 }
 0x555   : > { %v12462_v11 = vpop.f32.mrf.mxu1 }
 0x557   : > { %v12464_v7 = vpop.f32.mrf.mxu1 }
 0x559   : > { %v12466_v13 = vpop.f32.mrf.mxu1 }
 0x55b   : > { %v12468_v5 = vpop.f32.mrf.mxu1 }
 0x55d   : > { %v12470_v41 = vpop.f32.mrf.mxu1 }
 0x55f   : > { %v12472_v17 = vpop.f32.mrf.mxu1 }
 0x560   : > { %14074 = vst [vmem:[#allocation55_spill] sm:$0xff] %v12472_v17 }
 0x561   : > { %v12474_v59 = vpop.f32.mrf.mxu1 }
 0x562   : > { %14075 = vst [vmem:[#allocation35_spill] sm:$0xff] %v12474_v59 }
 0x563   : > { %v12476_v53 = vpop.f32.mrf.mxu1 }
 0x564   : > { %14076 = vst [vmem:[#allocation50_spill] sm:$0xff] %v12476_v53 }
 0x565   : > { %v12478_v56 = vpop.f32.mrf.mxu1 }
 0x566   : > { %14077 = vst [vmem:[#allocation65_spill] sm:$0xff] %v12478_v56 }
 0x567   : > { %v12480_v23 = vpop.f32.mrf.mxu1 }
 0x568   : > { %14078 = vst [vmem:[#allocation66_spill] sm:$0xff] %v12480_v23  ;;  %v4457_v23 = vadd.f32 %v4456_v45, %v12370_v58  ;;  %v8127_v58 = vcombine.low %v12444_v20, %v12444_v20 }
 0x569   : > { %v12482_v2 = vpop.f32.mrf.mxu1 }
 0x56a   : > { %14079 = vst [vmem:[#allocation33_spill] sm:$0xff] %v12482_v2  ;;  %v12510_v2 = vpop.f32.mrf.mxu0 }
 0x56b   : > { %v12484_v21 = vpop.f32.mrf.mxu1 }
 0x56c   : > { %14080 = vst [vmem:[#allocation58_spill] sm:$0xff] %v12484_v21  ;;  %v12515_v56 = vpop.f32.mrf.mxu0 }
 0x56d   : > { %v12488_v12 = vpop.f32.mrf.mxu1 }
 0x56e   : > { %14081 = vst [vmem:[#allocation57_spill] sm:$0xff] %v12488_v12 }
 0x56f   : > { %v12490_v61 = vpop.f32.mrf.mxu1 }
 0x570   : > { %14082 = vst [vmem:[#allocation67_spill] sm:$0xff] %v12490_v61 }
 0x571   : > { %v12494_v26 = vpop.f32.mrf.mxu1 }
 0x572   : > { %14083 = vst [vmem:[#allocation68_spill] sm:$0xff] %v12494_v26 }
 0x573   : > { %v12498_v29 = vpop.f32.mrf.mxu1 }
 0x574   : > { %14084 = vst [vmem:[#allocation73_spill] sm:$0xff] %v12498_v29  ;;  %v4461_v29 = vadd.f32 %v4460_v62, %v12382_v37 }
 0x575   : > { %v12502_v39 = vpop.f32.mrf.mxu1 }
 0x576   : > { %14085 = vst [vmem:[#allocation69_spill] sm:$0xff] %v12502_v39  ;;  %v4459_v39 = vadd.f32 %v4458_v9, %v12372_v15  ;;  %v12522_v15 = vpop.f32.mrf.mxu0 }
 0x577   : > { %v12506_v21 = vpop.f32.mrf.mxu1 }
 0x578   : > { %14086 = vst [vmem:[#allocation53_spill] sm:$0xff] %v12506_v21  ;;  %v4463_v21 = vadd.f32 %v4462_v22, %v12384_v31  ;;  %v4467_v31 = vadd.f32 %v12450_v55, %v12386_v38  ;;  %v4469_v38 = vadd.f32 %v12452_v16, %v12388_v52  ;;  %v12539_v22 = vpop.f32.mrf.mxu0  ;;  %v8730_v52 = vld [vmem:[%s13624_s6 + $0x34] ss:$8 sps:$4 sm:$0xff]  }
 0x581   : > { %v4714_v12 = vpop.f32.mrf.mxu1 }
 0x582   : > { %v4818_v54 = vadd.f32 %v4817_v49, %v4714_v12  ;;  %v8147_v49 = vcombine.low %v12437_v47, %v12437_v47  ;;  %v4473_v47 = vadd.f32 %v12456_v48, %v12392_v4 }
 0x583   : > { %v4716_v61 = vpop.f32.mrf.mxu1 }
 0x584   : > { %v4820_v51 = vadd.f32 %v4819_v60, %v4716_v61  ;;  %v4886_v18 = vmax.f32 %v4457_v23, %v4818_v54  ;;  %v5660_v54 = vsel %vm5480_vm8, %v8147_v49, 0  ;;  %v4483_v49 = vadd.f32 %v12464_v7, %v12400_v24 }
 0x585   : > { %v4718_v26 = vpop.f32.mrf.mxu1  ;;  %v4487_v24 = vadd.f32 %v12466_v13, %v12402_v46  ;;  %v4491_v7 = vadd.f32 %v12470_v41, %v12406_v10  ;;  %v14087_v46 = vld [vmem:[#allocation55_spill] sm:$0xff] }
 0x586   : > { %v4822_v53 = vadd.f32 %v4821_v0, %v4718_v26  ;;  %v4887_v37 = vmax.f32 %v4459_v39, %v4820_v51  ;;  %v5482_v51 = vsel %vm5480_vm8, %v8127_v58, 0  ;;  %v4493_v13 = vadd.f32 %v14087_v46, %v12408_v35 }
 0x587   : > { %v4720_v28 = vpop.f32.mrf.mxu1 }
 0x588   : > { %v4888_v59 = vmax.f32 %v4461_v29, %v4822_v53  ;;  %v4824_v3 = vadd.f32 %v4823_v40, %v4720_v28  ;;  %v8727_v29 = vld [vmem:[%s13624_s6 + $0x44] ss:$8 sps:$4 sm:$0xff]   ;;  %v8728_v53 = vld [vmem:[%s13624_s6 + $0x30] ss:$8 sps:$4 sm:$0xff]  }
 0x589   : > { %v4724_v17 = vpop.f32.mrf.mxu1 }
 0x58a   : > { %v4914_v45 = vpack.c.bf16 %v4888_v59, %v4886_v18  ;;  %v4889_v26 = vmax.f32 %v4463_v21, %v4824_v3  ;;  %v4828_v60 = vadd.f32 %v4827_v44, %v4724_v17  ;;  %v4471_v3 = vadd.f32 %v12454_v36, %v12390_v63  ;;  %v8725_v36 = vld [vmem:[%s13624_s6 + $0x40] ss:$8 sps:$4 sm:$0xff]   ;;  %v12547_v17 = vpop.f32.mrf.mxu0 }
 0x58b   : > { %v4726_v62 = vpop.f32.mrf.mxu1  ;;  %v4481_v21 = vadd.f32 %v12462_v11, %v12398_v42 }
 0x58c   : > { %v4915_v9 = vpack.c.bf16 %v4889_v26, %v4887_v37  ;;  %v4830_v18 = vadd.f32 %v4829_v50, %v4726_v62  ;;  %v4890_v55 = vmax.f32 %v4467_v31, %v4828_v60  ;;  %v4863_v61 = vpop.f32.mrf.mxu0 }
 0x58d   : > { %v4728_v28 = vpop.f32.mrf.mxu1 }
 0x58e   : > { %v4832_v39 = vadd.f32 %v4831_v57, %v4728_v28  ;;  %8060 = vmatprep.mubr.msk.bf16.mxu1 %vm5012_vm9, %v4915_v9  ;;  %8099 = vmatprep.mubr.msk.bf16.mxu0 %vm5012_vm9, %v4915_v9  ;;  %v4891_v4 = vmax.f32 %v4469_v38, %v4830_v18  ;;  %v4477_v57 = vadd.f32 %v12458_v43, %v12394_v8  ;;  %v4867_v26 = vpop.f32.mrf.mxu0 }
 0x58f   : > { %v4730_v20 = vpop.f32.mrf.mxu1  ;;  %5071 = vmatmul.mubr.bf16.vlgmr.msra.gmra.mxu1 %v4914_v45  ;;  %5248 = vmatmul.mubr.bf16.vlgmr.msra.gmra.mxu0 %v4914_v45  ;;  %v4479_v8 = vadd.f32 %v12460_v34, %v12396_v25  ;;  %v4489_v28 = vadd.f32 %v12468_v5, %v12404_v27  ;;  %v14088_v5 = vld [vmem:[#allocation18_spill] sm:$0xff] }
 0x590   : > { %v4892_v0 = vmax.f32 %v4471_v3, %v4832_v39  ;;  %v4834_v63 = vadd.f32 %v4833_v6, %v4730_v20  ;;  %5670 = vmatpush1.bf16.msra.mxu0 %v5660_v54  ;;  %5492 = vmatpush1.bf16.msra.mxu1 %v5482_v51  ;;  %v8733_v6 = vld [vmem:[%s13624_s6 + $0x24] ss:$8 sps:$4 sm:$0xff]   ;;  %v4869_v54 = vpop.f32.mrf.mxu0 }
 0x591   : > { %v4734_v40 = vpop.f32.mrf.mxu1  ;;  %5671 = vmatprep.subr.bf16.mxu0 %v8727_v29 }
 0x592   : > { %v4916_v16 = vpack.c.bf16 %v4892_v0, %v4890_v55  ;;  %v4893_v48 = vmax.f32 %v4473_v47, %v4834_v63  ;;  %v4838_v59 = vadd.f32 %v12486_v32, %v4734_v40  ;;  %v4871_v39 = vpop.f32.mrf.mxu0  ;;  %v14089_v47 = vld [vmem:[#allocation35_spill] sm:$0xff]  ;;  %v14090_v0 = vld [vmem:[#allocation10_spill] sm:$0xff]  ;;  %v14091_v63 = vld [vmem:[#allocation65_spill] sm:$0xff] }
 0x593   : > { %v4736_v44 = vpop.f32.mrf.mxu1  ;;  %v4497_v20 = vadd.f32 %v14089_v47, %v14088_v5  ;;  %v4501_v35 = vadd.f32 %v14091_v63, %v14090_v0  ;;  %v14092_v40 = vld [vmem:[#allocation51_spill] sm:$0xff]  ;;  %v14108_v47 = vld [vmem:[#allocation41_spill] sm:$0xff] }
 0x594   : > { %v4917_v50 = vpack.c.bf16 %v4893_v48, %v4891_v4  ;;  %5672 = vmatpush1.bf16.msra.mxu0 %v8725_v36  ;;  %v4840_v12 = vadd.f32 %v12492_v1, %v4736_v44  ;;  %v4894_v58 = vmax.f32 %v4477_v57, %v4838_v59  ;;  %v14094_v48 = vld [vmem:[#allocation42_spill] sm:$0xff] }
 0x595   : > { %v4738_v23 = vpop.f32.mrf.mxu1  ;;  %5673 = vmatprep.subr.bf16.mxu0 %v8730_v52  ;;  %v14093_v52 = vld [vmem:[#allocation50_spill] sm:$0xff] }
 0x596   : > { %v4842_v32 = vadd.f32 %v12496_v33, %v4738_v23  ;;  %8061 = vmatprep.mubr.msk.bf16.mxu1 %vm5012_vm9, %v4917_v50  ;;  %8100 = vmatprep.mubr.msk.bf16.mxu0 %vm5012_vm9, %v4917_v50  ;;  %v8731_v33 = vld [vmem:[%s13624_s6 + $0x20] ss:$8 sps:$4 sm:$0xff]   ;;  %v4895_v37 = vmax.f32 %v4479_v8, %v4840_v12  ;;  %v4499_v4 = vadd.f32 %v14093_v52, %v14092_v40  ;;  %v14095_v44 = vld [vmem:[#allocation66_spill] sm:$0xff] }
 0x597   : > { %v4740_v43 = vpop.f32.mrf.mxu1  ;;  %5079 = vmatmul.mubr.bf16.gmra.mxu1 %v4916_v16  ;;  %5256 = vmatmul.mubr.bf16.gmra.mxu0 %v4916_v16  ;;  %v4503_v50 = vadd.f32 %v14095_v44, %v14094_v48 }
 0x598   : > { %v4896_v42 = vmax.f32 %v4481_v21, %v4842_v32  ;;  %v4844_v1 = vadd.f32 %v12500_v19, %v4740_v43  ;;  %5674 = vmatpush1.bf16.msra.mxu0 %v8728_v53  ;;  %v14096_v43 = vld [vmem:[#allocation43_spill] sm:$0xff] }
 0x599   : > { %v4744_v11 = vpop.f32.mrf.mxu1  ;;  %5675 = vmatprep.subr.bf16.mxu0 %v8733_v6 }
 0x59a   : > { %v4918_v25 = vpack.c.bf16 %v4896_v42, %v4894_v58  ;;  %v4897_v34 = vmax.f32 %v4483_v49, %v4844_v1  ;;  %v4848_v9 = vadd.f32 %v12504_v30, %v4744_v11  ;;  %v14097_v49 = vld [vmem:[#allocation33_spill] sm:$0xff]  ;;  %v14098_v1 = vld [vmem:[#allocation36_spill] sm:$0xff] }
 0x59b   : > { %v4746_v45 = vpop.f32.mrf.mxu1  ;;  %v4507_v58 = vadd.f32 %v14097_v49, %v14096_v43  ;;  %v8751_v43 = vld [vmem:[%s13624_s6 + $0x68] ss:$8 sps:$4 sm:$0xff]   ;;  %v8756_v49 = vld [vmem:[%s13624_s6 + $0x5c] ss:$8 sps:$4 sm:$0xff]  }
 0x59c   : > { %v4919_v62 = vpack.c.bf16 %v4897_v34, %v4895_v37  ;;  %5676 = vmatpush1.bf16.msra.mxu0 %v8731_v33  ;;  %v4850_v60 = vadd.f32 %v12508_v14, %v4746_v45  ;;  %v4898_v29 = vmax.f32 %v4487_v24, %v4848_v9  ;;  %v14099_v33 = vld [vmem:[#allocation57_spill] sm:$0xff]  ;;  %v14101_v34 = vld [vmem:[#allocation58_spill] sm:$0xff]  ;;  %v14102_v9 = vld [vmem:[#allocation44_spill] sm:$0xff] }
 0x59d   : > { %v4748_v19 = vpop.f32.mrf.mxu1  ;;  %v4511_v11 = vadd.f32 %v14099_v33, %v14098_v1  ;;  %v14103_v24 = vld [vmem:[#allocation67_spill] sm:$0xff]  ;;  %v8167_v33 = vld [vmem:[%s13624_s6 + $0x100] sm:$0x33] }
 0x59e   : > { %v4852_v31 = vadd.f32 %v12510_v2, %v4748_v19  ;;  %8062 = vmatprep.mubr.msk.bf16.mxu1 %vm5012_vm9, %v4919_v62  ;;  %8101 = vmatprep.mubr.msk.bf16.mxu0 %vm5012_vm9, %v4919_v62  ;;  %v4899_v2 = vmax.f32 %v4489_v28, %v4850_v60  ;;  %v4513_v19 = vadd.f32 %v14103_v24, %v14102_v9 }
 0x59f   : > { %v4750_v30 = vpop.f32.mrf.mxu1  ;;  %5087 = vmatmul.mubr.bf16.gmra.mxu1 %v4918_v25  ;;  %5264 = vmatmul.mubr.bf16.gmra.mxu0 %v4918_v25 }
 0x5a0   : > { %v4900_v10 = vmax.f32 %v4491_v7, %v4852_v31  ;;  %v4854_v14 = vadd.f32 %v12515_v56, %v4750_v30 }
 0x5a1   : > { %v4754_v41 = vpop.f32.mrf.mxu1 }
 0x5a2   : > { %v4920_v51 = vpack.c.bf16 %v4900_v10, %v4898_v29  ;;  %v4901_v3 = vmax.f32 %v4493_v13, %v4854_v14  ;;  %v4858_v27 = vadd.f32 %v12522_v15, %v4754_v41  ;;  %v4873_v15 = vpop.f32.mrf.mxu0  ;;  %v14104_v41 = vld [vmem:[#allocation52_spill] sm:$0xff] }
 0x5a3   : > { %v4756_v18 = vpop.f32.mrf.mxu1 }
 0x5a4   : > { %v4921_v38 = vpack.c.bf16 %v4901_v3, %v4899_v2  ;;  %v4860_v36 = vadd.f32 %v12539_v22, %v4756_v18  ;;  %v4902_v59 = vmax.f32 %v4497_v20, %v4858_v27  ;;  %v4877_v12 = vpop.f32.mrf.mxu0  ;;  %v14105_v2 = vld [vmem:[#allocation68_spill] sm:$0xff]  ;;  %v14106_v18 = vld [vmem:[#allocation46_spill] sm:$0xff]  ;;  %v14109_v20 = vld [vmem:[#allocation73_spill] sm:$0xff] }
 0x5a5   : > { %v4758_v55 = vpop.f32.mrf.mxu1 }
 0x5a6   : > { %v4862_v56 = vadd.f32 %v12547_v17, %v4758_v55  ;;  %8063 = vmatprep.mubr.msk.bf16.mxu1 %vm5012_vm9, %v4921_v38  ;;  %8102 = vmatprep.mubr.msk.bf16.mxu0 %vm5012_vm9, %v4921_v38  ;;  %v4903_v23 = vmax.f32 %v4499_v4, %v4860_v36  ;;  %v4519_v55 = vadd.f32 %v14109_v20, %v14108_v47  ;;  %v14111_v36 = vld [vmem:[#allocation53_spill] sm:$0xff] }
 0x5a7   : > { %v4760_v16 = vpop.f32.mrf.mxu1  ;;  %5095 = vmatmul.mubr.bf16.gmra.mxu1 %v4920_v51  ;;  %5272 = vmatmul.mubr.bf16.gmra.mxu0 %v4920_v51  ;;  %v4517_v51 = vadd.f32 %v14105_v2, %v14104_v41  ;;  %v8767_v47 = vld [vmem:[%s13624_s6 + $0x12c] ss:$8 sps:$4 sm:$0xff]  }
 0x5a8   : > { %v4904_v53 = vmax.f32 %v4501_v35, %v4862_v56  ;;  %v4864_v57 = vadd.f32 %v4863_v61, %v4760_v16  ;;  %v14100_v61 = vld [vmem:[#allocation22_spill] sm:$0xff]  ;;  %v14110_v35 = vld [vmem:[#allocation56_spill] sm:$0xff] }
 0x5a9   : > { %v4764_v22 = vpop.f32.mrf.mxu1  ;;  %v4509_v45 = vadd.f32 %v14101_v34, %v14100_v61  ;;  %v4523_v56 = vadd.f32 %v14111_v36, %v14110_v35 }
 0x5aa   : > { %v4922_v17 = vpack.c.bf16 %v4904_v53, %v4902_v59  ;;  %v4905_v6 = vmax.f32 %v4503_v50, %v4864_v57  ;;  %v4868_v8 = vadd.f32 %v4867_v26, %v4764_v22  ;;  %v4879_v26 = vpop.f32.mrf.mxu0  ;;  %v14112_v50 = vmov 0   ;;  %v8736_v59 = vld [vmem:[%s13624_s6 + $0x10] ss:$8 sps:$4 sm:$0xff]   ;;  %v8738_v53 = vld [vmem:[%s13624_s6 + $0x14] ss:$8 sps:$4 sm:$0xff]  }
 0x5ab   : > { %v4766_v21 = vpop.f32.mrf.mxu1  ;;  %v8739_v57 = vld [vmem:[%s13624_s6 + $0x98] ss:$8 sps:$4 sm:$0xff]   ;;  %v8741_v22 = vld [vmem:[%s13624_s6 + $0x9c] ss:$8 sps:$4 sm:$0xff]   ;;  %5677 = vmatprep.subr.bf16.mxu0 %v8738_v53 }
 0x5ac   : > { %v4923_v32 = vpack.c.bf16 %v4905_v6, %v4903_v23  ;;  %v4870_v37 = vadd.f32 %v4869_v54, %v4766_v21  ;;  %v4906_v7 = vmax.f32 %v4507_v58, %v4868_v8  ;;  %v4881_v29 = vpop.f32.mrf.mxu0  ;;  %5493 = vmatprep.subr.bf16.mxu1 %v8741_v22  ;;  %5678 = vmatpush1.bf16.msra.mxu0 %v8736_v59  ;;  %v8744_v23 = vld [vmem:[%s13624_s6 + $0x4] ss:$8 sps:$4 sm:$0xff]   ;;  %v8745_v21 = vld [vmem:[%s13624_s6 + $0x88] ss:$8 sps:$4 sm:$0xff]   ;;  %v8754_v58 = vld [vmem:[%s13624_s6 + $0x58] ss:$8 sps:$4 sm:$0xff]  }
 0x5ad   : > { %v4768_v42 = vpop.f32.mrf.mxu1  ;;  %5494 = vmatpush1.bf16.msra.mxu1 %v8739_v57  ;;  %v8747_v6 = vld [vmem:[%s13624_s6 + $0x8c] ss:$8 sps:$4 sm:$0xff]   ;;  %5679 = vmatprep.subr.bf16.mxu0 %v8744_v23  ;;  %v8772_v57 = vld [vmem:[%s13624_s6 + $0x11c] ss:$8 sps:$4 sm:$0xff]  }
 0x5ae   : > { %v4872_v25 = vadd.f32 %v4871_v39, %v4768_v42  ;;  %8064 = vmatprep.mubr.msk.bf16.mxu1 %vm5012_vm9, %v4923_v32  ;;  %8103 = vmatprep.mubr.msk.bf16.mxu0 %vm5012_vm9, %v4923_v32  ;;  %v4907_v30 = vmax.f32 %v4509_v45, %v4870_v37  ;;  %v14107_v39 = vld [vmem:[#allocation69_spill] sm:$0xff]  ;;  %v4883_v63 = vpop.f32.mrf.mxu0  ;;  %v8748_v32 = vld [vmem:[%s13624_s6 + $0x78] ss:$8 sps:$4 sm:$0xff]   ;;  %v8775_v22 = vld [vmem:[%s13624_s6 + $0xf4] ss:$8 sps:$4 sm:$0xff]  }
 0x5af   : > { %v4770_v62 = vpop.f32.mrf.mxu1  ;;  %5103 = vmatmul.mubr.bf16.gmra.mxu1 %v4922_v17  ;;  %5280 = vmatmul.mubr.bf16.gmra.mxu0 %v4922_v17  ;;  %v4521_v38 = vadd.f32 %v14107_v39, %v14106_v18  ;;  %v8742_v17 = vld [vmem:[%s13624_s6] ss:$8 sps:$4 sm:$0xff]   ;;  %v8753_v8 = vld [vmem:[%s13624_s6 + $0x6c] ss:$8 sps:$4 sm:$0xff]   ;;  %v8198_v42 = vld [vmem:[%s13624_s6 + $0x158] sm:$0x33] }
 0x5b0   : > { %v4908_v60 = vmax.f32 %v4511_v11, %v4872_v25  ;;  %v4874_v31 = vadd.f32 %v4873_v15, %v4770_v62  ;;  %5495 = vmatprep.subr.bf16.mxu1 %v8747_v6  ;;  %5680 = vmatpush1.bf16.msra.mxu0 %v8742_v17  ;;  %v8210_v1 = vcombine.high %v8198_v42, %v8198_v42 }
 0x5b1   : > { %v4774_v28 = vpop.f32.mrf.mxu1  ;;  %5496 = vmatpush1.bf16.msra.mxu1 %v8745_v21  ;;  %v8179_v11 = vcombine.high %v8167_v33, %v8167_v33  ;;  %v8209_v45 = vcombine.low %v8198_v42, %v8198_v42 }
 0x5b2   : > { %v4924_v54 = vpack.c.bf16 %v4908_v60, %v4906_v7  ;;  %v4909_v46 = vmax.f32 %v4513_v19, %v4874_v31  ;;  %v4878_v14 = vadd.f32 %v4877_v12, %v4774_v28  ;;  %v8750_v12 = vld [vmem:[%s13624_s6 + $0x7c] ss:$8 sps:$4 sm:$0xff]   ;;  %8211 = vmatprep.subr.msk.bf16.mxu0 %vm5480_vm8, %v8210_v1  ;;  %v8761_v28 = vld [vmem:[%s13624_s6 + $0x14c] ss:$8 sps:$4 sm:$0xff]  }
 0x5b3   : > { %v4776_v13 = vpop.f32.mrf.mxu1  ;;  %5497 = vmatprep.subr.bf16.mxu1 %v8750_v12  ;;  %v6129_v31 = vsel %vm5480_vm8, %v8209_v45, 0  ;;  %v8781_v1 = vld [vmem:[%s13624_s6 + $0xe4] ss:$8 sps:$4 sm:$0xff]  }
 0x5b4   : > { %v4925_v10 = vpack.c.bf16 %v4909_v46, %v4907_v30  ;;  %v4880_v27 = vadd.f32 %v4879_v26, %v4776_v13  ;;  %v4910_v40 = vmax.f32 %v4517_v51, %v4878_v14  ;;  %v8764_v14 = vld [vmem:[%s13624_s6 + $0x13c] ss:$8 sps:$4 sm:$0xff]  }
 0x5b5   : > { %v4778_v3 = vpop.f32.mrf.mxu1  ;;  %5498 = vmatpush1.bf16.msra.mxu1 %v8748_v32  ;;  %v8770_v32 = vld [vmem:[%s13624_s6 + $0x118] ss:$8 sps:$4 sm:$0xff]  }
 0x5b6   : > { %v4882_v5 = vadd.f32 %v4881_v29, %v4778_v3  ;;  %8065 = vmatprep.mubr.msk.bf16.mxu1 %vm5012_vm9, %v4925_v10  ;;  %8104 = vmatprep.mubr.msk.bf16.mxu0 %vm5012_vm9, %v4925_v10  ;;  %v4911_v16 = vmax.f32 %v4519_v55, %v4880_v27  ;;  %v8759_v29 = vld [vmem:[%s13624_s6 + $0x148] ss:$8 sps:$4 sm:$0xff]  }
 0x5b7   : > { %v4780_v0 = vpop.f32.mrf.mxu1  ;;  %5111 = vmatmul.mubr.bf16.gmra.mxu1 %v4924_v54  ;;  %5288 = vmatmul.mubr.bf16.gmra.mxu0 %v4924_v54 }
 0x5b8   : > { %v4912_v52 = vmax.f32 %v4521_v38, %v4882_v5  ;;  %v4884_v4 = vadd.f32 %v4883_v63, %v4780_v0  ;;  %5499 = vmatprep.subr.bf16.mxu1 %v8753_v8  ;;  %v8762_v38 = vld [vmem:[%s13624_s6 + $0x138] ss:$8 sps:$4 sm:$0xff]   ;;  %v8178_v0 = vcombine.low %v8167_v33, %v8167_v33 }
 0x5b9   : > { %5500 = vmatpush1.bf16.msra.mxu1 %v8751_v43  ;;  %v8773_v43 = vld [vmem:[%s13624_s6 + $0xf0] ss:$8 sps:$4 sm:$0xff]  }
 0x5ba   : > { %v4926_v15 = vpack.c.bf16 %v4912_v52, %v4910_v40  ;;  %v4913_v48 = vmax.f32 %v4523_v56, %v4884_v4  ;;  %5501 = vmatprep.subr.bf16.mxu1 %v8756_v49  ;;  %v8765_v4 = vld [vmem:[%s13624_s6 + $0x128] ss:$8 sps:$4 sm:$0xff]   ;;  %v5877_v53 = vsel %vm5480_vm8, %v8178_v0, 0  ;;  %v8778_v49 = vld [vmem:[%s13624_s6 + $0x10c] ss:$8 sps:$4 sm:$0xff]  }
 0x5bc   : > { %v4927_v44 = vpack.c.bf16 %v4913_v48, %v4911_v16 }
 0x5bd   : > { %5502 = vmatpush1.bf16.msra.mxu1 %v8754_v58 }
 0x5be   : > { %8066 = vmatprep.mubr.msk.bf16.mxu1 %vm5012_vm9, %v4927_v44  ;;  %8105 = vmatprep.mubr.msk.bf16.mxu0 %vm5012_vm9, %v4927_v44 }
 0x5bf   : > { %5119 = vmatmul.mubr.bf16.gmra.mxu1 %v4926_v15  ;;  %5296 = vmatmul.mubr.bf16.gmra.mxu0 %v4926_v15 }
 0x5c0   : > { %5697 = vmatprep.mubr.bf16.mxu0 %v14112_v50  ;;  %5519 = vmatprep.mubr.bf16.mxu1 %v14112_v50 }
 0x5c1   : > { %8180 = vmatprep.subr.msk.bf16.mxu1 %vm5480_vm8, %v8179_v11 }
 0x64f   : > { %v5072_v37 = vpop.f32.mrf.mxu1  ;;  %v5249_v25 = vpop.f32.mrf.mxu0 }
 0x650   : > { %v5304_v9 = vmax.f32 %v5072_v37, %v5249_v25 }
 0x651   : > { %v5074_v61 = vpop.f32.mrf.mxu1  ;;  %v5251_v34 = vpop.f32.mrf.mxu0 }
 0x652   : > { %v8776_v61 = vld [vmem:[%s13624_s6 + $0x108] ss:$8 sps:$4 sm:$0xff]  }
 0x653   : > { %v5075_v62 = vpop.f32.mrf.mxu1  ;;  %v5252_v26 = vpop.f32.mrf.mxu0 }
 0x654   : > { %v5305_v24 = vmax.f32 %v5075_v62, %v5252_v26  ;;  %v8779_v26 = vld [vmem:[%s13624_s6 + $0xe0] ss:$8 sps:$4 sm:$0xff]  }
 0x655   : > { %v5077_v19 = vpop.f32.mrf.mxu1  ;;  %v5254_v7 = vpop.f32.mrf.mxu0 }
 0x656   : > { %v12673_v60 = vpack.c.bf16 %v5305_v24, %v5304_v9  ;;  %v8784_v19 = vld [vmem:[%s13624_s6 + $0xd4] ss:$8 sps:$4 sm:$0xff]  }
 0x657   : > { %v5080_v30 = vpop.f32.mrf.mxu1  ;;  %v5257_v54 = vpop.f32.mrf.mxu0 }
 0x658   : > { %8150 = vmatmul.mubr.msk.bf16.vlgmr.msra.gmra.mxu0 %vm5458_vm10, %v12673_v60  ;;  %v5351_v10 = vshll.u32 %v12673_v60, 16  ;;  %v5306_v51 = vmax.f32 %v5080_v30, %v5257_v54  ;;  %v5349_v63 = vshrl.u32 %v12673_v60, 16  ;;  %v6277_v35 = vrot.slane %v12673_v60, 2 }
 0x659   : > { %v5082_v46 = vpop.f32.mrf.mxu1  ;;  %v5259_v13 = vpop.f32.mrf.mxu0  ;;  %5707 = vmatprep.mubr.bf16.mxu0 %v14112_v50  ;;  %6139 = vmatpush1.bf16.msra.mxu0 %v6129_v31 }
 0x65a   : > { %6140 = vmatprep.subr.bf16.mxu0 %v8761_v28  ;;  %v5353_v27 = vrot.slane %v5351_v10, 1 }
 0x65b   : > { %v5083_v41 = vpop.f32.mrf.mxu1  ;;  %v5260_v2 = vpop.f32.mrf.mxu0 }
 0x65c   : > { %v5307_v3 = vmax.f32 %v5083_v41, %v5260_v2  ;;  %v5354_v16 = vor.u32 %v5353_v27, %v5349_v63  ;;  %v8787_v2 = vld [vmem:[%s13624_s6 + $0xc4] ss:$8 sps:$4 sm:$0xff]  }
 0x65d   : > { %v5085_v18 = vpop.f32.mrf.mxu1  ;;  %v5262_v39 = vpop.f32.mrf.mxu0  ;;  %6141 = vmatpush1.bf16.msra.mxu0 %v8759_v29  ;;  %v8782_v29 = vld [vmem:[%s13624_s6 + $0xd0] ss:$8 sps:$4 sm:$0xff]  }
 0x65e   : > { %v12694_v5 = vpack.c.bf16 %v5307_v3, %v5306_v51  ;;  %6142 = vmatprep.subr.bf16.mxu0 %v8764_v14 }
 0x65f   : > { %v5088_v20 = vpop.f32.mrf.mxu1  ;;  %v5265_v55 = vpop.f32.mrf.mxu0 }
 0x660   : > { %v5356_v36 = vshll.u32 %v12694_v5, 16  ;;  %v6278_v56 = vrot.slane %v12694_v5, 2  ;;  %8151 = vmatmul.mubr.msk.bf16.gmra.mxu0 %vm5458_vm10, %v12694_v5  ;;  %v5308_v23 = vmax.f32 %v5088_v20, %v5265_v55  ;;  %v5360_v33 = vshrl.u32 %v12694_v5, 16  ;;  %v8785_v20 = vld [vmem:[%s13624_s6 + $0xc0] ss:$8 sps:$4 sm:$0xff]  }
 0x661   : > { %v5090_v40 = vpop.f32.mrf.mxu1  ;;  %v5267_v52 = vpop.f32.mrf.mxu0  ;;  %5717 = vmatprep.mubr.bf16.mxu0 %v14112_v50  ;;  %6143 = vmatpush1.bf16.msra.mxu0 %v8762_v38 }
 0x662   : > { %v5358_v15 = vrot.slane %v5356_v36, 1  ;;  %6144 = vmatprep.subr.bf16.mxu0 %v8767_v47  ;;  %v12714_v48 = vsel %vm3599_vm3, %v6277_v35, %v6278_v56  ;;  %v8790_v35 = vld [vmem:[%s13624_s6 + $0xb4] ss:$8 sps:$4 sm:$0xff]  }
 0x663   : > { %v5091_v44 = vpop.f32.mrf.mxu1  ;;  %v5268_v59 = vpop.f32.mrf.mxu0 }
 0x664   : > { %v5309_v17 = vmax.f32 %v5091_v44, %v5268_v59  ;;  %v5359_v6 = vsel %vm2113_vm2, %v5354_v16, %v5358_v15  ;;  %v5362_v45 = vor.u32 %v5360_v33, %v5358_v15  ;;  %v12796_v16 = vld [vmem:[%s13624_s6 + $0x1b0] sm:$0x33] }
 0x665   : > { %v5093_v21 = vpop.f32.mrf.mxu1  ;;  %v5270_v12 = vpop.f32.mrf.mxu0  ;;  %8130 = vmatmul.mubr.msk.bf16.vlgmr.msra.gmra.mxu1 %vm5458_vm10, %v5359_v6  ;;  %6145 = vmatpush1.bf16.msra.mxu0 %v8765_v4 }
 0x666   : > { %v12728_v8 = vpack.c.bf16 %v5309_v17, %v5308_v23  ;;  %5529 = vmatprep.mubr.bf16.mxu1 %v14112_v50  ;;  %5887 = vmatpush1.bf16.msra.mxu1 %v5877_v53  ;;  %v8788_v53 = vld [vmem:[%s13624_s6 + $0xb0] ss:$8 sps:$4 sm:$0xff]   ;;  %v8241_v23 = vcombine.high %v12796_v16, %v12796_v16 }
 0x667   : > { %v5096_v58 = vpop.f32.mrf.mxu1  ;;  %v5273_v42 = vpop.f32.mrf.mxu0  ;;  %6146 = vmatprep.subr.bf16.mxu0 %v8772_v57  ;;  %5888 = vmatprep.subr.bf16.mxu1 %v8775_v22 }
 0x668   : > { %8152 = vmatmul.mubr.msk.bf16.gmra.mxu0 %vm5458_vm10, %v12728_v8  ;;  %v5364_v11 = vshll.u32 %v12728_v8, 16  ;;  %v6280_v34 = vrot.slane %v12728_v8, 2  ;;  %v5310_v31 = vmax.f32 %v5096_v58, %v5273_v42  ;;  %v5368_v51 = vshrl.u32 %v12728_v8, 16 }
 0x669   : > { %v5098_v37 = vpop.f32.mrf.mxu1  ;;  %v5275_v25 = vpop.f32.mrf.mxu0  ;;  %5727 = vmatprep.mubr.bf16.mxu0 %v14112_v50  ;;  %6147 = vmatpush1.bf16.msra.mxu0 %v8770_v32 }
 0x66a   : > { %v5366_v62 = vrot.slane %v5364_v11, 1  ;;  %5889 = vmatpush1.bf16.msra.mxu1 %v8773_v43  ;;  %6148 = vmatprep.subr.bf16.mxu0 %v8778_v49  ;;  %v12760_v7 = vsel %vm3599_vm3, %v6278_v56, %v6280_v34 }
 0x66b   : > { %v5099_v9 = vpop.f32.mrf.mxu1  ;;  %v5276_v24 = vpop.f32.mrf.mxu0  ;;  %5890 = vmatprep.subr.bf16.mxu1 %v8781_v1 }
 0x66c   : > { %v5311_v28 = vmax.f32 %v5099_v9, %v5276_v24  ;;  %v5367_v30 = vsel %vm2113_vm2, %v5362_v45, %v5366_v62  ;;  %v5370_v27 = vor.u32 %v5368_v51, %v5366_v62 }
 0x66d   : > { %v5101_v54 = vpop.f32.mrf.mxu1  ;;  %v5278_v46 = vpop.f32.mrf.mxu0  ;;  %8131 = vmatmul.mubr.msk.bf16.gmra.mxu1 %vm5458_vm10, %v5367_v30  ;;  %6149 = vmatpush1.bf16.msra.mxu0 %v8776_v61 }
 0x66e   : > { %v12764_v13 = vpack.c.bf16 %v5311_v28, %v5310_v31  ;;  %5539 = vmatprep.mubr.bf16.mxu1 %v14112_v50  ;;  %5891 = vmatpush1.bf16.msra.mxu1 %v8779_v26 }
 0x66f   : > { %v5104_v14 = vpop.f32.mrf.mxu1  ;;  %v5281_v41 = vpop.f32.mrf.mxu0  ;;  %5892 = vmatprep.subr.bf16.mxu1 %v8784_v19 }
 0x670   : > { %8153 = vmatmul.mubr.msk.bf16.gmra.mxu0 %vm5458_vm10, %v12764_v13  ;;  %v5372_v3 = vshll.u32 %v12764_v13, 16  ;;  %v6282_v38 = vrot.slane %v12764_v13, 2  ;;  %v5312_v40 = vmax.f32 %v5104_v14, %v5281_v41  ;;  %v5376_v17 = vshrl.u32 %v12764_v13, 16 }
 0x671   : > { %v5106_v18 = vpop.f32.mrf.mxu1  ;;  %v5283_v39 = vpop.f32.mrf.mxu0  ;;  %5737 = vmatprep.mubr.bf16.mxu0 %v14112_v50 }
 0x672   : > { %v5374_v47 = vrot.slane %v5372_v3, 1  ;;  %5893 = vmatpush1.bf16.msra.mxu1 %v8782_v29  ;;  %v12790_v56 = vsel %vm3599_vm3, %v6280_v34, %v6282_v38 }
 0x673   : > { %v5107_v55 = vpop.f32.mrf.mxu1  ;;  %v5284_v0 = vpop.f32.mrf.mxu0  ;;  %5894 = vmatprep.subr.bf16.mxu1 %v8787_v2 }
 0x674   : > { %v5313_v52 = vmax.f32 %v5107_v55, %v5284_v0  ;;  %v5375_v4 = vsel %vm2113_vm2, %v5370_v27, %v5374_v47  ;;  %v5378_v43 = vor.u32 %v5376_v17, %v5374_v47  ;;  %v6028_v55 = vrot.slane %v5360_v33, 1 }
 0x675   : > { %v5109_v15 = vpop.f32.mrf.mxu1  ;;  %v5286_v44 = vpop.f32.mrf.mxu0  ;;  %8132 = vmatmul.mubr.msk.bf16.gmra.mxu1 %vm5458_vm10, %v5375_v4  ;;  %v6026_v4 = vrot.slane %v5351_v10, 2 }
 0x676   : > { %v12799_v59 = vpack.c.bf16 %v5313_v52, %v5312_v40  ;;  %5549 = vmatprep.mubr.bf16.mxu1 %v14112_v50  ;;  %5895 = vmatpush1.bf16.msra.mxu1 %v8785_v20  ;;  %v6029_v20 = vrot.slane %v5356_v36, 2  ;;  %v6025_v52 = vrot.slane %v5349_v63, 1 }
 0x677   : > { %v5112_v57 = vpop.f32.mrf.mxu1  ;;  %v5289_v22 = vpop.f32.mrf.mxu0  ;;  %5896 = vmatprep.subr.bf16.mxu1 %v8790_v35 }
 0x678   : > { %8154 = vmatmul.mubr.msk.bf16.gmra.mxu0 %vm5458_vm10, %v12799_v59  ;;  %v5380_v6 = vshll.u32 %v12799_v59, 16  ;;  %v6284_v32 = vrot.slane %v12799_v59, 2  ;;  %v5314_v37 = vmax.f32 %v5112_v57, %v5289_v22  ;;  %v5384_v24 = vshrl.u32 %v12799_v59, 16 }
 0x679   : > { %v5114_v21 = vpop.f32.mrf.mxu1  ;;  %v5291_v12 = vpop.f32.mrf.mxu0  ;;  %5747 = vmatprep.mubr.bf16.mxu0 %v14112_v50  ;;  %v6030_v15 = vor.u32 %v6029_v20, %v6028_v55  ;;  %v6027_v63 = vor.u32 %v6026_v4, %v6025_v52  ;;  %v6032_v57 = vrot.slane %v5368_v51, 1  ;;  %v6033_v22 = vrot.slane %v5364_v11, 2 }
 0x67a   : > { %v5382_v49 = vrot.slane %v5380_v6, 1  ;;  %5897 = vmatpush1.bf16.msra.mxu1 %v8788_v53  ;;  %v12819_v1 = vsel %vm3599_vm3, %v6282_v38, %v6284_v32  ;;  %v6036_v51 = vrot.slane %v5376_v17, 1  ;;  %v6037_v11 = vrot.slane %v5372_v3, 2  ;;  %v8795_v17 = vld [vmem:[%s13624_s6 + $0x1a4] ss:$8 sps:$4 sm:$0xff]  }
 0x67b   : > { %v5115_v58 = vpop.f32.mrf.mxu1  ;;  %v5292_v42 = vpop.f32.mrf.mxu0  ;;  %8242 = vmatprep.subr.msk.bf16.mxu1 %vm5480_vm8, %v8241_v23  ;;  %v6031_v10 = vsel %vm3184_vm4, %v6027_v63, %v6030_v15  ;;  %v6034_v12 = vor.u32 %v6033_v22, %v6032_v57 }
 0x67c   : > { %v5315_v25 = vmax.f32 %v5115_v58, %v5292_v42  ;;  %v5383_v61 = vsel %vm2113_vm2, %v5378_v43, %v5382_v49  ;;  %v5386_v54 = vor.u32 %v5384_v24, %v5382_v49  ;;  %v8240_v43 = vcombine.low %v12796_v16, %v12796_v16 }
 0x67d   : > { %v5117_v34 = vpop.f32.mrf.mxu1  ;;  %v5294_v45 = vpop.f32.mrf.mxu0  ;;  %8133 = vmatmul.mubr.msk.bf16.gmra.mxu1 %vm5458_vm10, %v5383_v61  ;;  %v5788_v49 = vrot.slane %v12694_v5, 1  ;;  %v5787_v58 = vrot.slane %v12673_v60, 1  ;;  %v6038_v42 = vor.u32 %v6037_v11, %v6036_v51  ;;  %v8793_v5 = vld [vmem:[%s13624_s6 + $0x1a0] ss:$8 sps:$4 sm:$0xff]   ;;  %v6040_v16 = vrot.slane %v5384_v24, 1 }
 0x67e   : > { %v12823_v62 = vpack.c.bf16 %v5315_v25, %v5314_v37  ;;  %5559 = vmatprep.mubr.bf16.mxu1 %v14112_v50  ;;  %v6367_v37 = vsel %vm5480_vm8, %v8240_v43, 0  ;;  %v6041_v25 = vrot.slane %v5380_v6, 2  ;;  %v8798_v61 = vld [vmem:[%s13624_s6 + $0x194] ss:$8 sps:$4 sm:$0xff]   ;;  %v5790_v34 = vrot.slane %v12728_v8, 1 }
 0x67f   : > { %v5120_v26 = vpop.f32.mrf.mxu1  ;;  %v5297_v9 = vpop.f32.mrf.mxu0  ;;  %v5789_v3 = vsel %vm2803_vm1, %v5787_v58, %v5788_v49  ;;  %v6039_v60 = vsel %vm3184_vm4, %v6034_v12, %v6038_v42  ;;  %v8796_v45 = vld [vmem:[%s13624_s6 + $0x190] ss:$8 sps:$4 sm:$0xff]   ;;  %v8801_v6 = vld [vmem:[%s13624_s6 + $0x184] ss:$8 sps:$4 sm:$0xff]   ;;  %v8799_v8 = vld [vmem:[%s13624_s6 + $0x180] ss:$8 sps:$4 sm:$0xff]  }
 0x680   : > { %8155 = vmatmul.mubr.msk.bf16.gmra.mxu0 %vm5458_vm10, %v12823_v62  ;;  %v5388_v19 = vshll.u32 %v12823_v62, 16  ;;  %v6286_v30 = vrot.slane %v12823_v62, 2  ;;  %v5316_v2 = vmax.f32 %v5120_v26, %v5297_v9  ;;  %v5392_v0 = vshrl.u32 %v12823_v62, 16 }
 0x681   : > { %v5122_v31 = vpop.f32.mrf.mxu1  ;;  %v5299_v28 = vpop.f32.mrf.mxu0  ;;  %5757 = vmatprep.mubr.bf16.mxu0 %v14112_v50  ;;  %v6042_v26 = vor.u32 %v6041_v25, %v6040_v16  ;;  %v5791_v9 = vsel %vm2803_vm1, %v5788_v49, %v5790_v34 }
 0x682   : > { %v5390_v46 = vrot.slane %v5388_v19, 1  ;;  %v12837_v41 = vsel %vm3599_vm3, %v6284_v32, %v6286_v30  ;;  %v6035_v32 = vsel %vm3184_vm4, %v6030_v15, %v6034_v12  ;;  %v6044_v31 = vrot.slane %v5392_v0, 1 }
 0x683   : > { %v5123_v29 = vpop.f32.mrf.mxu1  ;;  %v5300_v14 = vpop.f32.mrf.mxu0  ;;  %v6043_v24 = vsel %vm3184_vm4, %v6038_v42, %v6042_v26  ;;  %v6045_v28 = vrot.slane %v5388_v19, 2  ;;  %v8807_v19 = vld [vmem:[%s13624_s6 + $0x164] ss:$8 sps:$4 sm:$0xff]  }
 0x684   : > { %v5317_v18 = vmax.f32 %v5123_v29, %v5300_v14  ;;  %v5391_v39 = vsel %vm2113_vm2, %v5386_v54, %v5390_v46  ;;  %v5394_v36 = vor.u32 %v5392_v0, %v5390_v46  ;;  %v5792_v54 = vrot.slane %v12764_v13, 1  ;;  %v8802_v46 = vld [vmem:[%s13624_s6 + $0x170] ss:$8 sps:$4 sm:$0xff]   ;;  %v8805_v13 = vld [vmem:[%s13624_s6 + $0x160] ss:$8 sps:$4 sm:$0xff]  }
 0x685   : > { %v5125_v38 = vpop.f32.mrf.mxu1  ;;  %v5302_v27 = vpop.f32.mrf.mxu0  ;;  %8134 = vmatmul.mubr.msk.bf16.gmra.mxu1 %vm5458_vm10, %v5391_v39  ;;  %v6046_v29 = vor.u32 %v6045_v28, %v6044_v31  ;;  %v5796_v0 = vrot.slane %v12823_v62, 1 }
 0x686   : > { %v12841_v47 = vpack.c.bf16 %v5317_v18, %v5316_v2  ;;  %5569 = vmatprep.mubr.bf16.mxu1 %v14112_v50  ;;  %v5793_v14 = vsel %vm2803_vm1, %v5790_v34, %v5792_v54  ;;  %v5794_v38 = vrot.slane %v12799_v59, 1 }
 0x687   : > { %v6047_v2 = vsel %vm3184_vm4, %v6042_v26, %v6046_v29 }
 0x688   : > { %8156 = vmatmul.mubr.msk.bf16.gmra.mxu0 %vm5458_vm10, %v12841_v47  ;;  %v5396_v35 = vshll.u32 %v12841_v47, 16  ;;  %v6288_v40 = vrot.slane %v12841_v47, 2  ;;  %v5400_v23 = vshrl.u32 %v12841_v47, 16  ;;  %v5795_v20 = vsel %vm2803_vm1, %v5792_v54, %v5794_v38 }
 0x689   : > { %6166 = vmatprep.mubr.bf16.mxu0 %v14112_v50  ;;  %v5797_v59 = vsel %vm2803_vm1, %v5794_v38, %v5796_v0 }
 0x68a   : > { %v5398_v33 = vrot.slane %v5396_v35, 1  ;;  %v12863_v44 = vsel %vm3599_vm3, %v6286_v30, %v6288_v40  ;;  %v8804_v30 = vld [vmem:[%s13624_s6 + $0x174] ss:$8 sps:$4 sm:$0xff]   ;;  %v6048_v18 = vrot.slane %v5400_v23, 1  ;;  %v6049_v39 = vrot.slane %v5396_v35, 2 }
 0x68b   : > { %v5798_v35 = vrot.slane %v12841_v47, 1 }
 0x68c   : > { %v5399_v53 = vsel %vm2113_vm2, %v5394_v36, %v5398_v33  ;;  %v5402_v21 = vor.u32 %v5400_v23, %v5398_v33  ;;  %v6050_v27 = vor.u32 %v6049_v39, %v6048_v18 }
 0x68d   : > { %8135 = vmatmul.mubr.msk.bf16.gmra.mxu1 %vm5458_vm10, %v5399_v53  ;;  %v5799_v52 = vsel %vm2803_vm1, %v5796_v0, %v5798_v35 }
 0x68e   : > { %5579 = vmatprep.mubr.bf16.mxu1 %v14112_v50  ;;  %v6051_v55 = vsel %vm3184_vm4, %v6046_v29, %v6050_v27 }
 0x690   : > { %8212 = vmatmul.mubr.msk.bf16.vlgmr.msra.gmra.mxu0 %vm5458_vm10, %v6031_v10 }
 0x691   : > { %6176 = vmatprep.mubr.bf16.mxu0 %v14112_v50 }
 0x695   : > { %8136 = vmatmul.mubr.msk.bf16.gmra.mxu1 %vm5458_vm10, %v5402_v21 }
 0x696   : > { %5914 = vmatprep.mubr.bf16.mxu1 %v14112_v50 }
 0x698   : > { %8213 = vmatmul.mubr.msk.bf16.gmra.mxu0 %vm5458_vm10, %v6035_v32 }
 0x699   : > { %6186 = vmatprep.mubr.bf16.mxu0 %v14112_v50 }
 0x69d   : > { %8181 = vmatmul.mubr.msk.bf16.vlgmr.msra.gmra.mxu1 %vm5458_vm10, %v5789_v3 }
 0x69e   : > { %5924 = vmatprep.mubr.bf16.mxu1 %v14112_v50  ;;  %6377 = vmatpush1.bf16.msra.mxu1 %v6367_v37 }
 0x69f   : > { %6378 = vmatprep.subr.bf16.mxu1 %v8795_v17 }
 0x6a0   : > { %8214 = vmatmul.mubr.msk.bf16.gmra.mxu0 %vm5458_vm10, %v6039_v60 }
 0x6a1   : > { %6196 = vmatprep.mubr.bf16.mxu0 %v14112_v50 }
 0x6a2   : > { %6379 = vmatpush1.bf16.msra.mxu1 %v8793_v5 }
 0x6a3   : > { %6380 = vmatprep.subr.bf16.mxu1 %v8798_v61 }
 0x6a5   : > { %8182 = vmatmul.mubr.msk.bf16.gmra.mxu1 %vm5458_vm10, %v5791_v9 }
 0x6a6   : > { %5934 = vmatprep.mubr.bf16.mxu1 %v14112_v50  ;;  %6381 = vmatpush1.bf16.msra.mxu1 %v8796_v45 }
 0x6a7   : > { %6382 = vmatprep.subr.bf16.mxu1 %v8801_v6 }
 0x6a8   : > { %8215 = vmatmul.mubr.msk.bf16.gmra.mxu0 %vm5458_vm10, %v6043_v24 }
 0x6a9   : > { %6206 = vmatprep.mubr.bf16.mxu0 %v14112_v50 }
 0x6aa   : > { %6383 = vmatpush1.bf16.msra.mxu1 %v8799_v8 }
 0x6ab   : > { %6384 = vmatprep.subr.bf16.mxu1 %v8804_v30 }
 0x6ad   : > { %8183 = vmatmul.mubr.msk.bf16.gmra.mxu1 %vm5458_vm10, %v5793_v14 }
 0x6ae   : > { %5944 = vmatprep.mubr.bf16.mxu1 %v14112_v50  ;;  %6385 = vmatpush1.bf16.msra.mxu1 %v8802_v46 }
 0x6af   : > { %6386 = vmatprep.subr.bf16.mxu1 %v8807_v19 }
 0x6b0   : > { %8216 = vmatmul.mubr.msk.bf16.gmra.mxu0 %vm5458_vm10, %v6047_v2 }
 0x6b1   : > { %6216 = vmatprep.mubr.bf16.mxu0 %v14112_v50 }
 0x6b2   : > { %6387 = vmatpush1.bf16.msra.mxu1 %v8805_v13 }
 0x6b3   : > { %6875 = vmatprep.subr.bf16.mxu1 %v14112_v50 }
 0x6b5   : > { %8184 = vmatmul.mubr.msk.bf16.gmra.mxu1 %vm5458_vm10, %v5795_v20 }
 0x6b6   : > { %5954 = vmatprep.mubr.bf16.mxu1 %v14112_v50 }
 0x6b8   : > { %8217 = vmatmul.mubr.msk.bf16.gmra.mxu0 %vm5458_vm10, %v6051_v55 }
 0x6b9   : > { %6226 = vmatprep.mubr.bf16.mxu0 %v14112_v50 }
 0x6bd   : > { %8185 = vmatmul.mubr.msk.bf16.gmra.mxu1 %vm5458_vm10, %v5797_v59 }
 0x6be   : > { %5964 = vmatprep.mubr.bf16.mxu1 %v14112_v50 }
 0x6c0   : > { %8218 = vmatmul.mubr.msk.bf16.gmra.mxu0 %vm5458_vm10, %v6050_v27 }
 0x6c1   : > { %6652 = vmatprep.mubr.bf16.mxu0 %v14112_v50 }
 0x6c5   : > { %8186 = vmatmul.mubr.msk.bf16.gmra.mxu1 %vm5458_vm10, %v5799_v52 }
 0x6c6   : > { %5974 = vmatprep.mubr.bf16.mxu1 %v14112_v50 }
 0x6cd   : > { %8187 = vmatmul.mubr.msk.bf16.gmra.mxu1 %vm5458_vm10, %v5798_v35 }
 0x6ce   : > { %6404 = vmatprep.mubr.bf16.mxu1 %v14112_v50 }
 0x6d5   : > { %8243 = vmatmul.mubr.msk.bf16.vlgmr.msra.gmra.mxu1 %vm5458_vm10, %v12714_v48 }
 0x6d6   : > { %6414 = vmatprep.mubr.bf16.mxu1 %v14112_v50 }
 0x6dd   : > { %8244 = vmatmul.mubr.msk.bf16.gmra.mxu1 %vm5458_vm10, %v12760_v7 }
 0x6de   : > { %6424 = vmatprep.mubr.bf16.mxu1 %v14112_v50 }
 0x6e5   : > { %8245 = vmatmul.mubr.msk.bf16.gmra.mxu1 %vm5458_vm10, %v12790_v56 }
 0x6e6   : > { %6434 = vmatprep.mubr.bf16.mxu1 %v14112_v50 }
 0x6ed   : > { %8246 = vmatmul.mubr.msk.bf16.gmra.mxu1 %vm5458_vm10, %v12819_v1 }
 0x6ee   : > { %6444 = vmatprep.mubr.bf16.mxu1 %v14112_v50 }
 0x6f5   : > { %8247 = vmatmul.mubr.msk.bf16.gmra.mxu1 %vm5458_vm10, %v12837_v41 }
 0x6f6   : > { %6454 = vmatprep.mubr.bf16.mxu1 %v14112_v50 }
 0x6fd   : > { %8248 = vmatmul.mubr.msk.bf16.gmra.mxu1 %vm5458_vm10, %v12863_v44 }
 0x6fe   : > { %6464 = vmatprep.mubr.bf16.mxu1 %v14112_v50 }
 0x705   : > { %8249 = vmatmul.mubr.msk.bf16.gmra.mxu1 %vm5458_vm10, %v6288_v40 }
 0x718   : > { %v5699_v48 = vpop.f32.mrf.mxu0 }
 0x71a   : > { %v5701_v7 = vpop.f32.mrf.mxu0 }
 0x71c   : > { %v5703_v56 = vpop.f32.mrf.mxu0 }
 0x71e   : > { %v5705_v1 = vpop.f32.mrf.mxu0 }
 0x720   : > { %v5709_v62 = vpop.f32.mrf.mxu0 }
 0x722   : > { %v5711_v4 = vpop.f32.mrf.mxu0 }
 0x724   : > { %v5713_v36 = vpop.f32.mrf.mxu0 }
 0x725   : > { %v5521_v33 = vpop.f32.mrf.mxu1 }
 0x726   : > { %v12989_v41 = vadd.f32 %v5699_v48, %v5521_v33  ;;  %v5715_v15 = vpop.f32.mrf.mxu0 }
 0x727   : > { %v5523_v53 = vpop.f32.mrf.mxu1 }
 0x728   : > { %v12991_v63 = vadd.f32 %v5701_v7, %v5523_v53  ;;  %v5719_v44 = vpop.f32.mrf.mxu0 }
 0x729   : > { %v5525_v10 = vpop.f32.mrf.mxu1 }
 0x72a   : > { %v12993_v57 = vadd.f32 %v5703_v56, %v5525_v10  ;;  %v5721_v47 = vpop.f32.mrf.mxu0 }
 0x72b   : > { %v5527_v40 = vpop.f32.mrf.mxu1 }
 0x72c   : > { %v12995_v22 = vadd.f32 %v5705_v1, %v5527_v40  ;;  %v5723_v23 = vpop.f32.mrf.mxu0 }
 0x72d   : > { %v5531_v21 = vpop.f32.mrf.mxu1 }
 0x72e   : > { %v12997_v12 = vadd.f32 %v5709_v62, %v5531_v21  ;;  %v5725_v32 = vpop.f32.mrf.mxu0 }
 0x72f   : > { %v5533_v51 = vpop.f32.mrf.mxu1 }
 0x730   : > { %v12999_v11 = vadd.f32 %v5711_v4, %v5533_v51  ;;  %v5729_v43 = vpop.f32.mrf.mxu0 }
 0x731   : > { %v5535_v49 = vpop.f32.mrf.mxu1 }
 0x732   : > { %v13001_v58 = vadd.f32 %v5713_v36, %v5535_v49  ;;  %v5731_v42 = vpop.f32.mrf.mxu0 }
 0x733   : > { %v5537_v37 = vpop.f32.mrf.mxu1 }
 0x734   : > { %v13003_v17 = vadd.f32 %v5715_v15, %v5537_v37  ;;  %v5733_v3 = vpop.f32.mrf.mxu0 }
 0x735   : > { %v5541_v5 = vpop.f32.mrf.mxu1 }
 0x736   : > { %v13005_v60 = vadd.f32 %v5719_v44, %v5541_v5  ;;  %v5735_v16 = vpop.f32.mrf.mxu0 }
 0x737   : > { %v5543_v25 = vpop.f32.mrf.mxu1 }
 0x738   : > { %v13007_v61 = vadd.f32 %v5721_v47, %v5543_v25  ;;  %v5739_v34 = vpop.f32.mrf.mxu0 }
 0x739   : > { %v5545_v45 = vpop.f32.mrf.mxu1 }
 0x73a   : > { %v13009_v26 = vadd.f32 %v5723_v23, %v5545_v45  ;;  %v5741_v6 = vpop.f32.mrf.mxu0 }
 0x73b   : > { %v5547_v9 = vpop.f32.mrf.mxu1 }
 0x73c   : > { %v13011_v8 = vadd.f32 %v5725_v32, %v5547_v9  ;;  %v5743_v24 = vpop.f32.mrf.mxu0 }
 0x73d   : > { %v5551_v31 = vpop.f32.mrf.mxu1 }
 0x73e   : > { %v13013_v28 = vadd.f32 %v5729_v43, %v5551_v31  ;;  %v5745_v30 = vpop.f32.mrf.mxu0 }
 0x73f   : > { %v5553_v54 = vpop.f32.mrf.mxu1 }
 0x740   : > { %v13015_v46 = vadd.f32 %v5731_v42, %v5553_v54  ;;  %v5749_v29 = vpop.f32.mrf.mxu0 }
 0x741   : > { %v5555_v19 = vpop.f32.mrf.mxu1 }
 0x742   : > { %v13017_v14 = vadd.f32 %v5733_v3, %v5555_v19  ;;  %v5751_v13 = vpop.f32.mrf.mxu0 }
 0x743   : > { %v5557_v2 = vpop.f32.mrf.mxu1 }
 0x744   : > { %v13019_v18 = vadd.f32 %v5735_v16, %v5557_v2  ;;  %v5753_v39 = vpop.f32.mrf.mxu0 }
 0x745   : > { %v5561_v38 = vpop.f32.mrf.mxu1 }
 0x746   : > { %v13021_v27 = vadd.f32 %v5739_v34, %v5561_v38  ;;  %v13023_v20 = vpop.f32.mrf.mxu0 }
 0x747   : > { %v5563_v55 = vpop.f32.mrf.mxu1 }
 0x748   : > { %v13025_v0 = vadd.f32 %v5741_v6, %v5563_v55  ;;  %v13027_v59 = vpop.f32.mrf.mxu0 }
 0x749   : > { %v5565_v35 = vpop.f32.mrf.mxu1 }
 0x74a   : > { %v13029_v52 = vadd.f32 %v5743_v24, %v5565_v35  ;;  %v13031_v48 = vpop.f32.mrf.mxu0 }
 0x74b   : > { %v5567_v7 = vpop.f32.mrf.mxu1 }
 0x74c   : > { %v13033_v56 = vadd.f32 %v5745_v30, %v5567_v7  ;;  %v13037_v4 = vpop.f32.mrf.mxu0 }
 0x74d   : > { %v5571_v1 = vpop.f32.mrf.mxu1 }
 0x74e   : > { %v13035_v62 = vadd.f32 %v5749_v29, %v5571_v1  ;;  %v13043_v44 = vpop.f32.mrf.mxu0 }
 0x74f   : > { %v5573_v36 = vpop.f32.mrf.mxu1  ;;  %14113 = vst [vmem:[#allocation54_spill] sm:$0xff] %v13043_v44 }
 0x750   : > { %v13039_v33 = vadd.f32 %v5751_v13, %v5573_v36  ;;  %v6168_v40 = vpop.f32.mrf.mxu0 }
 0x751   : > { %v5575_v15 = vpop.f32.mrf.mxu1 }
 0x752   : > { %v13041_v53 = vadd.f32 %v5753_v39, %v5575_v15  ;;  %v6170_v32 = vpop.f32.mrf.mxu0 }
 0x753   : > { %v13045_v10 = vpop.f32.mrf.mxu1 }
 0x754   : > { %v6172_v42 = vpop.f32.mrf.mxu0 }
 0x755   : > { %v13047_v47 = vpop.f32.mrf.mxu1 }
 0x756   : > { %v6174_v45 = vpop.f32.mrf.mxu0 }
 0x757   : > { %v13049_v23 = vpop.f32.mrf.mxu1 }
 0x758   : > { %v6178_v54 = vpop.f32.mrf.mxu0 }
 0x759   : > { %v13051_v21 = vpop.f32.mrf.mxu1 }
 0x75b   : > { %v13053_v51 = vpop.f32.mrf.mxu1 }
 0x75c   : > { %14114 = vst [vmem:[#allocation59_spill] sm:$0xff] %v13053_v51 }
 0x75d   : > { %v5916_v43 = vpop.f32.mrf.mxu1 }
 0x75e   : > { %v5985_v49 = vadd.f32 %v5916_v43, %v12989_v41 }
 0x75f   : > { %v5918_v37 = vpop.f32.mrf.mxu1 }
 0x760   : > { %v5986_v3 = vadd.f32 %v5918_v37, %v12991_v63  ;;  %v13057_v5 = vadd.f32 %v6168_v40, %v5985_v49 }
 0x761   : > { %v5920_v16 = vpop.f32.mrf.mxu1 }
 0x762   : > { %v5987_v25 = vadd.f32 %v5920_v16, %v12993_v57  ;;  %v13060_v34 = vadd.f32 %v6170_v32, %v5986_v3 }
 0x763   : > { %v5922_v6 = vpop.f32.mrf.mxu1 }
 0x764   : > { %v5988_v9 = vadd.f32 %v5922_v6, %v12995_v22  ;;  %v13063_v24 = vadd.f32 %v6172_v42, %v5987_v25 }
 0x765   : > { %v5926_v31 = vpop.f32.mrf.mxu1 }
 0x766   : > { %v5989_v41 = vadd.f32 %v5926_v31, %v12997_v12  ;;  %v13066_v30 = vadd.f32 %v6174_v45, %v5988_v9 }
 0x767   : > { %v5928_v63 = vpop.f32.mrf.mxu1 }
 0x768   : > { %v13069_v29 = vadd.f32 %v5928_v63, %v12999_v11  ;;  %v13071_v19 = vadd.f32 %v6178_v54, %v5989_v41  ;;  %v6180_v11 = vpop.f32.mrf.mxu0 }
 0x769   : > { %v5930_v57 = vpop.f32.mrf.mxu1 }
 0x76a   : > { %v13074_v13 = vadd.f32 %v5930_v57, %v13001_v58  ;;  %v6182_v36 = vpop.f32.mrf.mxu0 }
 0x76b   : > { %v5932_v2 = vpop.f32.mrf.mxu1 }
 0x76c   : > { %v13077_v22 = vadd.f32 %v5932_v2, %v13003_v17 }
 0x76d   : > { %v5936_v39 = vpop.f32.mrf.mxu1 }
 0x76e   : > { %v13080_v12 = vadd.f32 %v5936_v39, %v13005_v60  ;;  %v6503_v39 = vld [vmem:[%s13625_s7] sm:$0x3] }
 0x76f   : > { %v5938_v38 = vpop.f32.mrf.mxu1 }
 0x770   : > { %v13083_v55 = vadd.f32 %v5938_v38, %v13007_v61  ;;  %v13097_v61 = vpop.f32.mrf.mxu0 }
 0x771   : > { %v5940_v35 = vpop.f32.mrf.mxu1 }
 0x772   : > { %v13086_v7 = vadd.f32 %v5940_v35, %v13009_v26 }
 0x773   : > { %v5942_v1 = vpop.f32.mrf.mxu1 }
 0x774   : > { %v13089_v58 = vadd.f32 %v5942_v1, %v13011_v8  ;;  %v13105_v8 = vpop.f32.mrf.mxu0  ;;  %v14117_v1 = vld [vmem:[#allocation94_spill] sm:$0xff] }
 0x775   : > { %v5946_v17 = vpop.f32.mrf.mxu1 }
 0x776   : > { %v13092_v15 = vadd.f32 %v5946_v17, %v13013_v28  ;;  %v13113_v3 = vpop.f32.mrf.mxu0  ;;  %v14118_v17 = vsub.s32 0, %v14117_v1 }
 0x777   : > { %v5948_v60 = vpop.f32.mrf.mxu1 }
 0x778   : > { %v13095_v40 = vadd.f32 %v5948_v60, %v13015_v46  ;;  %v13121_v45 = vpop.f32.mrf.mxu0  ;;  %v13156_v60 = vrot.slane %v6503_v39, %v14118_v17 }
 0x779   : > { %v5950_v32 = vpop.f32.mrf.mxu1 }
 0x77a   : > { %v13100_v43 = vadd.f32 %v5950_v32, %v13017_v14  ;;  %v13129_v31 = vpop.f32.mrf.mxu0 }
 0x77b   : > { %v5952_v26 = vpop.f32.mrf.mxu1 }
 0x77c   : > { %v13103_v49 = vadd.f32 %v5952_v26, %v13019_v18 }
 0x77d   : > { %v5956_v42 = vpop.f32.mrf.mxu1 }
 0x77e   : > { %v13108_v28 = vadd.f32 %v5956_v42, %v13021_v27  ;;  %v14119_v42 = vsub.s32 1, %v14117_v1 }
 0x77f   : > { %v5958_v37 = vpop.f32.mrf.mxu1 }
 0x780   : > { %v13111_v46 = vadd.f32 %v5958_v37, %v13025_v0  ;;  %v13161_v37 = vrot.slane %v6503_v39, %v14119_v42 }
 0x781   : > { %v5960_v16 = vpop.f32.mrf.mxu1 }
 0x782   : > { %v13116_v14 = vadd.f32 %v5960_v16, %v13029_v52 }
 0x783   : > { %v5962_v25 = vpop.f32.mrf.mxu1 }
 0x784   : > { %v13119_v18 = vadd.f32 %v5962_v25, %v13033_v56  ;;  %v13136_v56 = vpop.f32.mrf.mxu0 }
 0x785   : > { %v5966_v6 = vpop.f32.mrf.mxu1 }
 0x786   : > { %v13124_v27 = vadd.f32 %v5966_v6, %v13035_v62  ;;  %v13142_v62 = vpop.f32.mrf.mxu0 }
 0x787   : > { %v5968_v9 = vpop.f32.mrf.mxu1 }
 0x788   : > { %v13127_v0 = vadd.f32 %v5968_v9, %v13039_v33 }
 0x789   : > { %v5970_v41 = vpop.f32.mrf.mxu1 }
 0x78a   : > { %v13132_v52 = vadd.f32 %v5970_v41, %v13041_v53  ;;  %v13151_v53 = vpop.f32.mrf.mxu0 }
 0x78b   : > { %v13134_v54 = vpop.f32.mrf.mxu1 }
 0x78c   : > { %v13163_v16 = vpop.f32.mrf.mxu0 }
 0x78d   : > { %v13138_v63 = vpop.f32.mrf.mxu1 }
 0x78e   : > { %v13173_v39 = vpop.f32.mrf.mxu0 }
 0x78f   : > { %v13140_v57 = vpop.f32.mrf.mxu1 }
 0x790   : > { %v6210_v44 = vpop.f32.mrf.mxu0 }
 0x791   : > { %v13144_v2 = vpop.f32.mrf.mxu1 }
 0x792   : > { %14115 = vst [vmem:[#allocation15_spill] sm:$0xff] %v13144_v2 }
 0x793   : > { %v13146_v33 = vpop.f32.mrf.mxu1 }
 0x794   : > { %14116 = vst [vmem:[#allocation71_spill] sm:$0xff] %v13146_v33 }
 0x795   : > { %v6406_v38 = vpop.f32.mrf.mxu1 }
 0x796   : > { %v6475_v35 = vadd.f32 %v6406_v38, %v13057_v5 }
 0x797   : > { %v6408_v32 = vpop.f32.mrf.mxu1 }
 0x798   : > { %v6476_v26 = vadd.f32 %v6408_v32, %v13060_v34  ;;  %v6515_v6 = vadd.f32 %v13156_v60, %v6475_v35  ;;  %v8814_v34 = vld [vmem:[%s13627_s9 + $0x38] sm:$0xff]   ;;  %v6242_v32 = vadd.f32 %v6180_v11, %v13069_v29 }
 0x799   : > { %v6410_v25 = vpop.f32.mrf.mxu1  ;;  %6876 = vmatpush1.bf16.msra.mxu1 %v8814_v34  ;;  %v6212_v34 = vpop.f32.mrf.mxu0 }
 0x79a   : > { %v6477_v9 = vadd.f32 %v6410_v25, %v13063_v24  ;;  %v6516_v5 = vadd.f32 %v13161_v37, %v6476_v26  ;;  %v6543_v42 = vmax.f32 %v6515_v6, 0.0  ;;  %6877 = vmatprep.subr.bf16.mxu1 %v14112_v50  ;;  %v6244_v6 = vadd.f32 %v13097_v61, %v13077_v22 }
 0x79b   : > { %v6412_v41 = vpop.f32.mrf.mxu1 }
 0x79c   : > { %v6517_v38 = vadd.f32 %v13156_v60, %v6477_v9  ;;  %v6478_v17 = vadd.f32 %v6412_v41, %v13066_v30  ;;  %v6243_v9 = vadd.f32 %v6182_v36, %v13074_v13  ;;  %v6544_v30 = vmax.f32 %v6516_v5, 0.0 }
 0x79d   : > { %v6416_v1 = vpop.f32.mrf.mxu1 }
 0x79e   : > { %v6545_v35 = vmax.f32 %v6517_v38, 0.0  ;;  %v6518_v24 = vadd.f32 %v13161_v37, %v6478_v17  ;;  %v6479_v25 = vadd.f32 %v6416_v1, %v13071_v19  ;;  %v6245_v17 = vadd.f32 %v13105_v8, %v13080_v12  ;;  %v6214_v12 = vpop.f32.mrf.mxu0 }
 0x79f   : > { %v6418_v26 = vpop.f32.mrf.mxu1 }
 0x7a0   : > { %v13180_v41 = vpack.c.bf16 %v6545_v35, %v6543_v42  ;;  %v6546_v33 = vmax.f32 %v6518_v24, 0.0  ;;  %v6480_v2 = vadd.f32 %v6418_v26, %v6242_v32  ;;  %v6519_v29 = vadd.f32 %v13156_v60, %v6479_v25 }
 0x7a1   : > { %v6420_v51 = vpop.f32.mrf.mxu1  ;;  %v6246_v32 = vadd.f32 %v13113_v3, %v13083_v55  ;;  %v6248_v55 = vadd.f32 %v13129_v31, %v13089_v58 }
 0x7a2   : > { %v6481_v11 = vadd.f32 %v6420_v51, %v6243_v9  ;;  %v13185_v19 = vpack.c.bf16 %v6546_v33, %v6544_v30  ;;  %v6520_v13 = vadd.f32 %v13161_v37, %v6480_v2  ;;  %v6547_v51 = vmax.f32 %v6519_v29, 0.0 }
 0x7a3   : > { %v6422_v38 = vpop.f32.mrf.mxu1  ;;  %v6247_v2 = vadd.f32 %v13121_v45, %v13086_v7 }
 0x7a4   : > { %v6521_v36 = vadd.f32 %v13156_v60, %v6481_v11  ;;  %v6482_v5 = vadd.f32 %v6422_v38, %v6244_v6  ;;  %v6548_v35 = vmax.f32 %v6520_v13, 0.0  ;;  %v6249_v6 = vadd.f32 %v13136_v56, %v13092_v15  ;;  %v6218_v38 = vpop.f32.mrf.mxu0 }
 0x7a5   : > { %v6426_v1 = vpop.f32.mrf.mxu1 }
 0x7a6   : > { %v6549_v42 = vmax.f32 %v6521_v36, 0.0  ;;  %v6522_v22 = vadd.f32 %v13161_v37, %v6482_v5  ;;  %v6483_v61 = vadd.f32 %v6426_v1, %v6245_v17  ;;  %v6250_v36 = vadd.f32 %v13142_v62, %v13095_v40  ;;  %v6220_v15 = vpop.f32.mrf.mxu0 }
 0x7a7   : > { %v6428_v33 = vpop.f32.mrf.mxu1  ;;  %v6252_v40 = vadd.f32 %v13163_v16, %v13103_v49 }
 0x7a8   : > { %v13196_v24 = vpack.c.bf16 %v6549_v42, %v6547_v51  ;;  %v6550_v25 = vmax.f32 %v6522_v22, 0.0  ;;  %v6484_v26 = vadd.f32 %v6428_v33, %v6246_v32  ;;  %v6523_v9 = vadd.f32 %v13156_v60, %v6483_v61 }
 0x7a9   : > { %v6430_v8 = vpop.f32.mrf.mxu1  ;;  %v6251_v32 = vadd.f32 %v13151_v53, %v13100_v43 }
 0x7aa   : > { %v6485_v30 = vadd.f32 %v6430_v8, %v6247_v2  ;;  %v13201_v3 = vpack.c.bf16 %v6550_v25, %v6548_v35  ;;  %v6524_v11 = vadd.f32 %v13161_v37, %v6484_v26  ;;  %v6551_v5 = vmax.f32 %v6523_v9, 0.0  ;;  %v6222_v8 = vpop.f32.mrf.mxu0 }
 0x7ab   : > { %v6432_v29 = vpop.f32.mrf.mxu1  ;;  %v6253_v26 = vadd.f32 %v13173_v39, %v13108_v28 }
 0x7ac   : > { %v6525_v7 = vadd.f32 %v13156_v60, %v6485_v30  ;;  %v6486_v45 = vadd.f32 %v6432_v29, %v6248_v55  ;;  %v6552_v51 = vmax.f32 %v6524_v11, 0.0  ;;  %v6254_v30 = vadd.f32 %v6210_v44, %v13111_v46 }
 0x7ad   : > { %v6436_v13 = vpop.f32.mrf.mxu1  ;;  %v6256_v44 = vadd.f32 %v6214_v12, %v13119_v18  ;;  %v6258_v12 = vadd.f32 %v6220_v15, %v13127_v0  ;;  %v5764_v0 = vadd.f32 %v13037_v4, %v13051_v21 }
 0x7ae   : > { %v6553_v17 = vmax.f32 %v6525_v7, 0.0  ;;  %v6526_v58 = vadd.f32 %v13161_v37, %v6486_v45  ;;  %v6487_v31 = vadd.f32 %v6436_v13, %v6249_v6  ;;  %v6255_v7 = vadd.f32 %v6212_v34, %v13116_v14 }
 0x7af   : > { %v6438_v1 = vpop.f32.mrf.mxu1 }
 0x7b0   : > { %v13212_v42 = vpack.c.bf16 %v6553_v17, %v6551_v5  ;;  %v6554_v22 = vmax.f32 %v6526_v58, 0.0  ;;  %v6488_v61 = vadd.f32 %v6438_v1, %v6250_v36  ;;  %v6527_v33 = vadd.f32 %v13156_v60, %v6487_v31  ;;  %v6224_v5 = vpop.f32.mrf.mxu0 }
 0x7b1   : > { %v6440_v56 = vpop.f32.mrf.mxu1  ;;  %v5756_v58 = vadd.f32 %v13023_v20, %v13045_v10 }
 0x7b2   : > { %v6489_v2 = vadd.f32 %v6440_v56, %v6251_v32  ;;  %v13217_v62 = vpack.c.bf16 %v6554_v22, %v6552_v51  ;;  %v6528_v25 = vadd.f32 %v13161_v37, %v6488_v61  ;;  %v6555_v55 = vmax.f32 %v6527_v33, 0.0  ;;  %v6228_v22 = vpop.f32.mrf.mxu0 }
 0x7b3   : > { %v6442_v35 = vpop.f32.mrf.mxu1  ;;  %v6257_v32 = vadd.f32 %v6218_v38, %v13124_v27  ;;  %v5760_v51 = vadd.f32 %v13027_v59, %v13047_v47  ;;  %v6008_v61 = vadd.f32 %v13134_v54, %v5756_v58  ;;  %v6259_v38 = vadd.f32 %v6222_v8, %v13132_v52  ;;  %v14122_v8 = vld [vmem:[#allocation15_spill] sm:$0xff] }
 0x7b4   : > { %v6529_v43 = vadd.f32 %v13156_v60, %v6489_v2  ;;  %v6490_v53 = vadd.f32 %v6442_v35, %v6252_v40  ;;  %v6556_v45 = vmax.f32 %v6528_v25, 0.0  ;;  %v5762_v2 = vadd.f32 %v13031_v48, %v13049_v23  ;;  %v6230_v15 = vpop.f32.mrf.mxu0 }
 0x7b5   : > { %v6446_v9 = vpop.f32.mrf.mxu1  ;;  %v6009_v40 = vadd.f32 %v13138_v63, %v5760_v51  ;;  %v6260_v23 = vadd.f32 %v6224_v5, %v6008_v61 }
 0x7b6   : > { %v6557_v29 = vmax.f32 %v6529_v43, 0.0  ;;  %v6530_v11 = vadd.f32 %v13161_v37, %v6490_v53  ;;  %v6491_v49 = vadd.f32 %v6446_v9, %v6253_v26  ;;  %v6010_v25 = vadd.f32 %v13140_v57, %v5762_v2  ;;  %v14120_v26 = vld [vmem:[#allocation59_spill] sm:$0xff]  ;;  %v14121_v9 = vld [vmem:[#allocation54_spill] sm:$0xff] }
 0x7b7   : > { %v6448_v16 = vpop.f32.mrf.mxu1  ;;  %v5766_v52 = vadd.f32 %v14121_v9, %v14120_v26  ;;  %v6261_v21 = vadd.f32 %v6228_v22, %v6009_v40  ;;  %v14123_v57 = vld [vmem:[#allocation71_spill] sm:$0xff]  ;;  %v8829_v26 = vld [vmem:[%s13627_s9 + $0x50] sm:$0xff]   ;;  %v8830_v9 = vld [vmem:[%s13627_s9 + $0x48] sm:$0xff]  }
 0x7b8   : > { %v13226_v6 = vpack.c.bf16 %v6557_v29, %v6555_v55  ;;  %v6558_v13 = vmax.f32 %v6530_v11, 0.0  ;;  %v6492_v36 = vadd.f32 %v6448_v16, %v6254_v30  ;;  %v6531_v28 = vadd.f32 %v13156_v60, %v6491_v49  ;;  %v6232_v49 = vpop.f32.mrf.mxu0 }
 0x7b9   : > { %v6450_v17 = vpop.f32.mrf.mxu1  ;;  %v6011_v30 = vadd.f32 %v14122_v8, %v5764_v0  ;;  %v6012_v16 = vadd.f32 %v14123_v57, %v5766_v52  ;;  %v8821_v0 = vld [vmem:[%s13627_s9 + $0x70] sm:$0xff]   ;;  %v8831_v52 = vld [vmem:[%s13627_s9 + $0x98] sm:$0xff]   ;;  %v8832_v8 = vld [vmem:[%s13627_s9 + $0x40] sm:$0xff]  }
 0x7ba   : > { %v6493_v39 = vadd.f32 %v6450_v17, %v6255_v7  ;;  %v13230_v46 = vpack.c.bf16 %v6558_v13, %v6556_v45  ;;  %v6532_v14 = vadd.f32 %v13161_v37, %v6492_v36  ;;  %v6559_v56 = vmax.f32 %v6531_v28, 0.0 }
 0x7bb   : > { %v6452_v31 = vpop.f32.mrf.mxu1  ;;  %v6262_v45 = vadd.f32 %v6230_v15, %v6010_v25  ;;  %v8822_v15 = vld [vmem:[%s13627_s9 + $0x18] sm:$0xff]   ;;  %v8823_v25 = vld [vmem:[%s13627_s9 + $0x68] sm:$0xff]  }
 0x7bc   : > { %v6533_v34 = vadd.f32 %v13156_v60, %v6493_v39  ;;  %v6494_v1 = vadd.f32 %v6452_v31, %v6256_v44  ;;  %v6560_v59 = vmax.f32 %v6532_v14, 0.0  ;;  %v6263_v39 = vadd.f32 %v6232_v49, %v6011_v30  ;;  %v8833_v30 = vld [vmem:[%s13627_s9 + $0x90] sm:$0xff]  }
 0x7bd   : > { %v6456_v18 = vpop.f32.mrf.mxu1 }
 0x7be   : > { %v6561_v33 = vmax.f32 %v6533_v34, 0.0  ;;  %v6534_v20 = vadd.f32 %v13161_v37, %v6494_v1  ;;  %v6495_v10 = vadd.f32 %v6456_v18, %v6257_v32  ;;  %v6234_v34 = vpop.f32.mrf.mxu0 }
 0x7bf   : > { %v6458_v27 = vpop.f32.mrf.mxu1  ;;  %v6264_v22 = vadd.f32 %v6234_v34, %v6012_v16 }
 0x7c0   : > { %v13246_v47 = vpack.c.bf16 %v6561_v33, %v6559_v56  ;;  %v6562_v54 = vmax.f32 %v6534_v20, 0.0  ;;  %v6496_v35 = vadd.f32 %v6458_v27, %v6258_v12  ;;  %v6535_v53 = vadd.f32 %v13156_v60, %v6495_v10 }
 0x7c1   : > { %v6460_v43 = vpop.f32.mrf.mxu1 }
 0x7c2   : > { %v6497_v48 = vadd.f32 %v6460_v43, %v6259_v38  ;;  %v6580_v63 = vpack.c.bf16 %v6562_v54, %v6560_v59  ;;  %v6536_v29 = vadd.f32 %v13161_v37, %v6496_v35  ;;  %v6563_v13 = vmax.f32 %v6535_v53, 0.0  ;;  %v8810_v35 = vld [vmem:[%s13626_s8 + $0x10] ss:$0 sps:$4 sm:$0xff]   ;;  %v8825_v53 = vld [vmem:[%s13627_s9 + $0x60] sm:$0xff]  }
 0x7c3   : > { %v6462_v55 = vpop.f32.mrf.mxu1  ;;  %v8824_v43 = vld [vmem:[%s13627_s9 + $0x10] sm:$0xff]  }
 0x7c4   : > { %v6537_v11 = vadd.f32 %v13156_v60, %v6497_v48  ;;  %v6498_v4 = vadd.f32 %v6462_v55, %v6260_v23  ;;  %v6564_v44 = vmax.f32 %v6536_v29, 0.0  ;;  %v8826_v48 = vld [vmem:[%s13627_s9 + $0x8] sm:$0xff]   ;;  %v8827_v23 = vld [vmem:[%s13627_s9 + $0x58] sm:$0xff]   ;;  %v8966_v55 = vmov 0.0  }
 0x7c5   : > { %v6466_v7 = vpop.f32.mrf.mxu1 }
 0x7c6   : > { %v6565_v36 = vmax.f32 %v6537_v11, 0.0  ;;  %v6538_v5 = vadd.f32 %v13161_v37, %v6498_v4  ;;  %v6499_v17 = vadd.f32 %v6466_v7, %v6261_v21 }
 0x7c7   : > { %v6468_v28 = vpop.f32.mrf.mxu1 }
 0x7c8   : > { %v6581_v58 = vpack.c.bf16 %v6565_v36, %v6563_v13  ;;  %v6566_v31 = vmax.f32 %v6538_v5, 0.0  ;;  %v6500_v14 = vadd.f32 %v6468_v28, %v6262_v45  ;;  %v6539_v32 = vadd.f32 %v13156_v60, %v6499_v17 }
 0x7c9   : > { %v6470_v1 = vpop.f32.mrf.mxu1 }
 0x7ca   : > { %v6501_v51 = vadd.f32 %v6470_v1, %v6263_v39  ;;  %v6582_v61 = vpack.c.bf16 %v6566_v31, %v6564_v44  ;;  %v6540_v12 = vadd.f32 %v13161_v37, %v6500_v14  ;;  %v6567_v20 = vmax.f32 %v6539_v32, 0.0  ;;  %v8834_v32 = vld [vmem:[%s13628_s10 + $0x20] sm:$0xff]  }
 0x7cb   : > { %v6472_v18 = vpop.f32.mrf.mxu1 }
 0x7cc   : > { %v6541_v56 = vadd.f32 %v13156_v60, %v6501_v51  ;;  %v6502_v33 = vadd.f32 %v6472_v18, %v6264_v22  ;;  %v6568_v40 = vmax.f32 %v6540_v12, 0.0  ;;  %v8808_v60 = vld [vmem:[%s13626_s8] sm:$0xff]   ;;  %v8837_v51 = vld [vmem:[%s13628_s10 + $0x70] sm:$0xff]   ;;  %v8835_v12 = vld [vmem:[%s13628_s10 + $0x18] sm:$0xff]  }
 0x7ce   : > { %v6569_v10 = vmax.f32 %v6541_v56, 0.0  ;;  %v6542_v2 = vadd.f32 %v13161_v37, %v6502_v33  ;;  %v8809_v37 = vld [vmem:[%s13626_s8 + $0x8] sm:$0xff]  }
 0x7d0   : > { %v6583_v27 = vpack.c.bf16 %v6569_v10, %v6567_v20  ;;  %v6570_v38 = vmax.f32 %v6542_v2, 0.0 }
 0x7d2   : > { %v6584_v59 = vpack.c.bf16 %v6570_v38, %v6568_v40  ;;  %v6615_v54 = vsel %vm3599_vm3, %v6583_v27, 0  ;;  %v8836_v38 = vld [vmem:[%s13628_s10 + $0x10] sm:$0xff]  }
 0x7d4   : > { %8253 = vmatprep.subr.msk.bf16.mxu0 %vm3599_vm3, %v6584_v59 }
 0x7d5   : > { %6623 = vmatpush1.bf16.msra.mxu0 %v6615_v54 }
 0x7d6   : > { %6624 = vmatprep.subr.bf16.mxu0 %v6582_v61 }
 0x7d9   : > { %6625 = vmatpush1.bf16.msra.mxu0 %v6581_v58 }
 0x7da   : > { %6626 = vmatprep.subr.bf16.mxu0 %v6580_v63 }
 0x7dd   : > { %6627 = vmatpush1.bf16.msra.mxu0 %v13246_v47 }
 0x7de   : > { %6628 = vmatprep.subr.bf16.mxu0 %v13230_v46 }
 0x7e1   : > { %6629 = vmatpush1.bf16.msra.mxu0 %v13226_v6 }
 0x7e2   : > { %6630 = vmatprep.subr.bf16.mxu0 %v13217_v62 }
 0x7e5   : > { %6631 = vmatpush1.bf16.msra.mxu0 %v13212_v42 }
 0x7e6   : > { %6632 = vmatprep.subr.bf16.mxu0 %v13201_v3 }
 0x7e9   : > { %6633 = vmatpush1.bf16.msra.mxu0 %v13196_v24 }
 0x7ea   : > { %6634 = vmatprep.subr.bf16.mxu0 %v13185_v19 }
 0x7ed   : > { %6635 = vmatpush1.bf16.msra.mxu0 %v13180_v41 }
 0x7ee   : > { %8265 = vmatprep.subr.msk.bf16.mxu0 %vm3599_vm3, %v6584_v59 }
 0x7f0   : > { %8254 = vmatmul.mubr.msk.bf16.vlgmr.msra.gmra.mxu0 %vm6603_vm11, %v8808_v60 }
 0x7f1   : > { %6712 = vmatpush1.bf16.msra.mxu0 %v6615_v54  ;;  %6662 = vmatprep.mubr.bf16.mxu0 %v14112_v50 }
 0x7f2   : > { %6713 = vmatprep.subr.bf16.mxu0 %v6582_v61 }
 0x7f5   : > { %6714 = vmatpush1.bf16.msra.mxu0 %v6581_v58 }
 0x7f6   : > { %6715 = vmatprep.subr.bf16.mxu0 %v6580_v63  ;;  %v8828_v63 = vld [vmem:[%s13627_s9] sm:$0xff]  }
 0x7f8   : > { %8255 = vmatmul.mubr.msk.bf16.gmra.mxu0 %vm6603_vm11, %v8809_v37 }
 0x7f9   : > { %6716 = vmatpush1.bf16.msra.mxu0 %v13246_v47  ;;  %6672 = vmatprep.mubr.bf16.mxu0 %v14112_v50  ;;  %v8820_v47 = vld [vmem:[%s13627_s9 + $0x20] sm:$0xff]  }
 0x7fa   : > { %6717 = vmatprep.subr.bf16.mxu0 %v13230_v46  ;;  %v8811_v46 = vld [vmem:[%s13626_s8 + $0x14] sm:$0xff]  }
 0x7fd   : > { %6718 = vmatpush1.bf16.msra.mxu0 %v13226_v6  ;;  %v8819_v6 = vld [vmem:[%s13627_s9 + $0x78] sm:$0xff]  }
 0x7fe   : > { %6719 = vmatprep.subr.bf16.mxu0 %v13217_v62  ;;  %v8815_v62 = vld [vmem:[%s13627_s9 + $0x88] sm:$0xff]  }
 0x800   : > { %8256 = vmatmul.mubr.msk.bf16.gmra.mxu0 %vm6603_vm11, %v8810_v35 }
 0x801   : > { %6720 = vmatpush1.bf16.msra.mxu0 %v13212_v42  ;;  %6741 = vmatprep.mubr.bf16.mxu0 %v14112_v50  ;;  %v8818_v42 = vld [vmem:[%s13627_s9 + $0x28] sm:$0xff]  }
 0x802   : > { %6721 = vmatprep.subr.bf16.mxu0 %v13201_v3  ;;  %v8817_v3 = vld [vmem:[%s13627_s9 + $0x80] sm:$0xff]  }
 0x805   : > { %6722 = vmatpush1.bf16.msra.mxu0 %v13196_v24  ;;  %v8816_v24 = vld [vmem:[%s13627_s9 + $0x30] sm:$0xff]  }
 0x806   : > { %6723 = vmatprep.subr.bf16.mxu0 %v13185_v19  ;;  %v8812_v19 = vld [vmem:[%s13626_s8 + $0x1c] sm:$0xff]   ;;  %6878 = vmatpush1.bf16.msra.mxu1 %v8816_v24  ;;  %v8839_v24 = vld [vmem:[%s13628_s10 + $0x68] sm:$0xff]  }
 0x807   : > { %6879 = vmatprep.subr.bf16.mxu1 %v14112_v50 }
 0x809   : > { %6724 = vmatpush1.bf16.msra.mxu0 %v13180_v41  ;;  %v8813_v41 = vld [vmem:[%s13626_s8 + $0x24] ss:$0 sps:$4 sm:$0xff]  }
 0x80a   : > { %7012 = vmatprep.subr.bf16.mxu0 %v14112_v50  ;;  %6880 = vmatpush1.bf16.msra.mxu1 %v8818_v42  ;;  %v8841_v42 = vld [vmem:[%s13628_s10 + $0x60] sm:$0xff]  }
 0x80b   : > { %6881 = vmatprep.subr.bf16.mxu1 %v14112_v50 }
 0x80c   : > { %8266 = vmatmul.mubr.msk.bf16.vlgmr.msra.gmra.mxu0 %vm6603_vm11, %v8811_v46 }
 0x80d   : > { %6751 = vmatprep.mubr.bf16.mxu0 %v14112_v50  ;;  %7013 = vmatpush1.bf16.msra.mxu0 %v8815_v62 }
 0x80e   : > { %7014 = vmatprep.subr.bf16.mxu0 %v14112_v50  ;;  %6882 = vmatpush1.bf16.msra.mxu1 %v8820_v47  ;;  %v8845_v47 = vld [vmem:[%s13628_s10 + $0x50] sm:$0xff]  }
 0x80f   : > { %6883 = vmatprep.subr.bf16.mxu1 %v14112_v50 }
 0x811   : > { %7015 = vmatpush1.bf16.msra.mxu0 %v8817_v3  ;;  %v8840_v3 = vld [vmem:[%s13628_s10] sm:$0xff]  }
 0x812   : > { %7016 = vmatprep.subr.bf16.mxu0 %v14112_v50  ;;  %6884 = vmatpush1.bf16.msra.mxu1 %v8822_v15 }
 0x813   : > { %6885 = vmatprep.subr.bf16.mxu1 %v14112_v50 }
 0x814   : > { %8267 = vmatmul.mubr.msk.bf16.gmra.mxu0 %vm6603_vm11, %v8812_v19 }
 0x815   : > { %6761 = vmatprep.mubr.bf16.mxu0 %v14112_v50  ;;  %7017 = vmatpush1.bf16.msra.mxu0 %v8819_v6  ;;  %v8843_v6 = vld [vmem:[%s13628_s10 + $0x58] sm:$0xff]  }
 0x816   : > { %7018 = vmatprep.subr.bf16.mxu0 %v14112_v50  ;;  %6886 = vmatpush1.bf16.msra.mxu1 %v8824_v43 }
 0x817   : > { %6887 = vmatprep.subr.bf16.mxu1 %v14112_v50 }
 0x819   : > { %7019 = vmatpush1.bf16.msra.mxu0 %v8821_v0 }
 0x81a   : > { %7020 = vmatprep.subr.bf16.mxu0 %v14112_v50  ;;  %6888 = vmatpush1.bf16.msra.mxu1 %v8826_v48 }
 0x81b   : > { %6889 = vmatprep.subr.bf16.mxu1 %v14112_v50 }
 0x81c   : > { %8268 = vmatmul.mubr.msk.bf16.gmra.mxu0 %vm6603_vm11, %v8813_v41  ;;  %v8838_v41 = vld [vmem:[%s13628_s10 + $0x8] sm:$0xff]  }
 0x81d   : > { %7021 = vmatpush1.bf16.msra.mxu0 %v8823_v25 }
 0x81e   : > { %7022 = vmatprep.subr.bf16.mxu0 %v14112_v50  ;;  %6890 = vmatpush1.bf16.msra.mxu1 %v8828_v63 }
 0x81f   : > { %6903 = vmatprep.subr.bf16.mxu1 %v14112_v50 }
 0x821   : > { %7023 = vmatpush1.bf16.msra.mxu0 %v8825_v53 }
 0x822   : > { %7024 = vmatprep.subr.bf16.mxu0 %v14112_v50  ;;  %6904 = vmatpush2.bf16.msra.mxu1 %v8830_v9 }
 0x823   : > { %6905 = vmatprep.subr.bf16.mxu1 %v14112_v50 }
 0x825   : > { %7025 = vmatpush1.bf16.msra.mxu0 %v8827_v23 }
 0x826   : > { %7026 = vmatprep.subr.bf16.mxu0 %v14112_v50  ;;  %6906 = vmatpush2.bf16.msra.mxu1 %v8832_v8 }
 0x827   : > { %8454 = vmatprep.subr.bf16.mxu1 %v8966_v55 }
 0x829   : > { %7027 = vmatpush1.bf16.msra.mxu0 %v8829_v26 }
 0x82a   : > { %7040 = vmatprep.subr.bf16.mxu0 %v14112_v50 }
 0x82d   : > { %7041 = vmatpush2.bf16.msra.mxu0 %v8831_v52  ;;  %v8842_v52 = vld [vmem:[%s13628_s10 + $0x48] sm:$0xff]  }
 0x82e   : > { %7042 = vmatprep.subr.bf16.mxu0 %v14112_v50 }
 0x831   : > { %7043 = vmatpush2.bf16.msra.mxu0 %v8833_v30 }
 0x832   : > { %8482 = vmatprep.subr.bf16.mxu0 %v8966_v55 }
 0x8b0   : > { %v6654_v29 = vpop.f32.mrf.mxu0 }
 0x8b2   : > { %v6656_v11 = vpop.f32.mrf.mxu0 }
 0x8b4   : > { %v6658_v4 = vpop.f32.mrf.mxu0 }
 0x8b6   : > { %v6660_v21 = vpop.f32.mrf.mxu0 }
 0x8b8   : > { %v6664_v50 = vpop.f32.mrf.mxu0 }
 0x8ba   : > { %v6666_v49 = vpop.f32.mrf.mxu0 }
 0x8bc   : > { %v6668_v57 = vpop.f32.mrf.mxu0 }
 0x8be   : > { %v6670_v16 = vpop.f32.mrf.mxu0 }
 0x8c0   : > { %v6674_v7 = vpop.f32.mrf.mxu0 }
 0x8c2   : > { %v6676_v45 = vpop.f32.mrf.mxu0 }
 0x8c4   : > { %v6678_v13 = vpop.f32.mrf.mxu0 }
 0x8c6   : > { %v6679_v36 = vpop.f32.mrf.mxu0 }
 0x8cc   : > { %v6743_v5 = vpop.f32.mrf.mxu0 }
 0x8cd   : > { %v6770_v14 = vmax.f32 %v6654_v29, %v6743_v5 }
 0x8ce   : > { %v6745_v17 = vpop.f32.mrf.mxu0 }
 0x8cf   : > { %v6771_v58 = vmax.f32 %v6656_v11, %v6745_v17 }
 0x8d0   : > { %v6747_v28 = vpop.f32.mrf.mxu0 }
 0x8d1   : > { %v6772_v39 = vmax.f32 %v6658_v4, %v6747_v28 }
 0x8d2   : > { %v6749_v44 = vpop.f32.mrf.mxu0 }
 0x8d3   : > { %v6773_v31 = vmax.f32 %v6660_v21, %v6749_v44  ;;  %v6780_v22 = vpack.c.bf16 %v6772_v39, %v6770_v14  ;;  %v8844_v21 = vld [vmem:[%s13628_s10 + $0x40] sm:$0xff]   ;;  %v8848_v39 = vld [vmem:[%s13628_s10 + $0x30] sm:$0xff]   ;;  %v8849_v44 = vld [vmem:[%s13628_s10 + $0xb8] sm:$0xff]  }
 0x8d4   : > { %v6753_v34 = vpop.f32.mrf.mxu0 }
 0x8d5   : > { %v6781_v1 = vpack.c.bf16 %v6773_v31, %v6771_v58  ;;  %v6774_v2 = vmax.f32 %v6664_v50, %v6753_v34 }
 0x8d6   : > { %v6755_v61 = vpop.f32.mrf.mxu0 }
 0x8d7   : > { %8279 = vmatprep.mubr.msk.bf16.mxu1 %vm2269_vm0, %v6781_v1  ;;  %8312 = vmatprep.mubr.msk.bf16.mxu0 %vm2269_vm0, %v6781_v1  ;;  %v6775_v20 = vmax.f32 %v6666_v49, %v6755_v61  ;;  %v8850_v1 = vld [vmem:[%s13628_s10 + $0x28] sm:$0xff]   ;;  %v8852_v61 = vld [vmem:[%s13628_s10 + $0x98] sm:$0xff]  }
 0x8d8   : > { %v6757_v18 = vpop.f32.mrf.mxu0  ;;  %6908 = vmatmul.mubr.bf16.vlgmr.msra.gmra.mxu1 %v6780_v22  ;;  %7045 = vmatmul.mubr.bf16.vlgmr.msra.gmra.mxu0 %v6780_v22 }
 0x8d9   : > { %8455 = vmatpush3.bf16.msra.mxu1 %v8834_v32  ;;  %8483 = vmatpush3.bf16.msra.mxu0 %v8837_v51  ;;  %v6776_v56 = vmax.f32 %v6668_v57, %v6757_v18  ;;  %v8851_v32 = vld [vmem:[%s13628_s10 + $0xb0] sm:$0xff]   ;;  %v8853_v18 = vld [vmem:[%s13628_s10 + $0xa8] sm:$0xff]  }
 0x8da   : > { %v6759_v33 = vpop.f32.mrf.mxu0  ;;  %8456 = vmatprep.subr.bf16.mxu1 %v8966_v55  ;;  %8484 = vmatprep.subr.bf16.mxu0 %v8966_v55 }
 0x8db   : > { %v6777_v10 = vmax.f32 %v6670_v16, %v6759_v33  ;;  %v6782_v59 = vpack.c.bf16 %v6776_v56, %v6774_v2  ;;  %v8854_v56 = vld [vmem:[%s13628_s10 + $0x90] sm:$0xff]   ;;  %v8855_v33 = vld [vmem:[%s13628_s10 + $0xa0] sm:$0xff]  }
 0x8dc   : > { %v6763_v40 = vpop.f32.mrf.mxu0 }
 0x8dd   : > { %v6783_v27 = vpack.c.bf16 %v6777_v10, %v6775_v20  ;;  %8457 = vmatpush3.bf16.msra.mxu1 %v8835_v12  ;;  %v6778_v46 = vmax.f32 %v6674_v7, %v6763_v40  ;;  %8485 = vmatpush3.bf16.msra.mxu0 %v8839_v24  ;;  %v8846_v7 = vld [vmem:[%s13628_s10 + $0x38] sm:$0xff]   ;;  %v8856_v10 = vld [vmem:[%s13628_s10 + $0x88] sm:$0xff]   ;;  %v8857_v40 = vld [vmem:[%s13628_s10 + $0x80] sm:$0xff]  }
 0x8de   : > { %v6765_v54 = vpop.f32.mrf.mxu0  ;;  %8458 = vmatprep.subr.bf16.mxu1 %v8966_v55  ;;  %8486 = vmatprep.subr.bf16.mxu0 %v8966_v55  ;;  %v8867_v24 = vld [vmem:[%s13632_s14 + $0x28] ss:$0 sps:$4 sm:$0x33]  }
 0x8df   : > { %8280 = vmatprep.mubr.msk.bf16.mxu1 %vm2269_vm0, %v6783_v27  ;;  %8313 = vmatprep.mubr.msk.bf16.mxu0 %vm2269_vm0, %v6783_v27  ;;  %v6779_v60 = vmax.f32 %v6676_v45, %v6765_v54  ;;  %v6784_v19 = vpack.c.bf16 %v6778_v46, %v6778_v46  ;;  %v8847_v45 = vld [vmem:[%s13628_s10 + $0xc0] sm:$0xff]   ;;  %v8858_v27 = vld [vmem:[%s13628_s10 + $0x78] sm:$0xff]  }
 0x8e0   : > { %6916 = vmatmul.mubr.bf16.gmra.mxu1 %v6782_v59  ;;  %7053 = vmatmul.mubr.bf16.gmra.mxu0 %v6782_v59  ;;  %v6767_v37 = vpop.f32.mrf.mxu0  ;;  %v8859_v59 = vld [vmem:[%s13630_s12 + $0x38] ss:$0 sps:$4 sm:$0xff]  }
 0x8e1   : > { %v6785_v35 = vpack.c.bf16 %v6779_v60, %v6779_v60  ;;  %8459 = vmatpush3.bf16.msra.mxu1 %v8836_v38  ;;  %8487 = vmatpush3.bf16.msra.mxu0 %v8841_v42  ;;  %v7586_v54 = vsel %vm5034_vm7, %v8859_v59, 0  ;;  %v8860_v60 = vld [vmem:[%s13630_s12 + $0x30] sm:$0xff]   ;;  %v8861_v37 = vld [vmem:[%s13630_s12 + $0x28] sm:$0xff]   ;;  %v8863_v46 = vld [vmem:[%s13630_s12 + $0x18] sm:$0xff]  }
 0x8e2   : > { %v6768_v62 = vpop.f32.mrf.mxu0  ;;  %8460 = vmatprep.subr.bf16.mxu1 %v8966_v55  ;;  %8488 = vmatprep.subr.bf16.mxu0 %v8966_v55  ;;  %v8868_v42 = vld [vmem:[%s13632_s14 + $0x20] sm:$0xff]  }
 0x8e3   : > { %8281 = vmatprep.mubr.msk.bf16.mxu1 %vm2269_vm0, %v6785_v35  ;;  %8314 = vmatprep.mubr.msk.bf16.mxu0 %vm2269_vm0, %v6785_v35  ;;  %v8862_v35 = vld [vmem:[%s13630_s12 + $0x20] sm:$0xff]   ;;  %v8864_v62 = vld [vmem:[%s13630_s12 + $0x10] sm:$0xff]  }
 0x8e5   : > { %8461 = vmatpush3.bf16.msra.mxu1 %v8838_v41  ;;  %8489 = vmatpush3.bf16.msra.mxu0 %v8843_v6  ;;  %v8866_v41 = vld [vmem:[%s13630_s12] sm:$0xff]   ;;  %v8869_v6 = vld [vmem:[%s13632_s14 + $0x18] sm:$0xff]  }
 0x8e6   : > { %8462 = vmatprep.subr.bf16.mxu1 %v8966_v55  ;;  %8490 = vmatprep.subr.bf16.mxu0 %v8966_v55 }
 0x8e8   : > { %6924 = vmatmul.mubr.bf16.gmra.mxu1 %v6784_v19  ;;  %7061 = vmatmul.mubr.bf16.gmra.mxu0 %v6784_v19  ;;  %v8865_v19 = vld [vmem:[%s13630_s12 + $0x8] sm:$0xff]  }
 0x8e9   : > { %8463 = vmatpush3.bf16.msra.mxu1 %v8840_v3  ;;  %8464 = vmatprep.mubr.msk.bf16.mxu1 %vm8967_vm12, %v8966_v55  ;;  %v7685_v3 = vsel %vm5480_vm8, %v8867_v24, 0 }
 0x8ea   : > { %8468 = vmatprep.subr.bf16.mxu1 %v8966_v55  ;;  %8492 = vmatprep.mubr.msk.bf16.mxu0 %vm8967_vm12, %v8966_v55 }
 0x8eb   : > { %8491 = vmatpush3.bf16.msra.mxu0 %v8845_v47  ;;  %v8870_v47 = vld [vmem:[%s13632_s14 + $0x10] sm:$0xff]  }
 0x8ec   : > { %8510 = vmatprep.subr.bf16.mxu0 %v8966_v55 }
 0x998   : > { %v6909_v0 = vpop.f32.mrf.mxu1  ;;  %v7046_v15 = vpop.f32.mrf.mxu0 }
 0x999   : > { %v7068_v23 = vmax.f32 %v6909_v0, %v7046_v15 }
 0x99a   : > { %v6911_v25 = vpop.f32.mrf.mxu1  ;;  %v7048_v43 = vpop.f32.mrf.mxu0 }
 0x99c   : > { %v6912_v53 = vpop.f32.mrf.mxu1  ;;  %v7049_v48 = vpop.f32.mrf.mxu0 }
 0x99d   : > { %v7069_v63 = vmax.f32 %v6912_v53, %v7049_v48 }
 0x99e   : > { %v6914_v26 = vpop.f32.mrf.mxu1  ;;  %v7051_v9 = vpop.f32.mrf.mxu0 }
 0x99f   : > { %v7073_v8 = vpack.c.bf16 %v7069_v63, %v7068_v23 }
 0x9a0   : > { %v6917_v30 = vpop.f32.mrf.mxu1  ;;  %v7054_v29 = vpop.f32.mrf.mxu0 }
 0x9a1   : > { %8465 = vmatmul.mubr.msk.bf16.vlgmr.msra.gmra.mxu1 %vm7117_vm13, %v7073_v8  ;;  %v7070_v57 = vmax.f32 %v6917_v30, %v7054_v29  ;;  %v7180_v12 = vrot.slane %v7073_v8, 4  ;;  %v8321_v29 = vld [vmem:[%s13629_s11] ss:$0 sm:$0xff] }
 0x9a2   : > { %8469 = vmatpush3.bf16.msra.mxu1 %v8842_v52  ;;  %v6919_v11 = vpop.f32.mrf.mxu1  ;;  %v7056_v4 = vpop.f32.mrf.mxu0  ;;  %8478 = vmatprep.mubr.msk.bf16.mxu1 %vm8967_vm12, %v8966_v55 }
 0x9a3   : > { %8470 = vmatprep.subr.bf16.mxu1 %v8966_v55 }
 0x9a4   : > { %v6920_v50 = vpop.f32.mrf.mxu1  ;;  %v7057_v49 = vpop.f32.mrf.mxu0 }
 0x9a5   : > { %v7071_v16 = vmax.f32 %v6920_v50, %v7057_v49 }
 0x9a6   : > { %8471 = vmatpush3.bf16.msra.mxu1 %v8844_v21  ;;  %v6922_v13 = vpop.f32.mrf.mxu1  ;;  %v7059_v36 = vpop.f32.mrf.mxu0 }
 0x9a7   : > { %v7074_v5 = vpack.c.bf16 %v7071_v16, %v7070_v57  ;;  %8472 = vmatprep.subr.bf16.mxu1 %v8966_v55 }
 0x9a8   : > { %v6925_v17 = vpop.f32.mrf.mxu1  ;;  %v7062_v28 = vpop.f32.mrf.mxu0 }
 0x9a9   : > { %8493 = vmatmul.mubr.msk.bf16.vlgmr.msra.gmra.mxu0 %vm7117_vm13, %v7074_v5  ;;  %v7072_v20 = vmax.f32 %v6925_v17, %v7062_v28  ;;  %v7352_v38 = vrot.slane %v7074_v5, 4 }
 0x9aa   : > { %8473 = vmatpush3.bf16.msra.mxu1 %v8846_v7  ;;  %8511 = vmatpush3.bf16.msra.mxu0 %v8847_v45  ;;  %v6927_v58 = vpop.f32.mrf.mxu1  ;;  %v7064_v31 = vpop.f32.mrf.mxu0 }
 0x9ab   : > { %8474 = vmatprep.subr.bf16.mxu1 %v8966_v55  ;;  %8512 = vmatprep.subr.bf16.mxu0 %v8966_v55  ;;  %v7075_v2 = vpack.c.bf16 %v7072_v20, %v7072_v20  ;;  %v8386_v58 = vld [vmem:[%s13631_s13] ss:$0 sm:$0xff] }
 0x9ac   : > { %v6928_v14 = vpop.f32.mrf.mxu1  ;;  %v7065_v34 = vpop.f32.mrf.mxu0  ;;  %8520 = vmatprep.mubr.msk.bf16.mxu0 %vm8967_vm12, %v8966_v55 }
 0x9ae   : > { %8475 = vmatpush3.bf16.msra.mxu1 %v8848_v39  ;;  %8513 = vmatpush3.bf16.msra.mxu0 %v8849_v44  ;;  %v6929_v51 = vpop.f32.mrf.mxu1  ;;  %v7066_v22 = vpop.f32.mrf.mxu0  ;;  %v8871_v39 = vld [vmem:[%s13632_s14 + $0x8] sm:$0xff]   ;;  %v8872_v44 = vld [vmem:[%s13632_s14] sm:$0xff]  }
 0x9af   : > { %8476 = vmatprep.subr.bf16.mxu1 %v8966_v55  ;;  %8514 = vmatprep.subr.bf16.mxu0 %v8966_v55 }
 0x9b2   : > { %8477 = vmatpush3.bf16.msra.mxu1 %v8850_v1  ;;  %8515 = vmatpush3.bf16.msra.mxu0 %v8851_v32 }
 0x9b3   : > { %8496 = vmatprep.subr.bf16.mxu1 %v8966_v55  ;;  %8516 = vmatprep.subr.bf16.mxu0 %v8966_v55 }
 0x9b5   : > { %8479 = vmatmul.mubr.msk.bf16.vlgmr.msra.gmra.mxu1 %vm7117_vm13, %v7180_v12 }
 0x9b6   : > { %8497 = vmatpush3.bf16.msra.mxu1 %v8852_v61  ;;  %8517 = vmatpush3.bf16.msra.mxu0 %v8853_v18 }
 0x9b7   : > { %8498 = vmatprep.subr.bf16.mxu1 %v8966_v55  ;;  %8518 = vmatprep.subr.bf16.mxu0 %v8966_v55 }
 0x9b8   : > { %8506 = vmatprep.mubr.msk.bf16.mxu1 %vm8967_vm12, %v8966_v55 }
 0x9ba   : > { %8499 = vmatpush3.bf16.msra.mxu1 %v8854_v56  ;;  %8519 = vmatpush3.bf16.msra.mxu0 %v8855_v33 }
 0x9bb   : > { %8500 = vmatprep.subr.bf16.mxu1 %v8966_v55  ;;  %8544 = vmatprep.subr.bf16.mxu0 %v8966_v55 }
 0x9bd   : > { %8521 = vmatmul.mubr.msk.bf16.vlgmr.msra.gmra.mxu0 %vm7117_vm13, %v7075_v2 }
 0x9be   : > { %8501 = vmatpush3.bf16.msra.mxu1 %v8856_v10  ;;  %8556 = vmatprep.mubr.msk.bf16.mxu0 %vm8967_vm12, %v8966_v55 }
 0x9bf   : > { %8502 = vmatprep.subr.bf16.mxu1 %v8966_v55  ;;  %8545 = vmatpush3.bf16.msra.mxu0 %v7685_v3 }
 0x9c0   : > { %8546 = vmatprep.subr.bf16.mxu0 %v8966_v55 }
 0x9c2   : > { %8503 = vmatpush3.bf16.msra.mxu1 %v8857_v40 }
 0x9c3   : > { %8504 = vmatprep.subr.bf16.mxu1 %v8966_v55  ;;  %8547 = vmatpush3.bf16.msra.mxu0 %v8868_v42 }
 0x9c4   : > { %8548 = vmatprep.subr.bf16.mxu0 %v8966_v55 }
 0x9c6   : > { %8505 = vmatpush3.bf16.msra.mxu1 %v8858_v27 }
 0x9c7   : > { %8524 = vmatprep.subr.bf16.mxu1 %v8966_v55  ;;  %8549 = vmatpush3.bf16.msra.mxu0 %v8869_v6 }
 0x9c8   : > { %8550 = vmatprep.subr.bf16.mxu0 %v8966_v55 }
 0x9c9   : > { %8507 = vmatmul.mubr.msk.bf16.vlgmr.msra.gmra.mxu1 %vm7117_vm13, %v7352_v38 }
 0x9ca   : > { %8540 = vmatprep.mubr.msk.bf16.mxu1 %vm8967_vm12, %v8966_v55  ;;  %8525 = vmatpush3.bf16.msra.mxu1 %v7586_v54 }
 0x9cb   : > { %8526 = vmatprep.subr.bf16.mxu1 %v8966_v55  ;;  %8551 = vmatpush3.bf16.msra.mxu0 %v8870_v47 }
 0x9cc   : > { %8552 = vmatprep.subr.bf16.mxu0 %v8966_v55 }
 0x9ce   : > { %8527 = vmatpush3.bf16.msra.mxu1 %v8860_v60 }
 0x9cf   : > { %8528 = vmatprep.subr.bf16.mxu1 %v8966_v55  ;;  %8553 = vmatpush3.bf16.msra.mxu0 %v8871_v39 }
 0x9d0   : > { %8554 = vmatprep.subr.bf16.mxu0 %v8966_v55 }
 0x9d2   : > { %8529 = vmatpush3.bf16.msra.mxu1 %v8861_v37 }
 0x9d3   : > { %8530 = vmatprep.subr.bf16.mxu1 %v8966_v55  ;;  %8555 = vmatpush3.bf16.msra.mxu0 %v8872_v44 }
 0x9d6   : > { %8531 = vmatpush3.bf16.msra.mxu1 %v8862_v35 }
 0x9d7   : > { %8532 = vmatprep.subr.bf16.mxu1 %v8966_v55 }
 0x9da   : > { %8533 = vmatpush3.bf16.msra.mxu1 %v8863_v46 }
 0x9db   : > { %8534 = vmatprep.subr.bf16.mxu1 %v8966_v55 }
 0x9de   : > { %8535 = vmatpush3.bf16.msra.mxu1 %v8864_v62 }
 0x9df   : > { %8536 = vmatprep.subr.bf16.mxu1 %v8966_v55 }
 0x9e2   : > { %8537 = vmatpush3.bf16.msra.mxu1 %v8865_v19 }
 0x9e3   : > { %8538 = vmatprep.subr.bf16.mxu1 %v8966_v55  ;;  %v8396_v55 = vld [vmem:[%s13633_s15] ss:$0 sm:$0xff] }
 0x9e6   : > { %8539 = vmatpush3.bf16.msra.mxu1 %v8866_v41 }
 0xa61   : > { %v7155_v0 = vpop.f32.mrf.mxu1 }
 0xa62   : > { %v7167_v21 = vadd.f32 %v8321_v29, %v7155_v0 }
 0xa63   : > { %v8466_v15 = vpop.f32.mrf.mxu1 }
 0xa65   : > { %v7158_v25 = vpop.f32.mrf.mxu1 }
 0xa67   : > { %v8467_v43 = vpop.f32.mrf.mxu1 }
 0xa69   : > { %v7333_v53 = vpop.f32.mrf.mxu0 }
 0xa6b   : > { %v8494_v48 = vpop.f32.mrf.mxu0 }
 0xa6d   : > { %v7336_v23 = vpop.f32.mrf.mxu0 }
 0xa6f   : > { %v8495_v63 = vpop.f32.mrf.mxu0 }
 0xa75   : > { %v7248_v26 = vpop.f32.mrf.mxu1 }
 0xa76   : > { %v7254_v49 = vadd.f32 %v7248_v26, %v7167_v21 }
 0xa77   : > { %v8480_v9 = vpop.f32.mrf.mxu1 }
 0xa78   : > { %v7339_v57 = vadd.f32 %v7333_v53, %v7254_v49 }
 0xa79   : > { %v7251_v52 = vpop.f32.mrf.mxu1 }
 0xa7b   : > { %v8481_v8 = vpop.f32.mrf.mxu1 }
 0xa7d   : > { %v7505_v30 = vpop.f32.mrf.mxu0 }
 0xa7f   : > { %v8522_v11 = vpop.f32.mrf.mxu0 }
 0xa81   : > { %v7508_v4 = vpop.f32.mrf.mxu0 }
 0xa83   : > { %v8523_v50 = vpop.f32.mrf.mxu0 }
 0xa89   : > { %v7420_v16 = vpop.f32.mrf.mxu1 }
 0xa8a   : > { %v7426_v7 = vadd.f32 %v7420_v16, %v7339_v57 }
 0xa8b   : > { %v8508_v45 = vpop.f32.mrf.mxu1 }
 0xa8c   : > { %v7511_v13 = vadd.f32 %v7505_v30, %v7426_v7 }
 0xa8d   : > { %v7423_v36 = vpop.f32.mrf.mxu1 }
 0xa8e   : > { %v7512_v5 = vmax.f32 %v7511_v13, 0.0 }
 0xa8f   : > { %v8509_v17 = vpop.f32.mrf.mxu1 }
 0xa90   : > { %v7513_v28 = vpack.c.bf16 %v7512_v5, %v7512_v5 }
 0xa92   : > { %8541 = vmatmul.mubr.msk.bf16.vlgmr.msra.gmra.mxu1 %vm7581_vm14, %v7513_v28 }
 0xb52   : > { %v7622_v31 = vpop.f32.mrf.mxu1 }
 0xb53   : > { %v7623_v14 = vadd.f32 %v8386_v58, %v7622_v31 }
 0xb54   : > { %v8542_v34 = vpop.f32.mrf.mxu1 }
 0xb55   : > { %v7628_v1 = vmax.f32 %v7623_v14, 0.0 }
 0xb56   : > { %v7625_v32 = vpop.f32.mrf.mxu1 }
 0xb57   : > { %v7629_v51 = vpack.c.bf16 %v7628_v1, %v7628_v1 }
 0xb58   : > { %v8543_v22 = vpop.f32.mrf.mxu1 }
 0xb59   : > { %8557 = vmatmul.mubr.msk.bf16.vlgmr.msra.gmra.mxu0 %vm5458_vm10, %v7629_v51 }
 0xc19   : > { %v7721_v61 = vpop.f32.mrf.mxu0 }
 0xc1a   : > { %v7722_v18 = vadd.f32 %v8396_v55, %v7721_v61 }
 0xc1b   : > { %v8558_v12 = vpop.f32.mrf.mxu0 }
 0xc1c   : > { %v7727_v56 = vsel %vm4290_vm6, %v7722_v18, -inf }
 0xc1d   : > { %7728 = vmax.xlane.f32.xlu0 %v7727_v56  ;;  %v7724_v33 = vpop.f32.mrf.mxu0 }
 0xc1f   : > { %v8559_v20 = vpop.f32.mrf.mxu0 }
 0xca6   : > { %v7729_v10 = vpop.xlane.xlu0 %7728 }
 0xca7   : > { %v7730_v2 = vsub.f32 %v7722_v18, %v7729_v10 }
 0xca9   : > { %v7731_v40 = vmul.f32 1.442695, %v7730_v2 }
 0xcab   : > { %8873 = vpow2.f32 %v7731_v40 }
 0xcb8   : > { %v8874_v27 = vpop.eup %8873 }
 0xcb9   : > { %v7733_v38 = vsel %vm4290_vm6, %v8874_v27, 0.0 }
 0xcba   : > { %7734 = vadd.xlane.f32.xlu1 %v7733_v38 }
 0xd43   : > { %v7735_v59 = vpop.xlane.xlu1 %7734 }
 0xd44   : > { %8875 = vlog2.f32 %v7735_v59 }
 0xd51   : > { %v8876_v54 = vpop.eup %8875 }
 0xd52   : > { %v7737_v60 = vmul.f32 0.6931472, %v8876_v54 }
 0xd54   : > { %v7738_v37 = vsub.f32 %v7730_v2, %v7737_v60 }
 0xd56   : > { %7739 = vst.msk [vmem:[%s529_s23] sm:$0xff] %vm4290_vm6, %v7738_v37 }
 0xd57   : > { %8909 = shalt.err (!%p8906_p2)
}
 0xd58   : > { %s8910_s19 = scalar_lea.hbm %s7752_s20, 128  ;;  %s8914_s23 = scalar_lea.hbm %s13634_s16, 256 }
 0xd59   : > { %p8911_p3 = scmp.ne.s32.totalorder %s7752_s20, %s8910_s19  ;;  %p8915_p8 = scmp.lt.s32.totalorder %s7752_s20, %s13634_s16 }
 0xd5a   : > { %p8916_p11 = scmp.lt.s32.totalorder %s8914_s23, %s8910_s19 }
 0xd5b   : > { %p8912_p4 = pnand %p8911_p3, %p9092_p5 }
 0xd5c   : > { %p8917_p9 = por %p8916_p11, %p8915_p8 }
 0xd5d   : > { %p8913_p7 = pneg %p8912_p4 }
 0xd5f   : > { %p8918_p10 = pnand %p8917_p9, %p8913_p7 }
 0xd61   : > { %8921 = shalt.err (!%p8918_p10)
}
 0xd62   : > { %8564 = dma.vmem_to_hbm [thread:$0]  (%p9092_p5), %s7755_s2, 128, %s7752_s20, %s7741_s28  }
 0xd63 PF: > { %p8576_p12 = scmp.ge.s32.totalorder %s8960_s24, 2  ;;  %s7766_s3 = sand.u32 1, %s8948_s21  }
 0xd64   : > { %s7767_s4 = scalar_lea.sflag [#allocation3], %s7766_s3 }
 0xd65   : > { %p8571_p13 = pnand %p8576_p12, %p9096_p6 }
 0xd67   : > { %p8572_p0 = pneg %p8571_p13 }
 0xd69   : > { %8943 = dma.done.wait (%p8572_p0), %s7767_s4, 128  }
 0xd6a   : > { %8945 = vsyncadd (%p8572_p0), %s7767_s4, 4294967168  ;;  %s14124_s1 = sld [smem:[#allocation8_spill]]  ;;  %p27_p1 = scmp.ge.s32.totalorder %s9079_s27, 4  }
 0xd6b   : > { %s14125_s23 = sld [smem:[#allocation9_spill]]  ;;  %s14126_s21 = smov %s8952_s22 }
 0xd6c   : > { %s14128_s24 = smov %s9079_s27  ;;  %29 = sbr.rel (!%p27_p1) target bundleno = 10 (0xa), region = 140 }
 0xd70   : > { %s14127_s22 = smov %s14124_s1 }
 0xd71   :  { %7772 = vsyncpa [#allocation3], 1 }
 0xd72   :  { %7774 = vsyncpa [#allocation3 + $0x1], 1 }
 0xd73   :  { %7775 = vsyncpa [#allocation4], 1 }
 0xd74   :  { %7777 = vsyncpa [#allocation4 + $0x1], 1 }

</bundles_post_ra>
